<compile_context>
chip_gen: v5e
topology: v5e:2x2
jax: 0.10.0
libtpu: 0.0.40
codegen_flags: <defaults>
</compile_context>

<pallas_src>
import functools
import math

import jax
import jax.numpy as jnp
from jax.experimental import pallas as pl
from jax.experimental.pallas import tpu as pltpu


def _pair(v):
    if isinstance(v, (tuple, list)):
        return tuple(v)
    return (v, v)


def _round_up(x, m):
    return ((x + m - 1) // m) * m


def _cdiv(a, b):
    return (a + b - 1) // b


def _lcm(a, b):
    return a * b // math.gcd(a, b)


def _block_spec(block_shape, index_map, buffers=None):
    """BlockSpec with optional buffer-count override (graceful fallback)."""
    if buffers is not None and buffers != 2:
        try:
            return pl.BlockSpec(block_shape, index_map,
                                pipeline_mode=pl.Buffered(buffers))
        except Exception:           # older jax without pipeline_mode/Buffered
            pass
    return pl.BlockSpec(block_shape, index_map)


# ---------------------------------------------------------------------------
# Kernel: one lane-dense (tm, CoutB) output tile per grid step.
# ---------------------------------------------------------------------------
def _conv_kernel(x_ref, w_ref, b_ref, o_ref, scr_ref, *,
                 taps, th, wout, cinb, m_blocks, fuse_k):
    # x_ref : (1, Hq, sh, Wq, sw, CinB)  polyphase image (sample, group-block)
    # w_ref : (1, KH*KW*CinB, CoutB)     fused  OR (1, KH*KW, CinB, CoutB) per-tap
    # b_ref : (1, 1, CoutB)              f32 bias row
    # o_ref : (1, tm, CoutB)             lane-dense output tile
    # scr_ref: (tm, KH*KW*CinB) patch    OR (tm, CoutB) f32 accumulator
    tm = th * wout
    h0 = pl.program_id(2) * th
    brow = b_ref[0]                                        # (1, CoutB)

    if fuse_k:
        # im2col in VMEM: one contiguous (th, wout, CinB) slice per filter tap
        # (rh / rw phases are static dims -> no per-tap lane rotations).
        for t, (qh, rh, qw, rw) in enumerate(taps):        # static, unrolled
            xs = x_ref[0, pl.ds(h0 + qh, th), rh, pl.ds(qw, wout), rw, :]
            scr_ref[:, pl.ds(t * cinb, cinb)] = xs.reshape(tm, cinb)
        wmat = w_ref[0]                                    # (Ktot, CoutB)
        # Single deep-K MXU matmul, emitted in M sub-blocks so the live f32
        # result never outgrows the vector register file.
        for m0, mb in m_blocks:
            acc = jnp.dot(scr_ref[pl.ds(m0, mb), :], wmat,
                          preferred_element_type=jnp.float32)
            o_ref[0, pl.ds(m0, mb), :] = (acc + brow).astype(o_ref.dtype)
    else:
        # Deep-Cin path (CinB >= 256 already fills the MXU): per-tap dots
        # accumulated in a VMEM f32 scratch instead of a spilling vreg value.
        for t, (qh, rh, qw, rw) in enumerate(taps):
            xs = x_ref[0, pl.ds(h0 + qh, th), rh, pl.ds(qw, wout), rw, :]
            upd = jnp.dot(xs.reshape(tm, cinb), w_ref[0, t],
                          preferred_element_type=jnp.float32)
            if t == 0:
                scr_ref[...] = upd
            else:
                scr_ref[...] = scr_ref[...] + upd
        for m0, mb in m_blocks:
            o_ref[0, pl.ds(m0, mb), :] = (scr_ref[pl.ds(m0, mb), :]
                                          + brow).astype(o_ref.dtype)


def conv2d_pallas(x, weight, bias, stride, padding, dilation, groups,
                  *, compute_dtype=jnp.float32, tm_target=None):
    """Matches torch.nn.functional.conv2d semantics (zeros padding), NCHW."""
    N, Cin, H, W = x.shape
    Cout, Cin_g, KH, KW = weight.shape
    assert Cin == Cin_g * groups
    assert Cout % groups == 0
    cout_g = Cout // groups
    sh, sw = stride
    ph, pw = padding
    dh, dw = dilation
    out_dtype = x.dtype
    csz = jnp.dtype(compute_dtype).itemsize
    osz = jnp.dtype(out_dtype).itemsize

    Hout = (H + 2 * ph - dh * (KH - 1) - 1) // sh + 1
    Wout = (W + 2 * pw - dw * (KW - 1) - 1) // sw + 1
    assert Hout > 0 and Wout > 0

    # ---- group packing: several small groups share one 128-lane output block.
    # TODO(synk): a dedicated VPU path would still be better for pure depthwise.
    if groups == 1 or cout_g >= 128:
        gpb = 1
    else:
        gpb = max(1, min(groups, 128 // max(cout_g, 1)))
    GB_n = _cdiv(groups, gpb)
    groups_pad = GB_n * gpb
    CinB = gpb * Cin_g
    CoutB = _round_up(gpb * cout_g, 128)
    Ktot = KH * KW * CinB
    fuse_k = CinB < 256            # deep-K fused matmul unless Cin already deep

    # ---- static tap table: kh*dh = qh*sh + rh,  kw*dw = qw*sw + rw.
    taps = []
    for kh in range(KH):
        for kw in range(KW):
            qh, rh = divmod(kh * dh, sh)
            qw, rw = divmod(kw * dw, sw)
            taps.append((qh, rh, qw, rw))
    qh_max = (dh * (KH - 1)) // sh
    qw_max = (dw * (KW - 1)) // sw
    Wq = Wout + qw_max

    # ---- generation-aware VMEM budget.
    try:
        info = pltpu.get_tpu_info()
        vmem_cap = int(getattr(info, "vmem_capacity_bytes", 64 * 2 ** 20))
    except Exception:
        vmem_cap = 64 * 2 ** 20
    vmem_budget = max(int(vmem_cap * 0.82), 32 * 2 ** 20)
    if tm_target is None:
        tm_target = 1024 if vmem_cap >= 96 * 2 ** 20 else 512

    # ---- output-row tiling: tm = TH*Wout aligned to sublanes (+256 if cheap).
    sub = 16 if csz == 2 else 8
    th_unit = sub // math.gcd(Wout, sub)
    u256 = 256 // math.gcd(Wout, 256)
    if u256 * Wout <= max(tm_target, th_unit * Wout) and u256 <= Hout:
        th_unit = _lcm(th_unit, u256)
    TH = th_unit * max(1, tm_target // (th_unit * Wout))
    TH = min(TH, th_unit * _cdiv(Hout, th_unit))

    w_bytes = Ktot * CoutB * csz
    b_bytes = CoutB * 4
    while True:
        n_h = _cdiv(Hout, TH)
        Hout_p = n_h * TH
        tm = TH * Wout
        Hq = Hout_p + qh_max
        img_bytes = Hq * sh * Wq * sw * CinB * csz
        scr_bytes = tm * Ktot * csz if fuse_k else tm * CoutB * 4
        need = w_bytes + b_bytes + img_bytes + 2 * tm * CoutB * osz + scr_bytes
        if need <= vmem_budget or TH <= th_unit:
            break
        TH = max(th_unit, ((TH // 2) // th_unit) * th_unit)
    # TODO(synk): if `need` still exceeds the budget (very large feature maps),
    # a halo-windowed manual-DMA path (memory_space=pl.ANY) would be required.
    img_buffers = 2 if (n_h == 1 and need + img_bytes <= vmem_budget) else 1
    est = need + (img_buffers - 1) * img_bytes + b_bytes
    vmem_limit = int(min(max(est + max(est // 3, 8 * 2 ** 20), 32 * 2 ** 20),
                         vmem_budget))

    # ---- polyphase input layout (pure relayout; no KH*KW HBM blow-up).
    xc = x.astype(compute_dtype)
    x_nhwc = jnp.transpose(xc, (0, 2, 3, 1))                    # (N, H, W, Cin)
    if groups_pad > groups:
        x_nhwc = jnp.pad(x_nhwc, ((0, 0), (0, 0), (0, 0),
                                  (0, (groups_pad - groups) * Cin_g)))
    pad_b = max(0, Hq * sh - H - ph)
    pad_r = max(0, Wq * sw - W - pw)
    xp = jnp.pad(x_nhwc, ((0, 0), (ph, pad_b), (pw, pad_r), (0, 0)))
    xp = xp[:, :Hq * sh, :Wq * sw, :]
    x_r = xp.reshape(N, Hq, sh, Wq, sw, GB_n, CinB)
    x_r = jnp.transpose(x_r, (0, 5, 1, 2, 3, 4, 6)).reshape(
        N * GB_n, Hq, sh, Wq, sw, CinB)

    # ---- per-group-block weights (block-diagonal only inside a group block).
    w_t = jnp.transpose(weight, (2, 3, 1, 0)).reshape(KH * KW, Cin_g,
                                                      groups, cout_g)
    if groups_pad > groups:
        w_t = jnp.pad(w_t, ((0, 0), (0, 0), (0, groups_pad - groups), (0, 0)))
    w_t = w_t.reshape(KH * KW, Cin_g, GB_n, gpb, cout_g)
    w_t = jnp.transpose(w_t, (2, 0, 3, 1, 4))   # (GB_n, KHKW, gpb, Cin_g, cout_g)
    if gpb == 1:
        w_bd = w_t.reshape(GB_n, KH * KW, CinB, cout_g)
    else:
        eye = jnp.eye(gpb, dtype=w_t.dtype)
        w_bd = jnp.einsum("gtpic,pq->gtpiqc", w_t, eye)
        w_bd = w_bd.reshape(GB_n, KH * KW, CinB, gpb * cout_g)
    w_bd = jnp.pad(w_bd, ((0, 0), (0, 0), (0, 0), (0, CoutB - gpb * cout_g)))
    w_bd = w_bd.astype(compute_dtype)
    if fuse_k:
        w_arr = w_bd.reshape(GB_n, Ktot, CoutB)
        w_spec = _block_spec((1, Ktot, CoutB), lambda n, gb, h: (gb, 0, 0),
                             buffers=1)
        scratch = pltpu.VMEM((tm, Ktot), compute_dtype)
    else:
        w_arr = w_bd
        w_spec = _block_spec((1, KH * KW, CinB, CoutB),
                             lambda n, gb, h: (gb, 0, 0, 0), buffers=1)
        scratch = pltpu.VMEM((tm, CoutB), jnp.float32)

    b_vec = (jnp.zeros((Cout,), jnp.float32) if bias is None
             else bias.astype(jnp.float32))
    b_g = b_vec.reshape(groups, cout_g)
    if groups_pad > groups:
        b_g = jnp.pad(b_g, ((0, groups_pad - groups), (0, 0)))
    b_g = b_g.reshape(GB_n, gpb * cout_g)
    b_arr = jnp.pad(b_g, ((0, 0), (0, CoutB - gpb * cout_g))).reshape(
        GB_n, 1, CoutB)

    # ---- M sub-blocks: keep the live f32 matmul result <= ~64 KiB.
    mblk = max(8, min(tm, (64 * 1024) // (CoutB * 4)))
    mblk -= mblk % 8
    mblk = max(8, mblk)
    m_blocks, m0 = [], 0
    while m0 < tm:
        m_blocks.append((m0, min(mblk, tm - m0)))
        m0 += mblk
    m_blocks = tuple(m_blocks)

    kernel = functools.partial(_conv_kernel, taps=tuple(taps), th=TH,
                               wout=Wout, cinb=CinB, m_blocks=m_blocks,
                               fuse_k=fuse_k)

    flops = 2 * N * GB_n * n_h * tm * Ktot * CoutB
    bytes_accessed = int(x_r.size * csz + w_arr.size * csz + b_arr.size * 4
                         + N * GB_n * n_h * tm * CoutB * osz)

    out = pl.pallas_call(
        kernel,
        out_shape=jax.ShapeDtypeStruct((N * GB_n * n_h, tm, CoutB), out_dtype),
        grid=(N, GB_n, n_h),
        in_specs=[
            # Whole polyphase image of (sample, group-block): constant over the
            # inner h axis -> DMA'd from HBM once per (n, gb).
            _block_spec((1, Hq, sh, Wq, sw, CinB),
                        lambda n, gb, h: (n * GB_n + gb, 0, 0, 0, 0, 0),
                        buffers=img_buffers),
            w_spec,
            _block_spec((1, 1, CoutB), lambda n, gb, h: (gb, 0, 0), buffers=1),
        ],
        out_specs=pl.BlockSpec(
            (1, tm, CoutB),
            lambda n, gb, h: ((n * GB_n + gb) * n_h + h, 0, 0)),
        scratch_shapes=[scratch],
        compiler_params=pltpu.CompilerParams(
            dimension_semantics=("parallel", "parallel", "parallel"),
            vmem_limit_bytes=vmem_limit),
        cost_estimate=pl.CostEstimate(flops=flops, transcendentals=0,
                                      bytes_accessed=bytes_accessed),
    )(x_r, w_arr, b_arr)

    # Epilogue: drop lane / row / group padding and return to NCHW (XLA-fused).
    # TODO(synk): callers that can consume NHWC should skip this transpose.
    out = out.reshape(N, GB_n, n_h, TH, Wout, CoutB)[..., :gpb * cout_g]
    out = out.reshape(N, GB_n, Hout_p, Wout, gpb, cout_g)
    out = jnp.transpose(out, (0, 1, 4, 5, 2, 3))
    out = out.reshape(N, groups_pad * cout_g, Hout_p, Wout)
    return out[:, :Cout, :Hout, :].astype(out_dtype)


class Conv2dPallas:
    """Python/JAX port of the syft Conv2d module (forward pass only)."""

    def __init__(self, in_channels, out_channels, kernel_size, stride=1,
                 padding=0, dilation=1, groups=1, bias=False,
                 padding_mode="zeros", *, key=None,
                 compute_dtype=jnp.float32):
        assert padding_mode == "zeros"
        self.in_channels = in_channels
        self.out_channels = out_channels
        self.kernel_size = _pair(kernel_size)
        self.stride = _pair(stride)
        self.padding = _pair(padding)
        self.dilation = _pair(dilation)
        self.groups = groups
        self.compute_dtype = compute_dtype

        if key is None:
            key = jax.random.PRNGKey(0)
        kw_key, kb_key = jax.random.split(key)
        KH, KW = self.kernel_size
        fan_in = (in_channels // groups) * KH * KW
        k = 1.0 / math.sqrt(fan_in)
        self.weight = jax.random.uniform(
            kw_key, (out_channels, in_channels // groups, KH, KW),
            dtype=jnp.float32, minval=-k, maxval=k)
        if bias:
            self.bias = jax.random.uniform(
                kb_key, (out_channels,), dtype=jnp.float32, minval=-k, maxval=k)
        else:
            self.bias = None

        self._fwd = jax.jit(functools.partial(
            conv2d_pallas, stride=self.stride, padding=self.padding,
            dilation=self.dilation, groups=self.groups,
            compute_dtype=self.compute_dtype))

    def __call__(self, x):
        assert x.shape[1] == self.in_channels
        return self._fwd(x, self.weight, self.bias)


def _reference(x, layer):
    out = jax.lax.conv_general_dilated(
        x, layer.weight,
        window_strides=layer.stride,
        padding=[(layer.padding[0], layer.padding[0]),
                 (layer.padding[1], layer.padding[1])],
        rhs_dilation=layer.dilation,
        feature_group_count=layer.groups,
        dimension_numbers=("NCHW", "OIHW", "NCHW"))
    if layer.bias is not None:
        out = out + layer.bias[None, :, None, None]
    return out


if __name__ == "__main__":
    key = jax.random.PRNGKey(0)
    kx, k1, k2 = jax.random.split(key, 3)
    x = jax.random.normal(kx, (2, 4, 16, 16), dtype=jnp.float32)

    # Case 1: standard conv, bias=True (f32, fused deep-K path)
    layer1 = Conv2dPallas(4, 8, kernel_size=3, stride=1, padding=1,
                          bias=True, key=k1)
    out1 = jax.block_until_ready(layer1(x))
    ref1 = _reference(x, layer1)
    assert out1.shape == ref1.shape
    assert jnp.allclose(out1, ref1, atol=1e-3, rtol=1e-3)

    # Case 2: grouped, strided, dilated conv, bias=False (module default)
    layer2 = Conv2dPallas(4, 4, kernel_size=3, stride=2, padding=2,
                          dilation=2, groups=2, bias=False, key=k2)
    out2 = jax.block_until_ready(layer2(x))
    ref2 = _reference(x, layer2)
    assert out2.shape == ref2.shape
    assert jnp.allclose(out2, ref2, atol=1e-3, rtol=1e-3)

    # Case 3: bf16 MXU operands, f32 accumulation.
    layer3 = Conv2dPallas(4, 8, kernel_size=3, stride=1, padding=1,
                          bias=True, key=k1, compute_dtype=jnp.bfloat16)
    out3 = jax.block_until_ready(layer3(x))
    assert out3.shape == ref1.shape
    assert jnp.allclose(out3, ref1, atol=5e-2, rtol=5e-2)

    print("KERNEL_OK")
</pallas_src>

<mosaic_0001>
module attributes {stable_mosaic.version = 11 : i64} {
  func.func @_conv_kernel(%arg0: i32, %arg1: i32, %arg2: i32, %arg3: memref<1x18x1x18x1x4xf32, #tpu.memory_space<vmem>>, %arg4: memref<1x36x128xf32, #tpu.memory_space<vmem>>, %arg5: memref<1x1x128xf32, #tpu.memory_space<vmem>>, %arg6: memref<1x256x128xf32, #tpu.memory_space<vmem>>, %arg7: memref<256x36xf32, #tpu.memory_space<vmem>>) attributes {dimension_semantics = [#tpu.dimension_semantics<parallel>, #tpu.dimension_semantics<parallel>, #tpu.dimension_semantics<parallel>], iteration_bounds = array<i64: 2, 1, 1>, scalar_prefetch = 0 : i64, scratch_operands = 1 : i64, tpu.core_type = #tpu.core_type<tc>, window_params = [{transform_indices = @transform_0, window_bounds = array<i64: 1, 18, 1, 18, 1, 4>}, {pipeline_mode = #tpu.pipeline_mode<synchronous>, transform_indices = @transform_1, window_bounds = array<i64: 1, 36, 128>}, {pipeline_mode = #tpu.pipeline_mode<synchronous>, transform_indices = @transform_2, window_bounds = array<i64: 1, 1, 128>}, {transform_indices = @transform_3, window_bounds = array<i64: 1, 256, 128>}]} {
    %c16_i32 = arith.constant 16 : i32
    %0 = arith.muli %arg2, %c16_i32 : i32
    %c0 = arith.constant 0 : index
    %c0_0 = arith.constant 0 : index
    %c0_1 = arith.constant 0 : index
    %1 = vector.load %arg5[%c0, %c0_0, %c0_1] : memref<1x1x128xf32, #tpu.memory_space<vmem>>, vector<1x1x128xf32>
    %2 = vector.shape_cast %1 : vector<1x1x128xf32> to vector<1x128xf32>
    %c0_i32 = arith.constant 0 : i32
    %3 = arith.addi %0, %c0_i32 : i32
    %c0_2 = arith.constant 0 : index
    %4 = arith.index_cast %3 : i32 to index
    %c0_3 = arith.constant 0 : index
    %c0_4 = arith.constant 0 : index
    %c0_5 = arith.constant 0 : index
    %c0_6 = arith.constant 0 : index
    %5 = vector.load %arg3[%c0_2, %4, %c0_3, %c0_4, %c0_5, %c0_6] : memref<1x18x1x18x1x4xf32, #tpu.memory_space<vmem>>, vector<1x16x1x16x1x4xf32>
    %6 = vector.shape_cast %5 : vector<1x16x1x16x1x4xf32> to vector<16x16x4xf32>
    %7 = vector.shape_cast %6 : vector<16x16x4xf32> to vector<256x4xf32>
    %c0_7 = arith.constant 0 : index
    %c0_8 = arith.constant 0 : index
    %8 = vector.load %arg7[%c0_7, %c0_8] : memref<256x36xf32, #tpu.memory_space<vmem>>, vector<256x4xf32>
    tpu.vector_store %arg7[%c0_7, %c0_8], %7 {strides = array<i32>} : memref<256x36xf32, #tpu.memory_space<vmem>>, vector<256x4xf32>,
    %c0_i32_9 = arith.constant 0 : i32
    %9 = arith.addi %0, %c0_i32_9 : i32
    %c0_10 = arith.constant 0 : index
    %10 = arith.index_cast %9 : i32 to index
    %c0_11 = arith.constant 0 : index
    %c1 = arith.constant 1 : index
    %c0_12 = arith.constant 0 : index
    %c0_13 = arith.constant 0 : index
    %11 = vector.load %arg3[%c0_10, %10, %c0_11, %c1, %c0_12, %c0_13] : memref<1x18x1x18x1x4xf32, #tpu.memory_space<vmem>>, vector<1x16x1x16x1x4xf32>
    %12 = vector.shape_cast %11 : vector<1x16x1x16x1x4xf32> to vector<16x16x4xf32>
    %13 = vector.shape_cast %12 : vector<16x16x4xf32> to vector<256x4xf32>
    %c0_14 = arith.constant 0 : index
    %c4 = arith.constant 4 : index
    %14 = vector.load %arg7[%c0_14, %c4] : memref<256x36xf32, #tpu.memory_space<vmem>>, vector<256x4xf32>
    tpu.vector_store %arg7[%c0_14, %c4], %13 {strides = array<i32>} : memref<256x36xf32, #tpu.memory_space<vmem>>, vector<256x4xf32>,
    %c0_i32_15 = arith.constant 0 : i32
    %15 = arith.addi %0, %c0_i32_15 : i32
    %c0_16 = arith.constant 0 : index
    %16 = arith.index_cast %15 : i32 to index
    %c0_17 = arith.constant 0 : index
    %c2 = arith.constant 2 : index
    %c0_18 = arith.constant 0 : index
    %c0_19 = arith.constant 0 : index
    %17 = vector.load %arg3[%c0_16, %16, %c0_17, %c2, %c0_18, %c0_19] : memref<1x18x1x18x1x4xf32, #tpu.memory_space<vmem>>, vector<1x16x1x16x1x4xf32>
    %18 = vector.shape_cast %17 : vector<1x16x1x16x1x4xf32> to vector<16x16x4xf32>
    %19 = vector.shape_cast %18 : vector<16x16x4xf32> to vector<256x4xf32>
    %c0_20 = arith.constant 0 : index
    %c8 = arith.constant 8 : index
    %20 = vector.load %arg7[%c0_20, %c8] : memref<256x36xf32, #tpu.memory_space<vmem>>, vector<256x4xf32>
    tpu.vector_store %arg7[%c0_20, %c8], %19 {strides = array<i32>} : memref<256x36xf32, #tpu.memory_space<vmem>>, vector<256x4xf32>,
    %c1_i32 = arith.constant 1 : i32
    %21 = arith.addi %0, %c1_i32 : i32
    %c0_21 = arith.constant 0 : index
    %22 = arith.index_cast %21 : i32 to index
    %c0_22 = arith.constant 0 : index
    %c0_23 = arith.constant 0 : index
    %c0_24 = arith.constant 0 : index
    %c0_25 = arith.constant 0 : index
    %23 = vector.load %arg3[%c0_21, %22, %c0_22, %c0_23, %c0_24, %c0_25] : memref<1x18x1x18x1x4xf32, #tpu.memory_space<vmem>>, vector<1x16x1x16x1x4xf32>
    %24 = vector.shape_cast %23 : vector<1x16x1x16x1x4xf32> to vector<16x16x4xf32>
    %25 = vector.shape_cast %24 : vector<16x16x4xf32> to vector<256x4xf32>
    %c0_26 = arith.constant 0 : index
    %c12 = arith.constant 12 : index
    %26 = vector.load %arg7[%c0_26, %c12] : memref<256x36xf32, #tpu.memory_space<vmem>>, vector<256x4xf32>
    tpu.vector_store %arg7[%c0_26, %c12], %25 {strides = array<i32>} : memref<256x36xf32, #tpu.memory_space<vmem>>, vector<256x4xf32>,
    %c1_i32_27 = arith.constant 1 : i32
    %27 = arith.addi %0, %c1_i32_27 : i32
    %c0_28 = arith.constant 0 : index
    %28 = arith.index_cast %27 : i32 to index
    %c0_29 = arith.constant 0 : index
    %c1_30 = arith.constant 1 : index
    %c0_31 = arith.constant 0 : index
    %c0_32 = arith.constant 0 : index
    %29 = vector.load %arg3[%c0_28, %28, %c0_29, %c1_30, %c0_31, %c0_32] : memref<1x18x1x18x1x4xf32, #tpu.memory_space<vmem>>, vector<1x16x1x16x1x4xf32>
    %30 = vector.shape_cast %29 : vector<1x16x1x16x1x4xf32> to vector<16x16x4xf32>
    %31 = vector.shape_cast %30 : vector<16x16x4xf32> to vector<256x4xf32>
    %c0_33 = arith.constant 0 : index
    %c16 = arith.constant 16 : index
    %32 = vector.load %arg7[%c0_33, %c16] : memref<256x36xf32, #tpu.memory_space<vmem>>, vector<256x4xf32>
    tpu.vector_store %arg7[%c0_33, %c16], %31 {strides = array<i32>} : memref<256x36xf32, #tpu.memory_space<vmem>>, vector<256x4xf32>,
    %c1_i32_34 = arith.constant 1 : i32
    %33 = arith.addi %0, %c1_i32_34 : i32
    %c0_35 = arith.constant 0 : index
    %34 = arith.index_cast %33 : i32 to index
    %c0_36 = arith.constant 0 : index
    %c2_37 = arith.constant 2 : index
    %c0_38 = arith.constant 0 : index
    %c0_39 = arith.constant 0 : index
    %35 = vector.load %arg3[%c0_35, %34, %c0_36, %c2_37, %c0_38, %c0_39] : memref<1x18x1x18x1x4xf32, #tpu.memory_space<vmem>>, vector<1x16x1x16x1x4xf32>
    %36 = vector.shape_cast %35 : vector<1x16x1x16x1x4xf32> to vector<16x16x4xf32>
    %37 = vector.shape_cast %36 : vector<16x16x4xf32> to vector<256x4xf32>
    %c0_40 = arith.constant 0 : index
    %c20 = arith.constant 20 : index
    %38 = vector.load %arg7[%c0_40, %c20] : memref<256x36xf32, #tpu.memory_space<vmem>>, vector<256x4xf32>
    tpu.vector_store %arg7[%c0_40, %c20], %37 {strides = array<i32>} : memref<256x36xf32, #tpu.memory_space<vmem>>, vector<256x4xf32>,
    %c2_i32 = arith.constant 2 : i32
    %39 = arith.addi %0, %c2_i32 : i32
    %c0_41 = arith.constant 0 : index
    %40 = arith.index_cast %39 : i32 to index
    %c0_42 = arith.constant 0 : index
    %c0_43 = arith.constant 0 : index
    %c0_44 = arith.constant 0 : index
    %c0_45 = arith.constant 0 : index
    %41 = vector.load %arg3[%c0_41, %40, %c0_42, %c0_43, %c0_44, %c0_45] : memref<1x18x1x18x1x4xf32, #tpu.memory_space<vmem>>, vector<1x16x1x16x1x4xf32>
    %42 = vector.shape_cast %41 : vector<1x16x1x16x1x4xf32> to vector<16x16x4xf32>
    %43 = vector.shape_cast %42 : vector<16x16x4xf32> to vector<256x4xf32>
    %c0_46 = arith.constant 0 : index
    %c24 = arith.constant 24 : index
    %44 = vector.load %arg7[%c0_46, %c24] : memref<256x36xf32, #tpu.memory_space<vmem>>, vector<256x4xf32>
    tpu.vector_store %arg7[%c0_46, %c24], %43 {strides = array<i32>} : memref<256x36xf32, #tpu.memory_space<vmem>>, vector<256x4xf32>,
    %c2_i32_47 = arith.constant 2 : i32
    %45 = arith.addi %0, %c2_i32_47 : i32
    %c0_48 = arith.constant 0 : index
    %46 = arith.index_cast %45 : i32 to index
    %c0_49 = arith.constant 0 : index
    %c1_50 = arith.constant 1 : index
    %c0_51 = arith.constant 0 : index
    %c0_52 = arith.constant 0 : index
    %47 = vector.load %arg3[%c0_48, %46, %c0_49, %c1_50, %c0_51, %c0_52] : memref<1x18x1x18x1x4xf32, #tpu.memory_space<vmem>>, vector<1x16x1x16x1x4xf32>
    %48 = vector.shape_cast %47 : vector<1x16x1x16x1x4xf32> to vector<16x16x4xf32>
    %49 = vector.shape_cast %48 : vector<16x16x4xf32> to vector<256x4xf32>
    %c0_53 = arith.constant 0 : index
    %c28 = arith.constant 28 : index
    %50 = vector.load %arg7[%c0_53, %c28] : memref<256x36xf32, #tpu.memory_space<vmem>>, vector<256x4xf32>
    tpu.vector_store %arg7[%c0_53, %c28], %49 {strides = array<i32>} : memref<256x36xf32, #tpu.memory_space<vmem>>, vector<256x4xf32>,
    %c2_i32_54 = arith.constant 2 : i32
    %51 = arith.addi %0, %c2_i32_54 : i32
    %c0_55 = arith.constant 0 : index
    %52 = arith.index_cast %51 : i32 to index
    %c0_56 = arith.constant 0 : index
    %c2_57 = arith.constant 2 : index
    %c0_58 = arith.constant 0 : index
    %c0_59 = arith.constant 0 : index
    %53 = vector.load %arg3[%c0_55, %52, %c0_56, %c2_57, %c0_58, %c0_59] : memref<1x18x1x18x1x4xf32, #tpu.memory_space<vmem>>, vector<1x16x1x16x1x4xf32>
    %54 = vector.shape_cast %53 : vector<1x16x1x16x1x4xf32> to vector<16x16x4xf32>
    %55 = vector.shape_cast %54 : vector<16x16x4xf32> to vector<256x4xf32>
    %c0_60 = arith.constant 0 : index
    %c32 = arith.constant 32 : index
    %56 = vector.load %arg7[%c0_60, %c32] : memref<256x36xf32, #tpu.memory_space<vmem>>, vector<256x4xf32>
    tpu.vector_store %arg7[%c0_60, %c32], %55 {strides = array<i32>} : memref<256x36xf32, #tpu.memory_space<vmem>>, vector<256x4xf32>,
    %c0_61 = arith.constant 0 : index
    %c0_62 = arith.constant 0 : index
    %c0_63 = arith.constant 0 : index
    %57 = vector.load %arg4[%c0_61, %c0_62, %c0_63] : memref<1x36x128xf32, #tpu.memory_space<vmem>>, vector<1x36x128xf32>
    %58 = vector.shape_cast %57 : vector<1x36x128xf32> to vector<36x128xf32>
    %c0_64 = arith.constant 0 : index
    %c0_65 = arith.constant 0 : index
    %59 = vector.load %arg7[%c0_64, %c0_65] : memref<256x36xf32, #tpu.memory_space<vmem>>, vector<128x36xf32>
    %cst = arith.constant dense<0.000000e+00> : vector<128x128xf32>
    %60 = tpu.matmul %59, %58, %cst {dimension_numbers = #tpu.dot_dimension_numbers<[1], [0], [0], [1], [0, 0, 1, 1], [], []>} : vector<128x36xf32>, vector<36x128xf32>, vector<128x128xf32> -> vector<128x128xf32>
    %61 = vector.broadcast %2 : vector<1x128xf32> to vector<128x128xf32>
    %62 = arith.addf %60, %61 : vector<128x128xf32>
    %c0_66 = arith.constant 0 : index
    %c0_67 = arith.constant 0 : index
    %c0_68 = arith.constant 0 : index
    %63 = vector.load %arg6[%c0_66, %c0_67, %c0_68] : memref<1x256x128xf32, #tpu.memory_space<vmem>>, vector<1x128x128xf32>
    %64 = vector.shape_cast %63 : vector<1x128x128xf32> to vector<128x128xf32>
    %65 = vector.shape_cast %62 : vector<128x128xf32> to vector<1x128x128xf32>
    tpu.vector_store %arg6[%c0_66, %c0_67, %c0_68], %65 {strides = array<i32>} : memref<1x256x128xf32, #tpu.memory_space<vmem>>, vector<1x128x128xf32>,
    %c128 = arith.constant 128 : index
    %c0_69 = arith.constant 0 : index
    %66 = vector.load %arg7[%c128, %c0_69] : memref<256x36xf32, #tpu.memory_space<vmem>>, vector<128x36xf32>
    %cst_70 = arith.constant dense<0.000000e+00> : vector<128x128xf32>
    %67 = tpu.matmul %66, %58, %cst_70 {dimension_numbers = #tpu.dot_dimension_numbers<[1], [0], [0], [1], [0, 0, 1, 1], [], []>} : vector<128x36xf32>, vector<36x128xf32>, vector<128x128xf32> -> vector<128x128xf32>
    %68 = vector.broadcast %2 : vector<1x128xf32> to vector<128x128xf32>
    %69 = arith.addf %67, %68 : vector<128x128xf32>
    %c0_71 = arith.constant 0 : index
    %c128_72 = arith.constant 128 : index
    %c0_73 = arith.constant 0 : index
    %70 = vector.load %arg6[%c0_71, %c128_72, %c0_73] : memref<1x256x128xf32, #tpu.memory_space<vmem>>, vector<1x128x128xf32>
    %71 = vector.shape_cast %70 : vector<1x128x128xf32> to vector<128x128xf32>
    %72 = vector.shape_cast %69 : vector<128x128xf32> to vector<1x128x128xf32>
    tpu.vector_store %arg6[%c0_71, %c128_72, %c0_73], %72 {strides = array<i32>} : memref<1x256x128xf32, #tpu.memory_space<vmem>>, vector<1x128x128xf32>,
    return
  }
  func.func @transform_0(%arg0: i32, %arg1: i32, %arg2: i32) -> (i32, i32, i32, i32, i32, i32) {
    %c1_i32 = arith.constant 1 : i32
    %0 = arith.muli %arg0, %c1_i32 : i32
    %1 = arith.addi %0, %arg1 : i32
    %c0_i32 = arith.constant 0 : i32
    %c0_i32_0 = arith.constant 0 : i32
    %c0_i32_1 = arith.constant 0 : i32
    %c0_i32_2 = arith.constant 0 : i32
    %c0_i32_3 = arith.constant 0 : i32
    %c0_i32_4 = arith.constant 0 : i32
    return %1, %c0_i32, %c0_i32_0, %c0_i32_1, %c0_i32_2, %c0_i32_3 : i32, i32, i32, i32, i32, i32
  }
  func.func @transform_1(%arg0: i32, %arg1: i32, %arg2: i32) -> (i32, i32, i32) {
    %c0_i32 = arith.constant 0 : i32
    %c0_i32_0 = arith.constant 0 : i32
    %c0_i32_1 = arith.constant 0 : i32
    return %arg1, %c0_i32, %c0_i32_0 : i32, i32, i32
  }
  func.func @transform_2(%arg0: i32, %arg1: i32, %arg2: i32) -> (i32, i32, i32) {
    %c0_i32 = arith.constant 0 : i32
    %c0_i32_0 = arith.constant 0 : i32
    %c0_i32_1 = arith.constant 0 : i32
    return %arg1, %c0_i32, %c0_i32_0 : i32, i32, i32
  }
  func.func @transform_3(%arg0: i32, %arg1: i32, %arg2: i32) -> (i32, i32, i32) {
    %c1_i32 = arith.constant 1 : i32
    %0 = arith.muli %arg0, %c1_i32 : i32
    %1 = arith.addi %0, %arg1 : i32
    %c1_i32_0 = arith.constant 1 : i32
    %2 = arith.muli %1, %c1_i32_0 : i32
    %3 = arith.addi %2, %arg2 : i32
    %c0_i32 = arith.constant 0 : i32
    %c0_i32_1 = arith.constant 0 : i32
    %c0_i32_2 = arith.constant 0 : i32
    return %3, %c0_i32, %c0_i32_1 : i32, i32, i32
  }
}

</mosaic_0001>

<bundles_post_ra>
// kernel: conv2d_pallas.1
= control target key start
LH: loop header
LB: loop body
LE: loop exit
PB: predicated region body
PF: predicated region fallthrough
CT: control target
= control target key end

     0   :  { %s11245_s12 = smov 0   ;;  %s11247_s13 = smov 0   ;;  %s14398_s0 = inlined_call_operand.vmem [shape: f32[2,18,1,18,1,4], index: 0, kind: input, shape index: {}]   ;;  %s14399_s1 = inlined_call_operand.vmem [shape: f32[1,36,128], index: 1, kind: input, shape index: {}]   ;;  %s14400_s2 = inlined_call_operand.vmem [shape: f32[1,1,128], index: 2, kind: input, shape index: {}]   ;;  %s14401_s3 = inlined_call_operand.vmem [shape: f32[2,256,128], index: 3, kind: output, shape index: {}]  }
   0x1   :  { %s11249_s14 = smov 0  }
   0x2 LB: > { %s32_s15 = sadd.s32 1, %s11211_s13  ;;  %p9061_p0 = scmp.ge.s32.totalorder %s11215_s14, 1  ;;  %s11215_s14 = sphi %s11249_s14, %s13_s14   ;;  %s11211_s13 = sphi %s11247_s13, %s14403_s13   ;;  %s11207_s12 = sphi %s11245_s12, %s14402_s12  }
   0x3   : > { %p34_p1 = scmp.ge.s32.totalorder %s32_s15, 2  ;;  %p181_p2 = scmp.lt.s32.totalorder %s11215_s14, 3 }
   0x5   : > { %s14405_s15 = smov (%p34_p1, %s32_s15), 0  ;;  %p182_p3 = pnand %p9061_p0, %p181_p2 }
   0x6   : > { %p216_p4 = scmp.lt.s32.totalorder (!%p182_p3), %s11207_s12, 1  ;;  %s11217_s20 = smov (!%p182_p3), 4  }
   0x7   : > { %185 = sbr.rel (%p182_p3) target bundleno = 4598 (0x11f6), region = 32  ;;  %s11218_s21 = smov (!%p182_p3), 8  }
   0x8   : > { %s11219_s22 = smov (!%p182_p3), 12   ;;  %s11220_s23 = smov (!%p182_p3), 16  }
   0x9   : > { %s11221_s24 = smov (!%p182_p3), 20   ;;  %s11222_s25 = smov (!%p182_p3), 24  }
   0xa   : > { %s11223_s26 = smov (!%p182_p3), 28   ;;  %s11224_s27 = smov (!%p182_p3), 32  }
   0xc   : > { %s14407_s12 = smov (!%p216_p4, %s11207_s12), 1  ;;  %vm1081_vm0 = vcmask 31744   ;;  %vm2019_vm1 = vcmask 64544   ;;  %vm2957_vm2 = vcmask 97344   ;;  %vm3896_vm3 = vcmask 130144  }
   0xd   : > { %s11159_s16 = smul.u32 324, %s14407_s12  ;;  %vm4834_vm4 = vcmask 162944   ;;  %vm5772_vm5 = vcmask 195744   ;;  %vm6711_vm6 = vcmask 228544   ;;  %vm7649_vm7 = vcmask 261344   ;;  %s11148_s11 = sshll.u32 %s14407_s12, 8 }
   0xe   : > { %vm8693_vm8 = vcmask 1043456   ;;  %vm8587_vm9 = vcmask 294144   ;;  %vm8644_vm10 = vcmask 293888  }
   0xf   : > { %s11269_s19 = scalar_lea.vmem %s14398_s0, %s11159_s16 }
  0x10   : > { %v242_v0 = vld [vmem:[%s11269_s19] sm:$0x1]  ;;  %v243_v1 = vld [vmem:[%s11269_s19 + $0x1] sm:$0x1]  ;;  %v244_v2 = vld [vmem:[%s11269_s19 + $0x2] sm:$0x1] }
  0x11   : > { %v245_v3 = vld [vmem:[%s11269_s19 + $0x3] sm:$0x1]  ;;  %754 = vst [vmem:[#allocation1] ss:$9 sm:$0xff] %v242_v0  ;;  %v246_v4 = vld [vmem:[%s11269_s19 + $0x4] sm:$0x1] }
  0x12   : > { %756 = vst [vmem:[#allocation1 + $0x1] ss:$9 sm:$0xff] %v243_v1  ;;  %v247_v5 = vld [vmem:[%s11269_s19 + $0x5] sm:$0x1]  ;;  %v248_v6 = vld [vmem:[%s11269_s19 + $0x6] sm:$0x1] }
  0x13   : > { %758 = vst [vmem:[#allocation1 + $0x2] ss:$9 sm:$0xff] %v244_v2  ;;  %v249_v7 = vld [vmem:[%s11269_s19 + $0x7] sm:$0x1]  ;;  %v250_v8 = vld [vmem:[%s11269_s19 + $0x8] sm:$0x1] }
  0x14   : > { %760 = vst [vmem:[#allocation1 + $0x3] ss:$9 sm:$0xff] %v245_v3  ;;  %v251_v9 = vld [vmem:[%s11269_s19 + $0x9] sm:$0x1]  ;;  %v252_v10 = vld [vmem:[%s11269_s19 + $0xa] sm:$0x1] }
  0x15   : > { %762 = vst [vmem:[#allocation1 + $0x4] ss:$9 sm:$0xff] %v246_v4  ;;  %v253_v12 = vld [vmem:[%s11269_s19 + $0xb] sm:$0x1]  ;;  %v254_v13 = vld [vmem:[%s11269_s19 + $0xc] sm:$0x1] }
  0x16   : > { %764 = vst [vmem:[#allocation1 + $0x5] ss:$9 sm:$0xff] %v247_v5  ;;  %v255_v14 = vld [vmem:[%s11269_s19 + $0xd] sm:$0x1]  ;;  %v256_v15 = vld [vmem:[%s11269_s19 + $0xe] sm:$0x1] }
  0x17   : > { %766 = vst [vmem:[#allocation1 + $0x6] ss:$9 sm:$0xff] %v248_v6  ;;  %v257_v16 = vld [vmem:[%s11269_s19 + $0xf] sm:$0x1]  ;;  %v258_v17 = vld [vmem:[%s11269_s19 + $0x12] sm:$0x1] }
  0x18   : > { %768 = vst [vmem:[#allocation1 + $0x7] ss:$9 sm:$0xff] %v249_v7  ;;  %v259_v18 = vld [vmem:[%s11269_s19 + $0x13] sm:$0x1]  ;;  %v260_v19 = vld [vmem:[%s11269_s19 + $0x14] sm:$0x1] }
  0x19   : > { %v261_v21 = vld [vmem:[%s11269_s19 + $0x15] sm:$0x1]  ;;  %v262_v22 = vld [vmem:[%s11269_s19 + $0x16] sm:$0x1]  ;;  %v263_v23 = vld [vmem:[%s11269_s19 + $0x17] sm:$0x1] }
  0x1a   : > { %v264_v24 = vld [vmem:[%s11269_s19 + $0x18] sm:$0x1]  ;;  %v265_v25 = vld [vmem:[%s11269_s19 + $0x19] sm:$0x1]  ;;  %v266_v26 = vld [vmem:[%s11269_s19 + $0x1a] sm:$0x1] }
  0x1b   : > { %v267_v27 = vld [vmem:[%s11269_s19 + $0x1b] sm:$0x1]  ;;  %v268_v28 = vld [vmem:[%s11269_s19 + $0x1c] sm:$0x1]  ;;  %v269_v30 = vld [vmem:[%s11269_s19 + $0x1d] sm:$0x1] }
  0x1c   : > { %v270_v31 = vld [vmem:[%s11269_s19 + $0x1e] sm:$0x1]  ;;  %v271_v32 = vld [vmem:[%s11269_s19 + $0x1f] sm:$0x1]  ;;  %v272_v33 = vld [vmem:[%s11269_s19 + $0x20] sm:$0x1] }
  0x1d   : > { %v273_v34 = vld [vmem:[%s11269_s19 + $0x21] sm:$0x1]  ;;  %v274_v35 = vld [vmem:[%s11269_s19 + $0x24] sm:$0x1]  ;;  %v275_v36 = vld [vmem:[%s11269_s19 + $0x25] sm:$0x1] }
  0x1e   : > { %v276_v37 = vld [vmem:[%s11269_s19 + $0x26] sm:$0x1]  ;;  %v277_v39 = vld [vmem:[%s11269_s19 + $0x27] sm:$0x1]  ;;  %v278_v40 = vld [vmem:[%s11269_s19 + $0x28] sm:$0x1] }
  0x1f   : > { %v11282_v11 = vld [vmem:[#allocation1] sm:$0xff]  ;;  %v279_v41 = vld [vmem:[%s11269_s19 + $0x29] sm:$0x1]  ;;  %v280_v42 = vld [vmem:[%s11269_s19 + $0x2a] sm:$0x1] }
  0x20   : > { %770 = vst [vmem:[#allocation1] ss:$9 sm:$0xff] %v250_v8  ;;  %v281_v43 = vld [vmem:[%s11269_s19 + $0x2b] sm:$0x1]  ;;  %v282_v44 = vld [vmem:[%s11269_s19 + $0x2c] sm:$0x1] }
  0x21   : > { %771 = vst [vmem:[#allocation1 + $0x1] ss:$9 sm:$0xff] %v251_v9  ;;  %v283_v45 = vld [vmem:[%s11269_s19 + $0x2d] sm:$0x1]  ;;  %v284_v46 = vld [vmem:[%s11269_s19 + $0x2e] sm:$0x1] }
  0x22   : > { %772 = vst [vmem:[#allocation1 + $0x2] ss:$9 sm:$0xff] %v252_v10  ;;  %v285_v48 = vld [vmem:[%s11269_s19 + $0x2f] sm:$0x1]  ;;  %v286_v49 = vld [vmem:[%s11269_s19 + $0x30] sm:$0x1] }
  0x23   : > { %773 = vst [vmem:[#allocation1 + $0x3] ss:$9 sm:$0xff] %v253_v12  ;;  %v287_v50 = vld [vmem:[%s11269_s19 + $0x31] sm:$0x1]  ;;  %v288_v51 = vld [vmem:[%s11269_s19 + $0x32] sm:$0x1] }
  0x24   : > { %774 = vst [vmem:[#allocation1 + $0x4] ss:$9 sm:$0xff] %v254_v13  ;;  %v289_v52 = vld [vmem:[%s11269_s19 + $0x33] sm:$0x1]  ;;  %v290_v53 = vld [vmem:[%s11269_s19 + $0x36] sm:$0x1] }
  0x25   : > { %775 = vst [vmem:[#allocation1 + $0x5] ss:$9 sm:$0xff] %v255_v14  ;;  %v291_v54 = vld [vmem:[%s11269_s19 + $0x37] sm:$0x1]  ;;  %v292_v55 = vld [vmem:[%s11269_s19 + $0x38] sm:$0x1] }
  0x26   : > { %776 = vst [vmem:[#allocation1 + $0x6] ss:$9 sm:$0xff] %v256_v15  ;;  %v293_v57 = vld [vmem:[%s11269_s19 + $0x39] sm:$0x1]  ;;  %v294_v58 = vld [vmem:[%s11269_s19 + $0x3a] sm:$0x1] }
  0x27   : > { %777 = vst [vmem:[#allocation1 + $0x7] ss:$9 sm:$0xff] %v257_v16  ;;  %v295_v59 = vld [vmem:[%s11269_s19 + $0x3b] sm:$0x1]  ;;  %v296_v60 = vld [vmem:[%s11269_s19 + $0x3c] sm:$0x1] }
  0x28   : > { %v297_v61 = vld [vmem:[%s11269_s19 + $0x3d] sm:$0x1]  ;;  %v298_v62 = vld [vmem:[%s11269_s19 + $0x3e] sm:$0x1]  ;;  %v299_v63 = vld [vmem:[%s11269_s19 + $0x3f] sm:$0x1] }
  0x29   : > { %v300_v0 = vld [vmem:[%s11269_s19 + $0x40] sm:$0x1]  ;;  %v301_v2 = vld [vmem:[%s11269_s19 + $0x41] sm:$0x1]  ;;  %v302_v3 = vld [vmem:[%s11269_s19 + $0x42] sm:$0x1] }
  0x2a   : > { %v303_v4 = vld [vmem:[%s11269_s19 + $0x43] sm:$0x1]  ;;  %v304_v5 = vld [vmem:[%s11269_s19 + $0x44] sm:$0x1]  ;;  %v305_v6 = vld [vmem:[%s11269_s19 + $0x45] sm:$0x1] }
  0x2b   : > { %v306_v7 = vld [vmem:[%s11269_s19 + $0x48] sm:$0x1]  ;;  %v307_v8 = vld [vmem:[%s11269_s19 + $0x49] sm:$0x1]  ;;  %v308_v9 = vld [vmem:[%s11269_s19 + $0x4a] sm:$0x1] }
  0x2c   : > { %v309_v12 = vld [vmem:[%s11269_s19 + $0x4b] sm:$0x1]  ;;  %v310_v13 = vld [vmem:[%s11269_s19 + $0x4c] sm:$0x1]  ;;  %v311_v14 = vld [vmem:[%s11269_s19 + $0x4d] sm:$0x1] }
  0x2d   : > { %v312_v15 = vld [vmem:[%s11269_s19 + $0x4e] sm:$0x1]  ;;  %v313_v16 = vld [vmem:[%s11269_s19 + $0x4f] sm:$0x1]  ;;  %1082 = vst.msk [vmem:[#allocation2] sm:$0xff] %vm1081_vm0, %v11282_v11 }
  0x2e   : > { %v11292_v20 = vld [vmem:[#allocation1] sm:$0xff] }
  0x2f   : > { %779 = vst [vmem:[#allocation1] ss:$9 sm:$0xff] %v258_v17  ;;  %v314_v17 = vld [vmem:[%s11269_s19 + $0x50] sm:$0x1] }
  0x30   : > { %780 = vst [vmem:[#allocation1 + $0x1] ss:$9 sm:$0xff] %v259_v18  ;;  %v315_v18 = vld [vmem:[%s11269_s19 + $0x51] sm:$0x1] }
  0x31   : > { %781 = vst [vmem:[#allocation1 + $0x2] ss:$9 sm:$0xff] %v260_v19  ;;  %v316_v19 = vld [vmem:[%s11269_s19 + $0x52] sm:$0x1] }
  0x32   : > { %782 = vst [vmem:[#allocation1 + $0x3] ss:$9 sm:$0xff] %v261_v21 }
  0x33   : > { %783 = vst [vmem:[#allocation1 + $0x4] ss:$9 sm:$0xff] %v262_v22  ;;  %v317_v22 = vld [vmem:[%s11269_s19 + $0x53] sm:$0x1] }
  0x34   : > { %784 = vst [vmem:[#allocation1 + $0x5] ss:$9 sm:$0xff] %v263_v23  ;;  %v318_v23 = vld [vmem:[%s11269_s19 + $0x54] sm:$0x1] }
  0x35   : > { %785 = vst [vmem:[#allocation1 + $0x6] ss:$9 sm:$0xff] %v264_v24  ;;  %v319_v24 = vld [vmem:[%s11269_s19 + $0x55] sm:$0x1] }
  0x36   : > { %786 = vst [vmem:[#allocation1 + $0x7] ss:$9 sm:$0xff] %v265_v25  ;;  %v320_v25 = vld [vmem:[%s11269_s19 + $0x56] sm:$0x1] }
  0x37   : > { %1083 = vst.msk [vmem:[#allocation2 + $0x8] sm:$0xff] %vm1081_vm0, %v11292_v20  ;;  %v9403_v20 = vld [vmem:[%s11269_s19 + $0x5f] sm:$0x1] }
  0x3d   : > { %v11302_v29 = vld [vmem:[#allocation1] sm:$0xff] }
  0x3e   : > { %788 = vst [vmem:[#allocation1] ss:$9 sm:$0xff] %v266_v26  ;;  %v321_v26 = vld [vmem:[%s11269_s19 + $0x57] sm:$0x1] }
  0x3f   : > { %789 = vst [vmem:[#allocation1 + $0x1] ss:$9 sm:$0xff] %v267_v27  ;;  %v322_v27 = vld [vmem:[%s11269_s19 + $0x5a] sm:$0x1] }
  0x40   : > { %790 = vst [vmem:[#allocation1 + $0x2] ss:$9 sm:$0xff] %v268_v28  ;;  %v323_v28 = vld [vmem:[%s11269_s19 + $0x5b] sm:$0x1] }
  0x41   : > { %791 = vst [vmem:[#allocation1 + $0x3] ss:$9 sm:$0xff] %v269_v30  ;;  %v324_v30 = vld [vmem:[%s11269_s19 + $0x5c] sm:$0x1] }
  0x42   : > { %792 = vst [vmem:[#allocation1 + $0x4] ss:$9 sm:$0xff] %v270_v31 }
  0x43   : > { %793 = vst [vmem:[#allocation1 + $0x5] ss:$9 sm:$0xff] %v271_v32  ;;  %v325_v32 = vld [vmem:[%s11269_s19 + $0x5d] sm:$0x1] }
  0x44   : > { %794 = vst [vmem:[#allocation1 + $0x6] ss:$9 sm:$0xff] %v272_v33  ;;  %v326_v33 = vld [vmem:[%s11269_s19 + $0x5e] sm:$0x1] }
  0x45   : > { %795 = vst [vmem:[#allocation1 + $0x7] ss:$9 sm:$0xff] %v273_v34  ;;  %v327_v34 = vld [vmem:[%s11269_s19 + $0x5f] sm:$0x1] }
  0x46   : > { %1084 = vst.msk [vmem:[#allocation2 + $0x10] sm:$0xff] %vm1081_vm0, %v11302_v29  ;;  %v9404_v29 = vld [vmem:[%s11269_s19 + $0x60] sm:$0x1] }
  0x4c   : > { %v11312_v38 = vld [vmem:[#allocation1] sm:$0xff] }
  0x4d   : > { %797 = vst [vmem:[#allocation1] ss:$9 sm:$0xff] %v274_v35  ;;  %v328_v35 = vld [vmem:[%s11269_s19 + $0x60] sm:$0x1] }
  0x4e   : > { %798 = vst [vmem:[#allocation1 + $0x1] ss:$9 sm:$0xff] %v275_v36  ;;  %v329_v36 = vld [vmem:[%s11269_s19 + $0x61] sm:$0x1] }
  0x4f   : > { %799 = vst [vmem:[#allocation1 + $0x2] ss:$9 sm:$0xff] %v276_v37  ;;  %v330_v37 = vld [vmem:[%s11269_s19 + $0x62] sm:$0x1] }
  0x50   : > { %800 = vst [vmem:[#allocation1 + $0x3] ss:$9 sm:$0xff] %v277_v39  ;;  %v331_v39 = vld [vmem:[%s11269_s19 + $0x63] sm:$0x1] }
  0x51   : > { %801 = vst [vmem:[#allocation1 + $0x4] ss:$9 sm:$0xff] %v278_v40  ;;  %v332_v40 = vld [vmem:[%s11269_s19 + $0x64] sm:$0x1] }
  0x52   : > { %802 = vst [vmem:[#allocation1 + $0x5] ss:$9 sm:$0xff] %v279_v41 }
  0x53   : > { %803 = vst [vmem:[#allocation1 + $0x6] ss:$9 sm:$0xff] %v280_v42  ;;  %v333_v42 = vld [vmem:[%s11269_s19 + $0x65] sm:$0x1] }
  0x54   : > { %804 = vst [vmem:[#allocation1 + $0x7] ss:$9 sm:$0xff] %v281_v43  ;;  %v334_v43 = vld [vmem:[%s11269_s19 + $0x66] sm:$0x1] }
  0x55   : > { %1085 = vst.msk [vmem:[#allocation2 + $0x18] sm:$0xff] %vm1081_vm0, %v11312_v38  ;;  %v9405_v38 = vld [vmem:[%s11269_s19 + $0x61] sm:$0x1] }
  0x5b   : > { %v11322_v47 = vld [vmem:[#allocation1] sm:$0xff] }
  0x5c   : > { %806 = vst [vmem:[#allocation1] ss:$9 sm:$0xff] %v282_v44  ;;  %v335_v44 = vld [vmem:[%s11269_s19 + $0x67] sm:$0x1] }
  0x5d   : > { %807 = vst [vmem:[#allocation1 + $0x1] ss:$9 sm:$0xff] %v283_v45  ;;  %v336_v45 = vld [vmem:[%s11269_s19 + $0x68] sm:$0x1] }
  0x5e   : > { %808 = vst [vmem:[#allocation1 + $0x2] ss:$9 sm:$0xff] %v284_v46  ;;  %v337_v46 = vld [vmem:[%s11269_s19 + $0x69] sm:$0x1] }
  0x5f   : > { %809 = vst [vmem:[#allocation1 + $0x3] ss:$9 sm:$0xff] %v285_v48  ;;  %v338_v48 = vld [vmem:[%s11269_s19 + $0x6c] sm:$0x1] }
  0x60   : > { %810 = vst [vmem:[#allocation1 + $0x4] ss:$9 sm:$0xff] %v286_v49  ;;  %v339_v49 = vld [vmem:[%s11269_s19 + $0x6d] sm:$0x1] }
  0x61   : > { %811 = vst [vmem:[#allocation1 + $0x5] ss:$9 sm:$0xff] %v287_v50  ;;  %v340_v50 = vld [vmem:[%s11269_s19 + $0x6e] sm:$0x1] }
  0x62   : > { %812 = vst [vmem:[#allocation1 + $0x6] ss:$9 sm:$0xff] %v288_v51 }
  0x63   : > { %813 = vst [vmem:[#allocation1 + $0x7] ss:$9 sm:$0xff] %v289_v52  ;;  %v341_v52 = vld [vmem:[%s11269_s19 + $0x6f] sm:$0x1] }
  0x64   : > { %1086 = vst.msk [vmem:[#allocation2 + $0x20] sm:$0xff] %vm1081_vm0, %v11322_v47  ;;  %v9407_v47 = vld [vmem:[%s11269_s19 + $0x63] sm:$0x1] }
  0x6a   : > { %v11332_v56 = vld [vmem:[#allocation1] sm:$0xff] }
  0x6b   : > { %815 = vst [vmem:[#allocation1] ss:$9 sm:$0xff] %v290_v53  ;;  %v342_v53 = vld [vmem:[%s11269_s19 + $0x70] sm:$0x1] }
  0x6c   : > { %816 = vst [vmem:[#allocation1 + $0x1] ss:$9 sm:$0xff] %v291_v54  ;;  %v343_v54 = vld [vmem:[%s11269_s19 + $0x71] sm:$0x1] }
  0x6d   : > { %817 = vst [vmem:[#allocation1 + $0x2] ss:$9 sm:$0xff] %v292_v55  ;;  %v344_v55 = vld [vmem:[%s11269_s19 + $0x72] sm:$0x1] }
  0x6e   : > { %818 = vst [vmem:[#allocation1 + $0x3] ss:$9 sm:$0xff] %v293_v57  ;;  %v345_v57 = vld [vmem:[%s11269_s19 + $0x73] sm:$0x1] }
  0x6f   : > { %819 = vst [vmem:[#allocation1 + $0x4] ss:$9 sm:$0xff] %v294_v58  ;;  %v346_v58 = vld [vmem:[%s11269_s19 + $0x74] sm:$0x1] }
  0x70   : > { %820 = vst [vmem:[#allocation1 + $0x5] ss:$9 sm:$0xff] %v295_v59  ;;  %v347_v59 = vld [vmem:[%s11269_s19 + $0x75] sm:$0x1] }
  0x71   : > { %821 = vst [vmem:[#allocation1 + $0x6] ss:$9 sm:$0xff] %v296_v60  ;;  %v348_v60 = vld [vmem:[%s11269_s19 + $0x76] sm:$0x1] }
  0x72   : > { %822 = vst [vmem:[#allocation1 + $0x7] ss:$9 sm:$0xff] %v297_v61 }
  0x73   : > { %1087 = vst.msk [vmem:[#allocation2 + $0x28] sm:$0xff] %vm1081_vm0, %v11332_v56 }
  0x79   : > { %v11342_v1 = vld [vmem:[#allocation1] sm:$0xff] }
  0x7a   : > { %824 = vst [vmem:[#allocation1] ss:$9 sm:$0xff] %v298_v62  ;;  %v349_v62 = vld [vmem:[%s11269_s19 + $0x77] sm:$0x1] }
  0x7b   : > { %825 = vst [vmem:[#allocation1 + $0x1] ss:$9 sm:$0xff] %v299_v63  ;;  %v350_v63 = vld [vmem:[%s11269_s19 + $0x78] sm:$0x1] }
  0x7c   : > { %826 = vst [vmem:[#allocation1 + $0x2] ss:$9 sm:$0xff] %v300_v0  ;;  %v351_v0 = vld [vmem:[%s11269_s19 + $0x79] sm:$0x1] }
  0x7d   : > { %827 = vst [vmem:[#allocation1 + $0x3] ss:$9 sm:$0xff] %v301_v2  ;;  %v352_v2 = vld [vmem:[%s11269_s19 + $0x7a] sm:$0x1] }
  0x7e   : > { %828 = vst [vmem:[#allocation1 + $0x4] ss:$9 sm:$0xff] %v302_v3  ;;  %v353_v3 = vld [vmem:[%s11269_s19 + $0x7b] sm:$0x1] }
  0x7f   : > { %829 = vst [vmem:[#allocation1 + $0x5] ss:$9 sm:$0xff] %v303_v4  ;;  %v354_v4 = vld [vmem:[%s11269_s19 + $0x7e] sm:$0x1] }
  0x80   : > { %830 = vst [vmem:[#allocation1 + $0x6] ss:$9 sm:$0xff] %v304_v5  ;;  %v355_v5 = vld [vmem:[%s11269_s19 + $0x7f] sm:$0x1] }
  0x81   : > { %831 = vst [vmem:[#allocation1 + $0x7] ss:$9 sm:$0xff] %v305_v6  ;;  %v356_v6 = vld [vmem:[%s11269_s19 + $0x80] sm:$0x1] }
  0x82   : > { %1088 = vst.msk [vmem:[#allocation2 + $0x30] sm:$0xff] %vm1081_vm0, %v11342_v1  ;;  %v9408_v1 = vld [vmem:[%s11269_s19 + $0x64] sm:$0x1] }
  0x88   : > { %v11352_v10 = vld [vmem:[#allocation1] sm:$0xff] }
  0x89   : > { %833 = vst [vmem:[#allocation1] ss:$9 sm:$0xff] %v306_v7 }
  0x8a   : > { %834 = vst [vmem:[#allocation1 + $0x1] ss:$9 sm:$0xff] %v307_v8  ;;  %v357_v8 = vld [vmem:[%s11269_s19 + $0x81] sm:$0x1] }
  0x8b   : > { %835 = vst [vmem:[#allocation1 + $0x2] ss:$9 sm:$0xff] %v308_v9  ;;  %v358_v9 = vld [vmem:[%s11269_s19 + $0x82] sm:$0x1] }
  0x8c   : > { %836 = vst [vmem:[#allocation1 + $0x3] ss:$9 sm:$0xff] %v309_v12  ;;  %v359_v12 = vld [vmem:[%s11269_s19 + $0x83] sm:$0x1] }
  0x8d   : > { %837 = vst [vmem:[#allocation1 + $0x4] ss:$9 sm:$0xff] %v310_v13  ;;  %v360_v13 = vld [vmem:[%s11269_s19 + $0x84] sm:$0x1] }
  0x8e   : > { %838 = vst [vmem:[#allocation1 + $0x5] ss:$9 sm:$0xff] %v311_v14  ;;  %v361_v14 = vld [vmem:[%s11269_s19 + $0x85] sm:$0x1] }
  0x8f   : > { %839 = vst [vmem:[#allocation1 + $0x6] ss:$9 sm:$0xff] %v312_v15  ;;  %v362_v15 = vld [vmem:[%s11269_s19 + $0x86] sm:$0x1] }
  0x90   : > { %840 = vst [vmem:[#allocation1 + $0x7] ss:$9 sm:$0xff] %v313_v16  ;;  %v363_v16 = vld [vmem:[%s11269_s19 + $0x87] sm:$0x1] }
  0x91   : > { %1089 = vst.msk [vmem:[#allocation2 + $0x38] sm:$0xff] %vm1081_vm0, %v11352_v10 }
  0x97   : > { %v11362_v21 = vld [vmem:[#allocation1] sm:$0xff] }
  0x98   : > { %842 = vst [vmem:[#allocation1] ss:$9 sm:$0xff] %v314_v17  ;;  %v364_v17 = vld [vmem:[%s11269_s19 + $0x88] sm:$0x1] }
  0x99   : > { %843 = vst [vmem:[#allocation1 + $0x1] ss:$9 sm:$0xff] %v315_v18 }
  0x9a   : > { %844 = vst [vmem:[#allocation1 + $0x2] ss:$9 sm:$0xff] %v316_v19  ;;  %v365_v19 = vld [vmem:[%s11269_s19 + $0x89] sm:$0x1] }
  0x9b   : > { %845 = vst [vmem:[#allocation1 + $0x3] ss:$9 sm:$0xff] %v317_v22  ;;  %v366_v22 = vld [vmem:[%s11269_s19 + $0x8a] sm:$0x1] }
  0x9c   : > { %846 = vst [vmem:[#allocation1 + $0x4] ss:$9 sm:$0xff] %v318_v23  ;;  %v367_v23 = vld [vmem:[%s11269_s19 + $0x8b] sm:$0x1] }
  0x9d   : > { %847 = vst [vmem:[#allocation1 + $0x5] ss:$9 sm:$0xff] %v319_v24  ;;  %v368_v24 = vld [vmem:[%s11269_s19 + $0x8c] sm:$0x1] }
  0x9e   : > { %848 = vst [vmem:[#allocation1 + $0x6] ss:$9 sm:$0xff] %v320_v25  ;;  %v369_v25 = vld [vmem:[%s11269_s19 + $0x8d] sm:$0x1] }
  0x9f   : > { %849 = vst [vmem:[#allocation1 + $0x7] ss:$9 sm:$0xff] %v321_v26  ;;  %v370_v26 = vld [vmem:[%s11269_s19 + $0x90] sm:$0x1] }
  0xa0   : > { %1090 = vst.msk [vmem:[#allocation2 + $0x40] sm:$0xff] %vm1081_vm0, %v11362_v21  ;;  %v9409_v21 = vld [vmem:[%s11269_s19 + $0x65] sm:$0x1] }
  0xa6   : > { %v11372_v31 = vld [vmem:[#allocation1] sm:$0xff] }
  0xa7   : > { %851 = vst [vmem:[#allocation1] ss:$9 sm:$0xff] %v322_v27  ;;  %v371_v27 = vld [vmem:[%s11269_s19 + $0x91] sm:$0x1] }
  0xa8   : > { %852 = vst [vmem:[#allocation1 + $0x1] ss:$9 sm:$0xff] %v323_v28  ;;  %v372_v28 = vld [vmem:[%s11269_s19 + $0x92] sm:$0x1] }
  0xa9   : > { %853 = vst [vmem:[#allocation1 + $0x2] ss:$9 sm:$0xff] %v324_v30 }
  0xaa   : > { %854 = vst [vmem:[#allocation1 + $0x3] ss:$9 sm:$0xff] %v325_v32  ;;  %v373_v32 = vld [vmem:[%s11269_s19 + $0x93] sm:$0x1] }
  0xab   : > { %855 = vst [vmem:[#allocation1 + $0x4] ss:$9 sm:$0xff] %v326_v33  ;;  %v374_v33 = vld [vmem:[%s11269_s19 + $0x94] sm:$0x1] }
  0xac   : > { %856 = vst [vmem:[#allocation1 + $0x5] ss:$9 sm:$0xff] %v327_v34  ;;  %v375_v34 = vld [vmem:[%s11269_s19 + $0x95] sm:$0x1] }
  0xad   : > { %857 = vst [vmem:[#allocation1 + $0x6] ss:$9 sm:$0xff] %v328_v35  ;;  %v376_v35 = vld [vmem:[%s11269_s19 + $0x96] sm:$0x1] }
  0xae   : > { %858 = vst [vmem:[#allocation1 + $0x7] ss:$9 sm:$0xff] %v329_v36  ;;  %v377_v36 = vld [vmem:[%s11269_s19 + $0x97] sm:$0x1] }
  0xaf   : > { %1091 = vst.msk [vmem:[#allocation2 + $0x48] sm:$0xff] %vm1081_vm0, %v11372_v31  ;;  %v9410_v31 = vld [vmem:[%s11269_s19 + $0x66] sm:$0x1] }
  0xb5   : > { %v11382_v41 = vld [vmem:[#allocation1] sm:$0xff] }
  0xb6   : > { %860 = vst [vmem:[#allocation1] ss:$9 sm:$0xff] %v330_v37  ;;  %v378_v37 = vld [vmem:[%s11269_s19 + $0x98] sm:$0x1] }
  0xb7   : > { %861 = vst [vmem:[#allocation1 + $0x1] ss:$9 sm:$0xff] %v331_v39  ;;  %v379_v39 = vld [vmem:[%s11269_s19 + $0x99] sm:$0x1] }
  0xb8   : > { %862 = vst [vmem:[#allocation1 + $0x2] ss:$9 sm:$0xff] %v332_v40  ;;  %v380_v40 = vld [vmem:[%s11269_s19 + $0x9a] sm:$0x1] }
  0xb9   : > { %863 = vst [vmem:[#allocation1 + $0x3] ss:$9 sm:$0xff] %v333_v42 }
  0xba   : > { %864 = vst [vmem:[#allocation1 + $0x4] ss:$9 sm:$0xff] %v334_v43  ;;  %v381_v43 = vld [vmem:[%s11269_s19 + $0x9b] sm:$0x1] }
  0xbb   : > { %865 = vst [vmem:[#allocation1 + $0x5] ss:$9 sm:$0xff] %v335_v44  ;;  %v382_v44 = vld [vmem:[%s11269_s19 + $0x9c] sm:$0x1] }
  0xbc   : > { %866 = vst [vmem:[#allocation1 + $0x6] ss:$9 sm:$0xff] %v336_v45  ;;  %v383_v45 = vld [vmem:[%s11269_s19 + $0x9d] sm:$0x1] }
  0xbd   : > { %867 = vst [vmem:[#allocation1 + $0x7] ss:$9 sm:$0xff] %v337_v46  ;;  %v384_v46 = vld [vmem:[%s11269_s19 + $0x9e] sm:$0x1] }
  0xbe   : > { %1092 = vst.msk [vmem:[#allocation2 + $0x50] sm:$0xff] %vm1081_vm0, %v11382_v41  ;;  %v9411_v41 = vld [vmem:[%s11269_s19 + $0x67] sm:$0x1] }
  0xc4   : > { %v11392_v51 = vld [vmem:[#allocation1] sm:$0xff] }
  0xc5   : > { %869 = vst [vmem:[#allocation1] ss:$9 sm:$0xff] %v338_v48  ;;  %v385_v48 = vld [vmem:[%s11269_s19 + $0x9f] sm:$0x1] }
  0xc6   : > { %870 = vst [vmem:[#allocation1 + $0x1] ss:$9 sm:$0xff] %v339_v49  ;;  %v386_v49 = vld [vmem:[%s11269_s19 + $0xa2] sm:$0x1] }
  0xc7   : > { %871 = vst [vmem:[#allocation1 + $0x2] ss:$9 sm:$0xff] %v340_v50  ;;  %v387_v50 = vld [vmem:[%s11269_s19 + $0xa3] sm:$0x1] }
  0xc8   : > { %872 = vst [vmem:[#allocation1 + $0x3] ss:$9 sm:$0xff] %v341_v52  ;;  %v388_v52 = vld [vmem:[%s11269_s19 + $0xa4] sm:$0x1] }
  0xc9   : > { %873 = vst [vmem:[#allocation1 + $0x4] ss:$9 sm:$0xff] %v342_v53 }
  0xca   : > { %874 = vst [vmem:[#allocation1 + $0x5] ss:$9 sm:$0xff] %v343_v54  ;;  %v389_v54 = vld [vmem:[%s11269_s19 + $0xa5] sm:$0x1] }
  0xcb   : > { %875 = vst [vmem:[#allocation1 + $0x6] ss:$9 sm:$0xff] %v344_v55  ;;  %v390_v55 = vld [vmem:[%s11269_s19 + $0xa6] sm:$0x1] }
  0xcc   : > { %876 = vst [vmem:[#allocation1 + $0x7] ss:$9 sm:$0xff] %v345_v57  ;;  %v391_v57 = vld [vmem:[%s11269_s19 + $0xa7] sm:$0x1] }
  0xcd   : > { %1093 = vst.msk [vmem:[#allocation2 + $0x58] sm:$0xff] %vm1081_vm0, %v11392_v51  ;;  %v9412_v51 = vld [vmem:[%s11269_s19 + $0x68] sm:$0x1] }
  0xd3   : > { %v11402_v61 = vld [vmem:[#allocation1] sm:$0xff] }
  0xd4   : > { %878 = vst [vmem:[#allocation1] ss:$9 sm:$0xff] %v346_v58  ;;  %v392_v58 = vld [vmem:[%s11269_s19 + $0xa8] sm:$0x1] }
  0xd5   : > { %879 = vst [vmem:[#allocation1 + $0x1] ss:$9 sm:$0xff] %v347_v59  ;;  %v393_v59 = vld [vmem:[%s11269_s19 + $0xa9] sm:$0x1] }
  0xd6   : > { %880 = vst [vmem:[#allocation1 + $0x2] ss:$9 sm:$0xff] %v348_v60  ;;  %v394_v60 = vld [vmem:[%s11269_s19 + $0xaa] sm:$0x1] }
  0xd7   : > { %881 = vst [vmem:[#allocation1 + $0x3] ss:$9 sm:$0xff] %v349_v62  ;;  %v395_v62 = vld [vmem:[%s11269_s19 + $0xab] sm:$0x1] }
  0xd8   : > { %882 = vst [vmem:[#allocation1 + $0x4] ss:$9 sm:$0xff] %v350_v63  ;;  %v396_v63 = vld [vmem:[%s11269_s19 + $0xac] sm:$0x1] }
  0xd9   : > { %883 = vst [vmem:[#allocation1 + $0x5] ss:$9 sm:$0xff] %v351_v0 }
  0xda   : > { %884 = vst [vmem:[#allocation1 + $0x6] ss:$9 sm:$0xff] %v352_v2  ;;  %v397_v2 = vld [vmem:[%s11269_s19 + $0xad] sm:$0x1] }
  0xdb   : > { %885 = vst [vmem:[#allocation1 + $0x7] ss:$9 sm:$0xff] %v353_v3  ;;  %v398_v3 = vld [vmem:[%s11269_s19 + $0xae] sm:$0x1] }
  0xdc   : > { %1094 = vst.msk [vmem:[#allocation2 + $0x60] sm:$0xff] %vm1081_vm0, %v11402_v61  ;;  %v9413_v61 = vld [vmem:[%s11269_s19 + $0x69] sm:$0x1] }
  0xe2   : > { %v11412_v7 = vld [vmem:[#allocation1] sm:$0xff] }
  0xe3   : > { %887 = vst [vmem:[#allocation1] ss:$9 sm:$0xff] %v354_v4  ;;  %v399_v4 = vld [vmem:[%s11269_s19 + $0xaf] sm:$0x1] }
  0xe4   : > { %888 = vst [vmem:[#allocation1 + $0x1] ss:$9 sm:$0xff] %v355_v5  ;;  %v400_v5 = vld [vmem:[%s11269_s19 + $0xb0] sm:$0x1] }
  0xe5   : > { %889 = vst [vmem:[#allocation1 + $0x2] ss:$9 sm:$0xff] %v356_v6  ;;  %v401_v6 = vld [vmem:[%s11269_s19 + $0xb1] sm:$0x1] }
  0xe6   : > { %890 = vst [vmem:[#allocation1 + $0x3] ss:$9 sm:$0xff] %v357_v8  ;;  %v402_v8 = vld [vmem:[%s11269_s19 + $0xb4] sm:$0x1] }
  0xe7   : > { %891 = vst [vmem:[#allocation1 + $0x4] ss:$9 sm:$0xff] %v358_v9  ;;  %v403_v9 = vld [vmem:[%s11269_s19 + $0xb5] sm:$0x1] }
  0xe8   : > { %892 = vst [vmem:[#allocation1 + $0x5] ss:$9 sm:$0xff] %v359_v12  ;;  %v404_v12 = vld [vmem:[%s11269_s19 + $0xb6] sm:$0x1] }
  0xe9   : > { %893 = vst [vmem:[#allocation1 + $0x6] ss:$9 sm:$0xff] %v360_v13 }
  0xea   : > { %894 = vst [vmem:[#allocation1 + $0x7] ss:$9 sm:$0xff] %v361_v14  ;;  %v405_v14 = vld [vmem:[%s11269_s19 + $0xb7] sm:$0x1] }
  0xeb   : > { %1095 = vst.msk [vmem:[#allocation2 + $0x68] sm:$0xff] %vm1081_vm0, %v11412_v7  ;;  %v9414_v7 = vld [vmem:[%s11269_s19 + $0x6a] sm:$0x1] }
  0xf1   : > { %v11422_v18 = vld [vmem:[#allocation1] sm:$0xff] }
  0xf2   : > { %896 = vst [vmem:[#allocation1] ss:$9 sm:$0xff] %v362_v15  ;;  %v406_v15 = vld [vmem:[%s11269_s19 + $0xb8] sm:$0x1] }
  0xf3   : > { %897 = vst [vmem:[#allocation1 + $0x1] ss:$9 sm:$0xff] %v363_v16  ;;  %v407_v16 = vld [vmem:[%s11269_s19 + $0xb9] sm:$0x1] }
  0xf4   : > { %898 = vst [vmem:[#allocation1 + $0x2] ss:$9 sm:$0xff] %v364_v17  ;;  %v408_v17 = vld [vmem:[%s11269_s19 + $0xba] sm:$0x1] }
  0xf5   : > { %899 = vst [vmem:[#allocation1 + $0x3] ss:$9 sm:$0xff] %v365_v19  ;;  %v409_v19 = vld [vmem:[%s11269_s19 + $0xbb] sm:$0x1] }
  0xf6   : > { %900 = vst [vmem:[#allocation1 + $0x4] ss:$9 sm:$0xff] %v366_v22  ;;  %v410_v22 = vld [vmem:[%s11269_s19 + $0xbc] sm:$0x1] }
  0xf7   : > { %901 = vst [vmem:[#allocation1 + $0x5] ss:$9 sm:$0xff] %v367_v23  ;;  %v411_v23 = vld [vmem:[%s11269_s19 + $0xbd] sm:$0x1] }
  0xf8   : > { %902 = vst [vmem:[#allocation1 + $0x6] ss:$9 sm:$0xff] %v368_v24  ;;  %v412_v24 = vld [vmem:[%s11269_s19 + $0xbe] sm:$0x1] }
  0xf9   : > { %903 = vst [vmem:[#allocation1 + $0x7] ss:$9 sm:$0xff] %v369_v25 }
  0xfa   : > { %1096 = vst.msk [vmem:[#allocation2 + $0x70] sm:$0xff] %vm1081_vm0, %v11422_v18  ;;  %v9415_v18 = vld [vmem:[%s11269_s19 + $0x6b] sm:$0x1] }
 0x100   : > { %v11432_v30 = vld [vmem:[#allocation1] sm:$0xff] }
 0x101   : > { %905 = vst [vmem:[#allocation1] ss:$9 sm:$0xff] %v370_v26  ;;  %v413_v26 = vld [vmem:[%s11269_s19 + $0xbf] sm:$0x1] }
 0x102   : > { %906 = vst [vmem:[#allocation1 + $0x1] ss:$9 sm:$0xff] %v371_v27  ;;  %v414_v27 = vld [vmem:[%s11269_s19 + $0xc0] sm:$0x1] }
 0x103   : > { %907 = vst [vmem:[#allocation1 + $0x2] ss:$9 sm:$0xff] %v372_v28  ;;  %v415_v28 = vld [vmem:[%s11269_s19 + $0xc1] sm:$0x1] }
 0x104   : > { %908 = vst [vmem:[#allocation1 + $0x3] ss:$9 sm:$0xff] %v373_v32  ;;  %v416_v32 = vld [vmem:[%s11269_s19 + $0xc2] sm:$0x1] }
 0x105   : > { %909 = vst [vmem:[#allocation1 + $0x4] ss:$9 sm:$0xff] %v374_v33  ;;  %v417_v33 = vld [vmem:[%s11269_s19 + $0xc3] sm:$0x1] }
 0x106   : > { %910 = vst [vmem:[#allocation1 + $0x5] ss:$9 sm:$0xff] %v375_v34  ;;  %v418_v34 = vld [vmem:[%s11269_s19 + $0xc6] sm:$0x1] }
 0x107   : > { %911 = vst [vmem:[#allocation1 + $0x6] ss:$9 sm:$0xff] %v376_v35  ;;  %v419_v35 = vld [vmem:[%s11269_s19 + $0xc7] sm:$0x1] }
 0x108   : > { %912 = vst [vmem:[#allocation1 + $0x7] ss:$9 sm:$0xff] %v377_v36  ;;  %v420_v36 = vld [vmem:[%s11269_s19 + $0xc8] sm:$0x1] }
 0x109   : > { %1097 = vst.msk [vmem:[#allocation2 + $0x78] sm:$0xff] %vm1081_vm0, %v11432_v30  ;;  %v9416_v30 = vld [vmem:[%s11269_s19 + $0x6e] sm:$0x1] }
 0x10f   : > { %v11442_v42 = vld [vmem:[#allocation1] sm:$0xff] }
 0x110   : > { %914 = vst [vmem:[#allocation1] ss:$9 sm:$0xff] %v378_v37 }
 0x111   : > { %915 = vst [vmem:[#allocation1 + $0x1] ss:$9 sm:$0xff] %v379_v39  ;;  %v421_v39 = vld [vmem:[%s11269_s19 + $0xc9] sm:$0x1] }
 0x112   : > { %916 = vst [vmem:[#allocation1 + $0x2] ss:$9 sm:$0xff] %v380_v40  ;;  %v422_v40 = vld [vmem:[%s11269_s19 + $0xca] sm:$0x1] }
 0x113   : > { %917 = vst [vmem:[#allocation1 + $0x3] ss:$9 sm:$0xff] %v381_v43  ;;  %v423_v43 = vld [vmem:[%s11269_s19 + $0xcb] sm:$0x1] }
 0x114   : > { %918 = vst [vmem:[#allocation1 + $0x4] ss:$9 sm:$0xff] %v382_v44  ;;  %v424_v44 = vld [vmem:[%s11269_s19 + $0xcc] sm:$0x1] }
 0x115   : > { %919 = vst [vmem:[#allocation1 + $0x5] ss:$9 sm:$0xff] %v383_v45  ;;  %v425_v45 = vld [vmem:[%s11269_s19 + $0xcd] sm:$0x1] }
 0x116   : > { %920 = vst [vmem:[#allocation1 + $0x6] ss:$9 sm:$0xff] %v384_v46  ;;  %v426_v46 = vld [vmem:[%s11269_s19 + $0xce] sm:$0x1] }
 0x117   : > { %921 = vst [vmem:[#allocation1 + $0x7] ss:$9 sm:$0xff] %v385_v48  ;;  %v427_v48 = vld [vmem:[%s11269_s19 + $0xcf] sm:$0x1] }
 0x118   : > { %1098 = vst.msk [vmem:[#allocation2 + $0x80] sm:$0xff] %vm1081_vm0, %v11442_v42  ;;  %v9417_v42 = vld [vmem:[%s11269_s19 + $0x6f] sm:$0x1] }
 0x11e   : > { %v11452_v53 = vld [vmem:[#allocation1] sm:$0xff] }
 0x11f   : > { %923 = vst [vmem:[#allocation1] ss:$9 sm:$0xff] %v386_v49  ;;  %v428_v49 = vld [vmem:[%s11269_s19 + $0xd0] sm:$0x1] }
 0x120   : > { %924 = vst [vmem:[#allocation1 + $0x1] ss:$9 sm:$0xff] %v387_v50 }
 0x121   : > { %925 = vst [vmem:[#allocation1 + $0x2] ss:$9 sm:$0xff] %v388_v52  ;;  %v429_v52 = vld [vmem:[%s11269_s19 + $0xd1] sm:$0x1] }
 0x122   : > { %926 = vst [vmem:[#allocation1 + $0x3] ss:$9 sm:$0xff] %v389_v54  ;;  %v430_v54 = vld [vmem:[%s11269_s19 + $0xd2] sm:$0x1] }
 0x123   : > { %927 = vst [vmem:[#allocation1 + $0x4] ss:$9 sm:$0xff] %v390_v55  ;;  %v431_v55 = vld [vmem:[%s11269_s19 + $0xd3] sm:$0x1] }
 0x124   : > { %928 = vst [vmem:[#allocation1 + $0x5] ss:$9 sm:$0xff] %v391_v57  ;;  %v432_v57 = vld [vmem:[%s11269_s19 + $0xd4] sm:$0x1] }
 0x125   : > { %929 = vst [vmem:[#allocation1 + $0x6] ss:$9 sm:$0xff] %v392_v58  ;;  %v433_v58 = vld [vmem:[%s11269_s19 + $0xd5] sm:$0x1] }
 0x126   : > { %930 = vst [vmem:[#allocation1 + $0x7] ss:$9 sm:$0xff] %v393_v59  ;;  %v434_v59 = vld [vmem:[%s11269_s19 + $0xd8] sm:$0x1] }
 0x127   : > { %1099 = vst.msk [vmem:[#allocation2 + $0x88] sm:$0xff] %vm1081_vm0, %v11452_v53 }
 0x12d   : > { %v11462_v0 = vld [vmem:[#allocation1] sm:$0xff] }
 0x12e   : > { %932 = vst [vmem:[#allocation1] ss:$9 sm:$0xff] %v394_v60  ;;  %v435_v60 = vld [vmem:[%s11269_s19 + $0xd9] sm:$0x1] }
 0x12f   : > { %933 = vst [vmem:[#allocation1 + $0x1] ss:$9 sm:$0xff] %v395_v62  ;;  %v436_v62 = vld [vmem:[%s11269_s19 + $0xda] sm:$0x1] }
 0x130   : > { %934 = vst [vmem:[#allocation1 + $0x2] ss:$9 sm:$0xff] %v396_v63 }
 0x131   : > { %935 = vst [vmem:[#allocation1 + $0x3] ss:$9 sm:$0xff] %v397_v2  ;;  %v437_v2 = vld [vmem:[%s11269_s19 + $0xdb] sm:$0x1] }
 0x132   : > { %936 = vst [vmem:[#allocation1 + $0x4] ss:$9 sm:$0xff] %v398_v3  ;;  %v438_v3 = vld [vmem:[%s11269_s19 + $0xdc] sm:$0x1] }
 0x133   : > { %937 = vst [vmem:[#allocation1 + $0x5] ss:$9 sm:$0xff] %v399_v4  ;;  %v439_v4 = vld [vmem:[%s11269_s19 + $0xdd] sm:$0x1] }
 0x134   : > { %938 = vst [vmem:[#allocation1 + $0x6] ss:$9 sm:$0xff] %v400_v5  ;;  %v440_v5 = vld [vmem:[%s11269_s19 + $0xde] sm:$0x1] }
 0x135   : > { %939 = vst [vmem:[#allocation1 + $0x7] ss:$9 sm:$0xff] %v401_v6  ;;  %v441_v6 = vld [vmem:[%s11269_s19 + $0xdf] sm:$0x1] }
 0x136   : > { %1100 = vst.msk [vmem:[#allocation2 + $0x90] sm:$0xff] %vm1081_vm0, %v11462_v0  ;;  %v9418_v0 = vld [vmem:[%s11269_s19 + $0x70] sm:$0x1] }
 0x13c   : > { %v11472_v13 = vld [vmem:[#allocation1] sm:$0xff] }
 0x13d   : > { %941 = vst [vmem:[#allocation1] ss:$9 sm:$0xff] %v402_v8  ;;  %v442_v8 = vld [vmem:[%s11269_s19 + $0xe0] sm:$0x1] }
 0x13e   : > { %942 = vst [vmem:[#allocation1 + $0x1] ss:$9 sm:$0xff] %v403_v9  ;;  %v443_v9 = vld [vmem:[%s11269_s19 + $0xe1] sm:$0x1] }
 0x13f   : > { %943 = vst [vmem:[#allocation1 + $0x2] ss:$9 sm:$0xff] %v404_v12  ;;  %v444_v12 = vld [vmem:[%s11269_s19 + $0xe2] sm:$0x1] }
 0x140   : > { %944 = vst [vmem:[#allocation1 + $0x3] ss:$9 sm:$0xff] %v405_v14 }
 0x141   : > { %945 = vst [vmem:[#allocation1 + $0x4] ss:$9 sm:$0xff] %v406_v15  ;;  %v445_v15 = vld [vmem:[%s11269_s19 + $0xe3] sm:$0x1] }
 0x142   : > { %946 = vst [vmem:[#allocation1 + $0x5] ss:$9 sm:$0xff] %v407_v16  ;;  %v446_v16 = vld [vmem:[%s11269_s19 + $0xe4] sm:$0x1] }
 0x143   : > { %947 = vst [vmem:[#allocation1 + $0x6] ss:$9 sm:$0xff] %v408_v17  ;;  %v447_v17 = vld [vmem:[%s11269_s19 + $0xe5] sm:$0x1] }
 0x144   : > { %948 = vst [vmem:[#allocation1 + $0x7] ss:$9 sm:$0xff] %v409_v19  ;;  %v448_v19 = vld [vmem:[%s11269_s19 + $0xe6] sm:$0x1] }
 0x145   : > { %1101 = vst.msk [vmem:[#allocation2 + $0x98] sm:$0xff] %vm1081_vm0, %v11472_v13 }
 0x14b   : > { %v11482_v25 = vld [vmem:[#allocation1] sm:$0xff] }
 0x14c   : > { %950 = vst [vmem:[#allocation1] ss:$9 sm:$0xff] %v410_v22  ;;  %v449_v22 = vld [vmem:[%s11269_s19 + $0xe7] sm:$0x1] }
 0x14d   : > { %951 = vst [vmem:[#allocation1 + $0x1] ss:$9 sm:$0xff] %v411_v23  ;;  %v450_v23 = vld [vmem:[%s11269_s19 + $0xea] sm:$0x1] }
 0x14e   : > { %952 = vst [vmem:[#allocation1 + $0x2] ss:$9 sm:$0xff] %v412_v24  ;;  %v451_v24 = vld [vmem:[%s11269_s19 + $0xeb] sm:$0x1] }
 0x14f   : > { %953 = vst [vmem:[#allocation1 + $0x3] ss:$9 sm:$0xff] %v413_v26  ;;  %v452_v26 = vld [vmem:[%s11269_s19 + $0xec] sm:$0x1] }
 0x150   : > { %954 = vst [vmem:[#allocation1 + $0x4] ss:$9 sm:$0xff] %v414_v27 }
 0x151   : > { %955 = vst [vmem:[#allocation1 + $0x5] ss:$9 sm:$0xff] %v415_v28  ;;  %v453_v28 = vld [vmem:[%s11269_s19 + $0xed] sm:$0x1] }
 0x152   : > { %956 = vst [vmem:[#allocation1 + $0x6] ss:$9 sm:$0xff] %v416_v32  ;;  %v454_v32 = vld [vmem:[%s11269_s19 + $0xee] sm:$0x1] }
 0x153   : > { %957 = vst [vmem:[#allocation1 + $0x7] ss:$9 sm:$0xff] %v417_v33  ;;  %v455_v33 = vld [vmem:[%s11269_s19 + $0xef] sm:$0x1] }
 0x154   : > { %1102 = vst.msk [vmem:[#allocation2 + $0xa0] sm:$0xff] %vm1081_vm0, %v11482_v25  ;;  %v9419_v25 = vld [vmem:[%s11269_s19 + $0x71] sm:$0x1] }
 0x15a   : > { %v11492_v37 = vld [vmem:[#allocation1] sm:$0xff] }
 0x15b   : > { %959 = vst [vmem:[#allocation1] ss:$9 sm:$0xff] %v418_v34  ;;  %v456_v34 = vld [vmem:[%s11269_s19 + $0xf0] sm:$0x1] }
 0x15c   : > { %960 = vst [vmem:[#allocation1 + $0x1] ss:$9 sm:$0xff] %v419_v35  ;;  %v457_v35 = vld [vmem:[%s11269_s19 + $0xf1] sm:$0x1] }
 0x15d   : > { %961 = vst [vmem:[#allocation1 + $0x2] ss:$9 sm:$0xff] %v420_v36  ;;  %v458_v36 = vld [vmem:[%s11269_s19 + $0xf2] sm:$0x1] }
 0x15e   : > { %962 = vst [vmem:[#allocation1 + $0x3] ss:$9 sm:$0xff] %v421_v39  ;;  %v459_v39 = vld [vmem:[%s11269_s19 + $0xf3] sm:$0x1] }
 0x15f   : > { %963 = vst [vmem:[#allocation1 + $0x4] ss:$9 sm:$0xff] %v422_v40  ;;  %v460_v40 = vld [vmem:[%s11269_s19 + $0xf4] sm:$0x1] }
 0x160   : > { %964 = vst [vmem:[#allocation1 + $0x5] ss:$9 sm:$0xff] %v423_v43 }
 0x161   : > { %965 = vst [vmem:[#allocation1 + $0x6] ss:$9 sm:$0xff] %v424_v44  ;;  %v461_v44 = vld [vmem:[%s11269_s19 + $0xf5] sm:$0x1] }
 0x162   : > { %966 = vst [vmem:[#allocation1 + $0x7] ss:$9 sm:$0xff] %v425_v45  ;;  %v462_v45 = vld [vmem:[%s11269_s19 + $0xf6] sm:$0x1] }
 0x163   : > { %1103 = vst.msk [vmem:[#allocation2 + $0xa8] sm:$0xff] %vm1081_vm0, %v11492_v37  ;;  %v9420_v37 = vld [vmem:[%s11269_s19 + $0x72] sm:$0x1] }
 0x169   : > { %v11502_v50 = vld [vmem:[#allocation1] sm:$0xff] }
 0x16a   : > { %968 = vst [vmem:[#allocation1] ss:$9 sm:$0xff] %v426_v46  ;;  %v463_v46 = vld [vmem:[%s11269_s19 + $0xf7] sm:$0x1] }
 0x16b   : > { %969 = vst [vmem:[#allocation1 + $0x1] ss:$9 sm:$0xff] %v427_v48  ;;  %v464_v48 = vld [vmem:[%s11269_s19 + $0xf8] sm:$0x1] }
 0x16c   : > { %970 = vst [vmem:[#allocation1 + $0x2] ss:$9 sm:$0xff] %v428_v49  ;;  %v465_v49 = vld [vmem:[%s11269_s19 + $0xf9] sm:$0x1] }
 0x16d   : > { %971 = vst [vmem:[#allocation1 + $0x3] ss:$9 sm:$0xff] %v429_v52  ;;  %v466_v52 = vld [vmem:[%s11269_s19 + $0xfc] sm:$0x1] }
 0x16e   : > { %972 = vst [vmem:[#allocation1 + $0x4] ss:$9 sm:$0xff] %v430_v54  ;;  %v467_v54 = vld [vmem:[%s11269_s19 + $0xfd] sm:$0x1] }
 0x16f   : > { %973 = vst [vmem:[#allocation1 + $0x5] ss:$9 sm:$0xff] %v431_v55  ;;  %v468_v55 = vld [vmem:[%s11269_s19 + $0xfe] sm:$0x1] }
 0x170   : > { %974 = vst [vmem:[#allocation1 + $0x6] ss:$9 sm:$0xff] %v432_v57 }
 0x171   : > { %975 = vst [vmem:[#allocation1 + $0x7] ss:$9 sm:$0xff] %v433_v58  ;;  %v469_v58 = vld [vmem:[%s11269_s19 + $0xff] sm:$0x1] }
 0x172   : > { %1104 = vst.msk [vmem:[#allocation2 + $0xb0] sm:$0xff] %vm1081_vm0, %v11502_v50  ;;  %v9421_v50 = vld [vmem:[%s11269_s19 + $0x73] sm:$0x1] }
 0x178   : > { %v11512_v63 = vld [vmem:[#allocation1] sm:$0xff] }
 0x179   : > { %977 = vst [vmem:[#allocation1] ss:$9 sm:$0xff] %v434_v59  ;;  %v470_v59 = vld [vmem:[%s11269_s19 + $0x100] sm:$0x1] }
 0x17a   : > { %978 = vst [vmem:[#allocation1 + $0x1] ss:$9 sm:$0xff] %v435_v60  ;;  %v471_v60 = vld [vmem:[%s11269_s19 + $0x101] sm:$0x1] }
 0x17b   : > { %979 = vst [vmem:[#allocation1 + $0x2] ss:$9 sm:$0xff] %v436_v62  ;;  %v472_v62 = vld [vmem:[%s11269_s19 + $0x102] sm:$0x1] }
 0x17c   : > { %980 = vst [vmem:[#allocation1 + $0x3] ss:$9 sm:$0xff] %v437_v2  ;;  %v473_v2 = vld [vmem:[%s11269_s19 + $0x103] sm:$0x1] }
 0x17d   : > { %981 = vst [vmem:[#allocation1 + $0x4] ss:$9 sm:$0xff] %v438_v3  ;;  %v474_v3 = vld [vmem:[%s11269_s19 + $0x104] sm:$0x1] }
 0x17e   : > { %982 = vst [vmem:[#allocation1 + $0x5] ss:$9 sm:$0xff] %v439_v4  ;;  %v475_v4 = vld [vmem:[%s11269_s19 + $0x105] sm:$0x1] }
 0x17f   : > { %983 = vst [vmem:[#allocation1 + $0x6] ss:$9 sm:$0xff] %v440_v5  ;;  %v476_v5 = vld [vmem:[%s11269_s19 + $0x106] sm:$0x1] }
 0x180   : > { %984 = vst [vmem:[#allocation1 + $0x7] ss:$9 sm:$0xff] %v441_v6 }
 0x181   : > { %1105 = vst.msk [vmem:[#allocation2 + $0xb8] sm:$0xff] %vm1081_vm0, %v11512_v63  ;;  %v9422_v63 = vld [vmem:[%s11269_s19 + $0x74] sm:$0x1] }
 0x187   : > { %v11522_v14 = vld [vmem:[#allocation1] sm:$0xff] }
 0x188   : > { %986 = vst [vmem:[#allocation1] ss:$9 sm:$0xff] %v442_v8  ;;  %v477_v8 = vld [vmem:[%s11269_s19 + $0x107] sm:$0x1] }
 0x189   : > { %987 = vst [vmem:[#allocation1 + $0x1] ss:$9 sm:$0xff] %v443_v9  ;;  %v478_v9 = vld [vmem:[%s11269_s19 + $0x108] sm:$0x1] }
 0x18a   : > { %988 = vst [vmem:[#allocation1 + $0x2] ss:$9 sm:$0xff] %v444_v12  ;;  %v479_v12 = vld [vmem:[%s11269_s19 + $0x109] sm:$0x1] }
 0x18b   : > { %989 = vst [vmem:[#allocation1 + $0x3] ss:$9 sm:$0xff] %v445_v15  ;;  %v480_v15 = vld [vmem:[%s11269_s19 + $0x10a] sm:$0x1] }
 0x18c   : > { %990 = vst [vmem:[#allocation1 + $0x4] ss:$9 sm:$0xff] %v446_v16  ;;  %v481_v16 = vld [vmem:[%s11269_s19 + $0x10b] sm:$0x1] }
 0x18d   : > { %991 = vst [vmem:[#allocation1 + $0x5] ss:$9 sm:$0xff] %v447_v17  ;;  %v482_v17 = vld [vmem:[%s11269_s19 + $0x10e] sm:$0x1] }
 0x18e   : > { %992 = vst [vmem:[#allocation1 + $0x6] ss:$9 sm:$0xff] %v448_v19  ;;  %v483_v19 = vld [vmem:[%s11269_s19 + $0x10f] sm:$0x1] }
 0x18f   : > { %993 = vst [vmem:[#allocation1 + $0x7] ss:$9 sm:$0xff] %v449_v22  ;;  %v484_v22 = vld [vmem:[%s11269_s19 + $0x110] sm:$0x1] }
 0x190   : > { %1106 = vst.msk [vmem:[#allocation2 + $0xc0] sm:$0xff] %vm1081_vm0, %v11522_v14  ;;  %v9423_v14 = vld [vmem:[%s11269_s19 + $0x75] sm:$0x1] }
 0x196   : > { %v11532_v27 = vld [vmem:[#allocation1] sm:$0xff] }
 0x197   : > { %995 = vst [vmem:[#allocation1] ss:$9 sm:$0xff] %v450_v23 }
 0x198   : > { %996 = vst [vmem:[#allocation1 + $0x1] ss:$9 sm:$0xff] %v451_v24  ;;  %v485_v24 = vld [vmem:[%s11269_s19 + $0x111] sm:$0x1] }
 0x199   : > { %997 = vst [vmem:[#allocation1 + $0x2] ss:$9 sm:$0xff] %v452_v26  ;;  %v486_v26 = vld [vmem:[%s11269_s19 + $0x112] sm:$0x1] }
 0x19a   : > { %998 = vst [vmem:[#allocation1 + $0x3] ss:$9 sm:$0xff] %v453_v28  ;;  %v487_v28 = vld [vmem:[%s11269_s19 + $0x113] sm:$0x1] }
 0x19b   : > { %999 = vst [vmem:[#allocation1 + $0x4] ss:$9 sm:$0xff] %v454_v32  ;;  %v488_v32 = vld [vmem:[%s11269_s19 + $0x114] sm:$0x1] }
 0x19c   : > { %1000 = vst [vmem:[#allocation1 + $0x5] ss:$9 sm:$0xff] %v455_v33  ;;  %v489_v33 = vld [vmem:[%s11269_s19 + $0x115] sm:$0x1] }
 0x19d   : > { %1001 = vst [vmem:[#allocation1 + $0x6] ss:$9 sm:$0xff] %v456_v34  ;;  %v490_v34 = vld [vmem:[%s11269_s19 + $0x116] sm:$0x1] }
 0x19e   : > { %1002 = vst [vmem:[#allocation1 + $0x7] ss:$9 sm:$0xff] %v457_v35  ;;  %v491_v35 = vld [vmem:[%s11269_s19 + $0x117] sm:$0x1] }
 0x19f   : > { %1107 = vst.msk [vmem:[#allocation2 + $0xc8] sm:$0xff] %vm1081_vm0, %v11532_v27 }
 0x1a5   : > { %v11542_v43 = vld [vmem:[#allocation1] sm:$0xff] }
 0x1a6   : > { %1004 = vst [vmem:[#allocation1] ss:$9 sm:$0xff] %v458_v36  ;;  %v492_v36 = vld [vmem:[%s11269_s19 + $0x118] sm:$0x1] }
 0x1a7   : > { %1005 = vst [vmem:[#allocation1 + $0x1] ss:$9 sm:$0xff] %v459_v39 }
 0x1a8   : > { %1006 = vst [vmem:[#allocation1 + $0x2] ss:$9 sm:$0xff] %v460_v40  ;;  %v493_v40 = vld [vmem:[%s11269_s19 + $0x119] sm:$0x1] }
 0x1a9   : > { %1007 = vst [vmem:[#allocation1 + $0x3] ss:$9 sm:$0xff] %v461_v44  ;;  %v494_v44 = vld [vmem:[%s11269_s19 + $0x11a] sm:$0x1] }
 0x1aa   : > { %1008 = vst [vmem:[#allocation1 + $0x4] ss:$9 sm:$0xff] %v462_v45  ;;  %v495_v45 = vld [vmem:[%s11269_s19 + $0x11b] sm:$0x1] }
 0x1ab   : > { %1009 = vst [vmem:[#allocation1 + $0x5] ss:$9 sm:$0xff] %v463_v46  ;;  %v496_v46 = vld [vmem:[%s11269_s19 + $0x11c] sm:$0x1] }
 0x1ac   : > { %1010 = vst [vmem:[#allocation1 + $0x6] ss:$9 sm:$0xff] %v464_v48  ;;  %v497_v48 = vld [vmem:[%s11269_s19 + $0x11d] sm:$0x1] }
 0x1ad   : > { %1011 = vst [vmem:[#allocation1 + $0x7] ss:$9 sm:$0xff] %v465_v49  ;;  %v9064_v49 = vld [vmem:[%s11269_s19 + $0x1] sm:$0x1] }
 0x1ae   : > { %1108 = vst.msk [vmem:[#allocation2 + $0xd0] sm:$0xff] %vm1081_vm0, %v11542_v43  ;;  %v9424_v43 = vld [vmem:[%s11269_s19 + $0x76] sm:$0x1] }
 0x1b4   : > { %v11552_v57 = vld [vmem:[#allocation1] sm:$0xff] }
 0x1b5   : > { %1013 = vst [vmem:[#allocation1] ss:$9 sm:$0xff] %v466_v52  ;;  %v9065_v52 = vld [vmem:[%s11269_s19 + $0x2] sm:$0x1] }
 0x1b6   : > { %1014 = vst [vmem:[#allocation1 + $0x1] ss:$9 sm:$0xff] %v467_v54 }
 0x1b7   : > { %1015 = vst [vmem:[#allocation1 + $0x2] ss:$9 sm:$0xff] %v468_v55  ;;  %v9066_v55 = vld [vmem:[%s11269_s19 + $0x3] sm:$0x1] }
 0x1b8   : > { %1016 = vst [vmem:[#allocation1 + $0x3] ss:$9 sm:$0xff] %v469_v58  ;;  %v9067_v58 = vld [vmem:[%s11269_s19 + $0x4] sm:$0x1] }
 0x1b9   : > { %1017 = vst [vmem:[#allocation1 + $0x4] ss:$9 sm:$0xff] %v470_v59  ;;  %v9068_v59 = vld [vmem:[%s11269_s19 + $0x5] sm:$0x1] }
 0x1ba   : > { %1018 = vst [vmem:[#allocation1 + $0x5] ss:$9 sm:$0xff] %v471_v60  ;;  %v9069_v60 = vld [vmem:[%s11269_s19 + $0x6] sm:$0x1] }
 0x1bb   : > { %1019 = vst [vmem:[#allocation1 + $0x6] ss:$9 sm:$0xff] %v472_v62  ;;  %v9070_v62 = vld [vmem:[%s11269_s19 + $0x7] sm:$0x1] }
 0x1bc   : > { %1020 = vst [vmem:[#allocation1 + $0x7] ss:$9 sm:$0xff] %v473_v2  ;;  %v9071_v2 = vld [vmem:[%s11269_s19 + $0x8] sm:$0x1] }
 0x1bd   : > { %1109 = vst.msk [vmem:[#allocation2 + $0xd8] sm:$0xff] %vm1081_vm0, %v11552_v57  ;;  %v9425_v57 = vld [vmem:[%s11269_s19 + $0x77] sm:$0x1] }
 0x1c3   : > { %v11562_v6 = vld [vmem:[#allocation1] sm:$0xff] }
 0x1c4   : > { %1022 = vst [vmem:[#allocation1] ss:$9 sm:$0xff] %v474_v3  ;;  %v9072_v3 = vld [vmem:[%s11269_s19 + $0x9] sm:$0x1] }
 0x1c5   : > { %1023 = vst [vmem:[#allocation1 + $0x1] ss:$9 sm:$0xff] %v475_v4  ;;  %v9073_v4 = vld [vmem:[%s11269_s19 + $0xa] sm:$0x1] }
 0x1c6   : > { %1024 = vst [vmem:[#allocation1 + $0x2] ss:$9 sm:$0xff] %v476_v5 }
 0x1c7   : > { %1025 = vst [vmem:[#allocation1 + $0x3] ss:$9 sm:$0xff] %v477_v8  ;;  %v9074_v8 = vld [vmem:[%s11269_s19 + $0xb] sm:$0x1] }
 0x1c8   : > { %1026 = vst [vmem:[#allocation1 + $0x4] ss:$9 sm:$0xff] %v478_v9  ;;  %v9075_v9 = vld [vmem:[%s11269_s19 + $0xc] sm:$0x1] }
 0x1c9   : > { %1027 = vst [vmem:[#allocation1 + $0x5] ss:$9 sm:$0xff] %v479_v12  ;;  %v9076_v12 = vld [vmem:[%s11269_s19 + $0xd] sm:$0x1] }
 0x1ca   : > { %1028 = vst [vmem:[#allocation1 + $0x6] ss:$9 sm:$0xff] %v480_v15  ;;  %v9077_v15 = vld [vmem:[%s11269_s19 + $0xe] sm:$0x1] }
 0x1cb   : > { %1029 = vst [vmem:[#allocation1 + $0x7] ss:$9 sm:$0xff] %v481_v16  ;;  %v9078_v16 = vld [vmem:[%s11269_s19 + $0xf] sm:$0x1] }
 0x1cc   : > { %1110 = vst.msk [vmem:[#allocation2 + $0xe0] sm:$0xff] %vm1081_vm0, %v11562_v6  ;;  %v9426_v6 = vld [vmem:[%s11269_s19 + $0x78] sm:$0x1] }
 0x1d2   : > { %v11572_v23 = vld [vmem:[#allocation1] sm:$0xff] }
 0x1d3   : > { %1031 = vst [vmem:[#allocation1] ss:$9 sm:$0xff] %v482_v17  ;;  %v9079_v17 = vld [vmem:[%s11269_s19 + $0x10] sm:$0x1] }
 0x1d4   : > { %1032 = vst [vmem:[#allocation1 + $0x1] ss:$9 sm:$0xff] %v483_v19  ;;  %v9080_v19 = vld [vmem:[%s11269_s19 + $0x13] sm:$0x1] }
 0x1d5   : > { %1033 = vst [vmem:[#allocation1 + $0x2] ss:$9 sm:$0xff] %v484_v22  ;;  %v9081_v22 = vld [vmem:[%s11269_s19 + $0x14] sm:$0x1] }
 0x1d6   : > { %1034 = vst [vmem:[#allocation1 + $0x3] ss:$9 sm:$0xff] %v485_v24 }
 0x1d7   : > { %1035 = vst [vmem:[#allocation1 + $0x4] ss:$9 sm:$0xff] %v486_v26  ;;  %v9082_v26 = vld [vmem:[%s11269_s19 + $0x15] sm:$0x1] }
 0x1d8   : > { %1036 = vst [vmem:[#allocation1 + $0x5] ss:$9 sm:$0xff] %v487_v28  ;;  %v9083_v28 = vld [vmem:[%s11269_s19 + $0x16] sm:$0x1] }
 0x1d9   : > { %1037 = vst [vmem:[#allocation1 + $0x6] ss:$9 sm:$0xff] %v488_v32  ;;  %v9084_v32 = vld [vmem:[%s11269_s19 + $0x17] sm:$0x1] }
 0x1da   : > { %1038 = vst [vmem:[#allocation1 + $0x7] ss:$9 sm:$0xff] %v489_v33  ;;  %v9085_v33 = vld [vmem:[%s11269_s19 + $0x18] sm:$0x1] }
 0x1db   : > { %1111 = vst.msk [vmem:[#allocation2 + $0xe8] sm:$0xff] %vm1081_vm0, %v11572_v23 }
 0x1e1   : > { %v11582_v39 = vld [vmem:[#allocation1] sm:$0xff] }
 0x1e2   : > { %1040 = vst [vmem:[#allocation1] ss:$9 sm:$0xff] %v490_v34  ;;  %v9086_v34 = vld [vmem:[%s11269_s19 + $0x19] sm:$0x1] }
 0x1e3   : > { %1041 = vst [vmem:[#allocation1 + $0x1] ss:$9 sm:$0xff] %v491_v35  ;;  %v9087_v35 = vld [vmem:[%s11269_s19 + $0x1a] sm:$0x1] }
 0x1e4   : > { %1042 = vst [vmem:[#allocation1 + $0x2] ss:$9 sm:$0xff] %v492_v36  ;;  %v9088_v36 = vld [vmem:[%s11269_s19 + $0x1b] sm:$0x1] }
 0x1e5   : > { %1043 = vst [vmem:[#allocation1 + $0x3] ss:$9 sm:$0xff] %v493_v40  ;;  %v9089_v40 = vld [vmem:[%s11269_s19 + $0x1c] sm:$0x1] }
 0x1e6   : > { %1044 = vst [vmem:[#allocation1 + $0x4] ss:$9 sm:$0xff] %v494_v44  ;;  %v9090_v44 = vld [vmem:[%s11269_s19 + $0x1d] sm:$0x1] }
 0x1e7   : > { %1045 = vst [vmem:[#allocation1 + $0x5] ss:$9 sm:$0xff] %v495_v45 }
 0x1e8   : > { %1046 = vst [vmem:[#allocation1 + $0x6] ss:$9 sm:$0xff] %v496_v46  ;;  %v9091_v46 = vld [vmem:[%s11269_s19 + $0x1e] sm:$0x1] }
 0x1e9   : > { %1047 = vst [vmem:[#allocation1 + $0x7] ss:$9 sm:$0xff] %v497_v48  ;;  %v9092_v48 = vld [vmem:[%s11269_s19 + $0x1f] sm:$0x1] }
 0x1ea   : > { %1112 = vst.msk [vmem:[#allocation2 + $0xf0] sm:$0xff] %vm1081_vm0, %v11582_v39  ;;  %v9427_v39 = vld [vmem:[%s11269_s19 + $0x79] sm:$0x1] }
 0x1f0   : > { %v11591_v54 = vld [vmem:[#allocation1] sm:$0xff] }
 0x1f1   : > { %1628 = vst [vmem:[#allocation1] ss:$9 sm:$0xff] %v9064_v49  ;;  %v9093_v49 = vld [vmem:[%s11269_s19 + $0x20] sm:$0x1] }
 0x1f2   : > { %1630 = vst [vmem:[#allocation1 + $0x1] ss:$9 sm:$0xff] %v9065_v52  ;;  %v9094_v52 = vld [vmem:[%s11269_s19 + $0x21] sm:$0x1] }
 0x1f3   : > { %1632 = vst [vmem:[#allocation1 + $0x2] ss:$9 sm:$0xff] %v9066_v55  ;;  %v9095_v55 = vld [vmem:[%s11269_s19 + $0x22] sm:$0x1] }
 0x1f4   : > { %1634 = vst [vmem:[#allocation1 + $0x3] ss:$9 sm:$0xff] %v9067_v58  ;;  %v9096_v58 = vld [vmem:[%s11269_s19 + $0x25] sm:$0x1] }
 0x1f5   : > { %1636 = vst [vmem:[#allocation1 + $0x4] ss:$9 sm:$0xff] %v9068_v59  ;;  %v9097_v59 = vld [vmem:[%s11269_s19 + $0x26] sm:$0x1] }
 0x1f6   : > { %1638 = vst [vmem:[#allocation1 + $0x5] ss:$9 sm:$0xff] %v9069_v60  ;;  %v9098_v60 = vld [vmem:[%s11269_s19 + $0x27] sm:$0x1] }
 0x1f7   : > { %1640 = vst [vmem:[#allocation1 + $0x6] ss:$9 sm:$0xff] %v9070_v62 }
 0x1f8   : > { %1642 = vst [vmem:[#allocation1 + $0x7] ss:$9 sm:$0xff] %v9071_v2  ;;  %v9099_v2 = vld [vmem:[%s11269_s19 + $0x28] sm:$0x1] }
 0x1f9   : > { %1113 = vst.msk [vmem:[#allocation2 + $0xf8] sm:$0xff] %vm1081_vm0, %v11591_v54  ;;  %v9428_v54 = vld [vmem:[%s11269_s19 + $0x7a] sm:$0x1] }
 0x1ff   : > { %v1643_v5 = vld [vmem:[#allocation1] sm:$0xff] }
 0x200   : > { %1923 = vrot.lane.b32.xlu0 %v1643_v5, %s11217_s20  ;;  %1644 = vst [vmem:[#allocation1] ss:$9 sm:$0xff] %v9072_v3  ;;  %v9100_v3 = vld [vmem:[%s11269_s19 + $0x29] sm:$0x1]  ;;  %v9102_v5 = vld [vmem:[%s11269_s19 + $0x2b] sm:$0x1] }
 0x201   : > { %1645 = vst [vmem:[#allocation1 + $0x1] ss:$9 sm:$0xff] %v9073_v4  ;;  %v9101_v4 = vld [vmem:[%s11269_s19 + $0x2a] sm:$0x1] }
 0x202   : > { %1646 = vst [vmem:[#allocation1 + $0x2] ss:$9 sm:$0xff] %v9074_v8  ;;  %v9103_v8 = vld [vmem:[%s11269_s19 + $0x2c] sm:$0x1] }
 0x203   : > { %1647 = vst [vmem:[#allocation1 + $0x3] ss:$9 sm:$0xff] %v9075_v9  ;;  %v9104_v9 = vld [vmem:[%s11269_s19 + $0x2d] sm:$0x1] }
 0x204   : > { %1648 = vst [vmem:[#allocation1 + $0x4] ss:$9 sm:$0xff] %v9076_v12  ;;  %v9105_v12 = vld [vmem:[%s11269_s19 + $0x2e] sm:$0x1] }
 0x205   : > { %1649 = vst [vmem:[#allocation1 + $0x5] ss:$9 sm:$0xff] %v9077_v15  ;;  %v9106_v15 = vld [vmem:[%s11269_s19 + $0x2f] sm:$0x1] }
 0x206   : > { %1650 = vst [vmem:[#allocation1 + $0x6] ss:$9 sm:$0xff] %v9078_v16 }
 0x207   : > { %1651 = vst [vmem:[#allocation1 + $0x7] ss:$9 sm:$0xff] %v9079_v17  ;;  %v9107_v17 = vld [vmem:[%s11269_s19 + $0x30] sm:$0x1] }
 0x20e   : > { %v1652_v24 = vld [vmem:[#allocation1] sm:$0xff] }
 0x20f   : > { %1925 = vrot.lane.b32.xlu0 %v1652_v24, %s11217_s20  ;;  %1653 = vst [vmem:[#allocation1] ss:$9 sm:$0xff] %v9080_v19  ;;  %v9108_v19 = vld [vmem:[%s11269_s19 + $0x31] sm:$0x1]  ;;  %v9110_v24 = vld [vmem:[%s11269_s19 + $0x33] sm:$0x1] }
 0x210   : > { %1654 = vst [vmem:[#allocation1 + $0x1] ss:$9 sm:$0xff] %v9081_v22  ;;  %v9109_v22 = vld [vmem:[%s11269_s19 + $0x32] sm:$0x1] }
 0x211   : > { %1655 = vst [vmem:[#allocation1 + $0x2] ss:$9 sm:$0xff] %v9082_v26  ;;  %v9111_v26 = vld [vmem:[%s11269_s19 + $0x34] sm:$0x1] }
 0x212   : > { %1656 = vst [vmem:[#allocation1 + $0x3] ss:$9 sm:$0xff] %v9083_v28  ;;  %v9112_v28 = vld [vmem:[%s11269_s19 + $0x37] sm:$0x1] }
 0x213   : > { %1657 = vst [vmem:[#allocation1 + $0x4] ss:$9 sm:$0xff] %v9084_v32  ;;  %v9113_v32 = vld [vmem:[%s11269_s19 + $0x38] sm:$0x1] }
 0x214   : > { %1658 = vst [vmem:[#allocation1 + $0x5] ss:$9 sm:$0xff] %v9085_v33  ;;  %v9114_v33 = vld [vmem:[%s11269_s19 + $0x39] sm:$0x1] }
 0x215   : > { %1659 = vst [vmem:[#allocation1 + $0x6] ss:$9 sm:$0xff] %v9086_v34 }
 0x216   : > { %1660 = vst [vmem:[#allocation1 + $0x7] ss:$9 sm:$0xff] %v9087_v35  ;;  %v9115_v35 = vld [vmem:[%s11269_s19 + $0x3a] sm:$0x1] }
 0x21d   : > { %v1661_v45 = vld [vmem:[#allocation1] sm:$0xff] }
 0x21e   : > { %1662 = vst [vmem:[#allocation1] ss:$9 sm:$0xff] %v9088_v36  ;;  %1927 = vrot.lane.b32.xlu1 %v1661_v45, %s11217_s20  ;;  %v9116_v36 = vld [vmem:[%s11269_s19 + $0x3b] sm:$0x1]  ;;  %v9119_v45 = vld [vmem:[%s11269_s19 + $0x3e] sm:$0x1] }
 0x21f   : > { %1663 = vst [vmem:[#allocation1 + $0x1] ss:$9 sm:$0xff] %v9089_v40  ;;  %v9117_v40 = vld [vmem:[%s11269_s19 + $0x3c] sm:$0x1] }
 0x220   : > { %1664 = vst [vmem:[#allocation1 + $0x2] ss:$9 sm:$0xff] %v9090_v44  ;;  %v9118_v44 = vld [vmem:[%s11269_s19 + $0x3d] sm:$0x1] }
 0x221   : > { %1665 = vst [vmem:[#allocation1 + $0x3] ss:$9 sm:$0xff] %v9091_v46  ;;  %v9120_v46 = vld [vmem:[%s11269_s19 + $0x3f] sm:$0x1] }
 0x222   : > { %1666 = vst [vmem:[#allocation1 + $0x4] ss:$9 sm:$0xff] %v9092_v48  ;;  %v9121_v48 = vld [vmem:[%s11269_s19 + $0x40] sm:$0x1] }
 0x223   : > { %1667 = vst [vmem:[#allocation1 + $0x5] ss:$9 sm:$0xff] %v9093_v49 }
 0x224   : > { %1668 = vst [vmem:[#allocation1 + $0x6] ss:$9 sm:$0xff] %v9094_v52  ;;  %v9122_v52 = vld [vmem:[%s11269_s19 + $0x41] sm:$0x1] }
 0x225   : > { %1669 = vst [vmem:[#allocation1 + $0x7] ss:$9 sm:$0xff] %v9095_v55  ;;  %v9123_v55 = vld [vmem:[%s11269_s19 + $0x42] sm:$0x1] }
 0x22c   : > { %v1670_v62 = vld [vmem:[#allocation1] sm:$0xff] }
 0x22d   : > { %1671 = vst [vmem:[#allocation1] ss:$9 sm:$0xff] %v9096_v58  ;;  %1929 = vrot.lane.b32.xlu1 %v1670_v62, %s11217_s20  ;;  %v9124_v58 = vld [vmem:[%s11269_s19 + $0x43] sm:$0x1]  ;;  %v9127_v62 = vld [vmem:[%s11269_s19 + $0x46] sm:$0x1] }
 0x22e   : > { %1672 = vst [vmem:[#allocation1 + $0x1] ss:$9 sm:$0xff] %v9097_v59  ;;  %v9125_v59 = vld [vmem:[%s11269_s19 + $0x44] sm:$0x1] }
 0x22f   : > { %1673 = vst [vmem:[#allocation1 + $0x2] ss:$9 sm:$0xff] %v9098_v60  ;;  %v9126_v60 = vld [vmem:[%s11269_s19 + $0x45] sm:$0x1] }
 0x230   : > { %1674 = vst [vmem:[#allocation1 + $0x3] ss:$9 sm:$0xff] %v9099_v2  ;;  %v9128_v2 = vld [vmem:[%s11269_s19 + $0x49] sm:$0x1] }
 0x231   : > { %1675 = vst [vmem:[#allocation1 + $0x4] ss:$9 sm:$0xff] %v9100_v3  ;;  %v9129_v3 = vld [vmem:[%s11269_s19 + $0x4a] sm:$0x1] }
 0x232   : > { %1676 = vst [vmem:[#allocation1 + $0x5] ss:$9 sm:$0xff] %v9101_v4  ;;  %v9130_v4 = vld [vmem:[%s11269_s19 + $0x4b] sm:$0x1] }
 0x233   : > { %1677 = vst [vmem:[#allocation1 + $0x6] ss:$9 sm:$0xff] %v9102_v5 }
 0x234   : > { %1678 = vst [vmem:[#allocation1 + $0x7] ss:$9 sm:$0xff] %v9103_v8  ;;  %v9131_v8 = vld [vmem:[%s11269_s19 + $0x4c] sm:$0x1] }
 0x23b   : > { %v1679_v16 = vld [vmem:[#allocation1] sm:$0xff] }
 0x23c   : > { %1680 = vst [vmem:[#allocation1] ss:$9 sm:$0xff] %v9104_v9  ;;  %1931 = vrot.lane.b32.xlu2 %v1679_v16, %s11217_s20  ;;  %v9132_v9 = vld [vmem:[%s11269_s19 + $0x4d] sm:$0x1]  ;;  %v9135_v16 = vld [vmem:[%s11269_s19 + $0x50] sm:$0x1] }
 0x23d   : > { %1681 = vst [vmem:[#allocation1 + $0x1] ss:$9 sm:$0xff] %v9105_v12  ;;  %v9133_v12 = vld [vmem:[%s11269_s19 + $0x4e] sm:$0x1] }
 0x23e   : > { %1682 = vst [vmem:[#allocation1 + $0x2] ss:$9 sm:$0xff] %v9106_v15  ;;  %v9134_v15 = vld [vmem:[%s11269_s19 + $0x4f] sm:$0x1] }
 0x23f   : > { %1683 = vst [vmem:[#allocation1 + $0x3] ss:$9 sm:$0xff] %v9107_v17  ;;  %v9136_v17 = vld [vmem:[%s11269_s19 + $0x51] sm:$0x1] }
 0x240   : > { %1684 = vst [vmem:[#allocation1 + $0x4] ss:$9 sm:$0xff] %v9108_v19  ;;  %v9137_v19 = vld [vmem:[%s11269_s19 + $0x52] sm:$0x1] }
 0x241   : > { %1685 = vst [vmem:[#allocation1 + $0x5] ss:$9 sm:$0xff] %v9109_v22  ;;  %v9138_v22 = vld [vmem:[%s11269_s19 + $0x53] sm:$0x1] }
 0x242   : > { %1686 = vst [vmem:[#allocation1 + $0x6] ss:$9 sm:$0xff] %v9110_v24 }
 0x243   : > { %1687 = vst [vmem:[#allocation1 + $0x7] ss:$9 sm:$0xff] %v9111_v26  ;;  %v9139_v26 = vld [vmem:[%s11269_s19 + $0x54] sm:$0x1] }
 0x24a   : > { %v1688_v34 = vld [vmem:[#allocation1] sm:$0xff] }
 0x24b   : > { %1689 = vst [vmem:[#allocation1] ss:$9 sm:$0xff] %v9112_v28  ;;  %1933 = vrot.lane.b32.xlu2 %v1688_v34, %s11217_s20  ;;  %v9140_v28 = vld [vmem:[%s11269_s19 + $0x55] sm:$0x1]  ;;  %v9143_v34 = vld [vmem:[%s11269_s19 + $0x58] sm:$0x1] }
 0x24c   : > { %1690 = vst [vmem:[#allocation1 + $0x1] ss:$9 sm:$0xff] %v9113_v32  ;;  %v9141_v32 = vld [vmem:[%s11269_s19 + $0x56] sm:$0x1] }
 0x24d   : > { %1691 = vst [vmem:[#allocation1 + $0x2] ss:$9 sm:$0xff] %v9114_v33  ;;  %v9142_v33 = vld [vmem:[%s11269_s19 + $0x57] sm:$0x1] }
 0x24e   : > { %1692 = vst [vmem:[#allocation1 + $0x3] ss:$9 sm:$0xff] %v9115_v35  ;;  %v9144_v35 = vld [vmem:[%s11269_s19 + $0x5b] sm:$0x1] }
 0x24f   : > { %1693 = vst [vmem:[#allocation1 + $0x4] ss:$9 sm:$0xff] %v9116_v36  ;;  %v9145_v36 = vld [vmem:[%s11269_s19 + $0x5c] sm:$0x1] }
 0x250   : > { %1694 = vst [vmem:[#allocation1 + $0x5] ss:$9 sm:$0xff] %v9117_v40 }
 0x251   : > { %1695 = vst [vmem:[#allocation1 + $0x6] ss:$9 sm:$0xff] %v9118_v44  ;;  %v9146_v44 = vld [vmem:[%s11269_s19 + $0x5d] sm:$0x1] }
 0x252   : > { %1696 = vst [vmem:[#allocation1 + $0x7] ss:$9 sm:$0xff] %v9119_v45  ;;  %v9147_v45 = vld [vmem:[%s11269_s19 + $0x5e] sm:$0x1] }
 0x259   : > { %v1697_v49 = vld [vmem:[#allocation1] sm:$0xff] }
 0x25a   : > { %1935 = vrot.lane.b32.xlu0 %v1697_v49, %s11217_s20  ;;  %1698 = vst [vmem:[#allocation1] ss:$9 sm:$0xff] %v9120_v46  ;;  %v9148_v46 = vld [vmem:[%s11269_s19 + $0x5f] sm:$0x1]  ;;  %v9150_v49 = vld [vmem:[%s11269_s19 + $0x61] sm:$0x1] }
 0x25b   : > { %1699 = vst [vmem:[#allocation1 + $0x1] ss:$9 sm:$0xff] %v9121_v48  ;;  %v9149_v48 = vld [vmem:[%s11269_s19 + $0x60] sm:$0x1] }
 0x25c   : > { %1700 = vst [vmem:[#allocation1 + $0x2] ss:$9 sm:$0xff] %v9122_v52  ;;  %v9151_v52 = vld [vmem:[%s11269_s19 + $0x62] sm:$0x1] }
 0x25d   : > { %1701 = vst [vmem:[#allocation1 + $0x3] ss:$9 sm:$0xff] %v9123_v55  ;;  %v9152_v55 = vld [vmem:[%s11269_s19 + $0x63] sm:$0x1] }
 0x25e   : > { %1702 = vst [vmem:[#allocation1 + $0x4] ss:$9 sm:$0xff] %v9124_v58  ;;  %v9153_v58 = vld [vmem:[%s11269_s19 + $0x64] sm:$0x1] }
 0x25f   : > { %1703 = vst [vmem:[#allocation1 + $0x5] ss:$9 sm:$0xff] %v9125_v59  ;;  %v9154_v59 = vld [vmem:[%s11269_s19 + $0x65] sm:$0x1] }
 0x260   : > { %1704 = vst [vmem:[#allocation1 + $0x6] ss:$9 sm:$0xff] %v9126_v60 }
 0x261   : > { %1705 = vst [vmem:[#allocation1 + $0x7] ss:$9 sm:$0xff] %v9127_v62  ;;  %v9155_v62 = vld [vmem:[%s11269_s19 + $0x66] sm:$0x1] }
 0x268   : > { %v1706_v5 = vld [vmem:[#allocation1] sm:$0xff] }
 0x269   : > { %1707 = vst [vmem:[#allocation1] ss:$9 sm:$0xff] %v9128_v2  ;;  %1937 = vrot.lane.b32.xlu1 %v1706_v5, %s11217_s20  ;;  %v9156_v2 = vld [vmem:[%s11269_s19 + $0x67] sm:$0x1]  ;;  %v9159_v5 = vld [vmem:[%s11269_s19 + $0x6a] sm:$0x1] }
 0x26a   : > { %1708 = vst [vmem:[#allocation1 + $0x1] ss:$9 sm:$0xff] %v9129_v3  ;;  %v9157_v3 = vld [vmem:[%s11269_s19 + $0x68] sm:$0x1] }
 0x26b   : > { %1709 = vst [vmem:[#allocation1 + $0x2] ss:$9 sm:$0xff] %v9130_v4  ;;  %v9158_v4 = vld [vmem:[%s11269_s19 + $0x69] sm:$0x1] }
 0x26c   : > { %1710 = vst [vmem:[#allocation1 + $0x3] ss:$9 sm:$0xff] %v9131_v8  ;;  %v9160_v8 = vld [vmem:[%s11269_s19 + $0x6d] sm:$0x1] }
 0x26d   : > { %1711 = vst [vmem:[#allocation1 + $0x4] ss:$9 sm:$0xff] %v9132_v9  ;;  %v9161_v9 = vld [vmem:[%s11269_s19 + $0x6e] sm:$0x1] }
 0x26e   : > { %1712 = vst [vmem:[#allocation1 + $0x5] ss:$9 sm:$0xff] %v9133_v12  ;;  %v9162_v12 = vld [vmem:[%s11269_s19 + $0x6f] sm:$0x1] }
 0x26f   : > { %1713 = vst [vmem:[#allocation1 + $0x6] ss:$9 sm:$0xff] %v9134_v15 }
 0x270   : > { %1714 = vst [vmem:[#allocation1 + $0x7] ss:$9 sm:$0xff] %v9135_v16  ;;  %v9163_v16 = vld [vmem:[%s11269_s19 + $0x70] sm:$0x1] }
 0x272   : > { %v1924_v11 = vpop.permute.xlu0 %1923 }
 0x273   : > { %2020 = vst.msk [vmem:[#allocation2] sm:$0xff] %vm2019_vm1, %v1924_v11  ;;  %v9451_v11 = vld [vmem:[%s11269_s19 + $0x95] sm:$0x1] }
 0x277   : > { %v1715_v24 = vld [vmem:[#allocation1] sm:$0xff] }
 0x278   : > { %1716 = vst [vmem:[#allocation1] ss:$9 sm:$0xff] %v9136_v17  ;;  %1939 = vrot.lane.b32.xlu2 %v1715_v24, %s11217_s20  ;;  %v9164_v17 = vld [vmem:[%s11269_s19 + $0x71] sm:$0x1]  ;;  %v9167_v24 = vld [vmem:[%s11269_s19 + $0x74] sm:$0x1] }
 0x279   : > { %1717 = vst [vmem:[#allocation1 + $0x1] ss:$9 sm:$0xff] %v9137_v19  ;;  %v9165_v19 = vld [vmem:[%s11269_s19 + $0x72] sm:$0x1] }
 0x27a   : > { %1718 = vst [vmem:[#allocation1 + $0x2] ss:$9 sm:$0xff] %v9138_v22  ;;  %v9166_v22 = vld [vmem:[%s11269_s19 + $0x73] sm:$0x1] }
 0x27b   : > { %1719 = vst [vmem:[#allocation1 + $0x3] ss:$9 sm:$0xff] %v9139_v26  ;;  %v9168_v26 = vld [vmem:[%s11269_s19 + $0x75] sm:$0x1] }
 0x27c   : > { %1720 = vst [vmem:[#allocation1 + $0x4] ss:$9 sm:$0xff] %v9140_v28  ;;  %v9169_v28 = vld [vmem:[%s11269_s19 + $0x76] sm:$0x1] }
 0x27d   : > { %1721 = vst [vmem:[#allocation1 + $0x5] ss:$9 sm:$0xff] %v9141_v32 }
 0x27e   : > { %1722 = vst [vmem:[#allocation1 + $0x6] ss:$9 sm:$0xff] %v9142_v33  ;;  %v9170_v33 = vld [vmem:[%s11269_s19 + $0x77] sm:$0x1] }
 0x27f   : > { %1723 = vst [vmem:[#allocation1 + $0x7] ss:$9 sm:$0xff] %v9143_v34  ;;  %v9171_v34 = vld [vmem:[%s11269_s19 + $0x78] sm:$0x1] }
 0x281   : > { %v1926_v53 = vpop.permute.xlu0 %1925 }
 0x282   : > { %2021 = vst.msk [vmem:[#allocation2 + $0x8] sm:$0xff] %vm2019_vm1, %v1926_v53  ;;  %v9470_v53 = vld [vmem:[%s11269_s19 + $0xaa] sm:$0x1] }
 0x286   : > { %v1724_v40 = vld [vmem:[#allocation1] sm:$0xff] }
 0x287   : > { %1941 = vrot.lane.b32.xlu0 %v1724_v40, %s11217_s20  ;;  %1725 = vst [vmem:[#allocation1] ss:$9 sm:$0xff] %v9144_v35  ;;  %v9172_v35 = vld [vmem:[%s11269_s19 + $0x79] sm:$0x1]  ;;  %v9174_v40 = vld [vmem:[%s11269_s19 + $0x7b] sm:$0x1] }
 0x288   : > { %1726 = vst [vmem:[#allocation1 + $0x1] ss:$9 sm:$0xff] %v9145_v36  ;;  %v9173_v36 = vld [vmem:[%s11269_s19 + $0x7a] sm:$0x1] }
 0x289   : > { %1727 = vst [vmem:[#allocation1 + $0x2] ss:$9 sm:$0xff] %v9146_v44  ;;  %v9175_v44 = vld [vmem:[%s11269_s19 + $0x7c] sm:$0x1] }
 0x28a   : > { %1728 = vst [vmem:[#allocation1 + $0x3] ss:$9 sm:$0xff] %v9147_v45  ;;  %v9176_v45 = vld [vmem:[%s11269_s19 + $0x7f] sm:$0x1] }
 0x28b   : > { %1729 = vst [vmem:[#allocation1 + $0x4] ss:$9 sm:$0xff] %v9148_v46  ;;  %v9177_v46 = vld [vmem:[%s11269_s19 + $0x80] sm:$0x1] }
 0x28c   : > { %1730 = vst [vmem:[#allocation1 + $0x5] ss:$9 sm:$0xff] %v9149_v48  ;;  %v9178_v48 = vld [vmem:[%s11269_s19 + $0x81] sm:$0x1] }
 0x28d   : > { %1731 = vst [vmem:[#allocation1 + $0x6] ss:$9 sm:$0xff] %v9150_v49 }
 0x28e   : > { %1732 = vst [vmem:[#allocation1 + $0x7] ss:$9 sm:$0xff] %v9151_v52  ;;  %v9179_v52 = vld [vmem:[%s11269_s19 + $0x82] sm:$0x1] }
 0x295   : > { %v1733_v60 = vld [vmem:[#allocation1] sm:$0xff] }
 0x296   : > { %1734 = vst [vmem:[#allocation1] ss:$9 sm:$0xff] %v9152_v55  ;;  %1943 = vrot.lane.b32.xlu1 %v1733_v60, %s11217_s20  ;;  %v9180_v55 = vld [vmem:[%s11269_s19 + $0x83] sm:$0x1]  ;;  %v9183_v60 = vld [vmem:[%s11269_s19 + $0x86] sm:$0x1]  ;;  %v1932_v10 = vpop.permute.xlu2 %1931 }
 0x297   : > { %1735 = vst [vmem:[#allocation1 + $0x1] ss:$9 sm:$0xff] %v9153_v58  ;;  %v9181_v58 = vld [vmem:[%s11269_s19 + $0x84] sm:$0x1] }
 0x298   : > { %1736 = vst [vmem:[#allocation1 + $0x2] ss:$9 sm:$0xff] %v9154_v59  ;;  %v9182_v59 = vld [vmem:[%s11269_s19 + $0x85] sm:$0x1] }
 0x299   : > { %1737 = vst [vmem:[#allocation1 + $0x3] ss:$9 sm:$0xff] %v9155_v62  ;;  %v9184_v62 = vld [vmem:[%s11269_s19 + $0x87] sm:$0x1] }
 0x29a   : > { %1738 = vst [vmem:[#allocation1 + $0x4] ss:$9 sm:$0xff] %v9156_v2  ;;  %v9185_v2 = vld [vmem:[%s11269_s19 + $0x88] sm:$0x1] }
 0x29b   : > { %1739 = vst [vmem:[#allocation1 + $0x5] ss:$9 sm:$0xff] %v9157_v3  ;;  %v9186_v3 = vld [vmem:[%s11269_s19 + $0x89] sm:$0x1] }
 0x29c   : > { %1740 = vst [vmem:[#allocation1 + $0x6] ss:$9 sm:$0xff] %v9158_v4 }
 0x29d   : > { %1741 = vst [vmem:[#allocation1 + $0x7] ss:$9 sm:$0xff] %v9159_v5  ;;  %v9187_v5 = vld [vmem:[%s11269_s19 + $0x8a] sm:$0x1] }
 0x29e   : > { %2024 = vst.msk [vmem:[#allocation2 + $0x20] sm:$0xff] %vm2019_vm1, %v1932_v10  ;;  %v9462_v10 = vld [vmem:[%s11269_s19 + $0xa0] sm:$0x1] }
 0x2a4   : > { %v1742_v15 = vld [vmem:[#allocation1] sm:$0xff] }
 0x2a5   : > { %1743 = vst [vmem:[#allocation1] ss:$9 sm:$0xff] %v9160_v8  ;;  %1945 = vrot.lane.b32.xlu2 %v1742_v15, %s11217_s20  ;;  %v9188_v8 = vld [vmem:[%s11269_s19 + $0x8b] sm:$0x1]  ;;  %v9191_v15 = vld [vmem:[%s11269_s19 + $0x8e] sm:$0x1]  ;;  %v1934_v27 = vpop.permute.xlu2 %1933 }
 0x2a6   : > { %1744 = vst [vmem:[#allocation1 + $0x1] ss:$9 sm:$0xff] %v9161_v9  ;;  %v9189_v9 = vld [vmem:[%s11269_s19 + $0x8c] sm:$0x1] }
 0x2a7   : > { %1745 = vst [vmem:[#allocation1 + $0x2] ss:$9 sm:$0xff] %v9162_v12  ;;  %v9190_v12 = vld [vmem:[%s11269_s19 + $0x8d] sm:$0x1] }
 0x2a8   : > { %1746 = vst [vmem:[#allocation1 + $0x3] ss:$9 sm:$0xff] %v9163_v16  ;;  %v9192_v16 = vld [vmem:[%s11269_s19 + $0x91] sm:$0x1] }
 0x2a9   : > { %1747 = vst [vmem:[#allocation1 + $0x4] ss:$9 sm:$0xff] %v9164_v17  ;;  %v9193_v17 = vld [vmem:[%s11269_s19 + $0x92] sm:$0x1] }
 0x2aa   : > { %1748 = vst [vmem:[#allocation1 + $0x5] ss:$9 sm:$0xff] %v9165_v19 }
 0x2ab   : > { %1749 = vst [vmem:[#allocation1 + $0x6] ss:$9 sm:$0xff] %v9166_v22  ;;  %v9194_v22 = vld [vmem:[%s11269_s19 + $0x93] sm:$0x1] }
 0x2ac   : > { %1750 = vst [vmem:[#allocation1 + $0x7] ss:$9 sm:$0xff] %v9167_v24  ;;  %v9195_v24 = vld [vmem:[%s11269_s19 + $0x94] sm:$0x1] }
 0x2ad   : > { %2025 = vst.msk [vmem:[#allocation2 + $0x28] sm:$0xff] %vm2019_vm1, %v1934_v27  ;;  %v9476_v27 = vld [vmem:[%s11269_s19 + $0xb0] sm:$0x1] }
 0x2b3   : > { %v1751_v32 = vld [vmem:[#allocation1] sm:$0xff] }
 0x2b4   : > { %1947 = vrot.lane.b32.xlu0 %v1751_v32, %s11217_s20  ;;  %1752 = vst [vmem:[#allocation1] ss:$9 sm:$0xff] %v9168_v26  ;;  %v9196_v26 = vld [vmem:[%s11269_s19 + $0x95] sm:$0x1]  ;;  %v9198_v32 = vld [vmem:[%s11269_s19 + $0x97] sm:$0x1] }
 0x2b5   : > { %1753 = vst [vmem:[#allocation1 + $0x1] ss:$9 sm:$0xff] %v9169_v28  ;;  %v9197_v28 = vld [vmem:[%s11269_s19 + $0x96] sm:$0x1] }
 0x2b6   : > { %1754 = vst [vmem:[#allocation1 + $0x2] ss:$9 sm:$0xff] %v9170_v33  ;;  %v9199_v33 = vld [vmem:[%s11269_s19 + $0x98] sm:$0x1] }
 0x2b7   : > { %1755 = vst [vmem:[#allocation1 + $0x3] ss:$9 sm:$0xff] %v9171_v34  ;;  %v9200_v34 = vld [vmem:[%s11269_s19 + $0x99] sm:$0x1] }
 0x2b8   : > { %1756 = vst [vmem:[#allocation1 + $0x4] ss:$9 sm:$0xff] %v9172_v35  ;;  %v9201_v35 = vld [vmem:[%s11269_s19 + $0x9a] sm:$0x1] }
 0x2b9   : > { %1757 = vst [vmem:[#allocation1 + $0x5] ss:$9 sm:$0xff] %v9173_v36  ;;  %v9202_v36 = vld [vmem:[%s11269_s19 + $0x9b] sm:$0x1] }
 0x2ba   : > { %1758 = vst [vmem:[#allocation1 + $0x6] ss:$9 sm:$0xff] %v9174_v40 }
 0x2bb   : > { %1759 = vst [vmem:[#allocation1 + $0x7] ss:$9 sm:$0xff] %v9175_v44  ;;  %v9203_v44 = vld [vmem:[%s11269_s19 + $0x9c] sm:$0x1] }
 0x2c2   : > { %v1760_v49 = vld [vmem:[#allocation1] sm:$0xff] }
 0x2c3   : > { %1761 = vst [vmem:[#allocation1] ss:$9 sm:$0xff] %v9176_v45  ;;  %1949 = vrot.lane.b32.xlu1 %v1760_v49, %s11217_s20  ;;  %v9204_v45 = vld [vmem:[%s11269_s19 + $0x9d] sm:$0x1]  ;;  %v9207_v49 = vld [vmem:[%s11269_s19 + $0xa0] sm:$0x1] }
 0x2c4   : > { %1762 = vst [vmem:[#allocation1 + $0x1] ss:$9 sm:$0xff] %v9177_v46  ;;  %v9205_v46 = vld [vmem:[%s11269_s19 + $0x9e] sm:$0x1] }
 0x2c5   : > { %1763 = vst [vmem:[#allocation1 + $0x2] ss:$9 sm:$0xff] %v9178_v48  ;;  %v9206_v48 = vld [vmem:[%s11269_s19 + $0x9f] sm:$0x1] }
 0x2c6   : > { %1764 = vst [vmem:[#allocation1 + $0x3] ss:$9 sm:$0xff] %v9179_v52  ;;  %v9208_v52 = vld [vmem:[%s11269_s19 + $0xa3] sm:$0x1] }
 0x2c7   : > { %1765 = vst [vmem:[#allocation1 + $0x4] ss:$9 sm:$0xff] %v9180_v55  ;;  %v9209_v55 = vld [vmem:[%s11269_s19 + $0xa4] sm:$0x1] }
 0x2c8   : > { %1766 = vst [vmem:[#allocation1 + $0x5] ss:$9 sm:$0xff] %v9181_v58  ;;  %v9210_v58 = vld [vmem:[%s11269_s19 + $0xa5] sm:$0x1] }
 0x2c9   : > { %1767 = vst [vmem:[#allocation1 + $0x6] ss:$9 sm:$0xff] %v9182_v59 }
 0x2ca   : > { %1768 = vst [vmem:[#allocation1 + $0x7] ss:$9 sm:$0xff] %v9183_v60  ;;  %v9211_v60 = vld [vmem:[%s11269_s19 + $0xa6] sm:$0x1] }
 0x2d1   : > { %v1769_v4 = vld [vmem:[#allocation1] sm:$0xff] }
 0x2d2   : > { %1770 = vst [vmem:[#allocation1] ss:$9 sm:$0xff] %v9184_v62  ;;  %1951 = vrot.lane.b32.xlu2 %v1769_v4, %s11217_s20  ;;  %v9212_v62 = vld [vmem:[%s11269_s19 + $0xa7] sm:$0x1]  ;;  %v9215_v4 = vld [vmem:[%s11269_s19 + $0xaa] sm:$0x1] }
 0x2d3   : > { %1771 = vst [vmem:[#allocation1 + $0x1] ss:$9 sm:$0xff] %v9185_v2  ;;  %v9213_v2 = vld [vmem:[%s11269_s19 + $0xa8] sm:$0x1] }
 0x2d4   : > { %1772 = vst [vmem:[#allocation1 + $0x2] ss:$9 sm:$0xff] %v9186_v3  ;;  %v9214_v3 = vld [vmem:[%s11269_s19 + $0xa9] sm:$0x1] }
 0x2d5   : > { %1773 = vst [vmem:[#allocation1 + $0x3] ss:$9 sm:$0xff] %v9187_v5  ;;  %v9216_v5 = vld [vmem:[%s11269_s19 + $0xab] sm:$0x1] }
 0x2d6   : > { %1774 = vst [vmem:[#allocation1 + $0x4] ss:$9 sm:$0xff] %v9188_v8  ;;  %v9217_v8 = vld [vmem:[%s11269_s19 + $0xac] sm:$0x1] }
 0x2d7   : > { %1775 = vst [vmem:[#allocation1 + $0x5] ss:$9 sm:$0xff] %v9189_v9 }
 0x2d8   : > { %1776 = vst [vmem:[#allocation1 + $0x6] ss:$9 sm:$0xff] %v9190_v12  ;;  %v9218_v12 = vld [vmem:[%s11269_s19 + $0xad] sm:$0x1] }
 0x2d9   : > { %1777 = vst [vmem:[#allocation1 + $0x7] ss:$9 sm:$0xff] %v9191_v15  ;;  %v9219_v15 = vld [vmem:[%s11269_s19 + $0xae] sm:$0x1] }
 0x2e0   : > { %v1778_v19 = vld [vmem:[#allocation1] sm:$0xff] }
 0x2e1   : > { %1953 = vrot.lane.b32.xlu0 %v1778_v19, %s11217_s20  ;;  %1779 = vst [vmem:[#allocation1] ss:$9 sm:$0xff] %v9192_v16  ;;  %v9220_v16 = vld [vmem:[%s11269_s19 + $0xaf] sm:$0x1]  ;;  %v9222_v19 = vld [vmem:[%s11269_s19 + $0xb1] sm:$0x1] }
 0x2e2   : > { %1780 = vst [vmem:[#allocation1 + $0x1] ss:$9 sm:$0xff] %v9193_v17  ;;  %v9221_v17 = vld [vmem:[%s11269_s19 + $0xb0] sm:$0x1] }
 0x2e3   : > { %1781 = vst [vmem:[#allocation1 + $0x2] ss:$9 sm:$0xff] %v9194_v22  ;;  %v9223_v22 = vld [vmem:[%s11269_s19 + $0xb2] sm:$0x1] }
 0x2e4   : > { %1782 = vst [vmem:[#allocation1 + $0x3] ss:$9 sm:$0xff] %v9195_v24  ;;  %v9224_v24 = vld [vmem:[%s11269_s19 + $0xb5] sm:$0x1] }
 0x2e5   : > { %1783 = vst [vmem:[#allocation1 + $0x4] ss:$9 sm:$0xff] %v9196_v26  ;;  %v9225_v26 = vld [vmem:[%s11269_s19 + $0xb6] sm:$0x1] }
 0x2e6   : > { %1784 = vst [vmem:[#allocation1 + $0x5] ss:$9 sm:$0xff] %v9197_v28  ;;  %v9226_v28 = vld [vmem:[%s11269_s19 + $0xb7] sm:$0x1] }
 0x2e7   : > { %1785 = vst [vmem:[#allocation1 + $0x6] ss:$9 sm:$0xff] %v9198_v32 }
 0x2e8   : > { %1786 = vst [vmem:[#allocation1 + $0x7] ss:$9 sm:$0xff] %v9199_v33  ;;  %v9227_v33 = vld [vmem:[%s11269_s19 + $0xb8] sm:$0x1] }
 0x2ef   : > { %v1787_v40 = vld [vmem:[#allocation1] sm:$0xff] }
 0x2f0   : > { %1788 = vst [vmem:[#allocation1] ss:$9 sm:$0xff] %v9200_v34  ;;  %1955 = vrot.lane.b32.xlu1 %v1787_v40, %s11217_s20  ;;  %v9228_v34 = vld [vmem:[%s11269_s19 + $0xb9] sm:$0x1]  ;;  %v9231_v40 = vld [vmem:[%s11269_s19 + $0xbc] sm:$0x1] }
 0x2f1   : > { %1789 = vst [vmem:[#allocation1 + $0x1] ss:$9 sm:$0xff] %v9201_v35  ;;  %v9229_v35 = vld [vmem:[%s11269_s19 + $0xba] sm:$0x1] }
 0x2f2   : > { %1790 = vst [vmem:[#allocation1 + $0x2] ss:$9 sm:$0xff] %v9202_v36  ;;  %v9230_v36 = vld [vmem:[%s11269_s19 + $0xbb] sm:$0x1] }
 0x2f3   : > { %1791 = vst [vmem:[#allocation1 + $0x3] ss:$9 sm:$0xff] %v9203_v44  ;;  %v9232_v44 = vld [vmem:[%s11269_s19 + $0xbd] sm:$0x1] }
 0x2f4   : > { %1792 = vst [vmem:[#allocation1 + $0x4] ss:$9 sm:$0xff] %v9204_v45  ;;  %v9233_v45 = vld [vmem:[%s11269_s19 + $0xbe] sm:$0x1] }
 0x2f5   : > { %1793 = vst [vmem:[#allocation1 + $0x5] ss:$9 sm:$0xff] %v9205_v46  ;;  %v9234_v46 = vld [vmem:[%s11269_s19 + $0xbf] sm:$0x1] }
 0x2f6   : > { %1794 = vst [vmem:[#allocation1 + $0x6] ss:$9 sm:$0xff] %v9206_v48 }
 0x2f7   : > { %1795 = vst [vmem:[#allocation1 + $0x7] ss:$9 sm:$0xff] %v9207_v49  ;;  %v9235_v49 = vld [vmem:[%s11269_s19 + $0xc0] sm:$0x1] }
 0x2fe   : > { %v1796_v59 = vld [vmem:[#allocation1] sm:$0xff] }
 0x2ff   : > { %1797 = vst [vmem:[#allocation1] ss:$9 sm:$0xff] %v9208_v52  ;;  %1957 = vrot.lane.b32.xlu2 %v1796_v59, %s11217_s20  ;;  %v9236_v52 = vld [vmem:[%s11269_s19 + $0xc1] sm:$0x1]  ;;  %v9239_v59 = vld [vmem:[%s11269_s19 + $0xc4] sm:$0x1] }
 0x300   : > { %1798 = vst [vmem:[#allocation1 + $0x1] ss:$9 sm:$0xff] %v9209_v55  ;;  %v9237_v55 = vld [vmem:[%s11269_s19 + $0xc2] sm:$0x1] }
 0x301   : > { %1799 = vst [vmem:[#allocation1 + $0x2] ss:$9 sm:$0xff] %v9210_v58  ;;  %v9238_v58 = vld [vmem:[%s11269_s19 + $0xc3] sm:$0x1] }
 0x302   : > { %1800 = vst [vmem:[#allocation1 + $0x3] ss:$9 sm:$0xff] %v9211_v60  ;;  %v9240_v60 = vld [vmem:[%s11269_s19 + $0xc7] sm:$0x1] }
 0x303   : > { %1801 = vst [vmem:[#allocation1 + $0x4] ss:$9 sm:$0xff] %v9212_v62  ;;  %v9241_v62 = vld [vmem:[%s11269_s19 + $0xc8] sm:$0x1] }
 0x304   : > { %1802 = vst [vmem:[#allocation1 + $0x5] ss:$9 sm:$0xff] %v9213_v2 }
 0x305   : > { %1803 = vst [vmem:[#allocation1 + $0x6] ss:$9 sm:$0xff] %v9214_v3  ;;  %v9242_v3 = vld [vmem:[%s11269_s19 + $0xc9] sm:$0x1] }
 0x306   : > { %1804 = vst [vmem:[#allocation1 + $0x7] ss:$9 sm:$0xff] %v9215_v4  ;;  %v9243_v4 = vld [vmem:[%s11269_s19 + $0xca] sm:$0x1] }
 0x30d   : > { %v1805_v9 = vld [vmem:[#allocation1] sm:$0xff] }
 0x30e   : > { %1959 = vrot.lane.b32.xlu0 %v1805_v9, %s11217_s20  ;;  %1806 = vst [vmem:[#allocation1] ss:$9 sm:$0xff] %v9216_v5  ;;  %v9244_v5 = vld [vmem:[%s11269_s19 + $0xcb] sm:$0x1]  ;;  %v9246_v9 = vld [vmem:[%s11269_s19 + $0xcd] sm:$0x1] }
 0x30f   : > { %1807 = vst [vmem:[#allocation1 + $0x1] ss:$9 sm:$0xff] %v9217_v8  ;;  %v9245_v8 = vld [vmem:[%s11269_s19 + $0xcc] sm:$0x1] }
 0x310   : > { %1808 = vst [vmem:[#allocation1 + $0x2] ss:$9 sm:$0xff] %v9218_v12  ;;  %v9247_v12 = vld [vmem:[%s11269_s19 + $0xce] sm:$0x1] }
 0x311   : > { %1809 = vst [vmem:[#allocation1 + $0x3] ss:$9 sm:$0xff] %v9219_v15  ;;  %v9248_v15 = vld [vmem:[%s11269_s19 + $0xcf] sm:$0x1] }
 0x312   : > { %1810 = vst [vmem:[#allocation1 + $0x4] ss:$9 sm:$0xff] %v9220_v16  ;;  %v9249_v16 = vld [vmem:[%s11269_s19 + $0xd0] sm:$0x1] }
 0x313   : > { %1811 = vst [vmem:[#allocation1 + $0x5] ss:$9 sm:$0xff] %v9221_v17  ;;  %v9250_v17 = vld [vmem:[%s11269_s19 + $0xd1] sm:$0x1] }
 0x314   : > { %1812 = vst [vmem:[#allocation1 + $0x6] ss:$9 sm:$0xff] %v9222_v19 }
 0x315   : > { %1813 = vst [vmem:[#allocation1 + $0x7] ss:$9 sm:$0xff] %v9223_v22  ;;  %v9251_v22 = vld [vmem:[%s11269_s19 + $0xd2] sm:$0x1] }
 0x31c   : > { %v1814_v32 = vld [vmem:[#allocation1] sm:$0xff] }
 0x31d   : > { %1815 = vst [vmem:[#allocation1] ss:$9 sm:$0xff] %v9224_v24  ;;  %1961 = vrot.lane.b32.xlu1 %v1814_v32, %s11217_s20  ;;  %v9252_v24 = vld [vmem:[%s11269_s19 + $0xd3] sm:$0x1]  ;;  %v9255_v32 = vld [vmem:[%s11269_s19 + $0xd6] sm:$0x1] }
 0x31e   : > { %1816 = vst [vmem:[#allocation1 + $0x1] ss:$9 sm:$0xff] %v9225_v26  ;;  %v9253_v26 = vld [vmem:[%s11269_s19 + $0xd4] sm:$0x1] }
 0x31f   : > { %1817 = vst [vmem:[#allocation1 + $0x2] ss:$9 sm:$0xff] %v9226_v28  ;;  %v9254_v28 = vld [vmem:[%s11269_s19 + $0xd5] sm:$0x1] }
 0x320   : > { %1818 = vst [vmem:[#allocation1 + $0x3] ss:$9 sm:$0xff] %v9227_v33  ;;  %v9256_v33 = vld [vmem:[%s11269_s19 + $0xd9] sm:$0x1] }
 0x321   : > { %1819 = vst [vmem:[#allocation1 + $0x4] ss:$9 sm:$0xff] %v9228_v34  ;;  %v9257_v34 = vld [vmem:[%s11269_s19 + $0xda] sm:$0x1] }
 0x322   : > { %1820 = vst [vmem:[#allocation1 + $0x5] ss:$9 sm:$0xff] %v9229_v35  ;;  %v9258_v35 = vld [vmem:[%s11269_s19 + $0xdb] sm:$0x1] }
 0x323   : > { %1821 = vst [vmem:[#allocation1 + $0x6] ss:$9 sm:$0xff] %v9230_v36 }
 0x324   : > { %1822 = vst [vmem:[#allocation1 + $0x7] ss:$9 sm:$0xff] %v9231_v40  ;;  %v9259_v40 = vld [vmem:[%s11269_s19 + $0xdc] sm:$0x1] }
 0x32b   : > { %v1823_v48 = vld [vmem:[#allocation1] sm:$0xff] }
 0x32c   : > { %1824 = vst [vmem:[#allocation1] ss:$9 sm:$0xff] %v9232_v44  ;;  %1963 = vrot.lane.b32.xlu2 %v1823_v48, %s11217_s20  ;;  %v9260_v44 = vld [vmem:[%s11269_s19 + $0xdd] sm:$0x1]  ;;  %v9263_v48 = vld [vmem:[%s11269_s19 + $0xe0] sm:$0x1] }
 0x32d   : > { %1825 = vst [vmem:[#allocation1 + $0x1] ss:$9 sm:$0xff] %v9233_v45  ;;  %v9261_v45 = vld [vmem:[%s11269_s19 + $0xde] sm:$0x1] }
 0x32e   : > { %1826 = vst [vmem:[#allocation1 + $0x2] ss:$9 sm:$0xff] %v9234_v46  ;;  %v9262_v46 = vld [vmem:[%s11269_s19 + $0xdf] sm:$0x1] }
 0x32f   : > { %1827 = vst [vmem:[#allocation1 + $0x3] ss:$9 sm:$0xff] %v9235_v49  ;;  %v9264_v49 = vld [vmem:[%s11269_s19 + $0xe1] sm:$0x1] }
 0x330   : > { %1828 = vst [vmem:[#allocation1 + $0x4] ss:$9 sm:$0xff] %v9236_v52  ;;  %v9265_v52 = vld [vmem:[%s11269_s19 + $0xe2] sm:$0x1] }
 0x331   : > { %1829 = vst [vmem:[#allocation1 + $0x5] ss:$9 sm:$0xff] %v9237_v55 }
 0x332   : > { %1830 = vst [vmem:[#allocation1 + $0x6] ss:$9 sm:$0xff] %v9238_v58  ;;  %v9266_v58 = vld [vmem:[%s11269_s19 + $0xe3] sm:$0x1] }
 0x333   : > { %1831 = vst [vmem:[#allocation1 + $0x7] ss:$9 sm:$0xff] %v9239_v59  ;;  %v9267_v59 = vld [vmem:[%s11269_s19 + $0xe4] sm:$0x1] }
 0x33a   : > { %v1832_v2 = vld [vmem:[#allocation1] sm:$0xff] }
 0x33b   : > { %1965 = vrot.lane.b32.xlu0 %v1832_v2, %s11217_s20  ;;  %1833 = vst [vmem:[#allocation1] ss:$9 sm:$0xff] %v9240_v60  ;;  %v9268_v60 = vld [vmem:[%s11269_s19 + $0xe5] sm:$0x1]  ;;  %v9270_v2 = vld [vmem:[%s11269_s19 + $0xe7] sm:$0x1] }
 0x33c   : > { %1834 = vst [vmem:[#allocation1 + $0x1] ss:$9 sm:$0xff] %v9241_v62  ;;  %v9269_v62 = vld [vmem:[%s11269_s19 + $0xe6] sm:$0x1] }
 0x33d   : > { %1835 = vst [vmem:[#allocation1 + $0x2] ss:$9 sm:$0xff] %v9242_v3  ;;  %v9271_v3 = vld [vmem:[%s11269_s19 + $0xe8] sm:$0x1] }
 0x33e   : > { %1836 = vst [vmem:[#allocation1 + $0x3] ss:$9 sm:$0xff] %v9243_v4  ;;  %v9272_v4 = vld [vmem:[%s11269_s19 + $0xeb] sm:$0x1] }
 0x33f   : > { %1837 = vst [vmem:[#allocation1 + $0x4] ss:$9 sm:$0xff] %v9244_v5  ;;  %v9273_v5 = vld [vmem:[%s11269_s19 + $0xec] sm:$0x1] }
 0x340   : > { %1838 = vst [vmem:[#allocation1 + $0x5] ss:$9 sm:$0xff] %v9245_v8  ;;  %v9274_v8 = vld [vmem:[%s11269_s19 + $0xed] sm:$0x1] }
 0x341   : > { %1839 = vst [vmem:[#allocation1 + $0x6] ss:$9 sm:$0xff] %v9246_v9 }
 0x342   : > { %1840 = vst [vmem:[#allocation1 + $0x7] ss:$9 sm:$0xff] %v9247_v12  ;;  %v9275_v12 = vld [vmem:[%s11269_s19 + $0xee] sm:$0x1] }
 0x349   : > { %v1841_v19 = vld [vmem:[#allocation1] sm:$0xff] }
 0x34a   : > { %1842 = vst [vmem:[#allocation1] ss:$9 sm:$0xff] %v9248_v15  ;;  %1967 = vrot.lane.b32.xlu1 %v1841_v19, %s11217_s20  ;;  %v9276_v15 = vld [vmem:[%s11269_s19 + $0xef] sm:$0x1]  ;;  %v9279_v19 = vld [vmem:[%s11269_s19 + $0xf2] sm:$0x1] }
 0x34b   : > { %1843 = vst [vmem:[#allocation1 + $0x1] ss:$9 sm:$0xff] %v9249_v16  ;;  %v9277_v16 = vld [vmem:[%s11269_s19 + $0xf0] sm:$0x1] }
 0x34c   : > { %1844 = vst [vmem:[#allocation1 + $0x2] ss:$9 sm:$0xff] %v9250_v17  ;;  %v9278_v17 = vld [vmem:[%s11269_s19 + $0xf1] sm:$0x1] }
 0x34d   : > { %1845 = vst [vmem:[#allocation1 + $0x3] ss:$9 sm:$0xff] %v9251_v22  ;;  %v9280_v22 = vld [vmem:[%s11269_s19 + $0xf3] sm:$0x1] }
 0x34e   : > { %1846 = vst [vmem:[#allocation1 + $0x4] ss:$9 sm:$0xff] %v9252_v24  ;;  %v9281_v24 = vld [vmem:[%s11269_s19 + $0xf4] sm:$0x1] }
 0x34f   : > { %1847 = vst [vmem:[#allocation1 + $0x5] ss:$9 sm:$0xff] %v9253_v26  ;;  %v9282_v26 = vld [vmem:[%s11269_s19 + $0xf5] sm:$0x1] }
 0x350   : > { %1848 = vst [vmem:[#allocation1 + $0x6] ss:$9 sm:$0xff] %v9254_v28 }
 0x351   : > { %1849 = vst [vmem:[#allocation1 + $0x7] ss:$9 sm:$0xff] %v9255_v32  ;;  %v9283_v32 = vld [vmem:[%s11269_s19 + $0xf6] sm:$0x1] }
 0x358   : > { %v1850_v36 = vld [vmem:[#allocation1] sm:$0xff] }
 0x359   : > { %1851 = vst [vmem:[#allocation1] ss:$9 sm:$0xff] %v9256_v33  ;;  %1969 = vrot.lane.b32.xlu2 %v1850_v36, %s11217_s20  ;;  %v9284_v33 = vld [vmem:[%s11269_s19 + $0xf7] sm:$0x1]  ;;  %v9287_v36 = vld [vmem:[%s11269_s19 + $0xfa] sm:$0x1] }
 0x35a   : > { %1852 = vst [vmem:[#allocation1 + $0x1] ss:$9 sm:$0xff] %v9257_v34  ;;  %v9285_v34 = vld [vmem:[%s11269_s19 + $0xf8] sm:$0x1] }
 0x35b   : > { %1853 = vst [vmem:[#allocation1 + $0x2] ss:$9 sm:$0xff] %v9258_v35  ;;  %v9286_v35 = vld [vmem:[%s11269_s19 + $0xf9] sm:$0x1] }
 0x35c   : > { %1854 = vst [vmem:[#allocation1 + $0x3] ss:$9 sm:$0xff] %v9259_v40  ;;  %v9288_v40 = vld [vmem:[%s11269_s19 + $0xfd] sm:$0x1] }
 0x35d   : > { %1855 = vst [vmem:[#allocation1 + $0x4] ss:$9 sm:$0xff] %v9260_v44  ;;  %v9289_v44 = vld [vmem:[%s11269_s19 + $0xfe] sm:$0x1] }
 0x35e   : > { %1856 = vst [vmem:[#allocation1 + $0x5] ss:$9 sm:$0xff] %v9261_v45 }
 0x35f   : > { %1857 = vst [vmem:[#allocation1 + $0x6] ss:$9 sm:$0xff] %v9262_v46  ;;  %v9290_v46 = vld [vmem:[%s11269_s19 + $0xff] sm:$0x1] }
 0x360   : > { %1858 = vst [vmem:[#allocation1 + $0x7] ss:$9 sm:$0xff] %v9263_v48  ;;  %v9291_v48 = vld [vmem:[%s11269_s19 + $0x100] sm:$0x1] }
 0x367   : > { %v1859_v55 = vld [vmem:[#allocation1] sm:$0xff] }
 0x368   : > { %1971 = vrot.lane.b32.xlu0 %v1859_v55, %s11217_s20  ;;  %1860 = vst [vmem:[#allocation1] ss:$9 sm:$0xff] %v9264_v49  ;;  %v9292_v49 = vld [vmem:[%s11269_s19 + $0x101] sm:$0x1]  ;;  %v9294_v55 = vld [vmem:[%s11269_s19 + $0x103] sm:$0x1] }
 0x369   : > { %1861 = vst [vmem:[#allocation1 + $0x1] ss:$9 sm:$0xff] %v9265_v52  ;;  %v9293_v52 = vld [vmem:[%s11269_s19 + $0x102] sm:$0x1] }
 0x36a   : > { %1862 = vst [vmem:[#allocation1 + $0x2] ss:$9 sm:$0xff] %v9266_v58  ;;  %v9295_v58 = vld [vmem:[%s11269_s19 + $0x104] sm:$0x1] }
 0x36b   : > { %1863 = vst [vmem:[#allocation1 + $0x3] ss:$9 sm:$0xff] %v9267_v59  ;;  %v9296_v59 = vld [vmem:[%s11269_s19 + $0x105] sm:$0x1] }
 0x36c   : > { %1864 = vst [vmem:[#allocation1 + $0x4] ss:$9 sm:$0xff] %v9268_v60  ;;  %v9297_v60 = vld [vmem:[%s11269_s19 + $0x106] sm:$0x1] }
 0x36d   : > { %1865 = vst [vmem:[#allocation1 + $0x5] ss:$9 sm:$0xff] %v9269_v62  ;;  %v9298_v62 = vld [vmem:[%s11269_s19 + $0x107] sm:$0x1] }
 0x36e   : > { %1866 = vst [vmem:[#allocation1 + $0x6] ss:$9 sm:$0xff] %v9270_v2 }
 0x36f   : > { %1867 = vst [vmem:[#allocation1 + $0x7] ss:$9 sm:$0xff] %v9271_v3  ;;  %v9299_v3 = vld [vmem:[%s11269_s19 + $0x108] sm:$0x1] }
 0x376   : > { %v1868_v9 = vld [vmem:[#allocation1] sm:$0xff] }
 0x377   : > { %1869 = vst [vmem:[#allocation1] ss:$9 sm:$0xff] %v9272_v4  ;;  %1973 = vrot.lane.b32.xlu1 %v1868_v9, %s11217_s20  ;;  %v9300_v4 = vld [vmem:[%s11269_s19 + $0x109] sm:$0x1]  ;;  %v9303_v9 = vld [vmem:[%s11269_s19 + $0x10c] sm:$0x1] }
 0x378   : > { %1870 = vst [vmem:[#allocation1 + $0x1] ss:$9 sm:$0xff] %v9273_v5  ;;  %v9301_v5 = vld [vmem:[%s11269_s19 + $0x10a] sm:$0x1] }
 0x379   : > { %1871 = vst [vmem:[#allocation1 + $0x2] ss:$9 sm:$0xff] %v9274_v8  ;;  %v9302_v8 = vld [vmem:[%s11269_s19 + $0x10b] sm:$0x1] }
 0x37a   : > { %1872 = vst [vmem:[#allocation1 + $0x3] ss:$9 sm:$0xff] %v9275_v12  ;;  %v9304_v12 = vld [vmem:[%s11269_s19 + $0x10f] sm:$0x1] }
 0x37b   : > { %1873 = vst [vmem:[#allocation1 + $0x4] ss:$9 sm:$0xff] %v9276_v15  ;;  %v9305_v15 = vld [vmem:[%s11269_s19 + $0x110] sm:$0x1] }
 0x37c   : > { %1874 = vst [vmem:[#allocation1 + $0x5] ss:$9 sm:$0xff] %v9277_v16  ;;  %v9306_v16 = vld [vmem:[%s11269_s19 + $0x111] sm:$0x1] }
 0x37d   : > { %1875 = vst [vmem:[#allocation1 + $0x6] ss:$9 sm:$0xff] %v9278_v17 }
 0x37e   : > { %1876 = vst [vmem:[#allocation1 + $0x7] ss:$9 sm:$0xff] %v9279_v19  ;;  %v9307_v19 = vld [vmem:[%s11269_s19 + $0x112] sm:$0x1] }
 0x385   : > { %v1877_v28 = vld [vmem:[#allocation1] sm:$0xff] }
 0x386   : > { %1878 = vst [vmem:[#allocation1] ss:$9 sm:$0xff] %v9280_v22  ;;  %1975 = vrot.lane.b32.xlu2 %v1877_v28, %s11217_s20  ;;  %v9308_v22 = vld [vmem:[%s11269_s19 + $0x113] sm:$0x1]  ;;  %v9311_v28 = vld [vmem:[%s11269_s19 + $0x116] sm:$0x1] }
 0x387   : > { %1879 = vst [vmem:[#allocation1 + $0x1] ss:$9 sm:$0xff] %v9281_v24  ;;  %v9309_v24 = vld [vmem:[%s11269_s19 + $0x114] sm:$0x1] }
 0x388   : > { %1880 = vst [vmem:[#allocation1 + $0x2] ss:$9 sm:$0xff] %v9282_v26  ;;  %v9310_v26 = vld [vmem:[%s11269_s19 + $0x115] sm:$0x1] }
 0x389   : > { %1881 = vst [vmem:[#allocation1 + $0x3] ss:$9 sm:$0xff] %v9283_v32  ;;  %v9312_v32 = vld [vmem:[%s11269_s19 + $0x117] sm:$0x1] }
 0x38a   : > { %1882 = vst [vmem:[#allocation1 + $0x4] ss:$9 sm:$0xff] %v9284_v33  ;;  %v9313_v33 = vld [vmem:[%s11269_s19 + $0x118] sm:$0x1] }
 0x38b   : > { %1883 = vst [vmem:[#allocation1 + $0x5] ss:$9 sm:$0xff] %v9285_v34 }
 0x38c   : > { %1884 = vst [vmem:[#allocation1 + $0x6] ss:$9 sm:$0xff] %v9286_v35  ;;  %v9314_v35 = vld [vmem:[%s11269_s19 + $0x119] sm:$0x1] }
 0x38d   : > { %1885 = vst [vmem:[#allocation1 + $0x7] ss:$9 sm:$0xff] %v9287_v36  ;;  %v9315_v36 = vld [vmem:[%s11269_s19 + $0x11a] sm:$0x1] }
 0x394   : > { %v1886_v45 = vld [vmem:[#allocation1] sm:$0xff] }
 0x395   : > { %1977 = vrot.lane.b32.xlu0 %v1886_v45, %s11217_s20  ;;  %1887 = vst [vmem:[#allocation1] ss:$9 sm:$0xff] %v9288_v40  ;;  %v9316_v40 = vld [vmem:[%s11269_s19 + $0x11b] sm:$0x1]  ;;  %v9318_v45 = vld [vmem:[%s11269_s19 + $0x11d] sm:$0x1] }
 0x396   : > { %1888 = vst [vmem:[#allocation1 + $0x1] ss:$9 sm:$0xff] %v9289_v44  ;;  %v9317_v44 = vld [vmem:[%s11269_s19 + $0x11c] sm:$0x1] }
 0x397   : > { %1889 = vst [vmem:[#allocation1 + $0x2] ss:$9 sm:$0xff] %v9290_v46  ;;  %v9319_v46 = vld [vmem:[%s11269_s19 + $0x11e] sm:$0x1] }
 0x398   : > { %1890 = vst [vmem:[#allocation1 + $0x3] ss:$9 sm:$0xff] %v9291_v48  ;;  %v9320_v48 = vld [vmem:[%s11269_s19 + $0x2] sm:$0x1] }
 0x399   : > { %1891 = vst [vmem:[#allocation1 + $0x4] ss:$9 sm:$0xff] %v9292_v49  ;;  %v9321_v49 = vld [vmem:[%s11269_s19 + $0x3] sm:$0x1] }
 0x39a   : > { %1892 = vst [vmem:[#allocation1 + $0x5] ss:$9 sm:$0xff] %v9293_v52 }
 0x39b   : > { %1893 = vst [vmem:[#allocation1 + $0x6] ss:$9 sm:$0xff] %v9294_v55  ;;  %v9322_v55 = vld [vmem:[%s11269_s19 + $0x4] sm:$0x1] }
 0x39c   : > { %1894 = vst [vmem:[#allocation1 + $0x7] ss:$9 sm:$0xff] %v9295_v58  ;;  %v9323_v58 = vld [vmem:[%s11269_s19 + $0x5] sm:$0x1] }
 0x3a3   : > { %v1895_v2 = vld [vmem:[#allocation1] sm:$0xff] }
 0x3a4   : > { %1896 = vst [vmem:[#allocation1] ss:$9 sm:$0xff] %v9296_v59  ;;  %1979 = vrot.lane.b32.xlu1 %v1895_v2, %s11217_s20  ;;  %v9324_v59 = vld [vmem:[%s11269_s19 + $0x6] sm:$0x1]  ;;  %v9327_v2 = vld [vmem:[%s11269_s19 + $0x9] sm:$0x1] }
 0x3a5   : > { %1897 = vst [vmem:[#allocation1 + $0x1] ss:$9 sm:$0xff] %v9297_v60  ;;  %v9325_v60 = vld [vmem:[%s11269_s19 + $0x7] sm:$0x1] }
 0x3a6   : > { %1898 = vst [vmem:[#allocation1 + $0x2] ss:$9 sm:$0xff] %v9298_v62  ;;  %v9326_v62 = vld [vmem:[%s11269_s19 + $0x8] sm:$0x1] }
 0x3a7   : > { %1899 = vst [vmem:[#allocation1 + $0x3] ss:$9 sm:$0xff] %v9299_v3  ;;  %v9328_v3 = vld [vmem:[%s11269_s19 + $0xa] sm:$0x1] }
 0x3a8   : > { %1900 = vst [vmem:[#allocation1 + $0x4] ss:$9 sm:$0xff] %v9300_v4  ;;  %v9329_v4 = vld [vmem:[%s11269_s19 + $0xb] sm:$0x1] }
 0x3a9   : > { %1901 = vst [vmem:[#allocation1 + $0x5] ss:$9 sm:$0xff] %v9301_v5  ;;  %v9330_v5 = vld [vmem:[%s11269_s19 + $0xc] sm:$0x1] }
 0x3aa   : > { %1902 = vst [vmem:[#allocation1 + $0x6] ss:$9 sm:$0xff] %v9302_v8 }
 0x3ab   : > { %1903 = vst [vmem:[#allocation1 + $0x7] ss:$9 sm:$0xff] %v9303_v9  ;;  %v9331_v9 = vld [vmem:[%s11269_s19 + $0xd] sm:$0x1] }
 0x3b2   : > { %v1904_v17 = vld [vmem:[#allocation1] sm:$0xff] }
 0x3b3   : > { %1905 = vst [vmem:[#allocation1] ss:$9 sm:$0xff] %v9304_v12  ;;  %1981 = vrot.lane.b32.xlu2 %v1904_v17, %s11217_s20  ;;  %v9332_v12 = vld [vmem:[%s11269_s19 + $0xe] sm:$0x1]  ;;  %v9335_v17 = vld [vmem:[%s11269_s19 + $0x11] sm:$0x1] }
 0x3b4   : > { %1906 = vst [vmem:[#allocation1 + $0x1] ss:$9 sm:$0xff] %v9305_v15  ;;  %v9333_v15 = vld [vmem:[%s11269_s19 + $0xf] sm:$0x1] }
 0x3b5   : > { %1907 = vst [vmem:[#allocation1 + $0x2] ss:$9 sm:$0xff] %v9306_v16  ;;  %v9334_v16 = vld [vmem:[%s11269_s19 + $0x10] sm:$0x1] }
 0x3b6   : > { %1908 = vst [vmem:[#allocation1 + $0x3] ss:$9 sm:$0xff] %v9307_v19  ;;  %v9336_v19 = vld [vmem:[%s11269_s19 + $0x14] sm:$0x1] }
 0x3b7   : > { %1909 = vst [vmem:[#allocation1 + $0x4] ss:$9 sm:$0xff] %v9308_v22  ;;  %v9337_v22 = vld [vmem:[%s11269_s19 + $0x15] sm:$0x1] }
 0x3b8   : > { %1910 = vst [vmem:[#allocation1 + $0x5] ss:$9 sm:$0xff] %v9309_v24 }
 0x3b9   : > { %1911 = vst [vmem:[#allocation1 + $0x6] ss:$9 sm:$0xff] %v9310_v26  ;;  %v9338_v26 = vld [vmem:[%s11269_s19 + $0x16] sm:$0x1] }
 0x3ba   : > { %1912 = vst [vmem:[#allocation1 + $0x7] ss:$9 sm:$0xff] %v9311_v28  ;;  %v9339_v28 = vld [vmem:[%s11269_s19 + $0x17] sm:$0x1] }
 0x3c1   : > { %v1913_v34 = vld [vmem:[#allocation1] sm:$0xff] }
 0x3c2   : > { %1983 = vrot.lane.b32.xlu0 %v1913_v34, %s11217_s20  ;;  %1914 = vst [vmem:[#allocation1] ss:$9 sm:$0xff] %v9312_v32  ;;  %v9340_v32 = vld [vmem:[%s11269_s19 + $0x18] sm:$0x1]  ;;  %v9342_v34 = vld [vmem:[%s11269_s19 + $0x1a] sm:$0x1] }
 0x3c3   : > { %1915 = vst [vmem:[#allocation1 + $0x1] ss:$9 sm:$0xff] %v9313_v33  ;;  %v9341_v33 = vld [vmem:[%s11269_s19 + $0x19] sm:$0x1] }
 0x3c4   : > { %1916 = vst [vmem:[#allocation1 + $0x2] ss:$9 sm:$0xff] %v9314_v35  ;;  %v9343_v35 = vld [vmem:[%s11269_s19 + $0x1b] sm:$0x1] }
 0x3c5   : > { %1917 = vst [vmem:[#allocation1 + $0x3] ss:$9 sm:$0xff] %v9315_v36  ;;  %v9344_v36 = vld [vmem:[%s11269_s19 + $0x1c] sm:$0x1] }
 0x3c6   : > { %1918 = vst [vmem:[#allocation1 + $0x4] ss:$9 sm:$0xff] %v9316_v40  ;;  %v9345_v40 = vld [vmem:[%s11269_s19 + $0x1d] sm:$0x1] }
 0x3c7   : > { %1919 = vst [vmem:[#allocation1 + $0x5] ss:$9 sm:$0xff] %v9317_v44  ;;  %v9346_v44 = vld [vmem:[%s11269_s19 + $0x1e] sm:$0x1] }
 0x3c8   : > { %1920 = vst [vmem:[#allocation1 + $0x6] ss:$9 sm:$0xff] %v9318_v45 }
 0x3c9   : > { %1921 = vst [vmem:[#allocation1 + $0x7] ss:$9 sm:$0xff] %v9319_v46  ;;  %v9347_v46 = vld [vmem:[%s11269_s19 + $0x1f] sm:$0x1] }
 0x3d0   : > { %v1922_v52 = vld [vmem:[#allocation1] sm:$0xff] }
 0x3d1   : > { %2566 = vst [vmem:[#allocation1] ss:$9 sm:$0xff] %v9320_v48  ;;  %1985 = vrot.lane.b32.xlu1 %v1922_v52, %s11217_s20  ;;  %v9348_v48 = vld [vmem:[%s11269_s19 + $0x20] sm:$0x1]  ;;  %v9350_v52 = vld [vmem:[%s11269_s19 + $0x22] sm:$0x1]  ;;  %s14306_s20 = scalar_lea.vmem %s14401_s3, %s11148_s11 }
 0x3d2   : > { %2568 = vst [vmem:[#allocation1 + $0x1] ss:$9 sm:$0xff] %v9321_v49  ;;  %v9349_v49 = vld [vmem:[%s11269_s19 + $0x21] sm:$0x1] }
 0x3d3   : > { %2570 = vst [vmem:[#allocation1 + $0x2] ss:$9 sm:$0xff] %v9322_v55  ;;  %v9351_v55 = vld [vmem:[%s11269_s19 + $0x23] sm:$0x1] }
 0x3d4   : > { %2572 = vst [vmem:[#allocation1 + $0x3] ss:$9 sm:$0xff] %v9323_v58  ;;  %v9352_v58 = vld [vmem:[%s11269_s19 + $0x26] sm:$0x1] }
 0x3d5   : > { %2574 = vst [vmem:[#allocation1 + $0x4] ss:$9 sm:$0xff] %v9324_v59  ;;  %v9353_v59 = vld [vmem:[%s11269_s19 + $0x27] sm:$0x1] }
 0x3d6   : > { %2576 = vst [vmem:[#allocation1 + $0x5] ss:$9 sm:$0xff] %v9325_v60  ;;  %v9354_v60 = vld [vmem:[%s11269_s19 + $0x28] sm:$0x1] }
 0x3d7   : > { %2578 = vst [vmem:[#allocation1 + $0x6] ss:$9 sm:$0xff] %v9326_v62 }
 0x3d8   : > { %2580 = vst [vmem:[#allocation1 + $0x7] ss:$9 sm:$0xff] %v9327_v2  ;;  %v9355_v2 = vld [vmem:[%s11269_s19 + $0x29] sm:$0x1] }
 0x3df   : > { %v2581_v8 = vld [vmem:[#allocation1] sm:$0xff] }
 0x3e0   : > { %2582 = vst [vmem:[#allocation1] ss:$9 sm:$0xff] %v9328_v3  ;;  %2861 = vrot.lane.b32.xlu2 %v2581_v8, %s11218_s21  ;;  %v9356_v3 = vld [vmem:[%s11269_s19 + $0x2a] sm:$0x1]  ;;  %v9359_v8 = vld [vmem:[%s11269_s19 + $0x2d] sm:$0x1] }
 0x3e1   : > { %2583 = vst [vmem:[#allocation1 + $0x1] ss:$9 sm:$0xff] %v9329_v4  ;;  %v9357_v4 = vld [vmem:[%s11269_s19 + $0x2b] sm:$0x1] }
 0x3e2   : > { %2584 = vst [vmem:[#allocation1 + $0x2] ss:$9 sm:$0xff] %v9330_v5  ;;  %v9358_v5 = vld [vmem:[%s11269_s19 + $0x2c] sm:$0x1] }
 0x3e3   : > { %2585 = vst [vmem:[#allocation1 + $0x3] ss:$9 sm:$0xff] %v9331_v9  ;;  %v9360_v9 = vld [vmem:[%s11269_s19 + $0x2e] sm:$0x1] }
 0x3e4   : > { %2586 = vst [vmem:[#allocation1 + $0x4] ss:$9 sm:$0xff] %v9332_v12  ;;  %v9361_v12 = vld [vmem:[%s11269_s19 + $0x2f] sm:$0x1] }
 0x3e5   : > { %2587 = vst [vmem:[#allocation1 + $0x5] ss:$9 sm:$0xff] %v9333_v15 }
 0x3e6   : > { %2588 = vst [vmem:[#allocation1 + $0x6] ss:$9 sm:$0xff] %v9334_v16  ;;  %v9362_v16 = vld [vmem:[%s11269_s19 + $0x30] sm:$0x1] }
 0x3e7   : > { %2589 = vst [vmem:[#allocation1 + $0x7] ss:$9 sm:$0xff] %v9335_v17  ;;  %v9363_v17 = vld [vmem:[%s11269_s19 + $0x31] sm:$0x1] }
 0x3ee   : > { %v2590_v24 = vld [vmem:[#allocation1] sm:$0xff] }
 0x3ef   : > { %2863 = vrot.lane.b32.xlu0 %v2590_v24, %s11218_s21  ;;  %2591 = vst [vmem:[#allocation1] ss:$9 sm:$0xff] %v9336_v19  ;;  %v9364_v19 = vld [vmem:[%s11269_s19 + $0x32] sm:$0x1]  ;;  %v9366_v24 = vld [vmem:[%s11269_s19 + $0x34] sm:$0x1] }
 0x3f0   : > { %2592 = vst [vmem:[#allocation1 + $0x1] ss:$9 sm:$0xff] %v9337_v22  ;;  %v9365_v22 = vld [vmem:[%s11269_s19 + $0x33] sm:$0x1] }
 0x3f1   : > { %2593 = vst [vmem:[#allocation1 + $0x2] ss:$9 sm:$0xff] %v9338_v26  ;;  %v9367_v26 = vld [vmem:[%s11269_s19 + $0x35] sm:$0x1] }
 0x3f2   : > { %2594 = vst [vmem:[#allocation1 + $0x3] ss:$9 sm:$0xff] %v9339_v28  ;;  %v9368_v28 = vld [vmem:[%s11269_s19 + $0x38] sm:$0x1] }
 0x3f3   : > { %2595 = vst [vmem:[#allocation1 + $0x4] ss:$9 sm:$0xff] %v9340_v32  ;;  %v9369_v32 = vld [vmem:[%s11269_s19 + $0x39] sm:$0x1] }
 0x3f4   : > { %2596 = vst [vmem:[#allocation1 + $0x5] ss:$9 sm:$0xff] %v9341_v33  ;;  %v9370_v33 = vld [vmem:[%s11269_s19 + $0x3a] sm:$0x1] }
 0x3f5   : > { %2597 = vst [vmem:[#allocation1 + $0x6] ss:$9 sm:$0xff] %v9342_v34 }
 0x3f6   : > { %2598 = vst [vmem:[#allocation1 + $0x7] ss:$9 sm:$0xff] %v9343_v35  ;;  %v9371_v35 = vld [vmem:[%s11269_s19 + $0x3b] sm:$0x1] }
 0x3fd   : > { %v2599_v45 = vld [vmem:[#allocation1] sm:$0xff] }
 0x3fe   : > { %2600 = vst [vmem:[#allocation1] ss:$9 sm:$0xff] %v9344_v36  ;;  %2865 = vrot.lane.b32.xlu1 %v2599_v45, %s11218_s21  ;;  %v9372_v36 = vld [vmem:[%s11269_s19 + $0x3c] sm:$0x1]  ;;  %v9375_v45 = vld [vmem:[%s11269_s19 + $0x3f] sm:$0x1] }
 0x3ff   : > { %2601 = vst [vmem:[#allocation1 + $0x1] ss:$9 sm:$0xff] %v9345_v40  ;;  %v9373_v40 = vld [vmem:[%s11269_s19 + $0x3d] sm:$0x1] }
 0x400   : > { %2602 = vst [vmem:[#allocation1 + $0x2] ss:$9 sm:$0xff] %v9346_v44  ;;  %v9374_v44 = vld [vmem:[%s11269_s19 + $0x3e] sm:$0x1] }
 0x401   : > { %2603 = vst [vmem:[#allocation1 + $0x3] ss:$9 sm:$0xff] %v9347_v46  ;;  %v9376_v46 = vld [vmem:[%s11269_s19 + $0x40] sm:$0x1] }
 0x402   : > { %2604 = vst [vmem:[#allocation1 + $0x4] ss:$9 sm:$0xff] %v9348_v48  ;;  %v9377_v48 = vld [vmem:[%s11269_s19 + $0x41] sm:$0x1] }
 0x403   : > { %2605 = vst [vmem:[#allocation1 + $0x5] ss:$9 sm:$0xff] %v9349_v49  ;;  %v9378_v49 = vld [vmem:[%s11269_s19 + $0x42] sm:$0x1] }
 0x404   : > { %2606 = vst [vmem:[#allocation1 + $0x6] ss:$9 sm:$0xff] %v9350_v52 }
 0x405   : > { %2607 = vst [vmem:[#allocation1 + $0x7] ss:$9 sm:$0xff] %v9351_v55  ;;  %v9379_v55 = vld [vmem:[%s11269_s19 + $0x43] sm:$0x1] }
 0x40c   : > { %v2608_v62 = vld [vmem:[#allocation1] sm:$0xff] }
 0x40d   : > { %2609 = vst [vmem:[#allocation1] ss:$9 sm:$0xff] %v9352_v58  ;;  %2867 = vrot.lane.b32.xlu2 %v2608_v62, %s11218_s21  ;;  %v9380_v58 = vld [vmem:[%s11269_s19 + $0x44] sm:$0x1]  ;;  %v9383_v62 = vld [vmem:[%s11269_s19 + $0x47] sm:$0x1] }
 0x40e   : > { %2610 = vst [vmem:[#allocation1 + $0x1] ss:$9 sm:$0xff] %v9353_v59  ;;  %v9381_v59 = vld [vmem:[%s11269_s19 + $0x45] sm:$0x1] }
 0x40f   : > { %2611 = vst [vmem:[#allocation1 + $0x2] ss:$9 sm:$0xff] %v9354_v60  ;;  %v9382_v60 = vld [vmem:[%s11269_s19 + $0x46] sm:$0x1] }
 0x410   : > { %2612 = vst [vmem:[#allocation1 + $0x3] ss:$9 sm:$0xff] %v9355_v2  ;;  %v9384_v2 = vld [vmem:[%s11269_s19 + $0x4a] sm:$0x1] }
 0x411   : > { %2613 = vst [vmem:[#allocation1 + $0x4] ss:$9 sm:$0xff] %v9356_v3  ;;  %v9385_v3 = vld [vmem:[%s11269_s19 + $0x4b] sm:$0x1] }
 0x412   : > { %2614 = vst [vmem:[#allocation1 + $0x5] ss:$9 sm:$0xff] %v9357_v4 }
 0x413   : > { %2615 = vst [vmem:[#allocation1 + $0x6] ss:$9 sm:$0xff] %v9358_v5  ;;  %v9386_v5 = vld [vmem:[%s11269_s19 + $0x4c] sm:$0x1] }
 0x414   : > { %2616 = vst [vmem:[#allocation1 + $0x7] ss:$9 sm:$0xff] %v9359_v8  ;;  %v9387_v8 = vld [vmem:[%s11269_s19 + $0x4d] sm:$0x1] }
 0x41b   : > { %v2617_v15 = vld [vmem:[#allocation1] sm:$0xff] }
 0x41c   : > { %2869 = vrot.lane.b32.xlu0 %v2617_v15, %s11218_s21  ;;  %2618 = vst [vmem:[#allocation1] ss:$9 sm:$0xff] %v9360_v9  ;;  %v9388_v9 = vld [vmem:[%s11269_s19 + $0x4e] sm:$0x1]  ;;  %v9390_v15 = vld [vmem:[%s11269_s19 + $0x50] sm:$0x1] }
 0x41d   : > { %2619 = vst [vmem:[#allocation1 + $0x1] ss:$9 sm:$0xff] %v9361_v12  ;;  %v9389_v12 = vld [vmem:[%s11269_s19 + $0x4f] sm:$0x1] }
 0x41e   : > { %2620 = vst [vmem:[#allocation1 + $0x2] ss:$9 sm:$0xff] %v9362_v16  ;;  %v9391_v16 = vld [vmem:[%s11269_s19 + $0x51] sm:$0x1] }
 0x41f   : > { %2621 = vst [vmem:[#allocation1 + $0x3] ss:$9 sm:$0xff] %v9363_v17  ;;  %v9392_v17 = vld [vmem:[%s11269_s19 + $0x52] sm:$0x1] }
 0x420   : > { %2622 = vst [vmem:[#allocation1 + $0x4] ss:$9 sm:$0xff] %v9364_v19  ;;  %v9393_v19 = vld [vmem:[%s11269_s19 + $0x53] sm:$0x1] }
 0x421   : > { %2623 = vst [vmem:[#allocation1 + $0x5] ss:$9 sm:$0xff] %v9365_v22  ;;  %v9394_v22 = vld [vmem:[%s11269_s19 + $0x54] sm:$0x1] }
 0x422   : > { %2624 = vst [vmem:[#allocation1 + $0x6] ss:$9 sm:$0xff] %v9366_v24 }
 0x423   : > { %2625 = vst [vmem:[#allocation1 + $0x7] ss:$9 sm:$0xff] %v9367_v26  ;;  %v9395_v26 = vld [vmem:[%s11269_s19 + $0x55] sm:$0x1] }
 0x42a   : > { %v2626_v34 = vld [vmem:[#allocation1] sm:$0xff] }
 0x42b   : > { %2627 = vst [vmem:[#allocation1] ss:$9 sm:$0xff] %v9368_v28  ;;  %2871 = vrot.lane.b32.xlu1 %v2626_v34, %s11218_s21  ;;  %v9396_v28 = vld [vmem:[%s11269_s19 + $0x56] sm:$0x1]  ;;  %v9399_v34 = vld [vmem:[%s11269_s19 + $0x59] sm:$0x1] }
 0x42c   : > { %2628 = vst [vmem:[#allocation1 + $0x1] ss:$9 sm:$0xff] %v9369_v32  ;;  %v9397_v32 = vld [vmem:[%s11269_s19 + $0x57] sm:$0x1] }
 0x42d   : > { %2629 = vst [vmem:[#allocation1 + $0x2] ss:$9 sm:$0xff] %v9370_v33  ;;  %v9398_v33 = vld [vmem:[%s11269_s19 + $0x58] sm:$0x1] }
 0x42e   : > { %2630 = vst [vmem:[#allocation1 + $0x3] ss:$9 sm:$0xff] %v9371_v35  ;;  %v9400_v35 = vld [vmem:[%s11269_s19 + $0x5c] sm:$0x1] }
 0x42f   : > { %2631 = vst [vmem:[#allocation1 + $0x4] ss:$9 sm:$0xff] %v9372_v36  ;;  %v9401_v36 = vld [vmem:[%s11269_s19 + $0x5d] sm:$0x1] }
 0x430   : > { %2632 = vst [vmem:[#allocation1 + $0x5] ss:$9 sm:$0xff] %v9373_v40  ;;  %v9402_v40 = vld [vmem:[%s11269_s19 + $0x5e] sm:$0x1] }
 0x431   : > { %2633 = vst [vmem:[#allocation1 + $0x6] ss:$9 sm:$0xff] %v9374_v44 }
 0x432   : > { %2634 = vst [vmem:[#allocation1 + $0x7] ss:$9 sm:$0xff] %v9375_v45  ;;  %v9406_v45 = vld [vmem:[%s11269_s19 + $0x62] sm:$0x1] }
 0x439   : > { %v2635_v52 = vld [vmem:[#allocation1] sm:$0xff] }
 0x43a   : > { %2636 = vst [vmem:[#allocation1] ss:$9 sm:$0xff] %v9376_v46  ;;  %2873 = vrot.lane.b32.xlu2 %v2635_v52, %s11218_s21  ;;  %v9429_v46 = vld [vmem:[%s11269_s19 + $0x7b] sm:$0x1]  ;;  %v9432_v52 = vld [vmem:[%s11269_s19 + $0x80] sm:$0x1] }
 0x43b   : > { %2637 = vst [vmem:[#allocation1 + $0x1] ss:$9 sm:$0xff] %v9377_v48  ;;  %v9430_v48 = vld [vmem:[%s11269_s19 + $0x7c] sm:$0x1] }
 0x43c   : > { %2638 = vst [vmem:[#allocation1 + $0x2] ss:$9 sm:$0xff] %v9378_v49  ;;  %v9431_v49 = vld [vmem:[%s11269_s19 + $0x7d] sm:$0x1] }
 0x43d   : > { %2639 = vst [vmem:[#allocation1 + $0x3] ss:$9 sm:$0xff] %v9379_v55  ;;  %v9433_v55 = vld [vmem:[%s11269_s19 + $0x81] sm:$0x1] }
 0x43e   : > { %2640 = vst [vmem:[#allocation1 + $0x4] ss:$9 sm:$0xff] %v9380_v58 }
 0x43f   : > { %2641 = vst [vmem:[#allocation1 + $0x5] ss:$9 sm:$0xff] %v9381_v59  ;;  %v9434_v59 = vld [vmem:[%s11269_s19 + $0x82] sm:$0x1] }
 0x440   : > { %2642 = vst [vmem:[#allocation1 + $0x6] ss:$9 sm:$0xff] %v9382_v60  ;;  %v9435_v60 = vld [vmem:[%s11269_s19 + $0x83] sm:$0x1] }
 0x441   : > { %2643 = vst [vmem:[#allocation1 + $0x7] ss:$9 sm:$0xff] %v9383_v62  ;;  %v9436_v62 = vld [vmem:[%s11269_s19 + $0x84] sm:$0x1] }
 0x448   : > { %v2644_v4 = vld [vmem:[#allocation1] sm:$0xff] }
 0x449   : > { %2875 = vrot.lane.b32.xlu0 %v2644_v4, %s11218_s21  ;;  %2645 = vst [vmem:[#allocation1] ss:$9 sm:$0xff] %v9384_v2  ;;  %v9437_v2 = vld [vmem:[%s11269_s19 + $0x85] sm:$0x1]  ;;  %v9439_v4 = vld [vmem:[%s11269_s19 + $0x87] sm:$0x1] }
 0x44a   : > { %2646 = vst [vmem:[#allocation1 + $0x1] ss:$9 sm:$0xff] %v9385_v3  ;;  %v9438_v3 = vld [vmem:[%s11269_s19 + $0x86] sm:$0x1] }
 0x44b   : > { %2647 = vst [vmem:[#allocation1 + $0x2] ss:$9 sm:$0xff] %v9386_v5  ;;  %v9440_v5 = vld [vmem:[%s11269_s19 + $0x88] sm:$0x1] }
 0x44c   : > { %2648 = vst [vmem:[#allocation1 + $0x3] ss:$9 sm:$0xff] %v9387_v8  ;;  %v9441_v8 = vld [vmem:[%s11269_s19 + $0x89] sm:$0x1] }
 0x44d   : > { %2649 = vst [vmem:[#allocation1 + $0x4] ss:$9 sm:$0xff] %v9388_v9  ;;  %v1936_v9 = vpop.permute.xlu0 %1935 }
 0x44e   : > { %2650 = vst [vmem:[#allocation1 + $0x5] ss:$9 sm:$0xff] %v9389_v12  ;;  %v9442_v12 = vld [vmem:[%s11269_s19 + $0x8a] sm:$0x1] }
 0x44f   : > { %2651 = vst [vmem:[#allocation1 + $0x6] ss:$9 sm:$0xff] %v9390_v15 }
 0x450   : > { %2652 = vst [vmem:[#allocation1 + $0x7] ss:$9 sm:$0xff] %v9391_v16  ;;  %v9443_v16 = vld [vmem:[%s11269_s19 + $0x8b] sm:$0x1] }
 0x451   : > { %2026 = vst.msk [vmem:[#allocation2 + $0x30] sm:$0xff] %vm2019_vm1, %v1936_v9  ;;  %v9494_v9 = vld [vmem:[%s11269_s19 + $0xc4] sm:$0x1] }
 0x457   : > { %v2653_v24 = vld [vmem:[#allocation1] sm:$0xff] }
 0x458   : > { %2654 = vst [vmem:[#allocation1] ss:$9 sm:$0xff] %v9392_v17  ;;  %2877 = vrot.lane.b32.xlu1 %v2653_v24, %s11218_s21  ;;  %v9444_v17 = vld [vmem:[%s11269_s19 + $0x8c] sm:$0x1]  ;;  %v9447_v24 = vld [vmem:[%s11269_s19 + $0x8f] sm:$0x1] }
 0x459   : > { %2655 = vst [vmem:[#allocation1 + $0x1] ss:$9 sm:$0xff] %v9393_v19  ;;  %v9445_v19 = vld [vmem:[%s11269_s19 + $0x8d] sm:$0x1] }
 0x45a   : > { %2656 = vst [vmem:[#allocation1 + $0x2] ss:$9 sm:$0xff] %v9394_v22  ;;  %v9446_v22 = vld [vmem:[%s11269_s19 + $0x8e] sm:$0x1] }
 0x45b   : > { %2657 = vst [vmem:[#allocation1 + $0x3] ss:$9 sm:$0xff] %v9395_v26  ;;  %v1940_v26 = vpop.permute.xlu2 %1939 }
 0x45c   : > { %2658 = vst [vmem:[#allocation1 + $0x4] ss:$9 sm:$0xff] %v9396_v28  ;;  %v9448_v28 = vld [vmem:[%s11269_s19 + $0x92] sm:$0x1] }
 0x45d   : > { %2659 = vst [vmem:[#allocation1 + $0x5] ss:$9 sm:$0xff] %v9397_v32  ;;  %v9449_v32 = vld [vmem:[%s11269_s19 + $0x93] sm:$0x1] }
 0x45e   : > { %2660 = vst [vmem:[#allocation1 + $0x6] ss:$9 sm:$0xff] %v9398_v33  ;;  %v9450_v33 = vld [vmem:[%s11269_s19 + $0x94] sm:$0x1] }
 0x45f   : > { %2661 = vst [vmem:[#allocation1 + $0x7] ss:$9 sm:$0xff] %v9399_v34 }
 0x460   : > { %2028 = vst.msk [vmem:[#allocation2 + $0x40] sm:$0xff] %vm2019_vm1, %v1940_v26  ;;  %v9499_v26 = vld [vmem:[%s11269_s19 + $0xcb] sm:$0x1] }
 0x466   : > { %v2662_v44 = vld [vmem:[#allocation1] sm:$0xff] }
 0x467   : > { %2663 = vst [vmem:[#allocation1] ss:$9 sm:$0xff] %v9400_v35  ;;  %2879 = vrot.lane.b32.xlu2 %v2662_v44, %s11218_s21  ;;  %v9452_v35 = vld [vmem:[%s11269_s19 + $0x96] sm:$0x1]  ;;  %v9455_v44 = vld [vmem:[%s11269_s19 + $0x99] sm:$0x1] }
 0x468   : > { %2664 = vst [vmem:[#allocation1 + $0x1] ss:$9 sm:$0xff] %v9401_v36  ;;  %v9453_v36 = vld [vmem:[%s11269_s19 + $0x97] sm:$0x1] }
 0x469   : > { %2665 = vst [vmem:[#allocation1 + $0x2] ss:$9 sm:$0xff] %v9402_v40  ;;  %v9454_v40 = vld [vmem:[%s11269_s19 + $0x98] sm:$0x1] }
 0x46a   : > { %2666 = vst [vmem:[#allocation1 + $0x3] ss:$9 sm:$0xff] %v9403_v20  ;;  %v9456_v20 = vld [vmem:[%s11269_s19 + $0x9a] sm:$0x1] }
 0x46b   : > { %2667 = vst [vmem:[#allocation1 + $0x4] ss:$9 sm:$0xff] %v9404_v29  ;;  %v9457_v29 = vld [vmem:[%s11269_s19 + $0x9b] sm:$0x1] }
 0x46c   : > { %2668 = vst [vmem:[#allocation1 + $0x5] ss:$9 sm:$0xff] %v9405_v38 }
 0x46d   : > { %2669 = vst [vmem:[#allocation1 + $0x6] ss:$9 sm:$0xff] %v9406_v45  ;;  %v9458_v45 = vld [vmem:[%s11269_s19 + $0x9c] sm:$0x1] }
 0x46e   : > { %2670 = vst [vmem:[#allocation1 + $0x7] ss:$9 sm:$0xff] %v9407_v47  ;;  %v9459_v47 = vld [vmem:[%s11269_s19 + $0x9d] sm:$0x1] }
 0x475   : > { %v2671_v56 = vld [vmem:[#allocation1] sm:$0xff] }
 0x476   : > { %2881 = vrot.lane.b32.xlu0 %v2671_v56, %s11218_s21  ;;  %2672 = vst [vmem:[#allocation1] ss:$9 sm:$0xff] %v9408_v1  ;;  %v9460_v56 = vld [vmem:[%s11269_s19 + $0x9e] sm:$0x1]  ;;  %v9461_v1 = vld [vmem:[%s11269_s19 + $0x9f] sm:$0x1] }
 0x477   : > { %2673 = vst [vmem:[#allocation1 + $0x1] ss:$9 sm:$0xff] %v9409_v21  ;;  %v9463_v21 = vld [vmem:[%s11269_s19 + $0xa1] sm:$0x1] }
 0x478   : > { %2674 = vst [vmem:[#allocation1 + $0x2] ss:$9 sm:$0xff] %v9410_v31  ;;  %v9464_v31 = vld [vmem:[%s11269_s19 + $0xa4] sm:$0x1] }
 0x479   : > { %2675 = vst [vmem:[#allocation1 + $0x3] ss:$9 sm:$0xff] %v9411_v41  ;;  %v9465_v41 = vld [vmem:[%s11269_s19 + $0xa5] sm:$0x1] }
 0x47a   : > { %2676 = vst [vmem:[#allocation1 + $0x4] ss:$9 sm:$0xff] %v9412_v51  ;;  %v1942_v51 = vpop.permute.xlu0 %1941 }
 0x47b   : > { %2677 = vst [vmem:[#allocation1 + $0x5] ss:$9 sm:$0xff] %v9413_v61  ;;  %v9466_v61 = vld [vmem:[%s11269_s19 + $0xa6] sm:$0x1] }
 0x47c   : > { %2678 = vst [vmem:[#allocation1 + $0x6] ss:$9 sm:$0xff] %v9414_v7 }
 0x47d   : > { %2679 = vst [vmem:[#allocation1 + $0x7] ss:$9 sm:$0xff] %v9415_v18  ;;  %v9467_v18 = vld [vmem:[%s11269_s19 + $0xa7] sm:$0x1] }
 0x47e   : > { %2029 = vst.msk [vmem:[#allocation2 + $0x48] sm:$0xff] %vm2019_vm1, %v1942_v51  ;;  %v9517_v51 = vld [vmem:[%s11269_s19 + $0xdf] sm:$0x1] }
 0x484   : > { %v2680_v13 = vld [vmem:[#allocation1] sm:$0xff] }
 0x485   : > { %2681 = vst [vmem:[#allocation1] ss:$9 sm:$0xff] %v9416_v30  ;;  %2883 = vrot.lane.b32.xlu1 %v2680_v13, %s11218_s21  ;;  %v9468_v30 = vld [vmem:[%s11269_s19 + $0xa8] sm:$0x1]  ;;  %v1946_v13 = vpop.permute.xlu2 %1945 }
 0x486   : > { %2682 = vst [vmem:[#allocation1 + $0x1] ss:$9 sm:$0xff] %v9417_v42  ;;  %v9469_v42 = vld [vmem:[%s11269_s19 + $0xa9] sm:$0x1] }
 0x487   : > { %2683 = vst [vmem:[#allocation1 + $0x2] ss:$9 sm:$0xff] %v9418_v0  ;;  %v9471_v0 = vld [vmem:[%s11269_s19 + $0xab] sm:$0x1] }
 0x488   : > { %2684 = vst [vmem:[#allocation1 + $0x3] ss:$9 sm:$0xff] %v9419_v25  ;;  %v9472_v25 = vld [vmem:[%s11269_s19 + $0xac] sm:$0x1] }
 0x489   : > { %2685 = vst [vmem:[#allocation1 + $0x4] ss:$9 sm:$0xff] %v9420_v37  ;;  %v9473_v37 = vld [vmem:[%s11269_s19 + $0xad] sm:$0x1] }
 0x48a   : > { %2686 = vst [vmem:[#allocation1 + $0x5] ss:$9 sm:$0xff] %v9421_v50  ;;  %v9474_v50 = vld [vmem:[%s11269_s19 + $0xae] sm:$0x1] }
 0x48b   : > { %2687 = vst [vmem:[#allocation1 + $0x6] ss:$9 sm:$0xff] %v9422_v63 }
 0x48c   : > { %2688 = vst [vmem:[#allocation1 + $0x7] ss:$9 sm:$0xff] %v9423_v14  ;;  %v9475_v14 = vld [vmem:[%s11269_s19 + $0xaf] sm:$0x1] }
 0x48d   : > { %2031 = vst.msk [vmem:[#allocation2 + $0x58] sm:$0xff] %vm2019_vm1, %v1946_v13 }
 0x493   : > { %v2689_v23 = vld [vmem:[#allocation1] sm:$0xff] }
 0x494   : > { %2690 = vst [vmem:[#allocation1] ss:$9 sm:$0xff] %v9424_v43  ;;  %2885 = vrot.lane.b32.xlu2 %v2689_v23, %s11218_s21  ;;  %v9477_v43 = vld [vmem:[%s11269_s19 + $0xb1] sm:$0x1]  ;;  %v9480_v23 = vld [vmem:[%s11269_s19 + $0xb6] sm:$0x1] }
 0x495   : > { %2691 = vst [vmem:[#allocation1 + $0x1] ss:$9 sm:$0xff] %v9425_v57  ;;  %v9478_v57 = vld [vmem:[%s11269_s19 + $0xb2] sm:$0x1] }
 0x496   : > { %2692 = vst [vmem:[#allocation1 + $0x2] ss:$9 sm:$0xff] %v9426_v6  ;;  %v9479_v6 = vld [vmem:[%s11269_s19 + $0xb3] sm:$0x1] }
 0x497   : > { %2693 = vst [vmem:[#allocation1 + $0x3] ss:$9 sm:$0xff] %v9427_v39  ;;  %v9481_v39 = vld [vmem:[%s11269_s19 + $0xb7] sm:$0x1] }
 0x498   : > { %2694 = vst [vmem:[#allocation1 + $0x4] ss:$9 sm:$0xff] %v9428_v54 }
 0x499   : > { %2695 = vst [vmem:[#allocation1 + $0x5] ss:$9 sm:$0xff] %v9429_v46  ;;  %v9482_v46 = vld [vmem:[%s11269_s19 + $0xb8] sm:$0x1] }
 0x49a   : > { %2696 = vst [vmem:[#allocation1 + $0x6] ss:$9 sm:$0xff] %v9430_v48  ;;  %v9483_v48 = vld [vmem:[%s11269_s19 + $0xb9] sm:$0x1] }
 0x49b   : > { %2697 = vst [vmem:[#allocation1 + $0x7] ss:$9 sm:$0xff] %v9431_v49  ;;  %v9484_v49 = vld [vmem:[%s11269_s19 + $0xba] sm:$0x1] }
 0x4a2   : > { %v2698_v58 = vld [vmem:[#allocation1] sm:$0xff] }
 0x4a3   : > { %2887 = vrot.lane.b32.xlu0 %v2698_v58, %s11218_s21  ;;  %2699 = vst [vmem:[#allocation1] ss:$9 sm:$0xff] %v9432_v52  ;;  %v9485_v52 = vld [vmem:[%s11269_s19 + $0xbb] sm:$0x1]  ;;  %v9487_v58 = vld [vmem:[%s11269_s19 + $0xbd] sm:$0x1] }
 0x4a4   : > { %2700 = vst [vmem:[#allocation1 + $0x1] ss:$9 sm:$0xff] %v9433_v55  ;;  %v9486_v55 = vld [vmem:[%s11269_s19 + $0xbc] sm:$0x1] }
 0x4a5   : > { %2701 = vst [vmem:[#allocation1 + $0x2] ss:$9 sm:$0xff] %v9434_v59  ;;  %v9488_v59 = vld [vmem:[%s11269_s19 + $0xbe] sm:$0x1] }
 0x4a6   : > { %2702 = vst [vmem:[#allocation1 + $0x3] ss:$9 sm:$0xff] %v9435_v60  ;;  %v9489_v60 = vld [vmem:[%s11269_s19 + $0xbf] sm:$0x1] }
 0x4a7   : > { %2703 = vst [vmem:[#allocation1 + $0x4] ss:$9 sm:$0xff] %v9436_v62  ;;  %v1928_v62 = vpop.permute.xlu1 %1927 }
 0x4a8   : > { %2704 = vst [vmem:[#allocation1 + $0x5] ss:$9 sm:$0xff] %v9437_v2  ;;  %v9490_v2 = vld [vmem:[%s11269_s19 + $0xc0] sm:$0x1] }
 0x4a9   : > { %2705 = vst [vmem:[#allocation1 + $0x6] ss:$9 sm:$0xff] %v9438_v3 }
 0x4aa   : > { %2706 = vst [vmem:[#allocation1 + $0x7] ss:$9 sm:$0xff] %v9439_v4  ;;  %v9491_v4 = vld [vmem:[%s11269_s19 + $0xc1] sm:$0x1] }
 0x4ab   : > { %2022 = vst.msk [vmem:[#allocation2 + $0x10] sm:$0xff] %vm2019_vm1, %v1928_v62  ;;  %v9540_v62 = vld [vmem:[%s11269_s19 + $0xf8] sm:$0x1] }
 0x4b1   : > { %v2707_v15 = vld [vmem:[#allocation1] sm:$0xff] }
 0x4b2   : > { %2708 = vst [vmem:[#allocation1] ss:$9 sm:$0xff] %v9440_v5  ;;  %2889 = vrot.lane.b32.xlu1 %v2707_v15, %s11218_s21  ;;  %v9492_v5 = vld [vmem:[%s11269_s19 + $0xc2] sm:$0x1]  ;;  %v1948_v15 = vpop.permute.xlu0 %1947 }
 0x4b3   : > { %2709 = vst [vmem:[#allocation1 + $0x1] ss:$9 sm:$0xff] %v9441_v8  ;;  %v9493_v8 = vld [vmem:[%s11269_s19 + $0xc3] sm:$0x1] }
 0x4b4   : > { %2710 = vst [vmem:[#allocation1 + $0x2] ss:$9 sm:$0xff] %v9442_v12  ;;  %v9495_v12 = vld [vmem:[%s11269_s19 + $0xc5] sm:$0x1] }
 0x4b5   : > { %2711 = vst [vmem:[#allocation1 + $0x3] ss:$9 sm:$0xff] %v9443_v16  ;;  %v1952_v16 = vpop.permute.xlu2 %1951 }
 0x4b6   : > { %2712 = vst [vmem:[#allocation1 + $0x4] ss:$9 sm:$0xff] %v9444_v17  ;;  %v9496_v17 = vld [vmem:[%s11269_s19 + $0xc8] sm:$0x1] }
 0x4b7   : > { %2713 = vst [vmem:[#allocation1 + $0x5] ss:$9 sm:$0xff] %v9445_v19  ;;  %v9497_v19 = vld [vmem:[%s11269_s19 + $0xc9] sm:$0x1] }
 0x4b8   : > { %2714 = vst [vmem:[#allocation1 + $0x6] ss:$9 sm:$0xff] %v9446_v22  ;;  %v9498_v22 = vld [vmem:[%s11269_s19 + $0xca] sm:$0x1] }
 0x4b9   : > { %2715 = vst [vmem:[#allocation1 + $0x7] ss:$9 sm:$0xff] %v9447_v24 }
 0x4ba   : > { %2032 = vst.msk [vmem:[#allocation2 + $0x60] sm:$0xff] %vm2019_vm1, %v1948_v15  ;;  %v9546_v15 = vld [vmem:[%s11269_s19 + $0x100] sm:$0x1] }
 0x4bb   : > { %2034 = vst.msk [vmem:[#allocation2 + $0x70] sm:$0xff] %vm2019_vm1, %v1952_v16 }
 0x4c0   : > { %v2716_v34 = vld [vmem:[#allocation1] sm:$0xff] }
 0x4c1   : > { %2717 = vst [vmem:[#allocation1] ss:$9 sm:$0xff] %v9448_v28  ;;  %2891 = vrot.lane.b32.xlu2 %v2716_v34, %s11218_s21  ;;  %v9500_v28 = vld [vmem:[%s11269_s19 + $0xcc] sm:$0x1]  ;;  %v9503_v34 = vld [vmem:[%s11269_s19 + $0xcf] sm:$0x1] }
 0x4c2   : > { %2718 = vst [vmem:[#allocation1 + $0x1] ss:$9 sm:$0xff] %v9449_v32  ;;  %v9501_v32 = vld [vmem:[%s11269_s19 + $0xcd] sm:$0x1] }
 0x4c3   : > { %2719 = vst [vmem:[#allocation1 + $0x2] ss:$9 sm:$0xff] %v9450_v33  ;;  %v9502_v33 = vld [vmem:[%s11269_s19 + $0xce] sm:$0x1] }
 0x4c4   : > { %2720 = vst [vmem:[#allocation1 + $0x3] ss:$9 sm:$0xff] %v9451_v11  ;;  %v9504_v11 = vld [vmem:[%s11269_s19 + $0xd0] sm:$0x1] }
 0x4c5   : > { %2721 = vst [vmem:[#allocation1 + $0x4] ss:$9 sm:$0xff] %v9452_v35  ;;  %v9505_v35 = vld [vmem:[%s11269_s19 + $0xd1] sm:$0x1] }
 0x4c6   : > { %2722 = vst [vmem:[#allocation1 + $0x5] ss:$9 sm:$0xff] %v9453_v36 }
 0x4c7   : > { %2723 = vst [vmem:[#allocation1 + $0x6] ss:$9 sm:$0xff] %v9454_v40  ;;  %v9506_v40 = vld [vmem:[%s11269_s19 + $0xd2] sm:$0x1] }
 0x4c8   : > { %2724 = vst [vmem:[#allocation1 + $0x7] ss:$9 sm:$0xff] %v9455_v44  ;;  %v9507_v44 = vld [vmem:[%s11269_s19 + $0xd3] sm:$0x1] }
 0x4cf   : > { %v2725_v38 = vld [vmem:[#allocation1] sm:$0xff] }
 0x4d0   : > { %2893 = vrot.lane.b32.xlu0 %v2725_v38, %s11218_s21  ;;  %2726 = vst [vmem:[#allocation1] ss:$9 sm:$0xff] %v9456_v20  ;;  %v9508_v20 = vld [vmem:[%s11269_s19 + $0xd4] sm:$0x1]  ;;  %v9510_v38 = vld [vmem:[%s11269_s19 + $0xd6] sm:$0x1] }
 0x4d1   : > { %2727 = vst [vmem:[#allocation1 + $0x1] ss:$9 sm:$0xff] %v9457_v29  ;;  %v9509_v29 = vld [vmem:[%s11269_s19 + $0xd5] sm:$0x1] }
 0x4d2   : > { %2728 = vst [vmem:[#allocation1 + $0x2] ss:$9 sm:$0xff] %v9458_v45  ;;  %v9511_v45 = vld [vmem:[%s11269_s19 + $0xd7] sm:$0x1] }
 0x4d3   : > { %2729 = vst [vmem:[#allocation1 + $0x3] ss:$9 sm:$0xff] %v9459_v47  ;;  %v9512_v47 = vld [vmem:[%s11269_s19 + $0xda] sm:$0x1] }
 0x4d4   : > { %2730 = vst [vmem:[#allocation1 + $0x4] ss:$9 sm:$0xff] %v9460_v56  ;;  %v9513_v56 = vld [vmem:[%s11269_s19 + $0xdb] sm:$0x1] }
 0x4d5   : > { %2731 = vst [vmem:[#allocation1 + $0x5] ss:$9 sm:$0xff] %v9461_v1  ;;  %v1930_v1 = vpop.permute.xlu1 %1929 }
 0x4d6   : > { %2732 = vst [vmem:[#allocation1 + $0x6] ss:$9 sm:$0xff] %v9462_v10  ;;  %v9514_v10 = vld [vmem:[%s11269_s19 + $0xdc] sm:$0x1] }
 0x4d7   : > { %2733 = vst [vmem:[#allocation1 + $0x7] ss:$9 sm:$0xff] %v9463_v21 }
 0x4d8   : > { %2023 = vst.msk [vmem:[#allocation2 + $0x18] sm:$0xff] %vm2019_vm1, %v1930_v1  ;;  %v9564_v1 = vld [vmem:[%s11269_s19 + $0x114] sm:$0x1] }
 0x4de   : > { %v2734_v7 = vld [vmem:[#allocation1] sm:$0xff] }
 0x4df   : > { %2735 = vst [vmem:[#allocation1] ss:$9 sm:$0xff] %v9464_v31  ;;  %2895 = vrot.lane.b32.xlu1 %v2734_v7, %s11218_s21  ;;  %v9515_v31 = vld [vmem:[%s11269_s19 + $0xdd] sm:$0x1]  ;;  %v9519_v7 = vld [vmem:[%s11269_s19 + $0xe1] sm:$0x1] }
 0x4e0   : > { %2736 = vst [vmem:[#allocation1 + $0x1] ss:$9 sm:$0xff] %v9465_v41  ;;  %v9516_v41 = vld [vmem:[%s11269_s19 + $0xde] sm:$0x1] }
 0x4e1   : > { %2737 = vst [vmem:[#allocation1 + $0x2] ss:$9 sm:$0xff] %v9466_v61  ;;  %v9518_v61 = vld [vmem:[%s11269_s19 + $0xe0] sm:$0x1] }
 0x4e2   : > { %2738 = vst [vmem:[#allocation1 + $0x3] ss:$9 sm:$0xff] %v9467_v18  ;;  %v1954_v18 = vpop.permute.xlu0 %1953 }
 0x4e3   : > { %2739 = vst [vmem:[#allocation1 + $0x4] ss:$9 sm:$0xff] %v9468_v30  ;;  %v1958_v30 = vpop.permute.xlu2 %1957 }
 0x4e4   : > { %2740 = vst [vmem:[#allocation1 + $0x5] ss:$9 sm:$0xff] %v9469_v42  ;;  %v9520_v42 = vld [vmem:[%s11269_s19 + $0xe2] sm:$0x1] }
 0x4e5   : > { %2741 = vst [vmem:[#allocation1 + $0x6] ss:$9 sm:$0xff] %v9470_v53  ;;  %v9521_v53 = vld [vmem:[%s11269_s19 + $0xe3] sm:$0x1] }
 0x4e6   : > { %2742 = vst [vmem:[#allocation1 + $0x7] ss:$9 sm:$0xff] %v9471_v0  ;;  %v9522_v0 = vld [vmem:[%s11269_s19 + $0xe4] sm:$0x1] }
 0x4e7   : > { %2035 = vst.msk [vmem:[#allocation2 + $0x78] sm:$0xff] %vm2019_vm1, %v1954_v18  ;;  %v9570_v18 = vld [vmem:[%s11269_s19 + $0x11a] sm:$0x1] }
 0x4e8   : > { %2037 = vst.msk [vmem:[#allocation2 + $0x88] sm:$0xff] %vm2019_vm1, %v1958_v30 }
 0x4ed   : > { %v2743_v63 = vld [vmem:[#allocation1] sm:$0xff] }
 0x4ee   : > { %2744 = vst [vmem:[#allocation1] ss:$9 sm:$0xff] %v9472_v25  ;;  %2897 = vrot.lane.b32.xlu2 %v2743_v63, %s11218_s21  ;;  %v9523_v25 = vld [vmem:[%s11269_s19 + $0xe5] sm:$0x1]  ;;  %v9526_v63 = vld [vmem:[%s11269_s19 + $0xe8] sm:$0x1] }
 0x4ef   : > { %2745 = vst [vmem:[#allocation1 + $0x1] ss:$9 sm:$0xff] %v9473_v37  ;;  %v9524_v37 = vld [vmem:[%s11269_s19 + $0xe6] sm:$0x1] }
 0x4f0   : > { %2746 = vst [vmem:[#allocation1 + $0x2] ss:$9 sm:$0xff] %v9474_v50  ;;  %v9525_v50 = vld [vmem:[%s11269_s19 + $0xe7] sm:$0x1] }
 0x4f1   : > { %2747 = vst [vmem:[#allocation1 + $0x3] ss:$9 sm:$0xff] %v9475_v14  ;;  %v9527_v14 = vld [vmem:[%s11269_s19 + $0xe9] sm:$0x1] }
 0x4f2   : > { %2748 = vst [vmem:[#allocation1 + $0x4] ss:$9 sm:$0xff] %v9476_v27  ;;  %v9528_v27 = vld [vmem:[%s11269_s19 + $0xec] sm:$0x1] }
 0x4f3   : > { %2749 = vst [vmem:[#allocation1 + $0x5] ss:$9 sm:$0xff] %v9477_v43  ;;  %v9529_v43 = vld [vmem:[%s11269_s19 + $0xed] sm:$0x1] }
 0x4f4   : > { %2750 = vst [vmem:[#allocation1 + $0x6] ss:$9 sm:$0xff] %v9478_v57 }
 0x4f5   : > { %2751 = vst [vmem:[#allocation1 + $0x7] ss:$9 sm:$0xff] %v9479_v6  ;;  %v9530_v6 = vld [vmem:[%s11269_s19 + $0xee] sm:$0x1] }
 0x4fc   : > { %v2752_v54 = vld [vmem:[#allocation1] sm:$0xff] }
 0x4fd   : > { %2899 = vrot.lane.b32.xlu0 %v2752_v54, %s11218_s21  ;;  %2753 = vst [vmem:[#allocation1] ss:$9 sm:$0xff] %v9480_v23  ;;  %v9531_v23 = vld [vmem:[%s11269_s19 + $0xef] sm:$0x1]  ;;  %v9533_v54 = vld [vmem:[%s11269_s19 + $0xf1] sm:$0x1] }
 0x4fe   : > { %2754 = vst [vmem:[#allocation1 + $0x1] ss:$9 sm:$0xff] %v9481_v39  ;;  %v9532_v39 = vld [vmem:[%s11269_s19 + $0xf0] sm:$0x1] }
 0x4ff   : > { %2755 = vst [vmem:[#allocation1 + $0x2] ss:$9 sm:$0xff] %v9482_v46  ;;  %v9534_v46 = vld [vmem:[%s11269_s19 + $0xf2] sm:$0x1] }
 0x500   : > { %2756 = vst [vmem:[#allocation1 + $0x3] ss:$9 sm:$0xff] %v9483_v48  ;;  %v9535_v48 = vld [vmem:[%s11269_s19 + $0xf3] sm:$0x1] }
 0x501   : > { %2757 = vst [vmem:[#allocation1 + $0x4] ss:$9 sm:$0xff] %v9484_v49  ;;  %v9536_v49 = vld [vmem:[%s11269_s19 + $0xf4] sm:$0x1] }
 0x502   : > { %2758 = vst [vmem:[#allocation1 + $0x5] ss:$9 sm:$0xff] %v9485_v52  ;;  %v9537_v52 = vld [vmem:[%s11269_s19 + $0xf5] sm:$0x1] }
 0x503   : > { %2759 = vst [vmem:[#allocation1 + $0x6] ss:$9 sm:$0xff] %v9486_v55  ;;  %v1938_v55 = vpop.permute.xlu1 %1937 }
 0x504   : > { %2760 = vst [vmem:[#allocation1 + $0x7] ss:$9 sm:$0xff] %v9487_v58  ;;  %v9538_v58 = vld [vmem:[%s11269_s19 + $0xf6] sm:$0x1] }
 0x505   : > { %2027 = vst.msk [vmem:[#allocation2 + $0x38] sm:$0xff] %vm2019_vm1, %v1938_v55  ;;  %v9588_v55 = vld [vmem:[%s11269_s19 + $0x1e] sm:$0x1] }
 0x50b   : > { %v2761_v3 = vld [vmem:[#allocation1] sm:$0xff] }
 0x50c   : > { %2762 = vst [vmem:[#allocation1] ss:$9 sm:$0xff] %v9488_v59  ;;  %2901 = vrot.lane.b32.xlu1 %v2761_v3, %s11218_s21  ;;  %v9542_v3 = vld [vmem:[%s11269_s19 + $0xfa] sm:$0x1] }
 0x50d   : > { %2763 = vst [vmem:[#allocation1 + $0x1] ss:$9 sm:$0xff] %v9489_v60  ;;  %v9539_v60 = vld [vmem:[%s11269_s19 + $0xf7] sm:$0x1] }
 0x50e   : > { %2764 = vst [vmem:[#allocation1 + $0x2] ss:$9 sm:$0xff] %v9490_v2  ;;  %v9541_v2 = vld [vmem:[%s11269_s19 + $0xf9] sm:$0x1] }
 0x50f   : > { %2765 = vst [vmem:[#allocation1 + $0x3] ss:$9 sm:$0xff] %v9491_v4  ;;  %v9543_v4 = vld [vmem:[%s11269_s19 + $0xfb] sm:$0x1] }
 0x510   : > { %2766 = vst [vmem:[#allocation1 + $0x4] ss:$9 sm:$0xff] %v9492_v5  ;;  %v1960_v5 = vpop.permute.xlu0 %1959 }
 0x511   : > { %2767 = vst [vmem:[#allocation1 + $0x5] ss:$9 sm:$0xff] %v9493_v8  ;;  %v1964_v8 = vpop.permute.xlu2 %1963 }
 0x512   : > { %2768 = vst [vmem:[#allocation1 + $0x6] ss:$9 sm:$0xff] %v9494_v9  ;;  %v9544_v9 = vld [vmem:[%s11269_s19 + $0xfe] sm:$0x1] }
 0x513   : > { %2769 = vst [vmem:[#allocation1 + $0x7] ss:$9 sm:$0xff] %v9495_v12  ;;  %v9545_v12 = vld [vmem:[%s11269_s19 + $0xff] sm:$0x1] }
 0x514   : > { %2038 = vst.msk [vmem:[#allocation2 + $0x90] sm:$0xff] %vm2019_vm1, %v1960_v5  ;;  %v9594_v5 = vld [vmem:[%s11269_s19 + $0x26] sm:$0x1] }
 0x515   : > { %2040 = vst.msk [vmem:[#allocation2 + $0xa0] sm:$0xff] %vm2019_vm1, %v1964_v8 }
 0x51a   : > { %v2770_v24 = vld [vmem:[#allocation1] sm:$0xff] }
 0x51b   : > { %2771 = vst [vmem:[#allocation1] ss:$9 sm:$0xff] %v9496_v17  ;;  %2903 = vrot.lane.b32.xlu2 %v2770_v24, %s11218_s21  ;;  %v9547_v17 = vld [vmem:[%s11269_s19 + $0x101] sm:$0x1]  ;;  %v9550_v24 = vld [vmem:[%s11269_s19 + $0x104] sm:$0x1] }
 0x51c   : > { %2772 = vst [vmem:[#allocation1 + $0x1] ss:$9 sm:$0xff] %v9497_v19  ;;  %v9548_v19 = vld [vmem:[%s11269_s19 + $0x102] sm:$0x1] }
 0x51d   : > { %2773 = vst [vmem:[#allocation1 + $0x2] ss:$9 sm:$0xff] %v9498_v22  ;;  %v9549_v22 = vld [vmem:[%s11269_s19 + $0x103] sm:$0x1] }
 0x51e   : > { %2774 = vst [vmem:[#allocation1 + $0x3] ss:$9 sm:$0xff] %v9499_v26  ;;  %v9551_v26 = vld [vmem:[%s11269_s19 + $0x105] sm:$0x1] }
 0x51f   : > { %2775 = vst [vmem:[#allocation1 + $0x4] ss:$9 sm:$0xff] %v9500_v28  ;;  %v9552_v28 = vld [vmem:[%s11269_s19 + $0x106] sm:$0x1] }
 0x520   : > { %2776 = vst [vmem:[#allocation1 + $0x5] ss:$9 sm:$0xff] %v9501_v32  ;;  %v9553_v32 = vld [vmem:[%s11269_s19 + $0x107] sm:$0x1] }
 0x521   : > { %2777 = vst [vmem:[#allocation1 + $0x6] ss:$9 sm:$0xff] %v9502_v33 }
 0x522   : > { %2778 = vst [vmem:[#allocation1 + $0x7] ss:$9 sm:$0xff] %v9503_v34  ;;  %v9554_v34 = vld [vmem:[%s11269_s19 + $0x108] sm:$0x1] }
 0x529   : > { %v2779_v36 = vld [vmem:[#allocation1] sm:$0xff] }
 0x52a   : > { %2905 = vrot.lane.b32.xlu0 %v2779_v36, %s11218_s21  ;;  %2780 = vst [vmem:[#allocation1] ss:$9 sm:$0xff] %v9504_v11  ;;  %v9555_v11 = vld [vmem:[%s11269_s19 + $0x109] sm:$0x1]  ;;  %v9557_v36 = vld [vmem:[%s11269_s19 + $0x10b] sm:$0x1] }
 0x52b   : > { %2781 = vst [vmem:[#allocation1 + $0x1] ss:$9 sm:$0xff] %v9505_v35  ;;  %v9556_v35 = vld [vmem:[%s11269_s19 + $0x10a] sm:$0x1] }
 0x52c   : > { %2782 = vst [vmem:[#allocation1 + $0x2] ss:$9 sm:$0xff] %v9506_v40  ;;  %v9558_v40 = vld [vmem:[%s11269_s19 + $0x10c] sm:$0x1] }
 0x52d   : > { %2783 = vst [vmem:[#allocation1 + $0x3] ss:$9 sm:$0xff] %v9507_v44  ;;  %v9559_v44 = vld [vmem:[%s11269_s19 + $0x10d] sm:$0x1] }
 0x52e   : > { %2784 = vst [vmem:[#allocation1 + $0x4] ss:$9 sm:$0xff] %v9508_v20  ;;  %v9560_v20 = vld [vmem:[%s11269_s19 + $0x110] sm:$0x1] }
 0x52f   : > { %2785 = vst [vmem:[#allocation1 + $0x5] ss:$9 sm:$0xff] %v9509_v29  ;;  %v9561_v29 = vld [vmem:[%s11269_s19 + $0x111] sm:$0x1] }
 0x530   : > { %2786 = vst [vmem:[#allocation1 + $0x6] ss:$9 sm:$0xff] %v9510_v38  ;;  %v1944_v38 = vpop.permute.xlu1 %1943 }
 0x531   : > { %2787 = vst [vmem:[#allocation1 + $0x7] ss:$9 sm:$0xff] %v9511_v45  ;;  %v9562_v45 = vld [vmem:[%s11269_s19 + $0x112] sm:$0x1] }
 0x532   : > { %2030 = vst.msk [vmem:[#allocation2 + $0x50] sm:$0xff] %vm2019_vm1, %v1944_v38  ;;  %v9612_v38 = vld [vmem:[%s11269_s19 + $0x3a] sm:$0x1] }
 0x538   : > { %v2788_v21 = vld [vmem:[#allocation1] sm:$0xff] }
 0x539   : > { %2789 = vst [vmem:[#allocation1] ss:$9 sm:$0xff] %v9512_v47  ;;  %2907 = vrot.lane.b32.xlu1 %v2788_v21, %s11218_s21  ;;  %v9566_v21 = vld [vmem:[%s11269_s19 + $0x116] sm:$0x1] }
 0x53a   : > { %2790 = vst [vmem:[#allocation1 + $0x1] ss:$9 sm:$0xff] %v9513_v56  ;;  %v9563_v56 = vld [vmem:[%s11269_s19 + $0x113] sm:$0x1] }
 0x53b   : > { %2791 = vst [vmem:[#allocation1 + $0x2] ss:$9 sm:$0xff] %v9514_v10  ;;  %v9565_v10 = vld [vmem:[%s11269_s19 + $0x115] sm:$0x1] }
 0x53c   : > { %2792 = vst [vmem:[#allocation1 + $0x3] ss:$9 sm:$0xff] %v9515_v31  ;;  %v9567_v31 = vld [vmem:[%s11269_s19 + $0x117] sm:$0x1] }
 0x53d   : > { %2793 = vst [vmem:[#allocation1 + $0x4] ss:$9 sm:$0xff] %v9516_v41  ;;  %v1966_v41 = vpop.permute.xlu0 %1965 }
 0x53e   : > { %2794 = vst [vmem:[#allocation1 + $0x5] ss:$9 sm:$0xff] %v9517_v51  ;;  %v1970_v51 = vpop.permute.xlu2 %1969 }
 0x53f   : > { %2795 = vst [vmem:[#allocation1 + $0x6] ss:$9 sm:$0xff] %v9518_v61  ;;  %v9568_v61 = vld [vmem:[%s11269_s19 + $0x118] sm:$0x1] }
 0x540   : > { %2796 = vst [vmem:[#allocation1 + $0x7] ss:$9 sm:$0xff] %v9519_v7  ;;  %v9569_v7 = vld [vmem:[%s11269_s19 + $0x119] sm:$0x1] }
 0x541   : > { %2041 = vst.msk [vmem:[#allocation2 + $0xa8] sm:$0xff] %vm2019_vm1, %v1966_v41  ;;  %v9618_v41 = vld [vmem:[%s11269_s19 + $0x40] sm:$0x1] }
 0x542   : > { %2043 = vst.msk [vmem:[#allocation2 + $0xb8] sm:$0xff] %vm2019_vm1, %v1970_v51 }
 0x547   : > { %v2797_v13 = vld [vmem:[#allocation1] sm:$0xff] }
 0x548   : > { %2798 = vst [vmem:[#allocation1] ss:$9 sm:$0xff] %v9520_v42  ;;  %2909 = vrot.lane.b32.xlu2 %v2797_v13, %s11218_s21  ;;  %v9571_v42 = vld [vmem:[%s11269_s19 + $0x11b] sm:$0x1]  ;;  %v9574_v13 = vld [vmem:[%s11269_s19 + $0x11e] sm:$0x1] }
 0x549   : > { %2799 = vst [vmem:[#allocation1 + $0x1] ss:$9 sm:$0xff] %v9521_v53  ;;  %v9572_v53 = vld [vmem:[%s11269_s19 + $0x11c] sm:$0x1] }
 0x54a   : > { %2800 = vst [vmem:[#allocation1 + $0x2] ss:$9 sm:$0xff] %v9522_v0  ;;  %v9573_v0 = vld [vmem:[%s11269_s19 + $0x11d] sm:$0x1] }
 0x54b   : > { %2801 = vst [vmem:[#allocation1 + $0x3] ss:$9 sm:$0xff] %v9523_v25  ;;  %v9575_v25 = vld [vmem:[%s11269_s19 + $0x11f] sm:$0x1] }
 0x54c   : > { %2802 = vst [vmem:[#allocation1 + $0x4] ss:$9 sm:$0xff] %v9524_v37  ;;  %v9576_v37 = vld [vmem:[%s11269_s19 + $0x12] sm:$0x1] }
 0x54d   : > { %2803 = vst [vmem:[#allocation1 + $0x5] ss:$9 sm:$0xff] %v9525_v50  ;;  %v9577_v50 = vld [vmem:[%s11269_s19 + $0x13] sm:$0x1] }
 0x54e   : > { %2804 = vst [vmem:[#allocation1 + $0x6] ss:$9 sm:$0xff] %v9526_v63 }
 0x54f   : > { %2805 = vst [vmem:[#allocation1 + $0x7] ss:$9 sm:$0xff] %v9527_v14  ;;  %v9578_v14 = vld [vmem:[%s11269_s19 + $0x14] sm:$0x1] }
 0x556   : > { %v2806_v57 = vld [vmem:[#allocation1] sm:$0xff] }
 0x557   : > { %2911 = vrot.lane.b32.xlu0 %v2806_v57, %s11218_s21  ;;  %2807 = vst [vmem:[#allocation1] ss:$9 sm:$0xff] %v9528_v27  ;;  %v9579_v27 = vld [vmem:[%s11269_s19 + $0x15] sm:$0x1]  ;;  %v9581_v57 = vld [vmem:[%s11269_s19 + $0x17] sm:$0x1] }
 0x558   : > { %2808 = vst [vmem:[#allocation1 + $0x1] ss:$9 sm:$0xff] %v9529_v43  ;;  %v9580_v43 = vld [vmem:[%s11269_s19 + $0x16] sm:$0x1] }
 0x559   : > { %2809 = vst [vmem:[#allocation1 + $0x2] ss:$9 sm:$0xff] %v9530_v6  ;;  %v9582_v6 = vld [vmem:[%s11269_s19 + $0x18] sm:$0x1] }
 0x55a   : > { %2810 = vst [vmem:[#allocation1 + $0x3] ss:$9 sm:$0xff] %v9531_v23  ;;  %v9583_v23 = vld [vmem:[%s11269_s19 + $0x19] sm:$0x1] }
 0x55b   : > { %2811 = vst [vmem:[#allocation1 + $0x4] ss:$9 sm:$0xff] %v9532_v39  ;;  %v9584_v39 = vld [vmem:[%s11269_s19 + $0x1a] sm:$0x1] }
 0x55c   : > { %2812 = vst [vmem:[#allocation1 + $0x5] ss:$9 sm:$0xff] %v9533_v54  ;;  %v9585_v54 = vld [vmem:[%s11269_s19 + $0x1b] sm:$0x1] }
 0x55d   : > { %2813 = vst [vmem:[#allocation1 + $0x6] ss:$9 sm:$0xff] %v9534_v46  ;;  %v1950_v46 = vpop.permute.xlu1 %1949 }
 0x55e   : > { %2814 = vst [vmem:[#allocation1 + $0x7] ss:$9 sm:$0xff] %v9535_v48  ;;  %v9586_v48 = vld [vmem:[%s11269_s19 + $0x1c] sm:$0x1] }
 0x55f   : > { %2033 = vst.msk [vmem:[#allocation2 + $0x68] sm:$0xff] %vm2019_vm1, %v1950_v46  ;;  %v9636_v46 = vld [vmem:[%s11269_s19 + $0x54] sm:$0x1] }
 0x565   : > { %v2815_v59 = vld [vmem:[#allocation1] sm:$0xff] }
 0x566   : > { %2816 = vst [vmem:[#allocation1] ss:$9 sm:$0xff] %v9536_v49  ;;  %2913 = vrot.lane.b32.xlu1 %v2815_v59, %s11218_s21  ;;  %v9590_v59 = vld [vmem:[%s11269_s19 + $0x20] sm:$0x1] }
 0x567   : > { %2817 = vst [vmem:[#allocation1 + $0x1] ss:$9 sm:$0xff] %v9537_v52  ;;  %v9587_v52 = vld [vmem:[%s11269_s19 + $0x1d] sm:$0x1] }
 0x568   : > { %2818 = vst [vmem:[#allocation1 + $0x2] ss:$9 sm:$0xff] %v9538_v58  ;;  %v9589_v58 = vld [vmem:[%s11269_s19 + $0x1f] sm:$0x1] }
 0x569   : > { %2819 = vst [vmem:[#allocation1 + $0x3] ss:$9 sm:$0xff] %v9539_v60  ;;  %v9591_v60 = vld [vmem:[%s11269_s19 + $0x21] sm:$0x1] }
 0x56a   : > { %2820 = vst [vmem:[#allocation1 + $0x4] ss:$9 sm:$0xff] %v9540_v62  ;;  %v1972_v62 = vpop.permute.xlu0 %1971 }
 0x56b   : > { %2821 = vst [vmem:[#allocation1 + $0x5] ss:$9 sm:$0xff] %v9541_v2  ;;  %v1976_v2 = vpop.permute.xlu2 %1975 }
 0x56c   : > { %2822 = vst [vmem:[#allocation1 + $0x6] ss:$9 sm:$0xff] %v9542_v3  ;;  %v9592_v3 = vld [vmem:[%s11269_s19 + $0x24] sm:$0x1] }
 0x56d   : > { %2823 = vst [vmem:[#allocation1 + $0x7] ss:$9 sm:$0xff] %v9543_v4  ;;  %v9593_v4 = vld [vmem:[%s11269_s19 + $0x25] sm:$0x1] }
 0x56e   : > { %2044 = vst.msk [vmem:[#allocation2 + $0xc0] sm:$0xff] %vm2019_vm1, %v1972_v62  ;;  %v9642_v62 = vld [vmem:[%s11269_s19 + $0x5c] sm:$0x1] }
 0x56f   : > { %2046 = vst.msk [vmem:[#allocation2 + $0xd0] sm:$0xff] %vm2019_vm1, %v1976_v2 }
 0x574   : > { %v2824_v16 = vld [vmem:[#allocation1] sm:$0xff] }
 0x575   : > { %2825 = vst [vmem:[#allocation1] ss:$9 sm:$0xff] %v9544_v9  ;;  %2915 = vrot.lane.b32.xlu2 %v2824_v16, %s11218_s21  ;;  %v9595_v9 = vld [vmem:[%s11269_s19 + $0x27] sm:$0x1]  ;;  %v9598_v16 = vld [vmem:[%s11269_s19 + $0x2a] sm:$0x1] }
 0x576   : > { %2826 = vst [vmem:[#allocation1 + $0x1] ss:$9 sm:$0xff] %v9545_v12  ;;  %v9596_v12 = vld [vmem:[%s11269_s19 + $0x28] sm:$0x1] }
 0x577   : > { %2827 = vst [vmem:[#allocation1 + $0x2] ss:$9 sm:$0xff] %v9546_v15  ;;  %v9597_v15 = vld [vmem:[%s11269_s19 + $0x29] sm:$0x1] }
 0x578   : > { %2828 = vst [vmem:[#allocation1 + $0x3] ss:$9 sm:$0xff] %v9547_v17  ;;  %v9599_v17 = vld [vmem:[%s11269_s19 + $0x2b] sm:$0x1] }
 0x579   : > { %2829 = vst [vmem:[#allocation1 + $0x4] ss:$9 sm:$0xff] %v9548_v19  ;;  %v9600_v19 = vld [vmem:[%s11269_s19 + $0x2c] sm:$0x1] }
 0x57a   : > { %2830 = vst [vmem:[#allocation1 + $0x5] ss:$9 sm:$0xff] %v9549_v22  ;;  %v9601_v22 = vld [vmem:[%s11269_s19 + $0x2d] sm:$0x1] }
 0x57b   : > { %2831 = vst [vmem:[#allocation1 + $0x6] ss:$9 sm:$0xff] %v9550_v24 }
 0x57c   : > { %2832 = vst [vmem:[#allocation1 + $0x7] ss:$9 sm:$0xff] %v9551_v26  ;;  %v9602_v26 = vld [vmem:[%s11269_s19 + $0x2e] sm:$0x1] }
 0x583   : > { %v2833_v33 = vld [vmem:[#allocation1] sm:$0xff] }
 0x584   : > { %2917 = vrot.lane.b32.xlu0 %v2833_v33, %s11218_s21  ;;  %2834 = vst [vmem:[#allocation1] ss:$9 sm:$0xff] %v9552_v28  ;;  %v9603_v28 = vld [vmem:[%s11269_s19 + $0x2f] sm:$0x1]  ;;  %v9605_v33 = vld [vmem:[%s11269_s19 + $0x31] sm:$0x1] }
 0x585   : > { %2835 = vst [vmem:[#allocation1 + $0x1] ss:$9 sm:$0xff] %v9553_v32  ;;  %v9604_v32 = vld [vmem:[%s11269_s19 + $0x30] sm:$0x1] }
 0x586   : > { %2836 = vst [vmem:[#allocation1 + $0x2] ss:$9 sm:$0xff] %v9554_v34  ;;  %v9606_v34 = vld [vmem:[%s11269_s19 + $0x32] sm:$0x1] }
 0x587   : > { %2837 = vst [vmem:[#allocation1 + $0x3] ss:$9 sm:$0xff] %v9555_v11  ;;  %v9607_v11 = vld [vmem:[%s11269_s19 + $0x33] sm:$0x1] }
 0x588   : > { %2838 = vst [vmem:[#allocation1 + $0x4] ss:$9 sm:$0xff] %v9556_v35  ;;  %v9608_v35 = vld [vmem:[%s11269_s19 + $0x36] sm:$0x1] }
 0x589   : > { %2839 = vst [vmem:[#allocation1 + $0x5] ss:$9 sm:$0xff] %v9557_v36  ;;  %v9609_v36 = vld [vmem:[%s11269_s19 + $0x37] sm:$0x1] }
 0x58a   : > { %2840 = vst [vmem:[#allocation1 + $0x6] ss:$9 sm:$0xff] %v9558_v40  ;;  %v1956_v40 = vpop.permute.xlu1 %1955 }
 0x58b   : > { %2841 = vst [vmem:[#allocation1 + $0x7] ss:$9 sm:$0xff] %v9559_v44  ;;  %v9610_v44 = vld [vmem:[%s11269_s19 + $0x38] sm:$0x1] }
 0x58c   : > { %2036 = vst.msk [vmem:[#allocation2 + $0x80] sm:$0xff] %vm2019_vm1, %v1956_v40  ;;  %v9660_v40 = vld [vmem:[%s11269_s19 + $0x70] sm:$0x1] }
 0x592   : > { %v2842_v47 = vld [vmem:[#allocation1] sm:$0xff] }
 0x593   : > { %2843 = vst [vmem:[#allocation1] ss:$9 sm:$0xff] %v9560_v20  ;;  %2919 = vrot.lane.b32.xlu1 %v2842_v47, %s11218_s21  ;;  %v9614_v47 = vld [vmem:[%s11269_s19 + $0x3c] sm:$0x1] }
 0x594   : > { %2844 = vst [vmem:[#allocation1 + $0x1] ss:$9 sm:$0xff] %v9561_v29  ;;  %v9611_v29 = vld [vmem:[%s11269_s19 + $0x39] sm:$0x1] }
 0x595   : > { %2845 = vst [vmem:[#allocation1 + $0x2] ss:$9 sm:$0xff] %v9562_v45  ;;  %v9613_v45 = vld [vmem:[%s11269_s19 + $0x3b] sm:$0x1] }
 0x596   : > { %2846 = vst [vmem:[#allocation1 + $0x3] ss:$9 sm:$0xff] %v9563_v56  ;;  %v9615_v56 = vld [vmem:[%s11269_s19 + $0x3d] sm:$0x1] }
 0x597   : > { %2847 = vst [vmem:[#allocation1 + $0x4] ss:$9 sm:$0xff] %v9564_v1  ;;  %v1978_v1 = vpop.permute.xlu0 %1977 }
 0x598   : > { %2848 = vst [vmem:[#allocation1 + $0x5] ss:$9 sm:$0xff] %v9565_v10  ;;  %v1982_v10 = vpop.permute.xlu2 %1981 }
 0x599   : > { %2849 = vst [vmem:[#allocation1 + $0x6] ss:$9 sm:$0xff] %v9566_v21  ;;  %v9616_v21 = vld [vmem:[%s11269_s19 + $0x3e] sm:$0x1] }
 0x59a   : > { %2850 = vst [vmem:[#allocation1 + $0x7] ss:$9 sm:$0xff] %v9567_v31  ;;  %v9617_v31 = vld [vmem:[%s11269_s19 + $0x3f] sm:$0x1] }
 0x59b   : > { %2047 = vst.msk [vmem:[#allocation2 + $0xd8] sm:$0xff] %vm2019_vm1, %v1978_v1  ;;  %v9666_v1 = vld [vmem:[%s11269_s19 + $0x76] sm:$0x1] }
 0x59c   : > { %2049 = vst.msk [vmem:[#allocation2 + $0xe8] sm:$0xff] %vm2019_vm1, %v1982_v10 }
 0x5a1   : > { %v2851_v30 = vld [vmem:[#allocation1] sm:$0xff] }
 0x5a2   : > { %2852 = vst [vmem:[#allocation1] ss:$9 sm:$0xff] %v9568_v61  ;;  %2921 = vrot.lane.b32.xlu2 %v2851_v30, %s11218_s21  ;;  %v9619_v61 = vld [vmem:[%s11269_s19 + $0x41] sm:$0x1]  ;;  %v9622_v30 = vld [vmem:[%s11269_s19 + $0x44] sm:$0x1] }
 0x5a3   : > { %2853 = vst [vmem:[#allocation1 + $0x1] ss:$9 sm:$0xff] %v9569_v7  ;;  %v9620_v7 = vld [vmem:[%s11269_s19 + $0x42] sm:$0x1] }
 0x5a4   : > { %2854 = vst [vmem:[#allocation1 + $0x2] ss:$9 sm:$0xff] %v9570_v18  ;;  %v9621_v18 = vld [vmem:[%s11269_s19 + $0x43] sm:$0x1] }
 0x5a5   : > { %2855 = vst [vmem:[#allocation1 + $0x3] ss:$9 sm:$0xff] %v9571_v42  ;;  %v9623_v42 = vld [vmem:[%s11269_s19 + $0x45] sm:$0x1] }
 0x5a6   : > { %2856 = vst [vmem:[#allocation1 + $0x4] ss:$9 sm:$0xff] %v9572_v53  ;;  %v9624_v53 = vld [vmem:[%s11269_s19 + $0x48] sm:$0x1] }
 0x5a7   : > { %2857 = vst [vmem:[#allocation1 + $0x5] ss:$9 sm:$0xff] %v9573_v0  ;;  %v9625_v0 = vld [vmem:[%s11269_s19 + $0x49] sm:$0x1] }
 0x5a8   : > { %2858 = vst [vmem:[#allocation1 + $0x6] ss:$9 sm:$0xff] %v9574_v13 }
 0x5a9   : > { %2859 = vst [vmem:[#allocation1 + $0x7] ss:$9 sm:$0xff] %v9575_v25  ;;  %v9626_v25 = vld [vmem:[%s11269_s19 + $0x4a] sm:$0x1] }
 0x5b0   : > { %v2860_v63 = vld [vmem:[#allocation1] sm:$0xff] }
 0x5b1   : > { %2923 = vrot.lane.b32.xlu0 %v2860_v63, %s11218_s21  ;;  %3505 = vst [vmem:[#allocation1] ss:$9 sm:$0xff] %v9576_v37  ;;  %v9627_v37 = vld [vmem:[%s11269_s19 + $0x4b] sm:$0x1]  ;;  %v9629_v63 = vld [vmem:[%s11269_s19 + $0x4d] sm:$0x1] }
 0x5b2   : > { %3507 = vst [vmem:[#allocation1 + $0x1] ss:$9 sm:$0xff] %v9577_v50  ;;  %v9628_v50 = vld [vmem:[%s11269_s19 + $0x4c] sm:$0x1] }
 0x5b3   : > { %3509 = vst [vmem:[#allocation1 + $0x2] ss:$9 sm:$0xff] %v9578_v14  ;;  %v9630_v14 = vld [vmem:[%s11269_s19 + $0x4e] sm:$0x1] }
 0x5b4   : > { %3511 = vst [vmem:[#allocation1 + $0x3] ss:$9 sm:$0xff] %v9579_v27  ;;  %v9631_v27 = vld [vmem:[%s11269_s19 + $0x4f] sm:$0x1] }
 0x5b5   : > { %3513 = vst [vmem:[#allocation1 + $0x4] ss:$9 sm:$0xff] %v9580_v43  ;;  %v9632_v43 = vld [vmem:[%s11269_s19 + $0x50] sm:$0x1] }
 0x5b6   : > { %3515 = vst [vmem:[#allocation1 + $0x5] ss:$9 sm:$0xff] %v9581_v57  ;;  %v9633_v57 = vld [vmem:[%s11269_s19 + $0x51] sm:$0x1] }
 0x5b7   : > { %3517 = vst [vmem:[#allocation1 + $0x6] ss:$9 sm:$0xff] %v9582_v6  ;;  %v1962_v6 = vpop.permute.xlu1 %1961 }
 0x5b8   : > { %3519 = vst [vmem:[#allocation1 + $0x7] ss:$9 sm:$0xff] %v9583_v23  ;;  %v9634_v23 = vld [vmem:[%s11269_s19 + $0x52] sm:$0x1] }
 0x5b9   : > { %2039 = vst.msk [vmem:[#allocation2 + $0x98] sm:$0xff] %vm2019_vm1, %v1962_v6  ;;  %v9684_v6 = vld [vmem:[%s11269_s19 + $0x8a] sm:$0x1] }
 0x5bf   : > { %v3520_v49 = vld [vmem:[#allocation1] sm:$0xff] }
 0x5c0   : > { %3521 = vst [vmem:[#allocation1] ss:$9 sm:$0xff] %v9584_v39  ;;  %3800 = vrot.lane.b32.xlu1 %v3520_v49, %s11219_s22  ;;  %v9638_v49 = vld [vmem:[%s11269_s19 + $0x56] sm:$0x1] }
 0x5c1   : > { %3522 = vst [vmem:[#allocation1 + $0x1] ss:$9 sm:$0xff] %v9585_v54  ;;  %v9635_v54 = vld [vmem:[%s11269_s19 + $0x53] sm:$0x1] }
 0x5c2   : > { %3523 = vst [vmem:[#allocation1 + $0x2] ss:$9 sm:$0xff] %v9586_v48  ;;  %v9637_v48 = vld [vmem:[%s11269_s19 + $0x55] sm:$0x1] }
 0x5c3   : > { %3524 = vst [vmem:[#allocation1 + $0x3] ss:$9 sm:$0xff] %v9587_v52  ;;  %v9639_v52 = vld [vmem:[%s11269_s19 + $0x57] sm:$0x1] }
 0x5c4   : > { %3525 = vst [vmem:[#allocation1 + $0x4] ss:$9 sm:$0xff] %v9588_v55  ;;  %v1984_v55 = vpop.permute.xlu0 %1983 }
 0x5c5   : > { %3526 = vst [vmem:[#allocation1 + $0x5] ss:$9 sm:$0xff] %v9589_v58  ;;  %v2862_v58 = vpop.permute.xlu2 %2861 }
 0x5c6   : > { %3527 = vst [vmem:[#allocation1 + $0x6] ss:$9 sm:$0xff] %v9590_v59  ;;  %v9640_v59 = vld [vmem:[%s11269_s19 + $0x5a] sm:$0x1] }
 0x5c7   : > { %3528 = vst [vmem:[#allocation1 + $0x7] ss:$9 sm:$0xff] %v9591_v60  ;;  %v9641_v60 = vld [vmem:[%s11269_s19 + $0x5b] sm:$0x1] }
 0x5c8   : > { %2050 = vst.msk [vmem:[#allocation2 + $0xf0] sm:$0xff] %vm2019_vm1, %v1984_v55  ;;  %v9690_v55 = vld [vmem:[%s11269_s19 + $0x92] sm:$0x1] }
 0x5c9   : > { %2958 = vst.msk [vmem:[#allocation2] sm:$0xff] %vm2957_vm2, %v2862_v58 }
 0x5ce   : > { %v3529_v8 = vld [vmem:[#allocation1] sm:$0xff] }
 0x5cf   : > { %3530 = vst [vmem:[#allocation1] ss:$9 sm:$0xff] %v9592_v3  ;;  %3802 = vrot.lane.b32.xlu2 %v3529_v8, %s11219_s22  ;;  %v9643_v3 = vld [vmem:[%s11269_s19 + $0x5d] sm:$0x1]  ;;  %v9646_v8 = vld [vmem:[%s11269_s19 + $0x60] sm:$0x1] }
 0x5d0   : > { %3531 = vst [vmem:[#allocation1 + $0x1] ss:$9 sm:$0xff] %v9593_v4  ;;  %v9644_v4 = vld [vmem:[%s11269_s19 + $0x5e] sm:$0x1] }
 0x5d1   : > { %3532 = vst [vmem:[#allocation1 + $0x2] ss:$9 sm:$0xff] %v9594_v5  ;;  %v9645_v5 = vld [vmem:[%s11269_s19 + $0x5f] sm:$0x1] }
 0x5d2   : > { %3533 = vst [vmem:[#allocation1 + $0x3] ss:$9 sm:$0xff] %v9595_v9  ;;  %v9647_v9 = vld [vmem:[%s11269_s19 + $0x61] sm:$0x1] }
 0x5d3   : > { %3534 = vst [vmem:[#allocation1 + $0x4] ss:$9 sm:$0xff] %v9596_v12  ;;  %v9648_v12 = vld [vmem:[%s11269_s19 + $0x62] sm:$0x1] }
 0x5d4   : > { %3535 = vst [vmem:[#allocation1 + $0x5] ss:$9 sm:$0xff] %v9597_v15  ;;  %v9649_v15 = vld [vmem:[%s11269_s19 + $0x63] sm:$0x1] }
 0x5d5   : > { %3536 = vst [vmem:[#allocation1 + $0x6] ss:$9 sm:$0xff] %v9598_v16 }
 0x5d6   : > { %3537 = vst [vmem:[#allocation1 + $0x7] ss:$9 sm:$0xff] %v9599_v17  ;;  %v9650_v17 = vld [vmem:[%s11269_s19 + $0x64] sm:$0x1] }
 0x5dd   : > { %v3538_v24 = vld [vmem:[#allocation1] sm:$0xff] }
 0x5de   : > { %3804 = vrot.lane.b32.xlu0 %v3538_v24, %s11219_s22  ;;  %3539 = vst [vmem:[#allocation1] ss:$9 sm:$0xff] %v9600_v19  ;;  %v9651_v19 = vld [vmem:[%s11269_s19 + $0x65] sm:$0x1]  ;;  %v9653_v24 = vld [vmem:[%s11269_s19 + $0x67] sm:$0x1] }
 0x5df   : > { %3540 = vst [vmem:[#allocation1 + $0x1] ss:$9 sm:$0xff] %v9601_v22  ;;  %v9652_v22 = vld [vmem:[%s11269_s19 + $0x66] sm:$0x1] }
 0x5e0   : > { %3541 = vst [vmem:[#allocation1 + $0x2] ss:$9 sm:$0xff] %v9602_v26  ;;  %v9654_v26 = vld [vmem:[%s11269_s19 + $0x68] sm:$0x1] }
 0x5e1   : > { %3542 = vst [vmem:[#allocation1 + $0x3] ss:$9 sm:$0xff] %v9603_v28  ;;  %v9655_v28 = vld [vmem:[%s11269_s19 + $0x69] sm:$0x1] }
 0x5e2   : > { %3543 = vst [vmem:[#allocation1 + $0x4] ss:$9 sm:$0xff] %v9604_v32  ;;  %v9656_v32 = vld [vmem:[%s11269_s19 + $0x6c] sm:$0x1] }
 0x5e3   : > { %3544 = vst [vmem:[#allocation1 + $0x5] ss:$9 sm:$0xff] %v9605_v33  ;;  %v9657_v33 = vld [vmem:[%s11269_s19 + $0x6d] sm:$0x1] }
 0x5e4   : > { %3545 = vst [vmem:[#allocation1 + $0x6] ss:$9 sm:$0xff] %v9606_v34  ;;  %v1968_v34 = vpop.permute.xlu1 %1967 }
 0x5e5   : > { %3546 = vst [vmem:[#allocation1 + $0x7] ss:$9 sm:$0xff] %v9607_v11  ;;  %v9658_v11 = vld [vmem:[%s11269_s19 + $0x6e] sm:$0x1] }
 0x5e6   : > { %2042 = vst.msk [vmem:[#allocation2 + $0xb0] sm:$0xff] %vm2019_vm1, %v1968_v34  ;;  %v9708_v34 = vld [vmem:[%s11269_s19 + $0xa6] sm:$0x1] }
 0x5ec   : > { %v3547_v20 = vld [vmem:[#allocation1] sm:$0xff] }
 0x5ed   : > { %3548 = vst [vmem:[#allocation1] ss:$9 sm:$0xff] %v9608_v35  ;;  %3806 = vrot.lane.b32.xlu1 %v3547_v20, %s11219_s22  ;;  %v9662_v20 = vld [vmem:[%s11269_s19 + $0x72] sm:$0x1] }
 0x5ee   : > { %3549 = vst [vmem:[#allocation1 + $0x1] ss:$9 sm:$0xff] %v9609_v36  ;;  %v9659_v36 = vld [vmem:[%s11269_s19 + $0x6f] sm:$0x1] }
 0x5ef   : > { %3550 = vst [vmem:[#allocation1 + $0x2] ss:$9 sm:$0xff] %v9610_v44  ;;  %v9661_v44 = vld [vmem:[%s11269_s19 + $0x71] sm:$0x1] }
 0x5f0   : > { %3551 = vst [vmem:[#allocation1 + $0x3] ss:$9 sm:$0xff] %v9611_v29  ;;  %v9663_v29 = vld [vmem:[%s11269_s19 + $0x73] sm:$0x1] }
 0x5f1   : > { %3552 = vst [vmem:[#allocation1 + $0x4] ss:$9 sm:$0xff] %v9612_v38  ;;  %v2864_v38 = vpop.permute.xlu0 %2863 }
 0x5f2   : > { %3553 = vst [vmem:[#allocation1 + $0x5] ss:$9 sm:$0xff] %v9613_v45  ;;  %v2868_v45 = vpop.permute.xlu2 %2867 }
 0x5f3   : > { %3554 = vst [vmem:[#allocation1 + $0x6] ss:$9 sm:$0xff] %v9614_v47  ;;  %v9664_v47 = vld [vmem:[%s11269_s19 + $0x74] sm:$0x1] }
 0x5f4   : > { %3555 = vst [vmem:[#allocation1 + $0x7] ss:$9 sm:$0xff] %v9615_v56  ;;  %v9665_v56 = vld [vmem:[%s11269_s19 + $0x75] sm:$0x1] }
 0x5f5   : > { %2959 = vst.msk [vmem:[#allocation2 + $0x8] sm:$0xff] %vm2957_vm2, %v2864_v38  ;;  %v9714_v38 = vld [vmem:[%s11269_s19 + $0xac] sm:$0x1] }
 0x5f6   : > { %2961 = vst.msk [vmem:[#allocation2 + $0x18] sm:$0xff] %vm2957_vm2, %v2868_v45 }
 0x5fb   : > { %v3556_v51 = vld [vmem:[#allocation1] sm:$0xff] }
 0x5fc   : > { %3557 = vst [vmem:[#allocation1] ss:$9 sm:$0xff] %v9616_v21  ;;  %3808 = vrot.lane.b32.xlu2 %v3556_v51, %s11219_s22  ;;  %v9667_v21 = vld [vmem:[%s11269_s19 + $0x77] sm:$0x1]  ;;  %v9670_v51 = vld [vmem:[%s11269_s19 + $0x7a] sm:$0x1] }
 0x5fd   : > { %3558 = vst [vmem:[#allocation1 + $0x1] ss:$9 sm:$0xff] %v9617_v31  ;;  %v9668_v31 = vld [vmem:[%s11269_s19 + $0x78] sm:$0x1] }
 0x5fe   : > { %3559 = vst [vmem:[#allocation1 + $0x2] ss:$9 sm:$0xff] %v9618_v41  ;;  %v9669_v41 = vld [vmem:[%s11269_s19 + $0x79] sm:$0x1] }
 0x5ff   : > { %3560 = vst [vmem:[#allocation1 + $0x3] ss:$9 sm:$0xff] %v9619_v61  ;;  %v9671_v61 = vld [vmem:[%s11269_s19 + $0x7b] sm:$0x1] }
 0x600   : > { %3561 = vst [vmem:[#allocation1 + $0x4] ss:$9 sm:$0xff] %v9620_v7  ;;  %v9672_v7 = vld [vmem:[%s11269_s19 + $0x7e] sm:$0x1] }
 0x601   : > { %3562 = vst [vmem:[#allocation1 + $0x5] ss:$9 sm:$0xff] %v9621_v18  ;;  %v9673_v18 = vld [vmem:[%s11269_s19 + $0x7f] sm:$0x1] }
 0x602   : > { %3563 = vst [vmem:[#allocation1 + $0x6] ss:$9 sm:$0xff] %v9622_v30 }
 0x603   : > { %3564 = vst [vmem:[#allocation1 + $0x7] ss:$9 sm:$0xff] %v9623_v42  ;;  %v9674_v42 = vld [vmem:[%s11269_s19 + $0x80] sm:$0x1] }
 0x60a   : > { %v3565_v13 = vld [vmem:[#allocation1] sm:$0xff] }
 0x60b   : > { %3810 = vrot.lane.b32.xlu0 %v3565_v13, %s11219_s22  ;;  %3566 = vst [vmem:[#allocation1] ss:$9 sm:$0xff] %v9624_v53  ;;  %v9675_v53 = vld [vmem:[%s11269_s19 + $0x81] sm:$0x1]  ;;  %v9677_v13 = vld [vmem:[%s11269_s19 + $0x83] sm:$0x1] }
 0x60c   : > { %3567 = vst [vmem:[#allocation1 + $0x1] ss:$9 sm:$0xff] %v9625_v0  ;;  %v9676_v0 = vld [vmem:[%s11269_s19 + $0x82] sm:$0x1] }
 0x60d   : > { %3568 = vst [vmem:[#allocation1 + $0x2] ss:$9 sm:$0xff] %v9626_v25  ;;  %v9678_v25 = vld [vmem:[%s11269_s19 + $0x84] sm:$0x1] }
 0x60e   : > { %3569 = vst [vmem:[#allocation1 + $0x3] ss:$9 sm:$0xff] %v9627_v37  ;;  %v9679_v37 = vld [vmem:[%s11269_s19 + $0x85] sm:$0x1] }
 0x60f   : > { %3570 = vst [vmem:[#allocation1 + $0x4] ss:$9 sm:$0xff] %v9628_v50  ;;  %v9680_v50 = vld [vmem:[%s11269_s19 + $0x86] sm:$0x1] }
 0x610   : > { %3571 = vst [vmem:[#allocation1 + $0x5] ss:$9 sm:$0xff] %v9629_v63  ;;  %v9681_v63 = vld [vmem:[%s11269_s19 + $0x87] sm:$0x1] }
 0x611   : > { %3572 = vst [vmem:[#allocation1 + $0x6] ss:$9 sm:$0xff] %v9630_v14  ;;  %v1974_v14 = vpop.permute.xlu1 %1973 }
 0x612   : > { %3573 = vst [vmem:[#allocation1 + $0x7] ss:$9 sm:$0xff] %v9631_v27  ;;  %v9682_v27 = vld [vmem:[%s11269_s19 + $0x88] sm:$0x1] }
 0x613   : > { %2045 = vst.msk [vmem:[#allocation2 + $0xc8] sm:$0xff] %vm2019_vm1, %v1974_v14  ;;  %v9732_v14 = vld [vmem:[%s11269_s19 + $0xc0] sm:$0x1] }
 0x619   : > { %v3574_v39 = vld [vmem:[#allocation1] sm:$0xff] }
 0x61a   : > { %3575 = vst [vmem:[#allocation1] ss:$9 sm:$0xff] %v9632_v43  ;;  %3812 = vrot.lane.b32.xlu1 %v3574_v39, %s11219_s22  ;;  %v9686_v39 = vld [vmem:[%s11269_s19 + $0x8c] sm:$0x1] }
 0x61b   : > { %3576 = vst [vmem:[#allocation1 + $0x1] ss:$9 sm:$0xff] %v9633_v57  ;;  %v9683_v57 = vld [vmem:[%s11269_s19 + $0x89] sm:$0x1] }
 0x61c   : > { %3577 = vst [vmem:[#allocation1 + $0x2] ss:$9 sm:$0xff] %v9634_v23  ;;  %v9685_v23 = vld [vmem:[%s11269_s19 + $0x8b] sm:$0x1] }
 0x61d   : > { %3578 = vst [vmem:[#allocation1 + $0x3] ss:$9 sm:$0xff] %v9635_v54  ;;  %v9687_v54 = vld [vmem:[%s11269_s19 + $0x8d] sm:$0x1] }
 0x61e   : > { %3579 = vst [vmem:[#allocation1 + $0x4] ss:$9 sm:$0xff] %v9636_v46  ;;  %v2870_v46 = vpop.permute.xlu0 %2869 }
 0x61f   : > { %3580 = vst [vmem:[#allocation1 + $0x5] ss:$9 sm:$0xff] %v9637_v48  ;;  %v2874_v48 = vpop.permute.xlu2 %2873 }
 0x620   : > { %3581 = vst [vmem:[#allocation1 + $0x6] ss:$9 sm:$0xff] %v9638_v49  ;;  %v9688_v49 = vld [vmem:[%s11269_s19 + $0x90] sm:$0x1] }
 0x621   : > { %3582 = vst [vmem:[#allocation1 + $0x7] ss:$9 sm:$0xff] %v9639_v52  ;;  %v9689_v52 = vld [vmem:[%s11269_s19 + $0x91] sm:$0x1] }
 0x622   : > { %2962 = vst.msk [vmem:[#allocation2 + $0x20] sm:$0xff] %vm2957_vm2, %v2870_v46  ;;  %v9738_v46 = vld [vmem:[%s11269_s19 + $0xc8] sm:$0x1] }
 0x623   : > { %2964 = vst.msk [vmem:[#allocation2 + $0x30] sm:$0xff] %vm2957_vm2, %v2874_v48 }
 0x628   : > { %v3583_v2 = vld [vmem:[#allocation1] sm:$0xff] }
 0x629   : > { %3584 = vst [vmem:[#allocation1] ss:$9 sm:$0xff] %v9640_v59  ;;  %3814 = vrot.lane.b32.xlu2 %v3583_v2, %s11219_s22  ;;  %v9691_v59 = vld [vmem:[%s11269_s19 + $0x93] sm:$0x1]  ;;  %v9694_v2 = vld [vmem:[%s11269_s19 + $0x96] sm:$0x1] }
 0x62a   : > { %3585 = vst [vmem:[#allocation1 + $0x1] ss:$9 sm:$0xff] %v9641_v60  ;;  %v9692_v60 = vld [vmem:[%s11269_s19 + $0x94] sm:$0x1] }
 0x62b   : > { %3586 = vst [vmem:[#allocation1 + $0x2] ss:$9 sm:$0xff] %v9642_v62  ;;  %v9693_v62 = vld [vmem:[%s11269_s19 + $0x95] sm:$0x1] }
 0x62c   : > { %3587 = vst [vmem:[#allocation1 + $0x3] ss:$9 sm:$0xff] %v9643_v3  ;;  %v9695_v3 = vld [vmem:[%s11269_s19 + $0x97] sm:$0x1] }
 0x62d   : > { %3588 = vst [vmem:[#allocation1 + $0x4] ss:$9 sm:$0xff] %v9644_v4  ;;  %v9696_v4 = vld [vmem:[%s11269_s19 + $0x98] sm:$0x1] }
 0x62e   : > { %3589 = vst [vmem:[#allocation1 + $0x5] ss:$9 sm:$0xff] %v9645_v5  ;;  %v9697_v5 = vld [vmem:[%s11269_s19 + $0x99] sm:$0x1] }
 0x62f   : > { %3590 = vst [vmem:[#allocation1 + $0x6] ss:$9 sm:$0xff] %v9646_v8 }
 0x630   : > { %3591 = vst [vmem:[#allocation1 + $0x7] ss:$9 sm:$0xff] %v9647_v9  ;;  %v9698_v9 = vld [vmem:[%s11269_s19 + $0x9a] sm:$0x1] }
 0x637   : > { %v3592_v16 = vld [vmem:[#allocation1] sm:$0xff] }
 0x638   : > { %3816 = vrot.lane.b32.xlu0 %v3592_v16, %s11219_s22  ;;  %3593 = vst [vmem:[#allocation1] ss:$9 sm:$0xff] %v9648_v12  ;;  %v9699_v12 = vld [vmem:[%s11269_s19 + $0x9b] sm:$0x1]  ;;  %v9701_v16 = vld [vmem:[%s11269_s19 + $0x9d] sm:$0x1] }
 0x639   : > { %3594 = vst [vmem:[#allocation1 + $0x1] ss:$9 sm:$0xff] %v9649_v15  ;;  %v9700_v15 = vld [vmem:[%s11269_s19 + $0x9c] sm:$0x1] }
 0x63a   : > { %3595 = vst [vmem:[#allocation1 + $0x2] ss:$9 sm:$0xff] %v9650_v17  ;;  %v9702_v17 = vld [vmem:[%s11269_s19 + $0x9e] sm:$0x1] }
 0x63b   : > { %3596 = vst [vmem:[#allocation1 + $0x3] ss:$9 sm:$0xff] %v9651_v19  ;;  %v9703_v19 = vld [vmem:[%s11269_s19 + $0x9f] sm:$0x1] }
 0x63c   : > { %3597 = vst [vmem:[#allocation1 + $0x4] ss:$9 sm:$0xff] %v9652_v22  ;;  %v9704_v22 = vld [vmem:[%s11269_s19 + $0xa2] sm:$0x1] }
 0x63d   : > { %3598 = vst [vmem:[#allocation1 + $0x5] ss:$9 sm:$0xff] %v9653_v24  ;;  %v9705_v24 = vld [vmem:[%s11269_s19 + $0xa3] sm:$0x1] }
 0x63e   : > { %3599 = vst [vmem:[#allocation1 + $0x6] ss:$9 sm:$0xff] %v9654_v26  ;;  %v1980_v26 = vpop.permute.xlu1 %1979 }
 0x63f   : > { %3600 = vst [vmem:[#allocation1 + $0x7] ss:$9 sm:$0xff] %v9655_v28  ;;  %v9706_v28 = vld [vmem:[%s11269_s19 + $0xa4] sm:$0x1] }
 0x640   : > { %2048 = vst.msk [vmem:[#allocation2 + $0xe0] sm:$0xff] %vm2019_vm1, %v1980_v26  ;;  %v9756_v26 = vld [vmem:[%s11269_s19 + $0xdc] sm:$0x1] }
 0x646   : > { %v3601_v35 = vld [vmem:[#allocation1] sm:$0xff] }
 0x647   : > { %3602 = vst [vmem:[#allocation1] ss:$9 sm:$0xff] %v9656_v32  ;;  %3818 = vrot.lane.b32.xlu1 %v3601_v35, %s11219_s22  ;;  %v9710_v35 = vld [vmem:[%s11269_s19 + $0xa8] sm:$0x1] }
 0x648   : > { %3603 = vst [vmem:[#allocation1 + $0x1] ss:$9 sm:$0xff] %v9657_v33  ;;  %v9707_v33 = vld [vmem:[%s11269_s19 + $0xa5] sm:$0x1] }
 0x649   : > { %3604 = vst [vmem:[#allocation1 + $0x2] ss:$9 sm:$0xff] %v9658_v11  ;;  %v9709_v11 = vld [vmem:[%s11269_s19 + $0xa7] sm:$0x1] }
 0x64a   : > { %3605 = vst [vmem:[#allocation1 + $0x3] ss:$9 sm:$0xff] %v9659_v36  ;;  %v9711_v36 = vld [vmem:[%s11269_s19 + $0xa9] sm:$0x1] }
 0x64b   : > { %3606 = vst [vmem:[#allocation1 + $0x4] ss:$9 sm:$0xff] %v9660_v40  ;;  %v2876_v40 = vpop.permute.xlu0 %2875 }
 0x64c   : > { %3607 = vst [vmem:[#allocation1 + $0x5] ss:$9 sm:$0xff] %v9661_v44  ;;  %v2880_v44 = vpop.permute.xlu2 %2879 }
 0x64d   : > { %3608 = vst [vmem:[#allocation1 + $0x6] ss:$9 sm:$0xff] %v9662_v20  ;;  %v9712_v20 = vld [vmem:[%s11269_s19 + $0xaa] sm:$0x1] }
 0x64e   : > { %3609 = vst [vmem:[#allocation1 + $0x7] ss:$9 sm:$0xff] %v9663_v29  ;;  %v9713_v29 = vld [vmem:[%s11269_s19 + $0xab] sm:$0x1] }
 0x64f   : > { %2965 = vst.msk [vmem:[#allocation2 + $0x38] sm:$0xff] %vm2957_vm2, %v2876_v40  ;;  %v9762_v40 = vld [vmem:[%s11269_s19 + $0xe2] sm:$0x1] }
 0x650   : > { %2967 = vst.msk [vmem:[#allocation2 + $0x48] sm:$0xff] %vm2957_vm2, %v2880_v44 }
 0x655   : > { %v3610_v10 = vld [vmem:[#allocation1] sm:$0xff] }
 0x656   : > { %3611 = vst [vmem:[#allocation1] ss:$9 sm:$0xff] %v9664_v47  ;;  %3820 = vrot.lane.b32.xlu2 %v3610_v10, %s11219_s22  ;;  %v9715_v47 = vld [vmem:[%s11269_s19 + $0xad] sm:$0x1]  ;;  %v9718_v10 = vld [vmem:[%s11269_s19 + $0xb0] sm:$0x1] }
 0x657   : > { %3612 = vst [vmem:[#allocation1 + $0x1] ss:$9 sm:$0xff] %v9665_v56  ;;  %v9716_v56 = vld [vmem:[%s11269_s19 + $0xae] sm:$0x1] }
 0x658   : > { %3613 = vst [vmem:[#allocation1 + $0x2] ss:$9 sm:$0xff] %v9666_v1  ;;  %v9717_v1 = vld [vmem:[%s11269_s19 + $0xaf] sm:$0x1] }
 0x659   : > { %3614 = vst [vmem:[#allocation1 + $0x3] ss:$9 sm:$0xff] %v9667_v21  ;;  %v9719_v21 = vld [vmem:[%s11269_s19 + $0xb1] sm:$0x1] }
 0x65a   : > { %3615 = vst [vmem:[#allocation1 + $0x4] ss:$9 sm:$0xff] %v9668_v31  ;;  %v9720_v31 = vld [vmem:[%s11269_s19 + $0xb4] sm:$0x1] }
 0x65b   : > { %3616 = vst [vmem:[#allocation1 + $0x5] ss:$9 sm:$0xff] %v9669_v41  ;;  %v9721_v41 = vld [vmem:[%s11269_s19 + $0xb5] sm:$0x1] }
 0x65c   : > { %3617 = vst [vmem:[#allocation1 + $0x6] ss:$9 sm:$0xff] %v9670_v51 }
 0x65d   : > { %3618 = vst [vmem:[#allocation1 + $0x7] ss:$9 sm:$0xff] %v9671_v61  ;;  %v9722_v61 = vld [vmem:[%s11269_s19 + $0xb6] sm:$0x1] }
 0x664   : > { %v3619_v30 = vld [vmem:[#allocation1] sm:$0xff] }
 0x665   : > { %3822 = vrot.lane.b32.xlu0 %v3619_v30, %s11219_s22  ;;  %3620 = vst [vmem:[#allocation1] ss:$9 sm:$0xff] %v9672_v7  ;;  %v9723_v7 = vld [vmem:[%s11269_s19 + $0xb7] sm:$0x1]  ;;  %v9725_v30 = vld [vmem:[%s11269_s19 + $0xb9] sm:$0x1] }
 0x666   : > { %3621 = vst [vmem:[#allocation1 + $0x1] ss:$9 sm:$0xff] %v9673_v18  ;;  %v9724_v18 = vld [vmem:[%s11269_s19 + $0xb8] sm:$0x1] }
 0x667   : > { %3622 = vst [vmem:[#allocation1 + $0x2] ss:$9 sm:$0xff] %v9674_v42  ;;  %v9726_v42 = vld [vmem:[%s11269_s19 + $0xba] sm:$0x1] }
 0x668   : > { %3623 = vst [vmem:[#allocation1 + $0x3] ss:$9 sm:$0xff] %v9675_v53  ;;  %v9727_v53 = vld [vmem:[%s11269_s19 + $0xbb] sm:$0x1] }
 0x669   : > { %3624 = vst [vmem:[#allocation1 + $0x4] ss:$9 sm:$0xff] %v9676_v0  ;;  %v9728_v0 = vld [vmem:[%s11269_s19 + $0xbc] sm:$0x1] }
 0x66a   : > { %3625 = vst [vmem:[#allocation1 + $0x5] ss:$9 sm:$0xff] %v9677_v13  ;;  %v9729_v13 = vld [vmem:[%s11269_s19 + $0xbd] sm:$0x1] }
 0x66b   : > { %3626 = vst [vmem:[#allocation1 + $0x6] ss:$9 sm:$0xff] %v9678_v25  ;;  %v1986_v25 = vpop.permute.xlu1 %1985 }
 0x66c   : > { %3627 = vst [vmem:[#allocation1 + $0x7] ss:$9 sm:$0xff] %v9679_v37  ;;  %v9730_v37 = vld [vmem:[%s11269_s19 + $0xbe] sm:$0x1] }
 0x66d   : > { %2051 = vst.msk [vmem:[#allocation2 + $0xf8] sm:$0xff] %vm2019_vm1, %v1986_v25  ;;  %v9780_v25 = vld [vmem:[%s11269_s19 + $0xf6] sm:$0x1] }
 0x673   : > { %v3628_v43 = vld [vmem:[#allocation1] sm:$0xff] }
 0x674   : > { %3629 = vst [vmem:[#allocation1] ss:$9 sm:$0xff] %v9680_v50  ;;  %3824 = vrot.lane.b32.xlu1 %v3628_v43, %s11219_s22  ;;  %v9734_v43 = vld [vmem:[%s11269_s19 + $0xc2] sm:$0x1] }
 0x675   : > { %3630 = vst [vmem:[#allocation1 + $0x1] ss:$9 sm:$0xff] %v9681_v63  ;;  %v9731_v63 = vld [vmem:[%s11269_s19 + $0xbf] sm:$0x1] }
 0x676   : > { %3631 = vst [vmem:[#allocation1 + $0x2] ss:$9 sm:$0xff] %v9682_v27  ;;  %v9733_v27 = vld [vmem:[%s11269_s19 + $0xc1] sm:$0x1] }
 0x677   : > { %3632 = vst [vmem:[#allocation1 + $0x3] ss:$9 sm:$0xff] %v9683_v57  ;;  %v9735_v57 = vld [vmem:[%s11269_s19 + $0xc3] sm:$0x1] }
 0x678   : > { %3633 = vst [vmem:[#allocation1 + $0x4] ss:$9 sm:$0xff] %v9684_v6  ;;  %v2882_v6 = vpop.permute.xlu0 %2881 }
 0x679   : > { %3634 = vst [vmem:[#allocation1 + $0x5] ss:$9 sm:$0xff] %v9685_v23  ;;  %v2886_v23 = vpop.permute.xlu2 %2885 }
 0x67a   : > { %3635 = vst [vmem:[#allocation1 + $0x6] ss:$9 sm:$0xff] %v9686_v39  ;;  %v9736_v39 = vld [vmem:[%s11269_s19 + $0xc6] sm:$0x1] }
 0x67b   : > { %3636 = vst [vmem:[#allocation1 + $0x7] ss:$9 sm:$0xff] %v9687_v54  ;;  %v9737_v54 = vld [vmem:[%s11269_s19 + $0xc7] sm:$0x1] }
 0x67c   : > { %2968 = vst.msk [vmem:[#allocation2 + $0x50] sm:$0xff] %vm2957_vm2, %v2882_v6  ;;  %v9786_v6 = vld [vmem:[%s11269_s19 + $0xfe] sm:$0x1] }
 0x67d   : > { %2970 = vst.msk [vmem:[#allocation2 + $0x60] sm:$0xff] %vm2957_vm2, %v2886_v23 }
 0x682   : > { %v3637_v58 = vld [vmem:[#allocation1] sm:$0xff] }
 0x683   : > { %3638 = vst [vmem:[#allocation1] ss:$9 sm:$0xff] %v9688_v49  ;;  %3826 = vrot.lane.b32.xlu2 %v3637_v58, %s11219_s22  ;;  %v9739_v49 = vld [vmem:[%s11269_s19 + $0xc9] sm:$0x1]  ;;  %v9742_v58 = vld [vmem:[%s11269_s19 + $0xcc] sm:$0x1] }
 0x684   : > { %3639 = vst [vmem:[#allocation1 + $0x1] ss:$9 sm:$0xff] %v9689_v52  ;;  %v9740_v52 = vld [vmem:[%s11269_s19 + $0xca] sm:$0x1] }
 0x685   : > { %3640 = vst [vmem:[#allocation1 + $0x2] ss:$9 sm:$0xff] %v9690_v55  ;;  %v9741_v55 = vld [vmem:[%s11269_s19 + $0xcb] sm:$0x1] }
 0x686   : > { %3641 = vst [vmem:[#allocation1 + $0x3] ss:$9 sm:$0xff] %v9691_v59  ;;  %v9743_v59 = vld [vmem:[%s11269_s19 + $0xcd] sm:$0x1] }
 0x687   : > { %3642 = vst [vmem:[#allocation1 + $0x4] ss:$9 sm:$0xff] %v9692_v60  ;;  %v9744_v60 = vld [vmem:[%s11269_s19 + $0xce] sm:$0x1] }
 0x688   : > { %3643 = vst [vmem:[#allocation1 + $0x5] ss:$9 sm:$0xff] %v9693_v62  ;;  %v9745_v62 = vld [vmem:[%s11269_s19 + $0xcf] sm:$0x1] }
 0x689   : > { %3644 = vst [vmem:[#allocation1 + $0x6] ss:$9 sm:$0xff] %v9694_v2 }
 0x68a   : > { %3645 = vst [vmem:[#allocation1 + $0x7] ss:$9 sm:$0xff] %v9695_v3  ;;  %v9746_v3 = vld [vmem:[%s11269_s19 + $0xd0] sm:$0x1] }
 0x691   : > { %v3646_v8 = vld [vmem:[#allocation1] sm:$0xff] }
 0x692   : > { %3828 = vrot.lane.b32.xlu0 %v3646_v8, %s11219_s22  ;;  %3647 = vst [vmem:[#allocation1] ss:$9 sm:$0xff] %v9696_v4  ;;  %v9747_v4 = vld [vmem:[%s11269_s19 + $0xd1] sm:$0x1]  ;;  %v9749_v8 = vld [vmem:[%s11269_s19 + $0xd3] sm:$0x1] }
 0x693   : > { %3648 = vst [vmem:[#allocation1 + $0x1] ss:$9 sm:$0xff] %v9697_v5  ;;  %v9748_v5 = vld [vmem:[%s11269_s19 + $0xd2] sm:$0x1] }
 0x694   : > { %3649 = vst [vmem:[#allocation1 + $0x2] ss:$9 sm:$0xff] %v9698_v9  ;;  %v9750_v9 = vld [vmem:[%s11269_s19 + $0xd4] sm:$0x1] }
 0x695   : > { %3650 = vst [vmem:[#allocation1 + $0x3] ss:$9 sm:$0xff] %v9699_v12  ;;  %v9751_v12 = vld [vmem:[%s11269_s19 + $0xd5] sm:$0x1] }
 0x696   : > { %3651 = vst [vmem:[#allocation1 + $0x4] ss:$9 sm:$0xff] %v9700_v15  ;;  %v9752_v15 = vld [vmem:[%s11269_s19 + $0xd8] sm:$0x1] }
 0x697   : > { %3652 = vst [vmem:[#allocation1 + $0x5] ss:$9 sm:$0xff] %v9701_v16  ;;  %v9753_v16 = vld [vmem:[%s11269_s19 + $0xd9] sm:$0x1] }
 0x698   : > { %3653 = vst [vmem:[#allocation1 + $0x6] ss:$9 sm:$0xff] %v9702_v17  ;;  %v2866_v17 = vpop.permute.xlu1 %2865 }
 0x699   : > { %3654 = vst [vmem:[#allocation1 + $0x7] ss:$9 sm:$0xff] %v9703_v19  ;;  %v9754_v19 = vld [vmem:[%s11269_s19 + $0xda] sm:$0x1] }
 0x69a   : > { %2960 = vst.msk [vmem:[#allocation2 + $0x10] sm:$0xff] %vm2957_vm2, %v2866_v17  ;;  %v9804_v17 = vld [vmem:[%s11269_s19 + $0x112] sm:$0x1] }
 0x6a0   : > { %v3655_v32 = vld [vmem:[#allocation1] sm:$0xff] }
 0x6a1   : > { %3656 = vst [vmem:[#allocation1] ss:$9 sm:$0xff] %v9704_v22  ;;  %3830 = vrot.lane.b32.xlu1 %v3655_v32, %s11219_s22  ;;  %v9758_v32 = vld [vmem:[%s11269_s19 + $0xde] sm:$0x1] }
 0x6a2   : > { %3657 = vst [vmem:[#allocation1 + $0x1] ss:$9 sm:$0xff] %v9705_v24  ;;  %v9755_v24 = vld [vmem:[%s11269_s19 + $0xdb] sm:$0x1] }
 0x6a3   : > { %3658 = vst [vmem:[#allocation1 + $0x2] ss:$9 sm:$0xff] %v9706_v28  ;;  %v9757_v28 = vld [vmem:[%s11269_s19 + $0xdd] sm:$0x1] }
 0x6a4   : > { %3659 = vst [vmem:[#allocation1 + $0x3] ss:$9 sm:$0xff] %v9707_v33  ;;  %v9759_v33 = vld [vmem:[%s11269_s19 + $0xdf] sm:$0x1] }
 0x6a5   : > { %3660 = vst [vmem:[#allocation1 + $0x4] ss:$9 sm:$0xff] %v9708_v34  ;;  %v2888_v34 = vpop.permute.xlu0 %2887 }
 0x6a6   : > { %3661 = vst [vmem:[#allocation1 + $0x5] ss:$9 sm:$0xff] %v9709_v11  ;;  %v2892_v11 = vpop.permute.xlu2 %2891 }
 0x6a7   : > { %3662 = vst [vmem:[#allocation1 + $0x6] ss:$9 sm:$0xff] %v9710_v35  ;;  %v9760_v35 = vld [vmem:[%s11269_s19 + $0xe0] sm:$0x1] }
 0x6a8   : > { %3663 = vst [vmem:[#allocation1 + $0x7] ss:$9 sm:$0xff] %v9711_v36  ;;  %v9761_v36 = vld [vmem:[%s11269_s19 + $0xe1] sm:$0x1] }
 0x6a9   : > { %2971 = vst.msk [vmem:[#allocation2 + $0x68] sm:$0xff] %vm2957_vm2, %v2888_v34  ;;  %v9810_v34 = vld [vmem:[%s11269_s19 + $0x118] sm:$0x1] }
 0x6aa   : > { %2973 = vst.msk [vmem:[#allocation2 + $0x78] sm:$0xff] %vm2957_vm2, %v2892_v11 }
 0x6af   : > { %v3664_v45 = vld [vmem:[#allocation1] sm:$0xff] }
 0x6b0   : > { %3665 = vst [vmem:[#allocation1] ss:$9 sm:$0xff] %v9712_v20  ;;  %3832 = vrot.lane.b32.xlu2 %v3664_v45, %s11219_s22  ;;  %v9763_v20 = vld [vmem:[%s11269_s19 + $0xe3] sm:$0x1]  ;;  %v9766_v45 = vld [vmem:[%s11269_s19 + $0xe6] sm:$0x1] }
 0x6b1   : > { %3666 = vst [vmem:[#allocation1 + $0x1] ss:$9 sm:$0xff] %v9713_v29  ;;  %v9764_v29 = vld [vmem:[%s11269_s19 + $0xe4] sm:$0x1] }
 0x6b2   : > { %3667 = vst [vmem:[#allocation1 + $0x2] ss:$9 sm:$0xff] %v9714_v38  ;;  %v9765_v38 = vld [vmem:[%s11269_s19 + $0xe5] sm:$0x1] }
 0x6b3   : > { %3668 = vst [vmem:[#allocation1 + $0x3] ss:$9 sm:$0xff] %v9715_v47  ;;  %v9767_v47 = vld [vmem:[%s11269_s19 + $0xe7] sm:$0x1] }
 0x6b4   : > { %3669 = vst [vmem:[#allocation1 + $0x4] ss:$9 sm:$0xff] %v9716_v56  ;;  %v9768_v56 = vld [vmem:[%s11269_s19 + $0xea] sm:$0x1] }
 0x6b5   : > { %3670 = vst [vmem:[#allocation1 + $0x5] ss:$9 sm:$0xff] %v9717_v1  ;;  %v9769_v1 = vld [vmem:[%s11269_s19 + $0xeb] sm:$0x1] }
 0x6b6   : > { %3671 = vst [vmem:[#allocation1 + $0x6] ss:$9 sm:$0xff] %v9718_v10 }
 0x6b7   : > { %3672 = vst [vmem:[#allocation1 + $0x7] ss:$9 sm:$0xff] %v9719_v21  ;;  %v9770_v21 = vld [vmem:[%s11269_s19 + $0xec] sm:$0x1] }
 0x6be   : > { %v3673_v51 = vld [vmem:[#allocation1] sm:$0xff] }
 0x6bf   : > { %3834 = vrot.lane.b32.xlu0 %v3673_v51, %s11219_s22  ;;  %3674 = vst [vmem:[#allocation1] ss:$9 sm:$0xff] %v9720_v31  ;;  %v9771_v31 = vld [vmem:[%s11269_s19 + $0xed] sm:$0x1]  ;;  %v9773_v51 = vld [vmem:[%s11269_s19 + $0xef] sm:$0x1] }
 0x6c0   : > { %3675 = vst [vmem:[#allocation1 + $0x1] ss:$9 sm:$0xff] %v9721_v41  ;;  %v9772_v41 = vld [vmem:[%s11269_s19 + $0xee] sm:$0x1] }
 0x6c1   : > { %3676 = vst [vmem:[#allocation1 + $0x2] ss:$9 sm:$0xff] %v9722_v61  ;;  %v9774_v61 = vld [vmem:[%s11269_s19 + $0xf0] sm:$0x1] }
 0x6c2   : > { %3677 = vst [vmem:[#allocation1 + $0x3] ss:$9 sm:$0xff] %v9723_v7  ;;  %v9775_v7 = vld [vmem:[%s11269_s19 + $0xf1] sm:$0x1] }
 0x6c3   : > { %3678 = vst [vmem:[#allocation1 + $0x4] ss:$9 sm:$0xff] %v9724_v18  ;;  %v9776_v18 = vld [vmem:[%s11269_s19 + $0xf2] sm:$0x1] }
 0x6c4   : > { %3679 = vst [vmem:[#allocation1 + $0x5] ss:$9 sm:$0xff] %v9725_v30  ;;  %v9777_v30 = vld [vmem:[%s11269_s19 + $0xf3] sm:$0x1] }
 0x6c5   : > { %3680 = vst [vmem:[#allocation1 + $0x6] ss:$9 sm:$0xff] %v9726_v42  ;;  %v2872_v42 = vpop.permute.xlu1 %2871 }
 0x6c6   : > { %3681 = vst [vmem:[#allocation1 + $0x7] ss:$9 sm:$0xff] %v9727_v53  ;;  %v9778_v53 = vld [vmem:[%s11269_s19 + $0xf4] sm:$0x1] }
 0x6c7   : > { %2963 = vst.msk [vmem:[#allocation2 + $0x28] sm:$0xff] %vm2957_vm2, %v2872_v42  ;;  %v9828_v42 = vld [vmem:[%s11269_s19 + $0x12c] sm:$0x1] }
 0x6cd   : > { %v3682_v50 = vld [vmem:[#allocation1] sm:$0xff] }
 0x6ce   : > { %3683 = vst [vmem:[#allocation1] ss:$9 sm:$0xff] %v9728_v0  ;;  %3836 = vrot.lane.b32.xlu1 %v3682_v50, %s11219_s22  ;;  %v9782_v50 = vld [vmem:[%s11269_s19 + $0xf8] sm:$0x1] }
 0x6cf   : > { %3684 = vst [vmem:[#allocation1 + $0x1] ss:$9 sm:$0xff] %v9729_v13  ;;  %v9779_v13 = vld [vmem:[%s11269_s19 + $0xf5] sm:$0x1] }
 0x6d0   : > { %3685 = vst [vmem:[#allocation1 + $0x2] ss:$9 sm:$0xff] %v9730_v37  ;;  %v9781_v37 = vld [vmem:[%s11269_s19 + $0xf7] sm:$0x1] }
 0x6d1   : > { %3686 = vst [vmem:[#allocation1 + $0x3] ss:$9 sm:$0xff] %v9731_v63  ;;  %v9783_v63 = vld [vmem:[%s11269_s19 + $0xf9] sm:$0x1] }
 0x6d2   : > { %3687 = vst [vmem:[#allocation1 + $0x4] ss:$9 sm:$0xff] %v9732_v14  ;;  %v2894_v14 = vpop.permute.xlu0 %2893 }
 0x6d3   : > { %3688 = vst [vmem:[#allocation1 + $0x5] ss:$9 sm:$0xff] %v9733_v27  ;;  %v2898_v27 = vpop.permute.xlu2 %2897 }
 0x6d4   : > { %3689 = vst [vmem:[#allocation1 + $0x6] ss:$9 sm:$0xff] %v9734_v43  ;;  %v9784_v43 = vld [vmem:[%s11269_s19 + $0xfc] sm:$0x1] }
 0x6d5   : > { %3690 = vst [vmem:[#allocation1 + $0x7] ss:$9 sm:$0xff] %v9735_v57  ;;  %v9785_v57 = vld [vmem:[%s11269_s19 + $0xfd] sm:$0x1] }
 0x6d6   : > { %2974 = vst.msk [vmem:[#allocation2 + $0x80] sm:$0xff] %vm2957_vm2, %v2894_v14 }
 0x6d7   : > { %2976 = vst.msk [vmem:[#allocation2 + $0x90] sm:$0xff] %vm2957_vm2, %v2898_v27  ;;  %v9834_v27 = vld [vmem:[%s11269_s19 + $0x15] sm:$0x1] }
 0x6dc   : > { %v3691_v48 = vld [vmem:[#allocation1] sm:$0xff] }
 0x6dd   : > { %3692 = vst [vmem:[#allocation1] ss:$9 sm:$0xff] %v9736_v39  ;;  %3838 = vrot.lane.b32.xlu2 %v3691_v48, %s11219_s22  ;;  %v9787_v39 = vld [vmem:[%s11269_s19 + $0xff] sm:$0x1]  ;;  %v9790_v48 = vld [vmem:[%s11269_s19 + $0x102] sm:$0x1] }
 0x6de   : > { %3693 = vst [vmem:[#allocation1 + $0x1] ss:$9 sm:$0xff] %v9737_v54  ;;  %v9788_v54 = vld [vmem:[%s11269_s19 + $0x100] sm:$0x1] }
 0x6df   : > { %3694 = vst [vmem:[#allocation1 + $0x2] ss:$9 sm:$0xff] %v9738_v46  ;;  %v9789_v46 = vld [vmem:[%s11269_s19 + $0x101] sm:$0x1] }
 0x6e0   : > { %3695 = vst [vmem:[#allocation1 + $0x3] ss:$9 sm:$0xff] %v9739_v49  ;;  %v9791_v49 = vld [vmem:[%s11269_s19 + $0x103] sm:$0x1] }
 0x6e1   : > { %3696 = vst [vmem:[#allocation1 + $0x4] ss:$9 sm:$0xff] %v9740_v52  ;;  %v9792_v52 = vld [vmem:[%s11269_s19 + $0x104] sm:$0x1] }
 0x6e2   : > { %3697 = vst [vmem:[#allocation1 + $0x5] ss:$9 sm:$0xff] %v9741_v55  ;;  %v9793_v55 = vld [vmem:[%s11269_s19 + $0x105] sm:$0x1] }
 0x6e3   : > { %3698 = vst [vmem:[#allocation1 + $0x6] ss:$9 sm:$0xff] %v9742_v58 }
 0x6e4   : > { %3699 = vst [vmem:[#allocation1 + $0x7] ss:$9 sm:$0xff] %v9743_v59  ;;  %v9794_v59 = vld [vmem:[%s11269_s19 + $0x106] sm:$0x1] }
 0x6eb   : > { %v3700_v2 = vld [vmem:[#allocation1] sm:$0xff] }
 0x6ec   : > { %3840 = vrot.lane.b32.xlu0 %v3700_v2, %s11219_s22  ;;  %3701 = vst [vmem:[#allocation1] ss:$9 sm:$0xff] %v9744_v60  ;;  %v9795_v60 = vld [vmem:[%s11269_s19 + $0x107] sm:$0x1]  ;;  %v9797_v2 = vld [vmem:[%s11269_s19 + $0x109] sm:$0x1] }
 0x6ed   : > { %3702 = vst [vmem:[#allocation1 + $0x1] ss:$9 sm:$0xff] %v9745_v62  ;;  %v9796_v62 = vld [vmem:[%s11269_s19 + $0x108] sm:$0x1] }
 0x6ee   : > { %3703 = vst [vmem:[#allocation1 + $0x2] ss:$9 sm:$0xff] %v9746_v3  ;;  %v9798_v3 = vld [vmem:[%s11269_s19 + $0x10a] sm:$0x1] }
 0x6ef   : > { %3704 = vst [vmem:[#allocation1 + $0x3] ss:$9 sm:$0xff] %v9747_v4  ;;  %v9799_v4 = vld [vmem:[%s11269_s19 + $0x10b] sm:$0x1] }
 0x6f0   : > { %3705 = vst [vmem:[#allocation1 + $0x4] ss:$9 sm:$0xff] %v9748_v5  ;;  %v9800_v5 = vld [vmem:[%s11269_s19 + $0x10e] sm:$0x1] }
 0x6f1   : > { %3706 = vst [vmem:[#allocation1 + $0x5] ss:$9 sm:$0xff] %v9749_v8  ;;  %v9801_v8 = vld [vmem:[%s11269_s19 + $0x10f] sm:$0x1] }
 0x6f2   : > { %3707 = vst [vmem:[#allocation1 + $0x6] ss:$9 sm:$0xff] %v9750_v9  ;;  %v2878_v9 = vpop.permute.xlu1 %2877 }
 0x6f3   : > { %3708 = vst [vmem:[#allocation1 + $0x7] ss:$9 sm:$0xff] %v9751_v12  ;;  %v9802_v12 = vld [vmem:[%s11269_s19 + $0x110] sm:$0x1] }
 0x6f4   : > { %2966 = vst.msk [vmem:[#allocation2 + $0x40] sm:$0xff] %vm2957_vm2, %v2878_v9  ;;  %v9852_v9 = vld [vmem:[%s11269_s19 + $0x29] sm:$0x1] }
 0x6fa   : > { %v3709_v22 = vld [vmem:[#allocation1] sm:$0xff] }
 0x6fb   : > { %3710 = vst [vmem:[#allocation1] ss:$9 sm:$0xff] %v9752_v15  ;;  %3842 = vrot.lane.b32.xlu1 %v3709_v22, %s11219_s22  ;;  %v9806_v22 = vld [vmem:[%s11269_s19 + $0x114] sm:$0x1] }
 0x6fc   : > { %3711 = vst [vmem:[#allocation1 + $0x1] ss:$9 sm:$0xff] %v9753_v16  ;;  %v9803_v16 = vld [vmem:[%s11269_s19 + $0x111] sm:$0x1] }
 0x6fd   : > { %3712 = vst [vmem:[#allocation1 + $0x2] ss:$9 sm:$0xff] %v9754_v19  ;;  %v9805_v19 = vld [vmem:[%s11269_s19 + $0x113] sm:$0x1] }
 0x6fe   : > { %3713 = vst [vmem:[#allocation1 + $0x3] ss:$9 sm:$0xff] %v9755_v24  ;;  %v9807_v24 = vld [vmem:[%s11269_s19 + $0x115] sm:$0x1] }
 0x6ff   : > { %3714 = vst [vmem:[#allocation1 + $0x4] ss:$9 sm:$0xff] %v9756_v26  ;;  %v2900_v26 = vpop.permute.xlu0 %2899 }
 0x700   : > { %3715 = vst [vmem:[#allocation1 + $0x5] ss:$9 sm:$0xff] %v9757_v28  ;;  %v2904_v28 = vpop.permute.xlu2 %2903 }
 0x701   : > { %3716 = vst [vmem:[#allocation1 + $0x6] ss:$9 sm:$0xff] %v9758_v32  ;;  %v9808_v32 = vld [vmem:[%s11269_s19 + $0x116] sm:$0x1] }
 0x702   : > { %3717 = vst [vmem:[#allocation1 + $0x7] ss:$9 sm:$0xff] %v9759_v33  ;;  %v9809_v33 = vld [vmem:[%s11269_s19 + $0x117] sm:$0x1] }
 0x703   : > { %2977 = vst.msk [vmem:[#allocation2 + $0x98] sm:$0xff] %vm2957_vm2, %v2900_v26  ;;  %v9858_v26 = vld [vmem:[%s11269_s19 + $0x2f] sm:$0x1] }
 0x704   : > { %2979 = vst.msk [vmem:[#allocation2 + $0xa8] sm:$0xff] %vm2957_vm2, %v2904_v28 }
 0x709   : > { %v3718_v44 = vld [vmem:[#allocation1] sm:$0xff] }
 0x70a   : > { %3719 = vst [vmem:[#allocation1] ss:$9 sm:$0xff] %v9760_v35  ;;  %3844 = vrot.lane.b32.xlu2 %v3718_v44, %s11219_s22  ;;  %v9811_v35 = vld [vmem:[%s11269_s19 + $0x119] sm:$0x1]  ;;  %v9814_v44 = vld [vmem:[%s11269_s19 + $0x11c] sm:$0x1] }
 0x70b   : > { %3720 = vst [vmem:[#allocation1 + $0x1] ss:$9 sm:$0xff] %v9761_v36  ;;  %v9812_v36 = vld [vmem:[%s11269_s19 + $0x11a] sm:$0x1] }
 0x70c   : > { %3721 = vst [vmem:[#allocation1 + $0x2] ss:$9 sm:$0xff] %v9762_v40  ;;  %v9813_v40 = vld [vmem:[%s11269_s19 + $0x11b] sm:$0x1] }
 0x70d   : > { %3722 = vst [vmem:[#allocation1 + $0x3] ss:$9 sm:$0xff] %v9763_v20  ;;  %v9815_v20 = vld [vmem:[%s11269_s19 + $0x11d] sm:$0x1] }
 0x70e   : > { %3723 = vst [vmem:[#allocation1 + $0x4] ss:$9 sm:$0xff] %v9764_v29  ;;  %v9816_v29 = vld [vmem:[%s11269_s19 + $0x120] sm:$0x1] }
 0x70f   : > { %3724 = vst [vmem:[#allocation1 + $0x5] ss:$9 sm:$0xff] %v9765_v38  ;;  %v9817_v38 = vld [vmem:[%s11269_s19 + $0x121] sm:$0x1] }
 0x710   : > { %3725 = vst [vmem:[#allocation1 + $0x6] ss:$9 sm:$0xff] %v9766_v45 }
 0x711   : > { %3726 = vst [vmem:[#allocation1 + $0x7] ss:$9 sm:$0xff] %v9767_v47  ;;  %v9818_v47 = vld [vmem:[%s11269_s19 + $0x122] sm:$0x1] }
 0x718   : > { %v3727_v10 = vld [vmem:[#allocation1] sm:$0xff] }
 0x719   : > { %3846 = vrot.lane.b32.xlu0 %v3727_v10, %s11219_s22  ;;  %3728 = vst [vmem:[#allocation1] ss:$9 sm:$0xff] %v9768_v56  ;;  %v9819_v56 = vld [vmem:[%s11269_s19 + $0x123] sm:$0x1]  ;;  %v9821_v10 = vld [vmem:[%s11269_s19 + $0x125] sm:$0x1] }
 0x71a   : > { %3729 = vst [vmem:[#allocation1 + $0x1] ss:$9 sm:$0xff] %v9769_v1  ;;  %v9820_v1 = vld [vmem:[%s11269_s19 + $0x124] sm:$0x1] }
 0x71b   : > { %3730 = vst [vmem:[#allocation1 + $0x2] ss:$9 sm:$0xff] %v9770_v21  ;;  %v9822_v21 = vld [vmem:[%s11269_s19 + $0x126] sm:$0x1] }
 0x71c   : > { %3731 = vst [vmem:[#allocation1 + $0x3] ss:$9 sm:$0xff] %v9771_v31  ;;  %v9823_v31 = vld [vmem:[%s11269_s19 + $0x127] sm:$0x1] }
 0x71d   : > { %3732 = vst [vmem:[#allocation1 + $0x4] ss:$9 sm:$0xff] %v9772_v41  ;;  %v9824_v41 = vld [vmem:[%s11269_s19 + $0x128] sm:$0x1] }
 0x71e   : > { %3733 = vst [vmem:[#allocation1 + $0x5] ss:$9 sm:$0xff] %v9773_v51  ;;  %v9825_v51 = vld [vmem:[%s11269_s19 + $0x129] sm:$0x1] }
 0x71f   : > { %3734 = vst [vmem:[#allocation1 + $0x6] ss:$9 sm:$0xff] %v9774_v61  ;;  %v2884_v61 = vpop.permute.xlu1 %2883 }
 0x720   : > { %3735 = vst [vmem:[#allocation1 + $0x7] ss:$9 sm:$0xff] %v9775_v7  ;;  %v9826_v7 = vld [vmem:[%s11269_s19 + $0x12a] sm:$0x1] }
 0x721   : > { %2969 = vst.msk [vmem:[#allocation2 + $0x58] sm:$0xff] %vm2957_vm2, %v2884_v61  ;;  %v9876_v61 = vld [vmem:[%s11269_s19 + $0x43] sm:$0x1] }
 0x727   : > { %v3736_v0 = vld [vmem:[#allocation1] sm:$0xff] }
 0x728   : > { %3737 = vst [vmem:[#allocation1] ss:$9 sm:$0xff] %v9776_v18  ;;  %3848 = vrot.lane.b32.xlu1 %v3736_v0, %s11219_s22  ;;  %v9830_v0 = vld [vmem:[%s11269_s19 + $0x12e] sm:$0x1] }
 0x729   : > { %3738 = vst [vmem:[#allocation1 + $0x1] ss:$9 sm:$0xff] %v9777_v30  ;;  %v9827_v30 = vld [vmem:[%s11269_s19 + $0x12b] sm:$0x1] }
 0x72a   : > { %3739 = vst [vmem:[#allocation1 + $0x2] ss:$9 sm:$0xff] %v9778_v53  ;;  %v9829_v53 = vld [vmem:[%s11269_s19 + $0x12d] sm:$0x1] }
 0x72b   : > { %3740 = vst [vmem:[#allocation1 + $0x3] ss:$9 sm:$0xff] %v9779_v13  ;;  %v9831_v13 = vld [vmem:[%s11269_s19 + $0x12f] sm:$0x1] }
 0x72c   : > { %3741 = vst [vmem:[#allocation1 + $0x4] ss:$9 sm:$0xff] %v9780_v25  ;;  %v2906_v25 = vpop.permute.xlu0 %2905 }
 0x72d   : > { %3742 = vst [vmem:[#allocation1 + $0x5] ss:$9 sm:$0xff] %v9781_v37  ;;  %v2910_v37 = vpop.permute.xlu2 %2909 }
 0x72e   : > { %3743 = vst [vmem:[#allocation1 + $0x6] ss:$9 sm:$0xff] %v9782_v50  ;;  %v9832_v50 = vld [vmem:[%s11269_s19 + $0x13] sm:$0x1] }
 0x72f   : > { %3744 = vst [vmem:[#allocation1 + $0x7] ss:$9 sm:$0xff] %v9783_v63  ;;  %v9833_v63 = vld [vmem:[%s11269_s19 + $0x14] sm:$0x1] }
 0x730   : > { %2980 = vst.msk [vmem:[#allocation2 + $0xb0] sm:$0xff] %vm2957_vm2, %v2906_v25  ;;  %v9882_v25 = vld [vmem:[%s11269_s19 + $0x4b] sm:$0x1] }
 0x731   : > { %2982 = vst.msk [vmem:[#allocation2 + $0xc0] sm:$0xff] %vm2957_vm2, %v2910_v37 }
 0x736   : > { %v3745_v23 = vld [vmem:[#allocation1] sm:$0xff] }
 0x737   : > { %3746 = vst [vmem:[#allocation1] ss:$9 sm:$0xff] %v9784_v43  ;;  %3850 = vrot.lane.b32.xlu2 %v3745_v23, %s11219_s22  ;;  %v9835_v43 = vld [vmem:[%s11269_s19 + $0x16] sm:$0x1]  ;;  %v9838_v23 = vld [vmem:[%s11269_s19 + $0x19] sm:$0x1] }
 0x738   : > { %3747 = vst [vmem:[#allocation1 + $0x1] ss:$9 sm:$0xff] %v9785_v57  ;;  %v9836_v57 = vld [vmem:[%s11269_s19 + $0x17] sm:$0x1] }
 0x739   : > { %3748 = vst [vmem:[#allocation1 + $0x2] ss:$9 sm:$0xff] %v9786_v6  ;;  %v9837_v6 = vld [vmem:[%s11269_s19 + $0x18] sm:$0x1] }
 0x73a   : > { %3749 = vst [vmem:[#allocation1 + $0x3] ss:$9 sm:$0xff] %v9787_v39  ;;  %v9839_v39 = vld [vmem:[%s11269_s19 + $0x1a] sm:$0x1] }
 0x73b   : > { %3750 = vst [vmem:[#allocation1 + $0x4] ss:$9 sm:$0xff] %v9788_v54  ;;  %v9840_v54 = vld [vmem:[%s11269_s19 + $0x1b] sm:$0x1] }
 0x73c   : > { %3751 = vst [vmem:[#allocation1 + $0x5] ss:$9 sm:$0xff] %v9789_v46  ;;  %v9841_v46 = vld [vmem:[%s11269_s19 + $0x1c] sm:$0x1] }
 0x73d   : > { %3752 = vst [vmem:[#allocation1 + $0x6] ss:$9 sm:$0xff] %v9790_v48 }
 0x73e   : > { %3753 = vst [vmem:[#allocation1 + $0x7] ss:$9 sm:$0xff] %v9791_v49  ;;  %v9842_v49 = vld [vmem:[%s11269_s19 + $0x1d] sm:$0x1] }
 0x745   : > { %v3754_v58 = vld [vmem:[#allocation1] sm:$0xff] }
 0x746   : > { %3852 = vrot.lane.b32.xlu0 %v3754_v58, %s11219_s22  ;;  %3755 = vst [vmem:[#allocation1] ss:$9 sm:$0xff] %v9792_v52  ;;  %v9843_v52 = vld [vmem:[%s11269_s19 + $0x1e] sm:$0x1]  ;;  %v9845_v58 = vld [vmem:[%s11269_s19 + $0x20] sm:$0x1] }
 0x747   : > { %3756 = vst [vmem:[#allocation1 + $0x1] ss:$9 sm:$0xff] %v9793_v55  ;;  %v9844_v55 = vld [vmem:[%s11269_s19 + $0x1f] sm:$0x1] }
 0x748   : > { %3757 = vst [vmem:[#allocation1 + $0x2] ss:$9 sm:$0xff] %v9794_v59  ;;  %v9846_v59 = vld [vmem:[%s11269_s19 + $0x21] sm:$0x1] }
 0x749   : > { %3758 = vst [vmem:[#allocation1 + $0x3] ss:$9 sm:$0xff] %v9795_v60  ;;  %v9847_v60 = vld [vmem:[%s11269_s19 + $0x22] sm:$0x1] }
 0x74a   : > { %3759 = vst [vmem:[#allocation1 + $0x4] ss:$9 sm:$0xff] %v9796_v62  ;;  %v9848_v62 = vld [vmem:[%s11269_s19 + $0x25] sm:$0x1] }
 0x74b   : > { %3760 = vst [vmem:[#allocation1 + $0x5] ss:$9 sm:$0xff] %v9797_v2  ;;  %v9849_v2 = vld [vmem:[%s11269_s19 + $0x26] sm:$0x1] }
 0x74c   : > { %3761 = vst [vmem:[#allocation1 + $0x6] ss:$9 sm:$0xff] %v9798_v3  ;;  %v2890_v3 = vpop.permute.xlu1 %2889 }
 0x74d   : > { %3762 = vst [vmem:[#allocation1 + $0x7] ss:$9 sm:$0xff] %v9799_v4  ;;  %v9850_v4 = vld [vmem:[%s11269_s19 + $0x27] sm:$0x1] }
 0x74e   : > { %2972 = vst.msk [vmem:[#allocation2 + $0x70] sm:$0xff] %vm2957_vm2, %v2890_v3  ;;  %v9900_v3 = vld [vmem:[%s11269_s19 + $0x5f] sm:$0x1] }
 0x754   : > { %v3763_v15 = vld [vmem:[#allocation1] sm:$0xff] }
 0x755   : > { %3764 = vst [vmem:[#allocation1] ss:$9 sm:$0xff] %v9800_v5  ;;  %3854 = vrot.lane.b32.xlu1 %v3763_v15, %s11219_s22  ;;  %v9854_v15 = vld [vmem:[%s11269_s19 + $0x2b] sm:$0x1] }
 0x756   : > { %3765 = vst [vmem:[#allocation1 + $0x1] ss:$9 sm:$0xff] %v9801_v8  ;;  %v9851_v8 = vld [vmem:[%s11269_s19 + $0x28] sm:$0x1] }
 0x757   : > { %3766 = vst [vmem:[#allocation1 + $0x2] ss:$9 sm:$0xff] %v9802_v12  ;;  %v9853_v12 = vld [vmem:[%s11269_s19 + $0x2a] sm:$0x1] }
 0x758   : > { %3767 = vst [vmem:[#allocation1 + $0x3] ss:$9 sm:$0xff] %v9803_v16  ;;  %v9855_v16 = vld [vmem:[%s11269_s19 + $0x2c] sm:$0x1] }
 0x759   : > { %3768 = vst [vmem:[#allocation1 + $0x4] ss:$9 sm:$0xff] %v9804_v17  ;;  %v2912_v17 = vpop.permute.xlu0 %2911 }
 0x75a   : > { %3769 = vst [vmem:[#allocation1 + $0x5] ss:$9 sm:$0xff] %v9805_v19  ;;  %v2916_v19 = vpop.permute.xlu2 %2915 }
 0x75b   : > { %3770 = vst [vmem:[#allocation1 + $0x6] ss:$9 sm:$0xff] %v9806_v22  ;;  %v9856_v22 = vld [vmem:[%s11269_s19 + $0x2d] sm:$0x1] }
 0x75c   : > { %3771 = vst [vmem:[#allocation1 + $0x7] ss:$9 sm:$0xff] %v9807_v24  ;;  %v9857_v24 = vld [vmem:[%s11269_s19 + $0x2e] sm:$0x1] }
 0x75d   : > { %2983 = vst.msk [vmem:[#allocation2 + $0xc8] sm:$0xff] %vm2957_vm2, %v2912_v17  ;;  %v9906_v17 = vld [vmem:[%s11269_s19 + $0x65] sm:$0x1] }
 0x75e   : > { %2985 = vst.msk [vmem:[#allocation2 + $0xd8] sm:$0xff] %vm2957_vm2, %v2916_v19 }
 0x763   : > { %v3772_v11 = vld [vmem:[#allocation1] sm:$0xff] }
 0x764   : > { %3773 = vst [vmem:[#allocation1] ss:$9 sm:$0xff] %v9808_v32  ;;  %3856 = vrot.lane.b32.xlu2 %v3772_v11, %s11219_s22  ;;  %v9859_v32 = vld [vmem:[%s11269_s19 + $0x30] sm:$0x1]  ;;  %v9862_v11 = vld [vmem:[%s11269_s19 + $0x33] sm:$0x1] }
 0x765   : > { %3774 = vst [vmem:[#allocation1 + $0x1] ss:$9 sm:$0xff] %v9809_v33  ;;  %v9860_v33 = vld [vmem:[%s11269_s19 + $0x31] sm:$0x1] }
 0x766   : > { %3775 = vst [vmem:[#allocation1 + $0x2] ss:$9 sm:$0xff] %v9810_v34  ;;  %v9861_v34 = vld [vmem:[%s11269_s19 + $0x32] sm:$0x1] }
 0x767   : > { %3776 = vst [vmem:[#allocation1 + $0x3] ss:$9 sm:$0xff] %v9811_v35  ;;  %v9863_v35 = vld [vmem:[%s11269_s19 + $0x34] sm:$0x1] }
 0x768   : > { %3777 = vst [vmem:[#allocation1 + $0x4] ss:$9 sm:$0xff] %v9812_v36  ;;  %v9864_v36 = vld [vmem:[%s11269_s19 + $0x37] sm:$0x1] }
 0x769   : > { %3778 = vst [vmem:[#allocation1 + $0x5] ss:$9 sm:$0xff] %v9813_v40  ;;  %v9865_v40 = vld [vmem:[%s11269_s19 + $0x38] sm:$0x1] }
 0x76a   : > { %3779 = vst [vmem:[#allocation1 + $0x6] ss:$9 sm:$0xff] %v9814_v44 }
 0x76b   : > { %3780 = vst [vmem:[#allocation1 + $0x7] ss:$9 sm:$0xff] %v9815_v20  ;;  %v9866_v20 = vld [vmem:[%s11269_s19 + $0x39] sm:$0x1] }
 0x772   : > { %v3781_v45 = vld [vmem:[#allocation1] sm:$0xff] }
 0x773   : > { %3858 = vrot.lane.b32.xlu0 %v3781_v45, %s11219_s22  ;;  %3782 = vst [vmem:[#allocation1] ss:$9 sm:$0xff] %v9816_v29  ;;  %v9867_v29 = vld [vmem:[%s11269_s19 + $0x3a] sm:$0x1]  ;;  %v9869_v45 = vld [vmem:[%s11269_s19 + $0x3c] sm:$0x1] }
 0x774   : > { %3783 = vst [vmem:[#allocation1 + $0x1] ss:$9 sm:$0xff] %v9817_v38  ;;  %v9868_v38 = vld [vmem:[%s11269_s19 + $0x3b] sm:$0x1] }
 0x775   : > { %3784 = vst [vmem:[#allocation1 + $0x2] ss:$9 sm:$0xff] %v9818_v47  ;;  %v9870_v47 = vld [vmem:[%s11269_s19 + $0x3d] sm:$0x1] }
 0x776   : > { %3785 = vst [vmem:[#allocation1 + $0x3] ss:$9 sm:$0xff] %v9819_v56  ;;  %v9871_v56 = vld [vmem:[%s11269_s19 + $0x3e] sm:$0x1] }
 0x777   : > { %3786 = vst [vmem:[#allocation1 + $0x4] ss:$9 sm:$0xff] %v9820_v1  ;;  %v9872_v1 = vld [vmem:[%s11269_s19 + $0x3f] sm:$0x1] }
 0x778   : > { %3787 = vst [vmem:[#allocation1 + $0x5] ss:$9 sm:$0xff] %v9821_v10  ;;  %v9873_v10 = vld [vmem:[%s11269_s19 + $0x40] sm:$0x1] }
 0x779   : > { %3788 = vst [vmem:[#allocation1 + $0x6] ss:$9 sm:$0xff] %v9822_v21  ;;  %v2896_v21 = vpop.permute.xlu1 %2895 }
 0x77a   : > { %3789 = vst [vmem:[#allocation1 + $0x7] ss:$9 sm:$0xff] %v9823_v31  ;;  %v9874_v31 = vld [vmem:[%s11269_s19 + $0x41] sm:$0x1] }
 0x77b   : > { %2975 = vst.msk [vmem:[#allocation2 + $0x88] sm:$0xff] %vm2957_vm2, %v2896_v21  ;;  %v9924_v21 = vld [vmem:[%s11269_s19 + $0x79] sm:$0x1] }
 0x781   : > { %v3790_v18 = vld [vmem:[#allocation1] sm:$0xff] }
 0x782   : > { %3791 = vst [vmem:[#allocation1] ss:$9 sm:$0xff] %v9824_v41  ;;  %3860 = vrot.lane.b32.xlu1 %v3790_v18, %s11219_s22  ;;  %v9878_v18 = vld [vmem:[%s11269_s19 + $0x45] sm:$0x1] }
 0x783   : > { %3792 = vst [vmem:[#allocation1 + $0x1] ss:$9 sm:$0xff] %v9825_v51  ;;  %v9875_v51 = vld [vmem:[%s11269_s19 + $0x42] sm:$0x1] }
 0x784   : > { %3793 = vst [vmem:[#allocation1 + $0x2] ss:$9 sm:$0xff] %v9826_v7  ;;  %v9877_v7 = vld [vmem:[%s11269_s19 + $0x44] sm:$0x1] }
 0x785   : > { %3794 = vst [vmem:[#allocation1 + $0x3] ss:$9 sm:$0xff] %v9827_v30  ;;  %v9879_v30 = vld [vmem:[%s11269_s19 + $0x46] sm:$0x1] }
 0x786   : > { %3795 = vst [vmem:[#allocation1 + $0x4] ss:$9 sm:$0xff] %v9828_v42  ;;  %v2918_v42 = vpop.permute.xlu0 %2917 }
 0x787   : > { %3796 = vst [vmem:[#allocation1 + $0x5] ss:$9 sm:$0xff] %v9829_v53  ;;  %v2922_v53 = vpop.permute.xlu2 %2921 }
 0x788   : > { %3797 = vst [vmem:[#allocation1 + $0x6] ss:$9 sm:$0xff] %v9830_v0  ;;  %v9880_v0 = vld [vmem:[%s11269_s19 + $0x49] sm:$0x1] }
 0x789   : > { %3798 = vst [vmem:[#allocation1 + $0x7] ss:$9 sm:$0xff] %v9831_v13  ;;  %v9881_v13 = vld [vmem:[%s11269_s19 + $0x4a] sm:$0x1] }
 0x78a   : > { %2986 = vst.msk [vmem:[#allocation2 + $0xe0] sm:$0xff] %vm2957_vm2, %v2918_v42  ;;  %v9930_v42 = vld [vmem:[%s11269_s19 + $0x81] sm:$0x1] }
 0x78b   : > { %2988 = vst.msk [vmem:[#allocation2 + $0xf0] sm:$0xff] %vm2957_vm2, %v2922_v53 }
 0x790   : > { %v3799_v14 = vld [vmem:[#allocation1] sm:$0xff] }
 0x791   : > { %4443 = vst [vmem:[#allocation1] ss:$9 sm:$0xff] %v9832_v50  ;;  %3862 = vrot.lane.b32.xlu2 %v3799_v14, %s11219_s22  ;;  %v9883_v50 = vld [vmem:[%s11269_s19 + $0x4c] sm:$0x1]  ;;  %v9885_v14 = vld [vmem:[%s11269_s19 + $0x4e] sm:$0x1] }
 0x792   : > { %4445 = vst [vmem:[#allocation1 + $0x1] ss:$9 sm:$0xff] %v9833_v63  ;;  %v9884_v63 = vld [vmem:[%s11269_s19 + $0x4d] sm:$0x1] }
 0x793   : > { %4447 = vst [vmem:[#allocation1 + $0x2] ss:$9 sm:$0xff] %v9834_v27  ;;  %v9886_v27 = vld [vmem:[%s11269_s19 + $0x4f] sm:$0x1] }
 0x794   : > { %4449 = vst [vmem:[#allocation1 + $0x3] ss:$9 sm:$0xff] %v9835_v43  ;;  %v9887_v43 = vld [vmem:[%s11269_s19 + $0x50] sm:$0x1] }
 0x795   : > { %4451 = vst [vmem:[#allocation1 + $0x4] ss:$9 sm:$0xff] %v9836_v57  ;;  %v9888_v57 = vld [vmem:[%s11269_s19 + $0x51] sm:$0x1] }
 0x796   : > { %4453 = vst [vmem:[#allocation1 + $0x5] ss:$9 sm:$0xff] %v9837_v6  ;;  %v9889_v6 = vld [vmem:[%s11269_s19 + $0x52] sm:$0x1] }
 0x797   : > { %4455 = vst [vmem:[#allocation1 + $0x6] ss:$9 sm:$0xff] %v9838_v23 }
 0x798   : > { %4457 = vst [vmem:[#allocation1 + $0x7] ss:$9 sm:$0xff] %v9839_v39  ;;  %v9890_v39 = vld [vmem:[%s11269_s19 + $0x53] sm:$0x1] }
 0x79f   : > { %v4458_v48 = vld [vmem:[#allocation1] sm:$0xff] }
 0x7a0   : > { %4738 = vrot.lane.b32.xlu0 %v4458_v48, %s11220_s23  ;;  %4459 = vst [vmem:[#allocation1] ss:$9 sm:$0xff] %v9840_v54  ;;  %v9891_v54 = vld [vmem:[%s11269_s19 + $0x54] sm:$0x1]  ;;  %v9893_v48 = vld [vmem:[%s11269_s19 + $0x56] sm:$0x1] }
 0x7a1   : > { %4460 = vst [vmem:[#allocation1 + $0x1] ss:$9 sm:$0xff] %v9841_v46  ;;  %v9892_v46 = vld [vmem:[%s11269_s19 + $0x55] sm:$0x1] }
 0x7a2   : > { %4461 = vst [vmem:[#allocation1 + $0x2] ss:$9 sm:$0xff] %v9842_v49  ;;  %v9894_v49 = vld [vmem:[%s11269_s19 + $0x57] sm:$0x1] }
 0x7a3   : > { %4462 = vst [vmem:[#allocation1 + $0x3] ss:$9 sm:$0xff] %v9843_v52  ;;  %v9895_v52 = vld [vmem:[%s11269_s19 + $0x58] sm:$0x1] }
 0x7a4   : > { %4463 = vst [vmem:[#allocation1 + $0x4] ss:$9 sm:$0xff] %v9844_v55  ;;  %v9896_v55 = vld [vmem:[%s11269_s19 + $0x5b] sm:$0x1] }
 0x7a5   : > { %4464 = vst [vmem:[#allocation1 + $0x5] ss:$9 sm:$0xff] %v9845_v58  ;;  %v9897_v58 = vld [vmem:[%s11269_s19 + $0x5c] sm:$0x1] }
 0x7a6   : > { %4465 = vst [vmem:[#allocation1 + $0x6] ss:$9 sm:$0xff] %v9846_v59  ;;  %v2902_v59 = vpop.permute.xlu1 %2901 }
 0x7a7   : > { %4466 = vst [vmem:[#allocation1 + $0x7] ss:$9 sm:$0xff] %v9847_v60  ;;  %v9898_v60 = vld [vmem:[%s11269_s19 + $0x5d] sm:$0x1] }
 0x7a8   : > { %2978 = vst.msk [vmem:[#allocation2 + $0xa0] sm:$0xff] %vm2957_vm2, %v2902_v59  ;;  %v9948_v59 = vld [vmem:[%s11269_s19 + $0x95] sm:$0x1] }
 0x7ae   : > { %v4467_v5 = vld [vmem:[#allocation1] sm:$0xff] }
 0x7af   : > { %4468 = vst [vmem:[#allocation1] ss:$9 sm:$0xff] %v9848_v62  ;;  %4740 = vrot.lane.b32.xlu1 %v4467_v5, %s11220_s23  ;;  %v9902_v5 = vld [vmem:[%s11269_s19 + $0x61] sm:$0x1] }
 0x7b0   : > { %4469 = vst [vmem:[#allocation1 + $0x1] ss:$9 sm:$0xff] %v9849_v2  ;;  %v9899_v2 = vld [vmem:[%s11269_s19 + $0x5e] sm:$0x1] }
 0x7b1   : > { %4470 = vst [vmem:[#allocation1 + $0x2] ss:$9 sm:$0xff] %v9850_v4  ;;  %v9901_v4 = vld [vmem:[%s11269_s19 + $0x60] sm:$0x1] }
 0x7b2   : > { %4471 = vst [vmem:[#allocation1 + $0x3] ss:$9 sm:$0xff] %v9851_v8  ;;  %v9903_v8 = vld [vmem:[%s11269_s19 + $0x62] sm:$0x1] }
 0x7b3   : > { %4472 = vst [vmem:[#allocation1 + $0x4] ss:$9 sm:$0xff] %v9852_v9  ;;  %v2924_v9 = vpop.permute.xlu0 %2923 }
 0x7b4   : > { %4473 = vst [vmem:[#allocation1 + $0x5] ss:$9 sm:$0xff] %v9853_v12  ;;  %v3803_v12 = vpop.permute.xlu2 %3802 }
 0x7b5   : > { %4474 = vst [vmem:[#allocation1 + $0x6] ss:$9 sm:$0xff] %v9854_v15  ;;  %v9904_v15 = vld [vmem:[%s11269_s19 + $0x63] sm:$0x1] }
 0x7b6   : > { %4475 = vst [vmem:[#allocation1 + $0x7] ss:$9 sm:$0xff] %v9855_v16  ;;  %v9905_v16 = vld [vmem:[%s11269_s19 + $0x64] sm:$0x1] }
 0x7b7   : > { %2989 = vst.msk [vmem:[#allocation2 + $0xf8] sm:$0xff] %vm2957_vm2, %v2924_v9  ;;  %v9954_v9 = vld [vmem:[%s11269_s19 + $0x9b] sm:$0x1] }
 0x7b8   : > { %3898 = vst.msk [vmem:[#allocation2 + $0x8] sm:$0xff] %vm3896_vm3, %v3803_v12 }
 0x7bd   : > { %v4476_v28 = vld [vmem:[#allocation1] sm:$0xff] }
 0x7be   : > { %4477 = vst [vmem:[#allocation1] ss:$9 sm:$0xff] %v9856_v22  ;;  %4742 = vrot.lane.b32.xlu2 %v4476_v28, %s11220_s23  ;;  %v9907_v22 = vld [vmem:[%s11269_s19 + $0x66] sm:$0x1]  ;;  %v9910_v28 = vld [vmem:[%s11269_s19 + $0x69] sm:$0x1] }
 0x7bf   : > { %4478 = vst [vmem:[#allocation1 + $0x1] ss:$9 sm:$0xff] %v9857_v24  ;;  %v9908_v24 = vld [vmem:[%s11269_s19 + $0x67] sm:$0x1] }
 0x7c0   : > { %4479 = vst [vmem:[#allocation1 + $0x2] ss:$9 sm:$0xff] %v9858_v26  ;;  %v9909_v26 = vld [vmem:[%s11269_s19 + $0x68] sm:$0x1] }
 0x7c1   : > { %4480 = vst [vmem:[#allocation1 + $0x3] ss:$9 sm:$0xff] %v9859_v32  ;;  %v9911_v32 = vld [vmem:[%s11269_s19 + $0x6a] sm:$0x1] }
 0x7c2   : > { %4481 = vst [vmem:[#allocation1 + $0x4] ss:$9 sm:$0xff] %v9860_v33  ;;  %v9912_v33 = vld [vmem:[%s11269_s19 + $0x6d] sm:$0x1] }
 0x7c3   : > { %4482 = vst [vmem:[#allocation1 + $0x5] ss:$9 sm:$0xff] %v9861_v34  ;;  %v9913_v34 = vld [vmem:[%s11269_s19 + $0x6e] sm:$0x1] }
 0x7c4   : > { %4483 = vst [vmem:[#allocation1 + $0x6] ss:$9 sm:$0xff] %v9862_v11 }
 0x7c5   : > { %4484 = vst [vmem:[#allocation1 + $0x7] ss:$9 sm:$0xff] %v9863_v35  ;;  %v9914_v35 = vld [vmem:[%s11269_s19 + $0x6f] sm:$0x1] }
 0x7cc   : > { %v4485_v44 = vld [vmem:[#allocation1] sm:$0xff] }
 0x7cd   : > { %4744 = vrot.lane.b32.xlu0 %v4485_v44, %s11220_s23  ;;  %4486 = vst [vmem:[#allocation1] ss:$9 sm:$0xff] %v9864_v36  ;;  %v9915_v36 = vld [vmem:[%s11269_s19 + $0x70] sm:$0x1]  ;;  %v9917_v44 = vld [vmem:[%s11269_s19 + $0x72] sm:$0x1] }
 0x7ce   : > { %4487 = vst [vmem:[#allocation1 + $0x1] ss:$9 sm:$0xff] %v9865_v40  ;;  %v9916_v40 = vld [vmem:[%s11269_s19 + $0x71] sm:$0x1] }
 0x7cf   : > { %4488 = vst [vmem:[#allocation1 + $0x2] ss:$9 sm:$0xff] %v9866_v20  ;;  %v9918_v20 = vld [vmem:[%s11269_s19 + $0x73] sm:$0x1] }
 0x7d0   : > { %4489 = vst [vmem:[#allocation1 + $0x3] ss:$9 sm:$0xff] %v9867_v29  ;;  %v9919_v29 = vld [vmem:[%s11269_s19 + $0x74] sm:$0x1] }
 0x7d1   : > { %4490 = vst [vmem:[#allocation1 + $0x4] ss:$9 sm:$0xff] %v9868_v38  ;;  %v9920_v38 = vld [vmem:[%s11269_s19 + $0x75] sm:$0x1] }
 0x7d2   : > { %4491 = vst [vmem:[#allocation1 + $0x5] ss:$9 sm:$0xff] %v9869_v45  ;;  %v9921_v45 = vld [vmem:[%s11269_s19 + $0x76] sm:$0x1] }
 0x7d3   : > { %4492 = vst [vmem:[#allocation1 + $0x6] ss:$9 sm:$0xff] %v9870_v47  ;;  %v2908_v47 = vpop.permute.xlu1 %2907 }
 0x7d4   : > { %4493 = vst [vmem:[#allocation1 + $0x7] ss:$9 sm:$0xff] %v9871_v56  ;;  %v9922_v56 = vld [vmem:[%s11269_s19 + $0x77] sm:$0x1] }
 0x7d5   : > { %2981 = vst.msk [vmem:[#allocation2 + $0xb8] sm:$0xff] %vm2957_vm2, %v2908_v47  ;;  %v9972_v47 = vld [vmem:[%s11269_s19 + $0xaf] sm:$0x1] }
 0x7db   : > { %v4494_v41 = vld [vmem:[#allocation1] sm:$0xff] }
 0x7dc   : > { %4495 = vst [vmem:[#allocation1] ss:$9 sm:$0xff] %v9872_v1  ;;  %4746 = vrot.lane.b32.xlu1 %v4494_v41, %s11220_s23  ;;  %v9926_v41 = vld [vmem:[%s11269_s19 + $0x7b] sm:$0x1] }
 0x7dd   : > { %4496 = vst [vmem:[#allocation1 + $0x1] ss:$9 sm:$0xff] %v9873_v10  ;;  %v9923_v10 = vld [vmem:[%s11269_s19 + $0x78] sm:$0x1] }
 0x7de   : > { %4497 = vst [vmem:[#allocation1 + $0x2] ss:$9 sm:$0xff] %v9874_v31  ;;  %v9925_v31 = vld [vmem:[%s11269_s19 + $0x7a] sm:$0x1] }
 0x7df   : > { %4498 = vst [vmem:[#allocation1 + $0x3] ss:$9 sm:$0xff] %v9875_v51  ;;  %v9927_v51 = vld [vmem:[%s11269_s19 + $0x7c] sm:$0x1] }
 0x7e0   : > { %4499 = vst [vmem:[#allocation1 + $0x4] ss:$9 sm:$0xff] %v9876_v61  ;;  %v3805_v61 = vpop.permute.xlu0 %3804 }
 0x7e1   : > { %4500 = vst [vmem:[#allocation1 + $0x5] ss:$9 sm:$0xff] %v9877_v7  ;;  %v3809_v7 = vpop.permute.xlu2 %3808 }
 0x7e2   : > { %4501 = vst [vmem:[#allocation1 + $0x6] ss:$9 sm:$0xff] %v9878_v18  ;;  %v9928_v18 = vld [vmem:[%s11269_s19 + $0x7f] sm:$0x1] }
 0x7e3   : > { %4502 = vst [vmem:[#allocation1 + $0x7] ss:$9 sm:$0xff] %v9879_v30  ;;  %v9929_v30 = vld [vmem:[%s11269_s19 + $0x80] sm:$0x1] }
 0x7e4   : > { %3899 = vst.msk [vmem:[#allocation2 + $0x10] sm:$0xff] %vm3896_vm3, %v3805_v61  ;;  %v9978_v61 = vld [vmem:[%s11269_s19 + $0xb7] sm:$0x1] }
 0x7e5   : > { %3901 = vst.msk [vmem:[#allocation2 + $0x20] sm:$0xff] %vm3896_vm3, %v3809_v7 }
 0x7ea   : > { %v4503_v37 = vld [vmem:[#allocation1] sm:$0xff] }
 0x7eb   : > { %4504 = vst [vmem:[#allocation1] ss:$9 sm:$0xff] %v9880_v0  ;;  %4748 = vrot.lane.b32.xlu2 %v4503_v37, %s11220_s23  ;;  %v9931_v0 = vld [vmem:[%s11269_s19 + $0x82] sm:$0x1]  ;;  %v9934_v37 = vld [vmem:[%s11269_s19 + $0x85] sm:$0x1] }
 0x7ec   : > { %4505 = vst [vmem:[#allocation1 + $0x1] ss:$9 sm:$0xff] %v9881_v13  ;;  %v9932_v13 = vld [vmem:[%s11269_s19 + $0x83] sm:$0x1] }
 0x7ed   : > { %4506 = vst [vmem:[#allocation1 + $0x2] ss:$9 sm:$0xff] %v9882_v25  ;;  %v9933_v25 = vld [vmem:[%s11269_s19 + $0x84] sm:$0x1] }
 0x7ee   : > { %4507 = vst [vmem:[#allocation1 + $0x3] ss:$9 sm:$0xff] %v9883_v50  ;;  %v9935_v50 = vld [vmem:[%s11269_s19 + $0x86] sm:$0x1] }
 0x7ef   : > { %4508 = vst [vmem:[#allocation1 + $0x4] ss:$9 sm:$0xff] %v9884_v63  ;;  %v9936_v63 = vld [vmem:[%s11269_s19 + $0x87] sm:$0x1] }
 0x7f0   : > { %4509 = vst [vmem:[#allocation1 + $0x5] ss:$9 sm:$0xff] %v9885_v14  ;;  %v9937_v14 = vld [vmem:[%s11269_s19 + $0x88] sm:$0x1] }
 0x7f1   : > { %4510 = vst [vmem:[#allocation1 + $0x6] ss:$9 sm:$0xff] %v9886_v27 }
 0x7f2   : > { %4511 = vst [vmem:[#allocation1 + $0x7] ss:$9 sm:$0xff] %v9887_v43  ;;  %v9938_v43 = vld [vmem:[%s11269_s19 + $0x89] sm:$0x1] }
 0x7f9   : > { %v4512_v23 = vld [vmem:[#allocation1] sm:$0xff] }
 0x7fa   : > { %4750 = vrot.lane.b32.xlu0 %v4512_v23, %s11220_s23  ;;  %4513 = vst [vmem:[#allocation1] ss:$9 sm:$0xff] %v9888_v57  ;;  %v9939_v57 = vld [vmem:[%s11269_s19 + $0x8a] sm:$0x1]  ;;  %v9941_v23 = vld [vmem:[%s11269_s19 + $0x8c] sm:$0x1] }
 0x7fb   : > { %4514 = vst [vmem:[#allocation1 + $0x1] ss:$9 sm:$0xff] %v9889_v6  ;;  %v9940_v6 = vld [vmem:[%s11269_s19 + $0x8b] sm:$0x1] }
 0x7fc   : > { %4515 = vst [vmem:[#allocation1 + $0x2] ss:$9 sm:$0xff] %v9890_v39  ;;  %v9942_v39 = vld [vmem:[%s11269_s19 + $0x8d] sm:$0x1] }
 0x7fd   : > { %4516 = vst [vmem:[#allocation1 + $0x3] ss:$9 sm:$0xff] %v9891_v54  ;;  %v9943_v54 = vld [vmem:[%s11269_s19 + $0x8e] sm:$0x1] }
 0x7fe   : > { %4517 = vst [vmem:[#allocation1 + $0x4] ss:$9 sm:$0xff] %v9892_v46  ;;  %v9944_v46 = vld [vmem:[%s11269_s19 + $0x91] sm:$0x1] }
 0x7ff   : > { %4518 = vst [vmem:[#allocation1 + $0x5] ss:$9 sm:$0xff] %v9893_v48  ;;  %v9945_v48 = vld [vmem:[%s11269_s19 + $0x92] sm:$0x1] }
 0x800   : > { %4519 = vst [vmem:[#allocation1 + $0x6] ss:$9 sm:$0xff] %v9894_v49  ;;  %v2914_v49 = vpop.permute.xlu1 %2913 }
 0x801   : > { %4520 = vst [vmem:[#allocation1 + $0x7] ss:$9 sm:$0xff] %v9895_v52  ;;  %v9946_v52 = vld [vmem:[%s11269_s19 + $0x93] sm:$0x1] }
 0x802   : > { %2984 = vst.msk [vmem:[#allocation2 + $0xd0] sm:$0xff] %vm2957_vm2, %v2914_v49  ;;  %v9996_v49 = vld [vmem:[%s11269_s19 + $0xcb] sm:$0x1] }
 0x808   : > { %v4521_v62 = vld [vmem:[#allocation1] sm:$0xff] }
 0x809   : > { %4522 = vst [vmem:[#allocation1] ss:$9 sm:$0xff] %v9896_v55  ;;  %4752 = vrot.lane.b32.xlu1 %v4521_v62, %s11220_s23  ;;  %v9950_v62 = vld [vmem:[%s11269_s19 + $0x97] sm:$0x1] }
 0x80a   : > { %4523 = vst [vmem:[#allocation1 + $0x1] ss:$9 sm:$0xff] %v9897_v58  ;;  %v9947_v58 = vld [vmem:[%s11269_s19 + $0x94] sm:$0x1] }
 0x80b   : > { %4524 = vst [vmem:[#allocation1 + $0x2] ss:$9 sm:$0xff] %v9898_v60  ;;  %v9949_v60 = vld [vmem:[%s11269_s19 + $0x96] sm:$0x1] }
 0x80c   : > { %4525 = vst [vmem:[#allocation1 + $0x3] ss:$9 sm:$0xff] %v9899_v2  ;;  %v9951_v2 = vld [vmem:[%s11269_s19 + $0x98] sm:$0x1] }
 0x80d   : > { %4526 = vst [vmem:[#allocation1 + $0x4] ss:$9 sm:$0xff] %v9900_v3  ;;  %v3811_v3 = vpop.permute.xlu0 %3810 }
 0x80e   : > { %4527 = vst [vmem:[#allocation1 + $0x5] ss:$9 sm:$0xff] %v9901_v4  ;;  %v3815_v4 = vpop.permute.xlu2 %3814 }
 0x80f   : > { %4528 = vst [vmem:[#allocation1 + $0x6] ss:$9 sm:$0xff] %v9902_v5  ;;  %v9952_v5 = vld [vmem:[%s11269_s19 + $0x99] sm:$0x1] }
 0x810   : > { %4529 = vst [vmem:[#allocation1 + $0x7] ss:$9 sm:$0xff] %v9903_v8  ;;  %v9953_v8 = vld [vmem:[%s11269_s19 + $0x9a] sm:$0x1] }
 0x811   : > { %3902 = vst.msk [vmem:[#allocation2 + $0x28] sm:$0xff] %vm3896_vm3, %v3811_v3  ;;  %v10002_v3 = vld [vmem:[%s11269_s19 + $0xd1] sm:$0x1] }
 0x812   : > { %3904 = vst.msk [vmem:[#allocation2 + $0x38] sm:$0xff] %vm3896_vm3, %v3815_v4 }
 0x817   : > { %v4530_v19 = vld [vmem:[#allocation1] sm:$0xff] }
 0x818   : > { %4531 = vst [vmem:[#allocation1] ss:$9 sm:$0xff] %v9904_v15  ;;  %4754 = vrot.lane.b32.xlu2 %v4530_v19, %s11220_s23  ;;  %v9955_v15 = vld [vmem:[%s11269_s19 + $0x9c] sm:$0x1]  ;;  %v9958_v19 = vld [vmem:[%s11269_s19 + $0x9f] sm:$0x1] }
 0x819   : > { %4532 = vst [vmem:[#allocation1 + $0x1] ss:$9 sm:$0xff] %v9905_v16  ;;  %v9956_v16 = vld [vmem:[%s11269_s19 + $0x9d] sm:$0x1] }
 0x81a   : > { %4533 = vst [vmem:[#allocation1 + $0x2] ss:$9 sm:$0xff] %v9906_v17  ;;  %v9957_v17 = vld [vmem:[%s11269_s19 + $0x9e] sm:$0x1] }
 0x81b   : > { %4534 = vst [vmem:[#allocation1 + $0x3] ss:$9 sm:$0xff] %v9907_v22  ;;  %v9959_v22 = vld [vmem:[%s11269_s19 + $0xa0] sm:$0x1] }
 0x81c   : > { %4535 = vst [vmem:[#allocation1 + $0x4] ss:$9 sm:$0xff] %v9908_v24  ;;  %v9960_v24 = vld [vmem:[%s11269_s19 + $0xa3] sm:$0x1] }
 0x81d   : > { %4536 = vst [vmem:[#allocation1 + $0x5] ss:$9 sm:$0xff] %v9909_v26  ;;  %v9961_v26 = vld [vmem:[%s11269_s19 + $0xa4] sm:$0x1] }
 0x81e   : > { %4537 = vst [vmem:[#allocation1 + $0x6] ss:$9 sm:$0xff] %v9910_v28 }
 0x81f   : > { %4538 = vst [vmem:[#allocation1 + $0x7] ss:$9 sm:$0xff] %v9911_v32  ;;  %v9962_v32 = vld [vmem:[%s11269_s19 + $0xa5] sm:$0x1] }
 0x826   : > { %v4539_v11 = vld [vmem:[#allocation1] sm:$0xff] }
 0x827   : > { %4756 = vrot.lane.b32.xlu0 %v4539_v11, %s11220_s23  ;;  %4540 = vst [vmem:[#allocation1] ss:$9 sm:$0xff] %v9912_v33  ;;  %v9963_v33 = vld [vmem:[%s11269_s19 + $0xa6] sm:$0x1]  ;;  %v9965_v11 = vld [vmem:[%s11269_s19 + $0xa8] sm:$0x1] }
 0x828   : > { %4541 = vst [vmem:[#allocation1 + $0x1] ss:$9 sm:$0xff] %v9913_v34  ;;  %v9964_v34 = vld [vmem:[%s11269_s19 + $0xa7] sm:$0x1] }
 0x829   : > { %4542 = vst [vmem:[#allocation1 + $0x2] ss:$9 sm:$0xff] %v9914_v35  ;;  %v9966_v35 = vld [vmem:[%s11269_s19 + $0xa9] sm:$0x1] }
 0x82a   : > { %4543 = vst [vmem:[#allocation1 + $0x3] ss:$9 sm:$0xff] %v9915_v36  ;;  %v9967_v36 = vld [vmem:[%s11269_s19 + $0xaa] sm:$0x1] }
 0x82b   : > { %4544 = vst [vmem:[#allocation1 + $0x4] ss:$9 sm:$0xff] %v9916_v40  ;;  %v9968_v40 = vld [vmem:[%s11269_s19 + $0xab] sm:$0x1] }
 0x82c   : > { %4545 = vst [vmem:[#allocation1 + $0x5] ss:$9 sm:$0xff] %v9917_v44  ;;  %v9969_v44 = vld [vmem:[%s11269_s19 + $0xac] sm:$0x1] }
 0x82d   : > { %4546 = vst [vmem:[#allocation1 + $0x6] ss:$9 sm:$0xff] %v9918_v20  ;;  %v2920_v20 = vpop.permute.xlu1 %2919 }
 0x82e   : > { %4547 = vst [vmem:[#allocation1 + $0x7] ss:$9 sm:$0xff] %v9919_v29  ;;  %v9970_v29 = vld [vmem:[%s11269_s19 + $0xad] sm:$0x1] }
 0x82f   : > { %2987 = vst.msk [vmem:[#allocation2 + $0xe8] sm:$0xff] %vm2957_vm2, %v2920_v20  ;;  %v10020_v20 = vld [vmem:[%s11269_s19 + $0xe5] sm:$0x1] }
 0x835   : > { %v4548_v1 = vld [vmem:[#allocation1] sm:$0xff] }
 0x836   : > { %4549 = vst [vmem:[#allocation1] ss:$9 sm:$0xff] %v9920_v38  ;;  %4758 = vrot.lane.b32.xlu1 %v4548_v1, %s11220_s23  ;;  %v9974_v1 = vld [vmem:[%s11269_s19 + $0xb1] sm:$0x1] }
 0x837   : > { %4550 = vst [vmem:[#allocation1 + $0x1] ss:$9 sm:$0xff] %v9921_v45  ;;  %v9971_v45 = vld [vmem:[%s11269_s19 + $0xae] sm:$0x1] }
 0x838   : > { %4551 = vst [vmem:[#allocation1 + $0x2] ss:$9 sm:$0xff] %v9922_v56  ;;  %v9973_v56 = vld [vmem:[%s11269_s19 + $0xb0] sm:$0x1] }
 0x839   : > { %4552 = vst [vmem:[#allocation1 + $0x3] ss:$9 sm:$0xff] %v9923_v10  ;;  %v9975_v10 = vld [vmem:[%s11269_s19 + $0xb2] sm:$0x1] }
 0x83a   : > { %4553 = vst [vmem:[#allocation1 + $0x4] ss:$9 sm:$0xff] %v9924_v21  ;;  %v3817_v21 = vpop.permute.xlu0 %3816 }
 0x83b   : > { %4554 = vst [vmem:[#allocation1 + $0x5] ss:$9 sm:$0xff] %v9925_v31  ;;  %v3821_v31 = vpop.permute.xlu2 %3820 }
 0x83c   : > { %4555 = vst [vmem:[#allocation1 + $0x6] ss:$9 sm:$0xff] %v9926_v41  ;;  %v9976_v41 = vld [vmem:[%s11269_s19 + $0xb5] sm:$0x1] }
 0x83d   : > { %4556 = vst [vmem:[#allocation1 + $0x7] ss:$9 sm:$0xff] %v9927_v51  ;;  %v9977_v51 = vld [vmem:[%s11269_s19 + $0xb6] sm:$0x1] }
 0x83e   : > { %3905 = vst.msk [vmem:[#allocation2 + $0x40] sm:$0xff] %vm3896_vm3, %v3817_v21  ;;  %v10026_v21 = vld [vmem:[%s11269_s19 + $0xed] sm:$0x1] }
 0x83f   : > { %3907 = vst.msk [vmem:[#allocation2 + $0x50] sm:$0xff] %vm3896_vm3, %v3821_v31 }
 0x844   : > { %v4557_v53 = vld [vmem:[#allocation1] sm:$0xff] }
 0x845   : > { %4558 = vst [vmem:[#allocation1] ss:$9 sm:$0xff] %v9928_v18  ;;  %4760 = vrot.lane.b32.xlu2 %v4557_v53, %s11220_s23  ;;  %v9979_v18 = vld [vmem:[%s11269_s19 + $0xb8] sm:$0x1]  ;;  %v9982_v53 = vld [vmem:[%s11269_s19 + $0xbb] sm:$0x1] }
 0x846   : > { %4559 = vst [vmem:[#allocation1 + $0x1] ss:$9 sm:$0xff] %v9929_v30  ;;  %v9980_v30 = vld [vmem:[%s11269_s19 + $0xb9] sm:$0x1] }
 0x847   : > { %4560 = vst [vmem:[#allocation1 + $0x2] ss:$9 sm:$0xff] %v9930_v42  ;;  %v9981_v42 = vld [vmem:[%s11269_s19 + $0xba] sm:$0x1] }
 0x848   : > { %4561 = vst [vmem:[#allocation1 + $0x3] ss:$9 sm:$0xff] %v9931_v0  ;;  %v9983_v0 = vld [vmem:[%s11269_s19 + $0xbc] sm:$0x1] }
 0x849   : > { %4562 = vst [vmem:[#allocation1 + $0x4] ss:$9 sm:$0xff] %v9932_v13  ;;  %v9984_v13 = vld [vmem:[%s11269_s19 + $0xbd] sm:$0x1] }
 0x84a   : > { %4563 = vst [vmem:[#allocation1 + $0x5] ss:$9 sm:$0xff] %v9933_v25  ;;  %v9985_v25 = vld [vmem:[%s11269_s19 + $0xbe] sm:$0x1] }
 0x84b   : > { %4564 = vst [vmem:[#allocation1 + $0x6] ss:$9 sm:$0xff] %v9934_v37 }
 0x84c   : > { %4565 = vst [vmem:[#allocation1 + $0x7] ss:$9 sm:$0xff] %v9935_v50  ;;  %v9986_v50 = vld [vmem:[%s11269_s19 + $0xbf] sm:$0x1] }
 0x853   : > { %v4566_v27 = vld [vmem:[#allocation1] sm:$0xff] }
 0x854   : > { %4762 = vrot.lane.b32.xlu0 %v4566_v27, %s11220_s23  ;;  %4567 = vst [vmem:[#allocation1] ss:$9 sm:$0xff] %v9936_v63  ;;  %v9987_v63 = vld [vmem:[%s11269_s19 + $0xc0] sm:$0x1]  ;;  %v9989_v27 = vld [vmem:[%s11269_s19 + $0xc2] sm:$0x1] }
 0x855   : > { %4568 = vst [vmem:[#allocation1 + $0x1] ss:$9 sm:$0xff] %v9937_v14  ;;  %v9988_v14 = vld [vmem:[%s11269_s19 + $0xc1] sm:$0x1] }
 0x856   : > { %4569 = vst [vmem:[#allocation1 + $0x2] ss:$9 sm:$0xff] %v9938_v43  ;;  %v9990_v43 = vld [vmem:[%s11269_s19 + $0xc3] sm:$0x1] }
 0x857   : > { %4570 = vst [vmem:[#allocation1 + $0x3] ss:$9 sm:$0xff] %v9939_v57  ;;  %v9991_v57 = vld [vmem:[%s11269_s19 + $0xc4] sm:$0x1] }
 0x858   : > { %4571 = vst [vmem:[#allocation1 + $0x4] ss:$9 sm:$0xff] %v9940_v6  ;;  %v9992_v6 = vld [vmem:[%s11269_s19 + $0xc7] sm:$0x1] }
 0x859   : > { %4572 = vst [vmem:[#allocation1 + $0x5] ss:$9 sm:$0xff] %v9941_v23  ;;  %v9993_v23 = vld [vmem:[%s11269_s19 + $0xc8] sm:$0x1] }
 0x85a   : > { %4573 = vst [vmem:[#allocation1 + $0x6] ss:$9 sm:$0xff] %v9942_v39  ;;  %v3801_v39 = vpop.permute.xlu1 %3800 }
 0x85b   : > { %4574 = vst [vmem:[#allocation1 + $0x7] ss:$9 sm:$0xff] %v9943_v54  ;;  %v9994_v54 = vld [vmem:[%s11269_s19 + $0xc9] sm:$0x1] }
 0x85c   : > { %3897 = vst.msk [vmem:[#allocation2] sm:$0xff] %vm3896_vm3, %v3801_v39  ;;  %v10044_v39 = vld [vmem:[%s11269_s19 + $0x101] sm:$0x1] }
 0x862   : > { %v4575_v55 = vld [vmem:[#allocation1] sm:$0xff] }
 0x863   : > { %4576 = vst [vmem:[#allocation1] ss:$9 sm:$0xff] %v9944_v46  ;;  %4764 = vrot.lane.b32.xlu1 %v4575_v55, %s11220_s23  ;;  %v9998_v55 = vld [vmem:[%s11269_s19 + $0xcd] sm:$0x1] }
 0x864   : > { %4577 = vst [vmem:[#allocation1 + $0x1] ss:$9 sm:$0xff] %v9945_v48  ;;  %v9995_v48 = vld [vmem:[%s11269_s19 + $0xca] sm:$0x1] }
 0x865   : > { %4578 = vst [vmem:[#allocation1 + $0x2] ss:$9 sm:$0xff] %v9946_v52  ;;  %v9997_v52 = vld [vmem:[%s11269_s19 + $0xcc] sm:$0x1] }
 0x866   : > { %4579 = vst [vmem:[#allocation1 + $0x3] ss:$9 sm:$0xff] %v9947_v58  ;;  %v9999_v58 = vld [vmem:[%s11269_s19 + $0xce] sm:$0x1] }
 0x867   : > { %4580 = vst [vmem:[#allocation1 + $0x4] ss:$9 sm:$0xff] %v9948_v59  ;;  %v3823_v59 = vpop.permute.xlu0 %3822 }
 0x868   : > { %4581 = vst [vmem:[#allocation1 + $0x5] ss:$9 sm:$0xff] %v9949_v60  ;;  %v3827_v60 = vpop.permute.xlu2 %3826 }
 0x869   : > { %4582 = vst [vmem:[#allocation1 + $0x6] ss:$9 sm:$0xff] %v9950_v62  ;;  %v10000_v62 = vld [vmem:[%s11269_s19 + $0xcf] sm:$0x1] }
 0x86a   : > { %4583 = vst [vmem:[#allocation1 + $0x7] ss:$9 sm:$0xff] %v9951_v2  ;;  %v10001_v2 = vld [vmem:[%s11269_s19 + $0xd0] sm:$0x1] }
 0x86b   : > { %3908 = vst.msk [vmem:[#allocation2 + $0x58] sm:$0xff] %vm3896_vm3, %v3823_v59  ;;  %v10050_v59 = vld [vmem:[%s11269_s19 + $0x107] sm:$0x1] }
 0x86c   : > { %3910 = vst.msk [vmem:[#allocation2 + $0x68] sm:$0xff] %vm3896_vm3, %v3827_v60 }
 0x871   : > { %v4584_v12 = vld [vmem:[#allocation1] sm:$0xff] }
 0x872   : > { %4585 = vst [vmem:[#allocation1] ss:$9 sm:$0xff] %v9952_v5  ;;  %4766 = vrot.lane.b32.xlu2 %v4584_v12, %s11220_s23  ;;  %v10003_v5 = vld [vmem:[%s11269_s19 + $0xd2] sm:$0x1]  ;;  %v10006_v12 = vld [vmem:[%s11269_s19 + $0xd5] sm:$0x1] }
 0x873   : > { %4586 = vst [vmem:[#allocation1 + $0x1] ss:$9 sm:$0xff] %v9953_v8  ;;  %v10004_v8 = vld [vmem:[%s11269_s19 + $0xd3] sm:$0x1] }
 0x874   : > { %4587 = vst [vmem:[#allocation1 + $0x2] ss:$9 sm:$0xff] %v9954_v9  ;;  %v10005_v9 = vld [vmem:[%s11269_s19 + $0xd4] sm:$0x1] }
 0x875   : > { %4588 = vst [vmem:[#allocation1 + $0x3] ss:$9 sm:$0xff] %v9955_v15  ;;  %v10007_v15 = vld [vmem:[%s11269_s19 + $0xd6] sm:$0x1] }
 0x876   : > { %4589 = vst [vmem:[#allocation1 + $0x4] ss:$9 sm:$0xff] %v9956_v16  ;;  %v10008_v16 = vld [vmem:[%s11269_s19 + $0xd9] sm:$0x1] }
 0x877   : > { %4590 = vst [vmem:[#allocation1 + $0x5] ss:$9 sm:$0xff] %v9957_v17  ;;  %v10009_v17 = vld [vmem:[%s11269_s19 + $0xda] sm:$0x1] }
 0x878   : > { %4591 = vst [vmem:[#allocation1 + $0x6] ss:$9 sm:$0xff] %v9958_v19 }
 0x879   : > { %4592 = vst [vmem:[#allocation1 + $0x7] ss:$9 sm:$0xff] %v9959_v22  ;;  %v10010_v22 = vld [vmem:[%s11269_s19 + $0xdb] sm:$0x1] }
 0x880   : > { %v4593_v28 = vld [vmem:[#allocation1] sm:$0xff] }
 0x881   : > { %4768 = vrot.lane.b32.xlu0 %v4593_v28, %s11220_s23  ;;  %4594 = vst [vmem:[#allocation1] ss:$9 sm:$0xff] %v9960_v24  ;;  %v10011_v24 = vld [vmem:[%s11269_s19 + $0xdc] sm:$0x1]  ;;  %v10013_v28 = vld [vmem:[%s11269_s19 + $0xde] sm:$0x1] }
 0x882   : > { %4595 = vst [vmem:[#allocation1 + $0x1] ss:$9 sm:$0xff] %v9961_v26  ;;  %v10012_v26 = vld [vmem:[%s11269_s19 + $0xdd] sm:$0x1] }
 0x883   : > { %4596 = vst [vmem:[#allocation1 + $0x2] ss:$9 sm:$0xff] %v9962_v32  ;;  %v10014_v32 = vld [vmem:[%s11269_s19 + $0xdf] sm:$0x1] }
 0x884   : > { %4597 = vst [vmem:[#allocation1 + $0x3] ss:$9 sm:$0xff] %v9963_v33  ;;  %v10015_v33 = vld [vmem:[%s11269_s19 + $0xe0] sm:$0x1] }
 0x885   : > { %4598 = vst [vmem:[#allocation1 + $0x4] ss:$9 sm:$0xff] %v9964_v34  ;;  %v10016_v34 = vld [vmem:[%s11269_s19 + $0xe1] sm:$0x1] }
 0x886   : > { %4599 = vst [vmem:[#allocation1 + $0x5] ss:$9 sm:$0xff] %v9965_v11  ;;  %v10017_v11 = vld [vmem:[%s11269_s19 + $0xe2] sm:$0x1] }
 0x887   : > { %4600 = vst [vmem:[#allocation1 + $0x6] ss:$9 sm:$0xff] %v9966_v35  ;;  %v3807_v35 = vpop.permute.xlu1 %3806 }
 0x888   : > { %4601 = vst [vmem:[#allocation1 + $0x7] ss:$9 sm:$0xff] %v9967_v36  ;;  %v10018_v36 = vld [vmem:[%s11269_s19 + $0xe3] sm:$0x1] }
 0x889   : > { %3900 = vst.msk [vmem:[#allocation2 + $0x18] sm:$0xff] %vm3896_vm3, %v3807_v35  ;;  %v10068_v35 = vld [vmem:[%s11269_s19 + $0x11b] sm:$0x1] }
 0x88f   : > { %v4602_v38 = vld [vmem:[#allocation1] sm:$0xff] }
 0x890   : > { %4603 = vst [vmem:[#allocation1] ss:$9 sm:$0xff] %v9968_v40  ;;  %4770 = vrot.lane.b32.xlu1 %v4602_v38, %s11220_s23  ;;  %v10022_v38 = vld [vmem:[%s11269_s19 + $0xe7] sm:$0x1] }
 0x891   : > { %4604 = vst [vmem:[#allocation1 + $0x1] ss:$9 sm:$0xff] %v9969_v44  ;;  %v10019_v44 = vld [vmem:[%s11269_s19 + $0xe4] sm:$0x1] }
 0x892   : > { %4605 = vst [vmem:[#allocation1 + $0x2] ss:$9 sm:$0xff] %v9970_v29  ;;  %v10021_v29 = vld [vmem:[%s11269_s19 + $0xe6] sm:$0x1] }
 0x893   : > { %4606 = vst [vmem:[#allocation1 + $0x3] ss:$9 sm:$0xff] %v9971_v45  ;;  %v10023_v45 = vld [vmem:[%s11269_s19 + $0xe8] sm:$0x1] }
 0x894   : > { %4607 = vst [vmem:[#allocation1 + $0x4] ss:$9 sm:$0xff] %v9972_v47  ;;  %v3829_v47 = vpop.permute.xlu0 %3828 }
 0x895   : > { %4608 = vst [vmem:[#allocation1 + $0x5] ss:$9 sm:$0xff] %v9973_v56  ;;  %v3833_v56 = vpop.permute.xlu2 %3832 }
 0x896   : > { %4609 = vst [vmem:[#allocation1 + $0x6] ss:$9 sm:$0xff] %v9974_v1  ;;  %v10024_v1 = vld [vmem:[%s11269_s19 + $0xeb] sm:$0x1] }
 0x897   : > { %4610 = vst [vmem:[#allocation1 + $0x7] ss:$9 sm:$0xff] %v9975_v10  ;;  %v10025_v10 = vld [vmem:[%s11269_s19 + $0xec] sm:$0x1] }
 0x898   : > { %3911 = vst.msk [vmem:[#allocation2 + $0x70] sm:$0xff] %vm3896_vm3, %v3829_v47  ;;  %v10074_v47 = vld [vmem:[%s11269_s19 + $0x123] sm:$0x1] }
 0x899   : > { %3913 = vst.msk [vmem:[#allocation2 + $0x80] sm:$0xff] %vm3896_vm3, %v3833_v56 }
 0x89e   : > { %v4611_v7 = vld [vmem:[#allocation1] sm:$0xff] }
 0x89f   : > { %4612 = vst [vmem:[#allocation1] ss:$9 sm:$0xff] %v9976_v41  ;;  %4772 = vrot.lane.b32.xlu2 %v4611_v7, %s11220_s23  ;;  %v10027_v41 = vld [vmem:[%s11269_s19 + $0xee] sm:$0x1]  ;;  %v10030_v7 = vld [vmem:[%s11269_s19 + $0xf1] sm:$0x1] }
 0x8a0   : > { %4613 = vst [vmem:[#allocation1 + $0x1] ss:$9 sm:$0xff] %v9977_v51  ;;  %v10028_v51 = vld [vmem:[%s11269_s19 + $0xef] sm:$0x1] }
 0x8a1   : > { %4614 = vst [vmem:[#allocation1 + $0x2] ss:$9 sm:$0xff] %v9978_v61  ;;  %v10029_v61 = vld [vmem:[%s11269_s19 + $0xf0] sm:$0x1] }
 0x8a2   : > { %4615 = vst [vmem:[#allocation1 + $0x3] ss:$9 sm:$0xff] %v9979_v18  ;;  %v10031_v18 = vld [vmem:[%s11269_s19 + $0xf2] sm:$0x1] }
 0x8a3   : > { %4616 = vst [vmem:[#allocation1 + $0x4] ss:$9 sm:$0xff] %v9980_v30  ;;  %v10032_v30 = vld [vmem:[%s11269_s19 + $0xf3] sm:$0x1] }
 0x8a4   : > { %4617 = vst [vmem:[#allocation1 + $0x5] ss:$9 sm:$0xff] %v9981_v42  ;;  %v10033_v42 = vld [vmem:[%s11269_s19 + $0xf4] sm:$0x1] }
 0x8a5   : > { %4618 = vst [vmem:[#allocation1 + $0x6] ss:$9 sm:$0xff] %v9982_v53 }
 0x8a6   : > { %4619 = vst [vmem:[#allocation1 + $0x7] ss:$9 sm:$0xff] %v9983_v0  ;;  %v10034_v0 = vld [vmem:[%s11269_s19 + $0xf5] sm:$0x1] }
 0x8ad   : > { %v4620_v37 = vld [vmem:[#allocation1] sm:$0xff] }
 0x8ae   : > { %4774 = vrot.lane.b32.xlu0 %v4620_v37, %s11220_s23  ;;  %4621 = vst [vmem:[#allocation1] ss:$9 sm:$0xff] %v9984_v13  ;;  %v10035_v13 = vld [vmem:[%s11269_s19 + $0xf6] sm:$0x1]  ;;  %v10037_v37 = vld [vmem:[%s11269_s19 + $0xf8] sm:$0x1] }
 0x8af   : > { %4622 = vst [vmem:[#allocation1 + $0x1] ss:$9 sm:$0xff] %v9985_v25  ;;  %v10036_v25 = vld [vmem:[%s11269_s19 + $0xf7] sm:$0x1] }
 0x8b0   : > { %4623 = vst [vmem:[#allocation1 + $0x2] ss:$9 sm:$0xff] %v9986_v50  ;;  %v10038_v50 = vld [vmem:[%s11269_s19 + $0xf9] sm:$0x1] }
 0x8b1   : > { %4624 = vst [vmem:[#allocation1 + $0x3] ss:$9 sm:$0xff] %v9987_v63  ;;  %v10039_v63 = vld [vmem:[%s11269_s19 + $0xfa] sm:$0x1] }
 0x8b2   : > { %4625 = vst [vmem:[#allocation1 + $0x4] ss:$9 sm:$0xff] %v9988_v14  ;;  %v10040_v14 = vld [vmem:[%s11269_s19 + $0xfd] sm:$0x1] }
 0x8b3   : > { %4626 = vst [vmem:[#allocation1 + $0x5] ss:$9 sm:$0xff] %v9989_v27  ;;  %v10041_v27 = vld [vmem:[%s11269_s19 + $0xfe] sm:$0x1] }
 0x8b4   : > { %4627 = vst [vmem:[#allocation1 + $0x6] ss:$9 sm:$0xff] %v9990_v43  ;;  %v3813_v43 = vpop.permute.xlu1 %3812 }
 0x8b5   : > { %4628 = vst [vmem:[#allocation1 + $0x7] ss:$9 sm:$0xff] %v9991_v57  ;;  %v10042_v57 = vld [vmem:[%s11269_s19 + $0xff] sm:$0x1] }
 0x8b6   : > { %3903 = vst.msk [vmem:[#allocation2 + $0x30] sm:$0xff] %vm3896_vm3, %v3813_v43  ;;  %v10092_v43 = vld [vmem:[%s11269_s19 + $0x18] sm:$0x1] }
 0x8bc   : > { %v4629_v46 = vld [vmem:[#allocation1] sm:$0xff] }
 0x8bd   : > { %4630 = vst [vmem:[#allocation1] ss:$9 sm:$0xff] %v9992_v6  ;;  %4776 = vrot.lane.b32.xlu1 %v4629_v46, %s11220_s23  ;;  %v10046_v46 = vld [vmem:[%s11269_s19 + $0x103] sm:$0x1] }
 0x8be   : > { %4631 = vst [vmem:[#allocation1 + $0x1] ss:$9 sm:$0xff] %v9993_v23  ;;  %v10043_v23 = vld [vmem:[%s11269_s19 + $0x100] sm:$0x1] }
 0x8bf   : > { %4632 = vst [vmem:[#allocation1 + $0x2] ss:$9 sm:$0xff] %v9994_v54  ;;  %v10045_v54 = vld [vmem:[%s11269_s19 + $0x102] sm:$0x1] }
 0x8c0   : > { %4633 = vst [vmem:[#allocation1 + $0x3] ss:$9 sm:$0xff] %v9995_v48  ;;  %v10047_v48 = vld [vmem:[%s11269_s19 + $0x104] sm:$0x1] }
 0x8c1   : > { %4634 = vst [vmem:[#allocation1 + $0x4] ss:$9 sm:$0xff] %v9996_v49  ;;  %v3835_v49 = vpop.permute.xlu0 %3834 }
 0x8c2   : > { %4635 = vst [vmem:[#allocation1 + $0x5] ss:$9 sm:$0xff] %v9997_v52  ;;  %v3839_v52 = vpop.permute.xlu2 %3838 }
 0x8c3   : > { %4636 = vst [vmem:[#allocation1 + $0x6] ss:$9 sm:$0xff] %v9998_v55  ;;  %v10048_v55 = vld [vmem:[%s11269_s19 + $0x105] sm:$0x1] }
 0x8c4   : > { %4637 = vst [vmem:[#allocation1 + $0x7] ss:$9 sm:$0xff] %v9999_v58  ;;  %v10049_v58 = vld [vmem:[%s11269_s19 + $0x106] sm:$0x1] }
 0x8c5   : > { %3914 = vst.msk [vmem:[#allocation2 + $0x88] sm:$0xff] %vm3896_vm3, %v3835_v49  ;;  %v10098_v49 = vld [vmem:[%s11269_s19 + $0x1e] sm:$0x1] }
 0x8c6   : > { %3916 = vst.msk [vmem:[#allocation2 + $0x98] sm:$0xff] %vm3896_vm3, %v3839_v52 }
 0x8cb   : > { %v4638_v4 = vld [vmem:[#allocation1] sm:$0xff] }
 0x8cc   : > { %4639 = vst [vmem:[#allocation1] ss:$9 sm:$0xff] %v10000_v62  ;;  %4778 = vrot.lane.b32.xlu2 %v4638_v4, %s11220_s23  ;;  %v10051_v62 = vld [vmem:[%s11269_s19 + $0x108] sm:$0x1]  ;;  %v10054_v4 = vld [vmem:[%s11269_s19 + $0x10b] sm:$0x1] }
 0x8cd   : > { %4640 = vst [vmem:[#allocation1 + $0x1] ss:$9 sm:$0xff] %v10001_v2  ;;  %v10052_v2 = vld [vmem:[%s11269_s19 + $0x109] sm:$0x1] }
 0x8ce   : > { %4641 = vst [vmem:[#allocation1 + $0x2] ss:$9 sm:$0xff] %v10002_v3  ;;  %v10053_v3 = vld [vmem:[%s11269_s19 + $0x10a] sm:$0x1] }
 0x8cf   : > { %4642 = vst [vmem:[#allocation1 + $0x3] ss:$9 sm:$0xff] %v10003_v5  ;;  %v10055_v5 = vld [vmem:[%s11269_s19 + $0x10c] sm:$0x1] }
 0x8d0   : > { %4643 = vst [vmem:[#allocation1 + $0x4] ss:$9 sm:$0xff] %v10004_v8  ;;  %v10056_v8 = vld [vmem:[%s11269_s19 + $0x10f] sm:$0x1] }
 0x8d1   : > { %4644 = vst [vmem:[#allocation1 + $0x5] ss:$9 sm:$0xff] %v10005_v9  ;;  %v10057_v9 = vld [vmem:[%s11269_s19 + $0x110] sm:$0x1] }
 0x8d2   : > { %4645 = vst [vmem:[#allocation1 + $0x6] ss:$9 sm:$0xff] %v10006_v12 }
 0x8d3   : > { %4646 = vst [vmem:[#allocation1 + $0x7] ss:$9 sm:$0xff] %v10007_v15  ;;  %v10058_v15 = vld [vmem:[%s11269_s19 + $0x111] sm:$0x1] }
 0x8da   : > { %v4647_v19 = vld [vmem:[#allocation1] sm:$0xff] }
 0x8db   : > { %4780 = vrot.lane.b32.xlu0 %v4647_v19, %s11220_s23  ;;  %4648 = vst [vmem:[#allocation1] ss:$9 sm:$0xff] %v10008_v16  ;;  %v10059_v16 = vld [vmem:[%s11269_s19 + $0x112] sm:$0x1]  ;;  %v10061_v19 = vld [vmem:[%s11269_s19 + $0x114] sm:$0x1] }
 0x8dc   : > { %4649 = vst [vmem:[#allocation1 + $0x1] ss:$9 sm:$0xff] %v10009_v17  ;;  %v10060_v17 = vld [vmem:[%s11269_s19 + $0x113] sm:$0x1] }
 0x8dd   : > { %4650 = vst [vmem:[#allocation1 + $0x2] ss:$9 sm:$0xff] %v10010_v22  ;;  %v10062_v22 = vld [vmem:[%s11269_s19 + $0x115] sm:$0x1] }
 0x8de   : > { %4651 = vst [vmem:[#allocation1 + $0x3] ss:$9 sm:$0xff] %v10011_v24  ;;  %v10063_v24 = vld [vmem:[%s11269_s19 + $0x116] sm:$0x1] }
 0x8df   : > { %4652 = vst [vmem:[#allocation1 + $0x4] ss:$9 sm:$0xff] %v10012_v26  ;;  %v10064_v26 = vld [vmem:[%s11269_s19 + $0x117] sm:$0x1] }
 0x8e0   : > { %4653 = vst [vmem:[#allocation1 + $0x5] ss:$9 sm:$0xff] %v10013_v28  ;;  %v10065_v28 = vld [vmem:[%s11269_s19 + $0x118] sm:$0x1] }
 0x8e1   : > { %4654 = vst [vmem:[#allocation1 + $0x6] ss:$9 sm:$0xff] %v10014_v32  ;;  %v3819_v32 = vpop.permute.xlu1 %3818 }
 0x8e2   : > { %4655 = vst [vmem:[#allocation1 + $0x7] ss:$9 sm:$0xff] %v10015_v33  ;;  %v10066_v33 = vld [vmem:[%s11269_s19 + $0x119] sm:$0x1] }
 0x8e3   : > { %3906 = vst.msk [vmem:[#allocation2 + $0x48] sm:$0xff] %vm3896_vm3, %v3819_v32  ;;  %v10116_v32 = vld [vmem:[%s11269_s19 + $0x32] sm:$0x1] }
 0x8e9   : > { %v4656_v40 = vld [vmem:[#allocation1] sm:$0xff] }
 0x8ea   : > { %4657 = vst [vmem:[#allocation1] ss:$9 sm:$0xff] %v10016_v34  ;;  %4782 = vrot.lane.b32.xlu1 %v4656_v40, %s11220_s23  ;;  %v10070_v40 = vld [vmem:[%s11269_s19 + $0x11d] sm:$0x1] }
 0x8eb   : > { %4658 = vst [vmem:[#allocation1 + $0x1] ss:$9 sm:$0xff] %v10017_v11  ;;  %v10067_v11 = vld [vmem:[%s11269_s19 + $0x11a] sm:$0x1] }
 0x8ec   : > { %4659 = vst [vmem:[#allocation1 + $0x2] ss:$9 sm:$0xff] %v10018_v36  ;;  %v10069_v36 = vld [vmem:[%s11269_s19 + $0x11c] sm:$0x1] }
 0x8ed   : > { %4660 = vst [vmem:[#allocation1 + $0x3] ss:$9 sm:$0xff] %v10019_v44  ;;  %v10071_v44 = vld [vmem:[%s11269_s19 + $0x11e] sm:$0x1] }
 0x8ee   : > { %4661 = vst [vmem:[#allocation1 + $0x4] ss:$9 sm:$0xff] %v10020_v20  ;;  %v3841_v20 = vpop.permute.xlu0 %3840 }
 0x8ef   : > { %4662 = vst [vmem:[#allocation1 + $0x5] ss:$9 sm:$0xff] %v10021_v29  ;;  %v3845_v29 = vpop.permute.xlu2 %3844 }
 0x8f0   : > { %4663 = vst [vmem:[#allocation1 + $0x6] ss:$9 sm:$0xff] %v10022_v38  ;;  %v10072_v38 = vld [vmem:[%s11269_s19 + $0x121] sm:$0x1] }
 0x8f1   : > { %4664 = vst [vmem:[#allocation1 + $0x7] ss:$9 sm:$0xff] %v10023_v45  ;;  %v10073_v45 = vld [vmem:[%s11269_s19 + $0x122] sm:$0x1] }
 0x8f2   : > { %3917 = vst.msk [vmem:[#allocation2 + $0xa0] sm:$0xff] %vm3896_vm3, %v3841_v20  ;;  %v10122_v20 = vld [vmem:[%s11269_s19 + $0x3a] sm:$0x1] }
 0x8f3   : > { %3919 = vst.msk [vmem:[#allocation2 + $0xb0] sm:$0xff] %vm3896_vm3, %v3845_v29 }
 0x8f8   : > { %v4665_v31 = vld [vmem:[#allocation1] sm:$0xff] }
 0x8f9   : > { %4666 = vst [vmem:[#allocation1] ss:$9 sm:$0xff] %v10024_v1  ;;  %4784 = vrot.lane.b32.xlu2 %v4665_v31, %s11220_s23  ;;  %v10075_v1 = vld [vmem:[%s11269_s19 + $0x124] sm:$0x1]  ;;  %v10078_v31 = vld [vmem:[%s11269_s19 + $0x127] sm:$0x1] }
 0x8fa   : > { %4667 = vst [vmem:[#allocation1 + $0x1] ss:$9 sm:$0xff] %v10025_v10  ;;  %v10076_v10 = vld [vmem:[%s11269_s19 + $0x125] sm:$0x1] }
 0x8fb   : > { %4668 = vst [vmem:[#allocation1 + $0x2] ss:$9 sm:$0xff] %v10026_v21  ;;  %v10077_v21 = vld [vmem:[%s11269_s19 + $0x126] sm:$0x1] }
 0x8fc   : > { %4669 = vst [vmem:[#allocation1 + $0x3] ss:$9 sm:$0xff] %v10027_v41  ;;  %v10079_v41 = vld [vmem:[%s11269_s19 + $0x128] sm:$0x1] }
 0x8fd   : > { %4670 = vst [vmem:[#allocation1 + $0x4] ss:$9 sm:$0xff] %v10028_v51  ;;  %v10080_v51 = vld [vmem:[%s11269_s19 + $0x129] sm:$0x1] }
 0x8fe   : > { %4671 = vst [vmem:[#allocation1 + $0x5] ss:$9 sm:$0xff] %v10029_v61  ;;  %v10081_v61 = vld [vmem:[%s11269_s19 + $0x12a] sm:$0x1] }
 0x8ff   : > { %4672 = vst [vmem:[#allocation1 + $0x6] ss:$9 sm:$0xff] %v10030_v7 }
 0x900   : > { %4673 = vst [vmem:[#allocation1 + $0x7] ss:$9 sm:$0xff] %v10031_v18  ;;  %v10082_v18 = vld [vmem:[%s11269_s19 + $0x12b] sm:$0x1] }
 0x907   : > { %v4674_v53 = vld [vmem:[#allocation1] sm:$0xff] }
 0x908   : > { %4786 = vrot.lane.b32.xlu0 %v4674_v53, %s11220_s23  ;;  %4675 = vst [vmem:[#allocation1] ss:$9 sm:$0xff] %v10032_v30  ;;  %v10083_v30 = vld [vmem:[%s11269_s19 + $0x12c] sm:$0x1]  ;;  %v10085_v53 = vld [vmem:[%s11269_s19 + $0x12e] sm:$0x1] }
 0x909   : > { %4676 = vst [vmem:[#allocation1 + $0x1] ss:$9 sm:$0xff] %v10033_v42  ;;  %v10084_v42 = vld [vmem:[%s11269_s19 + $0x12d] sm:$0x1] }
 0x90a   : > { %4677 = vst [vmem:[#allocation1 + $0x2] ss:$9 sm:$0xff] %v10034_v0  ;;  %v10086_v0 = vld [vmem:[%s11269_s19 + $0x12f] sm:$0x1] }
 0x90b   : > { %4678 = vst [vmem:[#allocation1 + $0x3] ss:$9 sm:$0xff] %v10035_v13  ;;  %v10087_v13 = vld [vmem:[%s11269_s19 + $0x130] sm:$0x1] }
 0x90c   : > { %4679 = vst [vmem:[#allocation1 + $0x4] ss:$9 sm:$0xff] %v10036_v25  ;;  %v10088_v25 = vld [vmem:[%s11269_s19 + $0x14] sm:$0x1] }
 0x90d   : > { %4680 = vst [vmem:[#allocation1 + $0x5] ss:$9 sm:$0xff] %v10037_v37  ;;  %v10089_v37 = vld [vmem:[%s11269_s19 + $0x15] sm:$0x1] }
 0x90e   : > { %4681 = vst [vmem:[#allocation1 + $0x6] ss:$9 sm:$0xff] %v10038_v50  ;;  %v3825_v50 = vpop.permute.xlu1 %3824 }
 0x90f   : > { %4682 = vst [vmem:[#allocation1 + $0x7] ss:$9 sm:$0xff] %v10039_v63 }
 0x910   : > { %3909 = vst.msk [vmem:[#allocation2 + $0x60] sm:$0xff] %vm3896_vm3, %v3825_v50  ;;  %v10140_v50 = vld [vmem:[%s11269_s19 + $0x4e] sm:$0x1] }
 0x916   : > { %v4683_v6 = vld [vmem:[#allocation1] sm:$0xff] }
 0x917   : > { %4684 = vst [vmem:[#allocation1] ss:$9 sm:$0xff] %v10040_v14  ;;  %4788 = vrot.lane.b32.xlu1 %v4683_v6, %s11220_s23  ;;  %v10090_v14 = vld [vmem:[%s11269_s19 + $0x16] sm:$0x1]  ;;  %v10094_v6 = vld [vmem:[%s11269_s19 + $0x1a] sm:$0x1] }
 0x918   : > { %4685 = vst [vmem:[#allocation1 + $0x1] ss:$9 sm:$0xff] %v10041_v27  ;;  %v10091_v27 = vld [vmem:[%s11269_s19 + $0x17] sm:$0x1] }
 0x919   : > { %4686 = vst [vmem:[#allocation1 + $0x2] ss:$9 sm:$0xff] %v10042_v57  ;;  %v10093_v57 = vld [vmem:[%s11269_s19 + $0x19] sm:$0x1] }
 0x91a   : > { %4687 = vst [vmem:[#allocation1 + $0x3] ss:$9 sm:$0xff] %v10043_v23  ;;  %v10095_v23 = vld [vmem:[%s11269_s19 + $0x1b] sm:$0x1] }
 0x91b   : > { %4688 = vst [vmem:[#allocation1 + $0x4] ss:$9 sm:$0xff] %v10044_v39  ;;  %v3847_v39 = vpop.permute.xlu0 %3846 }
 0x91c   : > { %4689 = vst [vmem:[#allocation1 + $0x5] ss:$9 sm:$0xff] %v10045_v54  ;;  %v3851_v54 = vpop.permute.xlu2 %3850 }
 0x91d   : > { %4690 = vst [vmem:[#allocation1 + $0x6] ss:$9 sm:$0xff] %v10046_v46  ;;  %v10096_v46 = vld [vmem:[%s11269_s19 + $0x1c] sm:$0x1] }
 0x91e   : > { %4691 = vst [vmem:[#allocation1 + $0x7] ss:$9 sm:$0xff] %v10047_v48  ;;  %v10097_v48 = vld [vmem:[%s11269_s19 + $0x1d] sm:$0x1] }
 0x91f   : > { %3920 = vst.msk [vmem:[#allocation2 + $0xb8] sm:$0xff] %vm3896_vm3, %v3847_v39  ;;  %v10146_v39 = vld [vmem:[%s11269_s19 + $0x54] sm:$0x1] }
 0x920   : > { %3922 = vst.msk [vmem:[#allocation2 + $0xc8] sm:$0xff] %vm3896_vm3, %v3851_v54 }
 0x925   : > { %v4692_v60 = vld [vmem:[#allocation1] sm:$0xff] }
 0x926   : > { %4693 = vst [vmem:[#allocation1] ss:$9 sm:$0xff] %v10048_v55  ;;  %4790 = vrot.lane.b32.xlu2 %v4692_v60, %s11220_s23  ;;  %v10099_v55 = vld [vmem:[%s11269_s19 + $0x1f] sm:$0x1]  ;;  %v10102_v60 = vld [vmem:[%s11269_s19 + $0x22] sm:$0x1] }
 0x927   : > { %4694 = vst [vmem:[#allocation1 + $0x1] ss:$9 sm:$0xff] %v10049_v58  ;;  %v10100_v58 = vld [vmem:[%s11269_s19 + $0x20] sm:$0x1] }
 0x928   : > { %4695 = vst [vmem:[#allocation1 + $0x2] ss:$9 sm:$0xff] %v10050_v59  ;;  %v10101_v59 = vld [vmem:[%s11269_s19 + $0x21] sm:$0x1] }
 0x929   : > { %4696 = vst [vmem:[#allocation1 + $0x3] ss:$9 sm:$0xff] %v10051_v62  ;;  %v10103_v62 = vld [vmem:[%s11269_s19 + $0x23] sm:$0x1] }
 0x92a   : > { %4697 = vst [vmem:[#allocation1 + $0x4] ss:$9 sm:$0xff] %v10052_v2  ;;  %v10104_v2 = vld [vmem:[%s11269_s19 + $0x26] sm:$0x1] }
 0x92b   : > { %4698 = vst [vmem:[#allocation1 + $0x5] ss:$9 sm:$0xff] %v10053_v3  ;;  %v10105_v3 = vld [vmem:[%s11269_s19 + $0x27] sm:$0x1] }
 0x92c   : > { %4699 = vst [vmem:[#allocation1 + $0x6] ss:$9 sm:$0xff] %v10054_v4 }
 0x92d   : > { %4700 = vst [vmem:[#allocation1 + $0x7] ss:$9 sm:$0xff] %v10055_v5  ;;  %v10106_v5 = vld [vmem:[%s11269_s19 + $0x28] sm:$0x1] }
 0x934   : > { %v4701_v12 = vld [vmem:[#allocation1] sm:$0xff] }
 0x935   : > { %4792 = vrot.lane.b32.xlu0 %v4701_v12, %s11220_s23  ;;  %4702 = vst [vmem:[#allocation1] ss:$9 sm:$0xff] %v10056_v8  ;;  %v10107_v8 = vld [vmem:[%s11269_s19 + $0x29] sm:$0x1]  ;;  %v10109_v12 = vld [vmem:[%s11269_s19 + $0x2b] sm:$0x1] }
 0x936   : > { %4703 = vst [vmem:[#allocation1 + $0x1] ss:$9 sm:$0xff] %v10057_v9  ;;  %v10108_v9 = vld [vmem:[%s11269_s19 + $0x2a] sm:$0x1] }
 0x937   : > { %4704 = vst [vmem:[#allocation1 + $0x2] ss:$9 sm:$0xff] %v10058_v15  ;;  %v10110_v15 = vld [vmem:[%s11269_s19 + $0x2c] sm:$0x1] }
 0x938   : > { %4705 = vst [vmem:[#allocation1 + $0x3] ss:$9 sm:$0xff] %v10059_v16  ;;  %v10111_v16 = vld [vmem:[%s11269_s19 + $0x2d] sm:$0x1] }
 0x939   : > { %4706 = vst [vmem:[#allocation1 + $0x4] ss:$9 sm:$0xff] %v10060_v17  ;;  %v10112_v17 = vld [vmem:[%s11269_s19 + $0x2e] sm:$0x1] }
 0x93a   : > { %4707 = vst [vmem:[#allocation1 + $0x5] ss:$9 sm:$0xff] %v10061_v19  ;;  %v10113_v19 = vld [vmem:[%s11269_s19 + $0x2f] sm:$0x1] }
 0x93b   : > { %4708 = vst [vmem:[#allocation1 + $0x6] ss:$9 sm:$0xff] %v10062_v22  ;;  %v3831_v22 = vpop.permute.xlu1 %3830 }
 0x93c   : > { %4709 = vst [vmem:[#allocation1 + $0x7] ss:$9 sm:$0xff] %v10063_v24  ;;  %v10114_v24 = vld [vmem:[%s11269_s19 + $0x30] sm:$0x1] }
 0x93d   : > { %3912 = vst.msk [vmem:[#allocation2 + $0x78] sm:$0xff] %vm3896_vm3, %v3831_v22  ;;  %v10164_v22 = vld [vmem:[%s11269_s19 + $0x68] sm:$0x1] }
 0x943   : > { %v4710_v34 = vld [vmem:[#allocation1] sm:$0xff] }
 0x944   : > { %4711 = vst [vmem:[#allocation1] ss:$9 sm:$0xff] %v10064_v26  ;;  %4794 = vrot.lane.b32.xlu1 %v4710_v34, %s11220_s23  ;;  %v10118_v34 = vld [vmem:[%s11269_s19 + $0x34] sm:$0x1] }
 0x945   : > { %4712 = vst [vmem:[#allocation1 + $0x1] ss:$9 sm:$0xff] %v10065_v28  ;;  %v10115_v28 = vld [vmem:[%s11269_s19 + $0x31] sm:$0x1] }
 0x946   : > { %4713 = vst [vmem:[#allocation1 + $0x2] ss:$9 sm:$0xff] %v10066_v33  ;;  %v10117_v33 = vld [vmem:[%s11269_s19 + $0x33] sm:$0x1] }
 0x947   : > { %4714 = vst [vmem:[#allocation1 + $0x3] ss:$9 sm:$0xff] %v10067_v11  ;;  %v10119_v11 = vld [vmem:[%s11269_s19 + $0x35] sm:$0x1] }
 0x948   : > { %4715 = vst [vmem:[#allocation1 + $0x4] ss:$9 sm:$0xff] %v10068_v35  ;;  %v3853_v35 = vpop.permute.xlu0 %3852 }
 0x949   : > { %4716 = vst [vmem:[#allocation1 + $0x5] ss:$9 sm:$0xff] %v10069_v36  ;;  %v3857_v36 = vpop.permute.xlu2 %3856 }
 0x94a   : > { %4717 = vst [vmem:[#allocation1 + $0x6] ss:$9 sm:$0xff] %v10070_v40  ;;  %v10120_v40 = vld [vmem:[%s11269_s19 + $0x38] sm:$0x1] }
 0x94b   : > { %4718 = vst [vmem:[#allocation1 + $0x7] ss:$9 sm:$0xff] %v10071_v44  ;;  %v10121_v44 = vld [vmem:[%s11269_s19 + $0x39] sm:$0x1] }
 0x94c   : > { %3923 = vst.msk [vmem:[#allocation2 + $0xd0] sm:$0xff] %vm3896_vm3, %v3853_v35  ;;  %v10170_v35 = vld [vmem:[%s11269_s19 + $0x70] sm:$0x1] }
 0x94d   : > { %3925 = vst.msk [vmem:[#allocation2 + $0xe0] sm:$0xff] %vm3896_vm3, %v3857_v36 }
 0x952   : > { %v4719_v56 = vld [vmem:[#allocation1] sm:$0xff] }
 0x953   : > { %4720 = vst [vmem:[#allocation1] ss:$9 sm:$0xff] %v10072_v38  ;;  %4796 = vrot.lane.b32.xlu2 %v4719_v56, %s11220_s23  ;;  %v10123_v38 = vld [vmem:[%s11269_s19 + $0x3b] sm:$0x1]  ;;  %v10126_v56 = vld [vmem:[%s11269_s19 + $0x3e] sm:$0x1] }
 0x954   : > { %4721 = vst [vmem:[#allocation1 + $0x1] ss:$9 sm:$0xff] %v10073_v45  ;;  %v10124_v45 = vld [vmem:[%s11269_s19 + $0x3c] sm:$0x1] }
 0x955   : > { %4722 = vst [vmem:[#allocation1 + $0x2] ss:$9 sm:$0xff] %v10074_v47  ;;  %v10125_v47 = vld [vmem:[%s11269_s19 + $0x3d] sm:$0x1] }
 0x956   : > { %4723 = vst [vmem:[#allocation1 + $0x3] ss:$9 sm:$0xff] %v10075_v1  ;;  %v10127_v1 = vld [vmem:[%s11269_s19 + $0x3f] sm:$0x1] }
 0x957   : > { %4724 = vst [vmem:[#allocation1 + $0x4] ss:$9 sm:$0xff] %v10076_v10  ;;  %v10128_v10 = vld [vmem:[%s11269_s19 + $0x40] sm:$0x1] }
 0x958   : > { %4725 = vst [vmem:[#allocation1 + $0x5] ss:$9 sm:$0xff] %v10077_v21  ;;  %v10129_v21 = vld [vmem:[%s11269_s19 + $0x41] sm:$0x1] }
 0x959   : > { %4726 = vst [vmem:[#allocation1 + $0x6] ss:$9 sm:$0xff] %v10078_v31 }
 0x95a   : > { %4727 = vst [vmem:[#allocation1 + $0x7] ss:$9 sm:$0xff] %v10079_v41  ;;  %v10130_v41 = vld [vmem:[%s11269_s19 + $0x42] sm:$0x1] }
 0x961   : > { %v4728_v7 = vld [vmem:[#allocation1] sm:$0xff] }
 0x962   : > { %4798 = vrot.lane.b32.xlu0 %v4728_v7, %s11220_s23  ;;  %4729 = vst [vmem:[#allocation1] ss:$9 sm:$0xff] %v10080_v51  ;;  %v10131_v51 = vld [vmem:[%s11269_s19 + $0x43] sm:$0x1]  ;;  %v10133_v7 = vld [vmem:[%s11269_s19 + $0x45] sm:$0x1] }
 0x963   : > { %4730 = vst [vmem:[#allocation1 + $0x1] ss:$9 sm:$0xff] %v10081_v61  ;;  %v10132_v61 = vld [vmem:[%s11269_s19 + $0x44] sm:$0x1] }
 0x964   : > { %4731 = vst [vmem:[#allocation1 + $0x2] ss:$9 sm:$0xff] %v10082_v18  ;;  %v10134_v18 = vld [vmem:[%s11269_s19 + $0x46] sm:$0x1] }
 0x965   : > { %4732 = vst [vmem:[#allocation1 + $0x3] ss:$9 sm:$0xff] %v10083_v30  ;;  %v10135_v30 = vld [vmem:[%s11269_s19 + $0x47] sm:$0x1] }
 0x966   : > { %4733 = vst [vmem:[#allocation1 + $0x4] ss:$9 sm:$0xff] %v10084_v42  ;;  %v10136_v42 = vld [vmem:[%s11269_s19 + $0x4a] sm:$0x1] }
 0x967   : > { %4734 = vst [vmem:[#allocation1 + $0x5] ss:$9 sm:$0xff] %v10085_v53  ;;  %v10137_v53 = vld [vmem:[%s11269_s19 + $0x4b] sm:$0x1] }
 0x968   : > { %4735 = vst [vmem:[#allocation1 + $0x6] ss:$9 sm:$0xff] %v10086_v0  ;;  %v3837_v0 = vpop.permute.xlu1 %3836 }
 0x969   : > { %4736 = vst [vmem:[#allocation1 + $0x7] ss:$9 sm:$0xff] %v10087_v13  ;;  %v10138_v13 = vld [vmem:[%s11269_s19 + $0x4c] sm:$0x1] }
 0x96a   : > { %3915 = vst.msk [vmem:[#allocation2 + $0x90] sm:$0xff] %vm3896_vm3, %v3837_v0  ;;  %v10188_v0 = vld [vmem:[%s11269_s19 + $0x84] sm:$0x1] }
 0x970   : > { %v4737_v63 = vld [vmem:[#allocation1] sm:$0xff] }
 0x971   : > { %5381 = vst [vmem:[#allocation1] ss:$9 sm:$0xff] %v10088_v25  ;;  %4800 = vrot.lane.b32.xlu1 %v4737_v63, %s11220_s23  ;;  %v10141_v63 = vld [vmem:[%s11269_s19 + $0x4f] sm:$0x1] }
 0x972   : > { %5383 = vst [vmem:[#allocation1 + $0x1] ss:$9 sm:$0xff] %v10089_v37  ;;  %v10139_v37 = vld [vmem:[%s11269_s19 + $0x4d] sm:$0x1] }
 0x973   : > { %5385 = vst [vmem:[#allocation1 + $0x2] ss:$9 sm:$0xff] %v10090_v14  ;;  %v10142_v14 = vld [vmem:[%s11269_s19 + $0x50] sm:$0x1] }
 0x974   : > { %5387 = vst [vmem:[#allocation1 + $0x3] ss:$9 sm:$0xff] %v10091_v27  ;;  %v10143_v27 = vld [vmem:[%s11269_s19 + $0x51] sm:$0x1] }
 0x975   : > { %5389 = vst [vmem:[#allocation1 + $0x4] ss:$9 sm:$0xff] %v10092_v43  ;;  %v3859_v43 = vpop.permute.xlu0 %3858 }
 0x976   : > { %5391 = vst [vmem:[#allocation1 + $0x5] ss:$9 sm:$0xff] %v10093_v57  ;;  %v3863_v57 = vpop.permute.xlu2 %3862 }
 0x977   : > { %5393 = vst [vmem:[#allocation1 + $0x6] ss:$9 sm:$0xff] %v10094_v6  ;;  %v10144_v6 = vld [vmem:[%s11269_s19 + $0x52] sm:$0x1] }
 0x978   : > { %5395 = vst [vmem:[#allocation1 + $0x7] ss:$9 sm:$0xff] %v10095_v23  ;;  %v10145_v23 = vld [vmem:[%s11269_s19 + $0x53] sm:$0x1] }
 0x979   : > { %3926 = vst.msk [vmem:[#allocation2 + $0xe8] sm:$0xff] %vm3896_vm3, %v3859_v43  ;;  %v10194_v43 = vld [vmem:[%s11269_s19 + $0x8a] sm:$0x1] }
 0x97a   : > { %3928 = vst.msk [vmem:[#allocation2 + $0xf8] sm:$0xff] %vm3896_vm3, %v3863_v57 }
 0x97f   : > { %v5396_v52 = vld [vmem:[#allocation1] sm:$0xff] }
 0x980   : > { %5397 = vst [vmem:[#allocation1] ss:$9 sm:$0xff] %v10096_v46  ;;  %5676 = vrot.lane.b32.xlu2 %v5396_v52, %s11221_s24  ;;  %v10147_v46 = vld [vmem:[%s11269_s19 + $0x55] sm:$0x1]  ;;  %v10150_v52 = vld [vmem:[%s11269_s19 + $0x58] sm:$0x1] }
 0x981   : > { %5398 = vst [vmem:[#allocation1 + $0x1] ss:$9 sm:$0xff] %v10097_v48  ;;  %v10148_v48 = vld [vmem:[%s11269_s19 + $0x56] sm:$0x1] }
 0x982   : > { %5399 = vst [vmem:[#allocation1 + $0x2] ss:$9 sm:$0xff] %v10098_v49  ;;  %v10149_v49 = vld [vmem:[%s11269_s19 + $0x57] sm:$0x1] }
 0x983   : > { %5400 = vst [vmem:[#allocation1 + $0x3] ss:$9 sm:$0xff] %v10099_v55  ;;  %v10151_v55 = vld [vmem:[%s11269_s19 + $0x59] sm:$0x1] }
 0x984   : > { %5401 = vst [vmem:[#allocation1 + $0x4] ss:$9 sm:$0xff] %v10100_v58  ;;  %v10152_v58 = vld [vmem:[%s11269_s19 + $0x5c] sm:$0x1] }
 0x985   : > { %5402 = vst [vmem:[#allocation1 + $0x5] ss:$9 sm:$0xff] %v10101_v59  ;;  %v10153_v59 = vld [vmem:[%s11269_s19 + $0x5d] sm:$0x1] }
 0x986   : > { %5403 = vst [vmem:[#allocation1 + $0x6] ss:$9 sm:$0xff] %v10102_v60 }
 0x987   : > { %5404 = vst [vmem:[#allocation1 + $0x7] ss:$9 sm:$0xff] %v10103_v62  ;;  %v10154_v62 = vld [vmem:[%s11269_s19 + $0x5e] sm:$0x1] }
 0x98e   : > { %v5405_v4 = vld [vmem:[#allocation1] sm:$0xff] }
 0x98f   : > { %5678 = vrot.lane.b32.xlu0 %v5405_v4, %s11221_s24  ;;  %5406 = vst [vmem:[#allocation1] ss:$9 sm:$0xff] %v10104_v2  ;;  %v10155_v2 = vld [vmem:[%s11269_s19 + $0x5f] sm:$0x1]  ;;  %v10157_v4 = vld [vmem:[%s11269_s19 + $0x61] sm:$0x1] }
 0x990   : > { %5407 = vst [vmem:[#allocation1 + $0x1] ss:$9 sm:$0xff] %v10105_v3  ;;  %v10156_v3 = vld [vmem:[%s11269_s19 + $0x60] sm:$0x1] }
 0x991   : > { %5408 = vst [vmem:[#allocation1 + $0x2] ss:$9 sm:$0xff] %v10106_v5  ;;  %v10158_v5 = vld [vmem:[%s11269_s19 + $0x62] sm:$0x1] }
 0x992   : > { %5409 = vst [vmem:[#allocation1 + $0x3] ss:$9 sm:$0xff] %v10107_v8  ;;  %v10159_v8 = vld [vmem:[%s11269_s19 + $0x63] sm:$0x1] }
 0x993   : > { %5410 = vst [vmem:[#allocation1 + $0x4] ss:$9 sm:$0xff] %v10108_v9  ;;  %v10160_v9 = vld [vmem:[%s11269_s19 + $0x64] sm:$0x1] }
 0x994   : > { %5411 = vst [vmem:[#allocation1 + $0x5] ss:$9 sm:$0xff] %v10109_v12  ;;  %v10161_v12 = vld [vmem:[%s11269_s19 + $0x65] sm:$0x1] }
 0x995   : > { %5412 = vst [vmem:[#allocation1 + $0x6] ss:$9 sm:$0xff] %v10110_v15  ;;  %v3843_v15 = vpop.permute.xlu1 %3842 }
 0x996   : > { %5413 = vst [vmem:[#allocation1 + $0x7] ss:$9 sm:$0xff] %v10111_v16  ;;  %v10162_v16 = vld [vmem:[%s11269_s19 + $0x66] sm:$0x1] }
 0x997   : > { %3918 = vst.msk [vmem:[#allocation2 + $0xa8] sm:$0xff] %vm3896_vm3, %v3843_v15  ;;  %v10212_v15 = vld [vmem:[%s11269_s19 + $0x9e] sm:$0x1] }
 0x99d   : > { %v5414_v26 = vld [vmem:[#allocation1] sm:$0xff] }
 0x99e   : > { %5415 = vst [vmem:[#allocation1] ss:$9 sm:$0xff] %v10112_v17  ;;  %5680 = vrot.lane.b32.xlu1 %v5414_v26, %s11221_s24  ;;  %v10166_v26 = vld [vmem:[%s11269_s19 + $0x6a] sm:$0x1] }
 0x99f   : > { %5416 = vst [vmem:[#allocation1 + $0x1] ss:$9 sm:$0xff] %v10113_v19  ;;  %v10163_v19 = vld [vmem:[%s11269_s19 + $0x67] sm:$0x1] }
 0x9a0   : > { %5417 = vst [vmem:[#allocation1 + $0x2] ss:$9 sm:$0xff] %v10114_v24  ;;  %v10165_v24 = vld [vmem:[%s11269_s19 + $0x69] sm:$0x1] }
 0x9a1   : > { %5418 = vst [vmem:[#allocation1 + $0x3] ss:$9 sm:$0xff] %v10115_v28  ;;  %v10167_v28 = vld [vmem:[%s11269_s19 + $0x6b] sm:$0x1] }
 0x9a2   : > { %5419 = vst [vmem:[#allocation1 + $0x4] ss:$9 sm:$0xff] %v10116_v32  ;;  %v4739_v32 = vpop.permute.xlu0 %4738 }
 0x9a3   : > { %5420 = vst [vmem:[#allocation1 + $0x5] ss:$9 sm:$0xff] %v10117_v33  ;;  %v4743_v33 = vpop.permute.xlu2 %4742 }
 0x9a4   : > { %5421 = vst [vmem:[#allocation1 + $0x6] ss:$9 sm:$0xff] %v10118_v34  ;;  %v10168_v34 = vld [vmem:[%s11269_s19 + $0x6e] sm:$0x1] }
 0x9a5   : > { %5422 = vst [vmem:[#allocation1 + $0x7] ss:$9 sm:$0xff] %v10119_v11  ;;  %v10169_v11 = vld [vmem:[%s11269_s19 + $0x6f] sm:$0x1] }
 0x9a6   : > { %4835 = vst.msk [vmem:[#allocation2] sm:$0xff] %vm4834_vm4, %v4739_v32  ;;  %v10218_v32 = vld [vmem:[%s11269_s19 + $0xa6] sm:$0x1] }
 0x9a7   : > { %4837 = vst.msk [vmem:[#allocation2 + $0x10] sm:$0xff] %vm4834_vm4, %v4743_v33 }
 0x9ac   : > { %v5423_v29 = vld [vmem:[#allocation1] sm:$0xff] }
 0x9ad   : > { %5424 = vst [vmem:[#allocation1] ss:$9 sm:$0xff] %v10120_v40  ;;  %5682 = vrot.lane.b32.xlu2 %v5423_v29, %s11221_s24  ;;  %v10171_v40 = vld [vmem:[%s11269_s19 + $0x71] sm:$0x1]  ;;  %v10174_v29 = vld [vmem:[%s11269_s19 + $0x74] sm:$0x1] }
 0x9ae   : > { %5425 = vst [vmem:[#allocation1 + $0x1] ss:$9 sm:$0xff] %v10121_v44  ;;  %v10172_v44 = vld [vmem:[%s11269_s19 + $0x72] sm:$0x1] }
 0x9af   : > { %5426 = vst [vmem:[#allocation1 + $0x2] ss:$9 sm:$0xff] %v10122_v20  ;;  %v10173_v20 = vld [vmem:[%s11269_s19 + $0x73] sm:$0x1] }
 0x9b0   : > { %5427 = vst [vmem:[#allocation1 + $0x3] ss:$9 sm:$0xff] %v10123_v38  ;;  %v10175_v38 = vld [vmem:[%s11269_s19 + $0x75] sm:$0x1] }
 0x9b1   : > { %5428 = vst [vmem:[#allocation1 + $0x4] ss:$9 sm:$0xff] %v10124_v45  ;;  %v10176_v45 = vld [vmem:[%s11269_s19 + $0x76] sm:$0x1] }
 0x9b2   : > { %5429 = vst [vmem:[#allocation1 + $0x5] ss:$9 sm:$0xff] %v10125_v47  ;;  %v10177_v47 = vld [vmem:[%s11269_s19 + $0x77] sm:$0x1] }
 0x9b3   : > { %5430 = vst [vmem:[#allocation1 + $0x6] ss:$9 sm:$0xff] %v10126_v56 }
 0x9b4   : > { %5431 = vst [vmem:[#allocation1 + $0x7] ss:$9 sm:$0xff] %v10127_v1  ;;  %v10178_v1 = vld [vmem:[%s11269_s19 + $0x78] sm:$0x1] }
 0x9bb   : > { %v5432_v31 = vld [vmem:[#allocation1] sm:$0xff] }
 0x9bc   : > { %5684 = vrot.lane.b32.xlu0 %v5432_v31, %s11221_s24  ;;  %5433 = vst [vmem:[#allocation1] ss:$9 sm:$0xff] %v10128_v10  ;;  %v10179_v10 = vld [vmem:[%s11269_s19 + $0x79] sm:$0x1]  ;;  %v10181_v31 = vld [vmem:[%s11269_s19 + $0x7b] sm:$0x1] }
 0x9bd   : > { %5434 = vst [vmem:[#allocation1 + $0x1] ss:$9 sm:$0xff] %v10129_v21  ;;  %v10180_v21 = vld [vmem:[%s11269_s19 + $0x7a] sm:$0x1] }
 0x9be   : > { %5435 = vst [vmem:[#allocation1 + $0x2] ss:$9 sm:$0xff] %v10130_v41  ;;  %v10182_v41 = vld [vmem:[%s11269_s19 + $0x7c] sm:$0x1] }
 0x9bf   : > { %5436 = vst [vmem:[#allocation1 + $0x3] ss:$9 sm:$0xff] %v10131_v51  ;;  %v10183_v51 = vld [vmem:[%s11269_s19 + $0x7d] sm:$0x1] }
 0x9c0   : > { %5437 = vst [vmem:[#allocation1 + $0x4] ss:$9 sm:$0xff] %v10132_v61  ;;  %v10184_v61 = vld [vmem:[%s11269_s19 + $0x80] sm:$0x1] }
 0x9c1   : > { %5438 = vst [vmem:[#allocation1 + $0x5] ss:$9 sm:$0xff] %v10133_v7  ;;  %v10185_v7 = vld [vmem:[%s11269_s19 + $0x81] sm:$0x1] }
 0x9c2   : > { %5439 = vst [vmem:[#allocation1 + $0x6] ss:$9 sm:$0xff] %v10134_v18  ;;  %v3849_v18 = vpop.permute.xlu1 %3848 }
 0x9c3   : > { %5440 = vst [vmem:[#allocation1 + $0x7] ss:$9 sm:$0xff] %v10135_v30  ;;  %v10186_v30 = vld [vmem:[%s11269_s19 + $0x82] sm:$0x1] }
 0x9c4   : > { %3921 = vst.msk [vmem:[#allocation2 + $0xc0] sm:$0xff] %vm3896_vm3, %v3849_v18  ;;  %v10236_v18 = vld [vmem:[%s11269_s19 + $0xba] sm:$0x1] }
 0x9ca   : > { %v5441_v25 = vld [vmem:[#allocation1] sm:$0xff] }
 0x9cb   : > { %5442 = vst [vmem:[#allocation1] ss:$9 sm:$0xff] %v10136_v42  ;;  %5686 = vrot.lane.b32.xlu1 %v5441_v25, %s11221_s24  ;;  %v10190_v25 = vld [vmem:[%s11269_s19 + $0x86] sm:$0x1] }
 0x9cc   : > { %5443 = vst [vmem:[#allocation1 + $0x1] ss:$9 sm:$0xff] %v10137_v53  ;;  %v10187_v53 = vld [vmem:[%s11269_s19 + $0x83] sm:$0x1] }
 0x9cd   : > { %5444 = vst [vmem:[#allocation1 + $0x2] ss:$9 sm:$0xff] %v10138_v13  ;;  %v10189_v13 = vld [vmem:[%s11269_s19 + $0x85] sm:$0x1] }
 0x9ce   : > { %5445 = vst [vmem:[#allocation1 + $0x3] ss:$9 sm:$0xff] %v10139_v37  ;;  %v10191_v37 = vld [vmem:[%s11269_s19 + $0x87] sm:$0x1] }
 0x9cf   : > { %5446 = vst [vmem:[#allocation1 + $0x4] ss:$9 sm:$0xff] %v10140_v50  ;;  %v4745_v50 = vpop.permute.xlu0 %4744 }
 0x9d0   : > { %5447 = vst [vmem:[#allocation1 + $0x5] ss:$9 sm:$0xff] %v10141_v63  ;;  %v4749_v63 = vpop.permute.xlu2 %4748 }
 0x9d1   : > { %5448 = vst [vmem:[#allocation1 + $0x6] ss:$9 sm:$0xff] %v10142_v14  ;;  %v10192_v14 = vld [vmem:[%s11269_s19 + $0x88] sm:$0x1] }
 0x9d2   : > { %5449 = vst [vmem:[#allocation1 + $0x7] ss:$9 sm:$0xff] %v10143_v27  ;;  %v10193_v27 = vld [vmem:[%s11269_s19 + $0x89] sm:$0x1] }
 0x9d3   : > { %4838 = vst.msk [vmem:[#allocation2 + $0x18] sm:$0xff] %vm4834_vm4, %v4745_v50  ;;  %v10242_v50 = vld [vmem:[%s11269_s19 + $0xc0] sm:$0x1] }
 0x9d4   : > { %4840 = vst.msk [vmem:[#allocation2 + $0x28] sm:$0xff] %vm4834_vm4, %v4749_v63 }
 0x9d9   : > { %v5450_v54 = vld [vmem:[#allocation1] sm:$0xff] }
 0x9da   : > { %5451 = vst [vmem:[#allocation1] ss:$9 sm:$0xff] %v10144_v6  ;;  %5688 = vrot.lane.b32.xlu2 %v5450_v54, %s11221_s24  ;;  %v10195_v6 = vld [vmem:[%s11269_s19 + $0x8b] sm:$0x1]  ;;  %v10198_v54 = vld [vmem:[%s11269_s19 + $0x8e] sm:$0x1] }
 0x9db   : > { %5452 = vst [vmem:[#allocation1 + $0x1] ss:$9 sm:$0xff] %v10145_v23  ;;  %v10196_v23 = vld [vmem:[%s11269_s19 + $0x8c] sm:$0x1] }
 0x9dc   : > { %5453 = vst [vmem:[#allocation1 + $0x2] ss:$9 sm:$0xff] %v10146_v39  ;;  %v10197_v39 = vld [vmem:[%s11269_s19 + $0x8d] sm:$0x1] }
 0x9dd   : > { %5454 = vst [vmem:[#allocation1 + $0x3] ss:$9 sm:$0xff] %v10147_v46  ;;  %v10199_v46 = vld [vmem:[%s11269_s19 + $0x8f] sm:$0x1] }
 0x9de   : > { %5455 = vst [vmem:[#allocation1 + $0x4] ss:$9 sm:$0xff] %v10148_v48  ;;  %v10200_v48 = vld [vmem:[%s11269_s19 + $0x92] sm:$0x1] }
 0x9df   : > { %5456 = vst [vmem:[#allocation1 + $0x5] ss:$9 sm:$0xff] %v10149_v49  ;;  %v10201_v49 = vld [vmem:[%s11269_s19 + $0x93] sm:$0x1] }
 0x9e0   : > { %5457 = vst [vmem:[#allocation1 + $0x6] ss:$9 sm:$0xff] %v10150_v52 }
 0x9e1   : > { %5458 = vst [vmem:[#allocation1 + $0x7] ss:$9 sm:$0xff] %v10151_v55  ;;  %v10202_v55 = vld [vmem:[%s11269_s19 + $0x94] sm:$0x1] }
 0x9e8   : > { %v5459_v60 = vld [vmem:[#allocation1] sm:$0xff] }
 0x9e9   : > { %5690 = vrot.lane.b32.xlu0 %v5459_v60, %s11221_s24  ;;  %5460 = vst [vmem:[#allocation1] ss:$9 sm:$0xff] %v10152_v58  ;;  %v10203_v58 = vld [vmem:[%s11269_s19 + $0x95] sm:$0x1]  ;;  %v10205_v60 = vld [vmem:[%s11269_s19 + $0x97] sm:$0x1] }
 0x9ea   : > { %5461 = vst [vmem:[#allocation1 + $0x1] ss:$9 sm:$0xff] %v10153_v59  ;;  %v10204_v59 = vld [vmem:[%s11269_s19 + $0x96] sm:$0x1] }
 0x9eb   : > { %5462 = vst [vmem:[#allocation1 + $0x2] ss:$9 sm:$0xff] %v10154_v62  ;;  %v10206_v62 = vld [vmem:[%s11269_s19 + $0x98] sm:$0x1] }
 0x9ec   : > { %5463 = vst [vmem:[#allocation1 + $0x3] ss:$9 sm:$0xff] %v10155_v2  ;;  %v10207_v2 = vld [vmem:[%s11269_s19 + $0x99] sm:$0x1] }
 0x9ed   : > { %5464 = vst [vmem:[#allocation1 + $0x4] ss:$9 sm:$0xff] %v10156_v3  ;;  %v10208_v3 = vld [vmem:[%s11269_s19 + $0x9a] sm:$0x1] }
 0x9ee   : > { %5465 = vst [vmem:[#allocation1 + $0x5] ss:$9 sm:$0xff] %v10157_v4  ;;  %v10209_v4 = vld [vmem:[%s11269_s19 + $0x9b] sm:$0x1] }
 0x9ef   : > { %5466 = vst [vmem:[#allocation1 + $0x6] ss:$9 sm:$0xff] %v10158_v5  ;;  %v3855_v5 = vpop.permute.xlu1 %3854 }
 0x9f0   : > { %5467 = vst [vmem:[#allocation1 + $0x7] ss:$9 sm:$0xff] %v10159_v8  ;;  %v10210_v8 = vld [vmem:[%s11269_s19 + $0x9c] sm:$0x1] }
 0x9f1   : > { %3924 = vst.msk [vmem:[#allocation2 + $0xd8] sm:$0xff] %vm3896_vm3, %v3855_v5  ;;  %v10260_v5 = vld [vmem:[%s11269_s19 + $0xd4] sm:$0x1] }
 0x9f7   : > { %v5468_v17 = vld [vmem:[#allocation1] sm:$0xff] }
 0x9f8   : > { %5469 = vst [vmem:[#allocation1] ss:$9 sm:$0xff] %v10160_v9  ;;  %5692 = vrot.lane.b32.xlu1 %v5468_v17, %s11221_s24  ;;  %v10214_v17 = vld [vmem:[%s11269_s19 + $0xa0] sm:$0x1] }
 0x9f9   : > { %5470 = vst [vmem:[#allocation1 + $0x1] ss:$9 sm:$0xff] %v10161_v12  ;;  %v10211_v12 = vld [vmem:[%s11269_s19 + $0x9d] sm:$0x1] }
 0x9fa   : > { %5471 = vst [vmem:[#allocation1 + $0x2] ss:$9 sm:$0xff] %v10162_v16  ;;  %v10213_v16 = vld [vmem:[%s11269_s19 + $0x9f] sm:$0x1] }
 0x9fb   : > { %5472 = vst [vmem:[#allocation1 + $0x3] ss:$9 sm:$0xff] %v10163_v19  ;;  %v10215_v19 = vld [vmem:[%s11269_s19 + $0xa1] sm:$0x1] }
 0x9fc   : > { %5473 = vst [vmem:[#allocation1 + $0x4] ss:$9 sm:$0xff] %v10164_v22  ;;  %v4751_v22 = vpop.permute.xlu0 %4750 }
 0x9fd   : > { %5474 = vst [vmem:[#allocation1 + $0x5] ss:$9 sm:$0xff] %v10165_v24  ;;  %v4755_v24 = vpop.permute.xlu2 %4754 }
 0x9fe   : > { %5475 = vst [vmem:[#allocation1 + $0x6] ss:$9 sm:$0xff] %v10166_v26  ;;  %v10216_v26 = vld [vmem:[%s11269_s19 + $0xa4] sm:$0x1] }
 0x9ff   : > { %5476 = vst [vmem:[#allocation1 + $0x7] ss:$9 sm:$0xff] %v10167_v28  ;;  %v10217_v28 = vld [vmem:[%s11269_s19 + $0xa5] sm:$0x1] }
 0xa00   : > { %4841 = vst.msk [vmem:[#allocation2 + $0x30] sm:$0xff] %vm4834_vm4, %v4751_v22  ;;  %v10266_v22 = vld [vmem:[%s11269_s19 + $0xdc] sm:$0x1] }
 0xa01   : > { %4843 = vst.msk [vmem:[#allocation2 + $0x40] sm:$0xff] %vm4834_vm4, %v4755_v24 }
 0xa06   : > { %v5477_v36 = vld [vmem:[#allocation1] sm:$0xff] }
 0xa07   : > { %5478 = vst [vmem:[#allocation1] ss:$9 sm:$0xff] %v10168_v34  ;;  %5694 = vrot.lane.b32.xlu2 %v5477_v36, %s11221_s24  ;;  %v10219_v34 = vld [vmem:[%s11269_s19 + $0xa7] sm:$0x1]  ;;  %v10222_v36 = vld [vmem:[%s11269_s19 + $0xaa] sm:$0x1] }
 0xa08   : > { %5479 = vst [vmem:[#allocation1 + $0x1] ss:$9 sm:$0xff] %v10169_v11  ;;  %v10220_v11 = vld [vmem:[%s11269_s19 + $0xa8] sm:$0x1] }
 0xa09   : > { %5480 = vst [vmem:[#allocation1 + $0x2] ss:$9 sm:$0xff] %v10170_v35  ;;  %v10221_v35 = vld [vmem:[%s11269_s19 + $0xa9] sm:$0x1] }
 0xa0a   : > { %5481 = vst [vmem:[#allocation1 + $0x3] ss:$9 sm:$0xff] %v10171_v40  ;;  %v10223_v40 = vld [vmem:[%s11269_s19 + $0xab] sm:$0x1] }
 0xa0b   : > { %5482 = vst [vmem:[#allocation1 + $0x4] ss:$9 sm:$0xff] %v10172_v44  ;;  %v10224_v44 = vld [vmem:[%s11269_s19 + $0xac] sm:$0x1] }
 0xa0c   : > { %5483 = vst [vmem:[#allocation1 + $0x5] ss:$9 sm:$0xff] %v10173_v20  ;;  %v10225_v20 = vld [vmem:[%s11269_s19 + $0xad] sm:$0x1] }
 0xa0d   : > { %5484 = vst [vmem:[#allocation1 + $0x6] ss:$9 sm:$0xff] %v10174_v29 }
 0xa0e   : > { %5485 = vst [vmem:[#allocation1 + $0x7] ss:$9 sm:$0xff] %v10175_v38  ;;  %v10226_v38 = vld [vmem:[%s11269_s19 + $0xae] sm:$0x1] }
 0xa15   : > { %v5486_v56 = vld [vmem:[#allocation1] sm:$0xff] }
 0xa16   : > { %5696 = vrot.lane.b32.xlu0 %v5486_v56, %s11221_s24  ;;  %5487 = vst [vmem:[#allocation1] ss:$9 sm:$0xff] %v10176_v45  ;;  %v10227_v45 = vld [vmem:[%s11269_s19 + $0xaf] sm:$0x1]  ;;  %v10229_v56 = vld [vmem:[%s11269_s19 + $0xb1] sm:$0x1] }
 0xa17   : > { %5488 = vst [vmem:[#allocation1 + $0x1] ss:$9 sm:$0xff] %v10177_v47  ;;  %v10228_v47 = vld [vmem:[%s11269_s19 + $0xb0] sm:$0x1] }
 0xa18   : > { %5489 = vst [vmem:[#allocation1 + $0x2] ss:$9 sm:$0xff] %v10178_v1  ;;  %v10230_v1 = vld [vmem:[%s11269_s19 + $0xb2] sm:$0x1] }
 0xa19   : > { %5490 = vst [vmem:[#allocation1 + $0x3] ss:$9 sm:$0xff] %v10179_v10  ;;  %v10231_v10 = vld [vmem:[%s11269_s19 + $0xb3] sm:$0x1] }
 0xa1a   : > { %5491 = vst [vmem:[#allocation1 + $0x4] ss:$9 sm:$0xff] %v10180_v21  ;;  %v10232_v21 = vld [vmem:[%s11269_s19 + $0xb6] sm:$0x1] }
 0xa1b   : > { %5492 = vst [vmem:[#allocation1 + $0x5] ss:$9 sm:$0xff] %v10181_v31  ;;  %v10233_v31 = vld [vmem:[%s11269_s19 + $0xb7] sm:$0x1] }
 0xa1c   : > { %5493 = vst [vmem:[#allocation1 + $0x6] ss:$9 sm:$0xff] %v10182_v41  ;;  %v3861_v41 = vpop.permute.xlu1 %3860 }
 0xa1d   : > { %5494 = vst [vmem:[#allocation1 + $0x7] ss:$9 sm:$0xff] %v10183_v51  ;;  %v10234_v51 = vld [vmem:[%s11269_s19 + $0xb8] sm:$0x1] }
 0xa1e   : > { %3927 = vst.msk [vmem:[#allocation2 + $0xf0] sm:$0xff] %vm3896_vm3, %v3861_v41  ;;  %v10284_v41 = vld [vmem:[%s11269_s19 + $0xf0] sm:$0x1] }
 0xa24   : > { %v5495_v42 = vld [vmem:[#allocation1] sm:$0xff] }
 0xa25   : > { %5496 = vst [vmem:[#allocation1] ss:$9 sm:$0xff] %v10184_v61  ;;  %5698 = vrot.lane.b32.xlu1 %v5495_v42, %s11221_s24  ;;  %v10238_v42 = vld [vmem:[%s11269_s19 + $0xbc] sm:$0x1] }
 0xa26   : > { %5497 = vst [vmem:[#allocation1 + $0x1] ss:$9 sm:$0xff] %v10185_v7  ;;  %v10235_v7 = vld [vmem:[%s11269_s19 + $0xb9] sm:$0x1] }
 0xa27   : > { %5498 = vst [vmem:[#allocation1 + $0x2] ss:$9 sm:$0xff] %v10186_v30  ;;  %v10237_v30 = vld [vmem:[%s11269_s19 + $0xbb] sm:$0x1] }
 0xa28   : > { %5499 = vst [vmem:[#allocation1 + $0x3] ss:$9 sm:$0xff] %v10187_v53  ;;  %v10239_v53 = vld [vmem:[%s11269_s19 + $0xbd] sm:$0x1] }
 0xa29   : > { %5500 = vst [vmem:[#allocation1 + $0x4] ss:$9 sm:$0xff] %v10188_v0  ;;  %v4757_v0 = vpop.permute.xlu0 %4756 }
 0xa2a   : > { %5501 = vst [vmem:[#allocation1 + $0x5] ss:$9 sm:$0xff] %v10189_v13  ;;  %v4761_v13 = vpop.permute.xlu2 %4760 }
 0xa2b   : > { %5502 = vst [vmem:[#allocation1 + $0x6] ss:$9 sm:$0xff] %v10190_v25  ;;  %v10240_v25 = vld [vmem:[%s11269_s19 + $0xbe] sm:$0x1] }
 0xa2c   : > { %5503 = vst [vmem:[#allocation1 + $0x7] ss:$9 sm:$0xff] %v10191_v37  ;;  %v10241_v37 = vld [vmem:[%s11269_s19 + $0xbf] sm:$0x1] }
 0xa2d   : > { %4844 = vst.msk [vmem:[#allocation2 + $0x48] sm:$0xff] %vm4834_vm4, %v4757_v0  ;;  %v10290_v0 = vld [vmem:[%s11269_s19 + $0xf6] sm:$0x1] }
 0xa2e   : > { %4846 = vst.msk [vmem:[#allocation2 + $0x58] sm:$0xff] %vm4834_vm4, %v4761_v13 }
 0xa33   : > { %v5504_v57 = vld [vmem:[#allocation1] sm:$0xff] }
 0xa34   : > { %5505 = vst [vmem:[#allocation1] ss:$9 sm:$0xff] %v10192_v14  ;;  %5700 = vrot.lane.b32.xlu2 %v5504_v57, %s11221_s24  ;;  %v10243_v14 = vld [vmem:[%s11269_s19 + $0xc1] sm:$0x1]  ;;  %v10246_v57 = vld [vmem:[%s11269_s19 + $0xc4] sm:$0x1] }
 0xa35   : > { %5506 = vst [vmem:[#allocation1 + $0x1] ss:$9 sm:$0xff] %v10193_v27  ;;  %v10244_v27 = vld [vmem:[%s11269_s19 + $0xc2] sm:$0x1] }
 0xa36   : > { %5507 = vst [vmem:[#allocation1 + $0x2] ss:$9 sm:$0xff] %v10194_v43  ;;  %v10245_v43 = vld [vmem:[%s11269_s19 + $0xc3] sm:$0x1] }
 0xa37   : > { %5508 = vst [vmem:[#allocation1 + $0x3] ss:$9 sm:$0xff] %v10195_v6  ;;  %v10247_v6 = vld [vmem:[%s11269_s19 + $0xc5] sm:$0x1] }
 0xa38   : > { %5509 = vst [vmem:[#allocation1 + $0x4] ss:$9 sm:$0xff] %v10196_v23  ;;  %v10248_v23 = vld [vmem:[%s11269_s19 + $0xc8] sm:$0x1] }
 0xa39   : > { %5510 = vst [vmem:[#allocation1 + $0x5] ss:$9 sm:$0xff] %v10197_v39  ;;  %v10249_v39 = vld [vmem:[%s11269_s19 + $0xc9] sm:$0x1] }
 0xa3a   : > { %5511 = vst [vmem:[#allocation1 + $0x6] ss:$9 sm:$0xff] %v10198_v54 }
 0xa3b   : > { %5512 = vst [vmem:[#allocation1 + $0x7] ss:$9 sm:$0xff] %v10199_v46  ;;  %v10250_v46 = vld [vmem:[%s11269_s19 + $0xca] sm:$0x1] }
 0xa42   : > { %v5513_v52 = vld [vmem:[#allocation1] sm:$0xff] }
 0xa43   : > { %5702 = vrot.lane.b32.xlu0 %v5513_v52, %s11221_s24  ;;  %5514 = vst [vmem:[#allocation1] ss:$9 sm:$0xff] %v10200_v48  ;;  %v10251_v48 = vld [vmem:[%s11269_s19 + $0xcb] sm:$0x1]  ;;  %v10253_v52 = vld [vmem:[%s11269_s19 + $0xcd] sm:$0x1] }
 0xa44   : > { %5515 = vst [vmem:[#allocation1 + $0x1] ss:$9 sm:$0xff] %v10201_v49  ;;  %v10252_v49 = vld [vmem:[%s11269_s19 + $0xcc] sm:$0x1] }
 0xa45   : > { %5516 = vst [vmem:[#allocation1 + $0x2] ss:$9 sm:$0xff] %v10202_v55  ;;  %v10254_v55 = vld [vmem:[%s11269_s19 + $0xce] sm:$0x1] }
 0xa46   : > { %5517 = vst [vmem:[#allocation1 + $0x3] ss:$9 sm:$0xff] %v10203_v58  ;;  %v10255_v58 = vld [vmem:[%s11269_s19 + $0xcf] sm:$0x1] }
 0xa47   : > { %5518 = vst [vmem:[#allocation1 + $0x4] ss:$9 sm:$0xff] %v10204_v59  ;;  %v10256_v59 = vld [vmem:[%s11269_s19 + $0xd0] sm:$0x1] }
 0xa48   : > { %5519 = vst [vmem:[#allocation1 + $0x5] ss:$9 sm:$0xff] %v10205_v60  ;;  %v10257_v60 = vld [vmem:[%s11269_s19 + $0xd1] sm:$0x1] }
 0xa49   : > { %5520 = vst [vmem:[#allocation1 + $0x6] ss:$9 sm:$0xff] %v10206_v62  ;;  %v4741_v62 = vpop.permute.xlu1 %4740 }
 0xa4a   : > { %5521 = vst [vmem:[#allocation1 + $0x7] ss:$9 sm:$0xff] %v10207_v2  ;;  %v10258_v2 = vld [vmem:[%s11269_s19 + $0xd2] sm:$0x1] }
 0xa4b   : > { %4836 = vst.msk [vmem:[#allocation2 + $0x8] sm:$0xff] %vm4834_vm4, %v4741_v62  ;;  %v10309_v62 = vld [vmem:[%s11269_s19 + $0x10b] sm:$0x1] }
 0xa51   : > { %v5522_v9 = vld [vmem:[#allocation1] sm:$0xff] }
 0xa52   : > { %5523 = vst [vmem:[#allocation1] ss:$9 sm:$0xff] %v10208_v3  ;;  %5704 = vrot.lane.b32.xlu1 %v5522_v9, %s11221_s24  ;;  %v10262_v9 = vld [vmem:[%s11269_s19 + $0xd6] sm:$0x1] }
 0xa53   : > { %5524 = vst [vmem:[#allocation1 + $0x1] ss:$9 sm:$0xff] %v10209_v4  ;;  %v10259_v4 = vld [vmem:[%s11269_s19 + $0xd3] sm:$0x1] }
 0xa54   : > { %5525 = vst [vmem:[#allocation1 + $0x2] ss:$9 sm:$0xff] %v10210_v8  ;;  %v10261_v8 = vld [vmem:[%s11269_s19 + $0xd5] sm:$0x1] }
 0xa55   : > { %5526 = vst [vmem:[#allocation1 + $0x3] ss:$9 sm:$0xff] %v10211_v12  ;;  %v10263_v12 = vld [vmem:[%s11269_s19 + $0xd7] sm:$0x1] }
 0xa56   : > { %5527 = vst [vmem:[#allocation1 + $0x4] ss:$9 sm:$0xff] %v10212_v15  ;;  %v4763_v15 = vpop.permute.xlu0 %4762 }
 0xa57   : > { %5528 = vst [vmem:[#allocation1 + $0x5] ss:$9 sm:$0xff] %v10213_v16  ;;  %v4767_v16 = vpop.permute.xlu2 %4766 }
 0xa58   : > { %5529 = vst [vmem:[#allocation1 + $0x6] ss:$9 sm:$0xff] %v10214_v17  ;;  %v10264_v17 = vld [vmem:[%s11269_s19 + $0xda] sm:$0x1] }
 0xa59   : > { %5530 = vst [vmem:[#allocation1 + $0x7] ss:$9 sm:$0xff] %v10215_v19  ;;  %v10265_v19 = vld [vmem:[%s11269_s19 + $0xdb] sm:$0x1] }
 0xa5a   : > { %4847 = vst.msk [vmem:[#allocation2 + $0x60] sm:$0xff] %vm4834_vm4, %v4763_v15 }
 0xa5b   : > { %4849 = vst.msk [vmem:[#allocation2 + $0x70] sm:$0xff] %vm4834_vm4, %v4767_v16  ;;  %v10315_v16 = vld [vmem:[%s11269_s19 + $0x113] sm:$0x1] }
 0xa60   : > { %v5531_v33 = vld [vmem:[#allocation1] sm:$0xff] }
 0xa61   : > { %5532 = vst [vmem:[#allocation1] ss:$9 sm:$0xff] %v10216_v26  ;;  %5706 = vrot.lane.b32.xlu2 %v5531_v33, %s11221_s24  ;;  %v10267_v26 = vld [vmem:[%s11269_s19 + $0xdd] sm:$0x1]  ;;  %v10270_v33 = vld [vmem:[%s11269_s19 + $0xe0] sm:$0x1] }
 0xa62   : > { %5533 = vst [vmem:[#allocation1 + $0x1] ss:$9 sm:$0xff] %v10217_v28  ;;  %v10268_v28 = vld [vmem:[%s11269_s19 + $0xde] sm:$0x1] }
 0xa63   : > { %5534 = vst [vmem:[#allocation1 + $0x2] ss:$9 sm:$0xff] %v10218_v32  ;;  %v10269_v32 = vld [vmem:[%s11269_s19 + $0xdf] sm:$0x1] }
 0xa64   : > { %5535 = vst [vmem:[#allocation1 + $0x3] ss:$9 sm:$0xff] %v10219_v34  ;;  %v10271_v34 = vld [vmem:[%s11269_s19 + $0xe1] sm:$0x1] }
 0xa65   : > { %5536 = vst [vmem:[#allocation1 + $0x4] ss:$9 sm:$0xff] %v10220_v11  ;;  %v10272_v11 = vld [vmem:[%s11269_s19 + $0xe2] sm:$0x1] }
 0xa66   : > { %5537 = vst [vmem:[#allocation1 + $0x5] ss:$9 sm:$0xff] %v10221_v35  ;;  %v10273_v35 = vld [vmem:[%s11269_s19 + $0xe3] sm:$0x1] }
 0xa67   : > { %5538 = vst [vmem:[#allocation1 + $0x6] ss:$9 sm:$0xff] %v10222_v36 }
 0xa68   : > { %5539 = vst [vmem:[#allocation1 + $0x7] ss:$9 sm:$0xff] %v10223_v40  ;;  %v10274_v40 = vld [vmem:[%s11269_s19 + $0xe4] sm:$0x1] }
 0xa6f   : > { %v5540_v29 = vld [vmem:[#allocation1] sm:$0xff] }
 0xa70   : > { %5708 = vrot.lane.b32.xlu0 %v5540_v29, %s11221_s24  ;;  %5541 = vst [vmem:[#allocation1] ss:$9 sm:$0xff] %v10224_v44  ;;  %v10275_v44 = vld [vmem:[%s11269_s19 + $0xe5] sm:$0x1]  ;;  %v10277_v29 = vld [vmem:[%s11269_s19 + $0xe7] sm:$0x1] }
 0xa71   : > { %5542 = vst [vmem:[#allocation1 + $0x1] ss:$9 sm:$0xff] %v10225_v20  ;;  %v10276_v20 = vld [vmem:[%s11269_s19 + $0xe6] sm:$0x1] }
 0xa72   : > { %5543 = vst [vmem:[#allocation1 + $0x2] ss:$9 sm:$0xff] %v10226_v38  ;;  %v10278_v38 = vld [vmem:[%s11269_s19 + $0xe8] sm:$0x1] }
 0xa73   : > { %5544 = vst [vmem:[#allocation1 + $0x3] ss:$9 sm:$0xff] %v10227_v45  ;;  %v10279_v45 = vld [vmem:[%s11269_s19 + $0xe9] sm:$0x1] }
 0xa74   : > { %5545 = vst [vmem:[#allocation1 + $0x4] ss:$9 sm:$0xff] %v10228_v47  ;;  %v10280_v47 = vld [vmem:[%s11269_s19 + $0xec] sm:$0x1] }
 0xa75   : > { %5546 = vst [vmem:[#allocation1 + $0x5] ss:$9 sm:$0xff] %v10229_v56  ;;  %v10281_v56 = vld [vmem:[%s11269_s19 + $0xed] sm:$0x1] }
 0xa76   : > { %5547 = vst [vmem:[#allocation1 + $0x6] ss:$9 sm:$0xff] %v10230_v1  ;;  %v4747_v1 = vpop.permute.xlu1 %4746 }
 0xa77   : > { %5548 = vst [vmem:[#allocation1 + $0x7] ss:$9 sm:$0xff] %v10231_v10  ;;  %v10282_v10 = vld [vmem:[%s11269_s19 + $0xee] sm:$0x1] }
 0xa78   : > { %4839 = vst.msk [vmem:[#allocation2 + $0x20] sm:$0xff] %vm4834_vm4, %v4747_v1  ;;  %v10333_v1 = vld [vmem:[%s11269_s19 + $0x127] sm:$0x1] }
 0xa7e   : > { %v5549_v61 = vld [vmem:[#allocation1] sm:$0xff] }
 0xa7f   : > { %5550 = vst [vmem:[#allocation1] ss:$9 sm:$0xff] %v10232_v21  ;;  %5710 = vrot.lane.b32.xlu1 %v5549_v61, %s11221_s24  ;;  %v10286_v61 = vld [vmem:[%s11269_s19 + $0xf2] sm:$0x1] }
 0xa80   : > { %5551 = vst [vmem:[#allocation1 + $0x1] ss:$9 sm:$0xff] %v10233_v31  ;;  %v10283_v31 = vld [vmem:[%s11269_s19 + $0xef] sm:$0x1] }
 0xa81   : > { %5552 = vst [vmem:[#allocation1 + $0x2] ss:$9 sm:$0xff] %v10234_v51  ;;  %v10285_v51 = vld [vmem:[%s11269_s19 + $0xf1] sm:$0x1] }
 0xa82   : > { %5553 = vst [vmem:[#allocation1 + $0x3] ss:$9 sm:$0xff] %v10235_v7  ;;  %v10287_v7 = vld [vmem:[%s11269_s19 + $0xf3] sm:$0x1] }
 0xa83   : > { %5554 = vst [vmem:[#allocation1 + $0x4] ss:$9 sm:$0xff] %v10236_v18  ;;  %v4769_v18 = vpop.permute.xlu0 %4768 }
 0xa84   : > { %5555 = vst [vmem:[#allocation1 + $0x5] ss:$9 sm:$0xff] %v10237_v30  ;;  %v4773_v30 = vpop.permute.xlu2 %4772 }
 0xa85   : > { %5556 = vst [vmem:[#allocation1 + $0x6] ss:$9 sm:$0xff] %v10238_v42  ;;  %v10288_v42 = vld [vmem:[%s11269_s19 + $0xf4] sm:$0x1] }
 0xa86   : > { %5557 = vst [vmem:[#allocation1 + $0x7] ss:$9 sm:$0xff] %v10239_v53  ;;  %v10289_v53 = vld [vmem:[%s11269_s19 + $0xf5] sm:$0x1] }
 0xa87   : > { %4850 = vst.msk [vmem:[#allocation2 + $0x78] sm:$0xff] %vm4834_vm4, %v4769_v18 }
 0xa88   : > { %4852 = vst.msk [vmem:[#allocation2 + $0x88] sm:$0xff] %vm4834_vm4, %v4773_v30  ;;  %v10339_v30 = vld [vmem:[%s11269_s19 + $0x12d] sm:$0x1] }
 0xa8d   : > { %v5558_v63 = vld [vmem:[#allocation1] sm:$0xff] }
 0xa8e   : > { %5559 = vst [vmem:[#allocation1] ss:$9 sm:$0xff] %v10240_v25  ;;  %5712 = vrot.lane.b32.xlu2 %v5558_v63, %s11221_s24  ;;  %v10291_v25 = vld [vmem:[%s11269_s19 + $0xf7] sm:$0x1]  ;;  %v10294_v63 = vld [vmem:[%s11269_s19 + $0xfa] sm:$0x1] }
 0xa8f   : > { %5560 = vst [vmem:[#allocation1 + $0x1] ss:$9 sm:$0xff] %v10241_v37  ;;  %v10292_v37 = vld [vmem:[%s11269_s19 + $0xf8] sm:$0x1] }
 0xa90   : > { %5561 = vst [vmem:[#allocation1 + $0x2] ss:$9 sm:$0xff] %v10242_v50  ;;  %v10293_v50 = vld [vmem:[%s11269_s19 + $0xf9] sm:$0x1] }
 0xa91   : > { %5562 = vst [vmem:[#allocation1 + $0x3] ss:$9 sm:$0xff] %v10243_v14  ;;  %v10295_v14 = vld [vmem:[%s11269_s19 + $0xfb] sm:$0x1] }
 0xa92   : > { %5563 = vst [vmem:[#allocation1 + $0x4] ss:$9 sm:$0xff] %v10244_v27  ;;  %v10296_v27 = vld [vmem:[%s11269_s19 + $0xfe] sm:$0x1] }
 0xa93   : > { %5564 = vst [vmem:[#allocation1 + $0x5] ss:$9 sm:$0xff] %v10245_v43  ;;  %v10297_v43 = vld [vmem:[%s11269_s19 + $0xff] sm:$0x1] }
 0xa94   : > { %5565 = vst [vmem:[#allocation1 + $0x6] ss:$9 sm:$0xff] %v10246_v57 }
 0xa95   : > { %5566 = vst [vmem:[#allocation1 + $0x7] ss:$9 sm:$0xff] %v10247_v6  ;;  %v10298_v6 = vld [vmem:[%s11269_s19 + $0x100] sm:$0x1] }
 0xa9c   : > { %v5567_v54 = vld [vmem:[#allocation1] sm:$0xff] }
 0xa9d   : > { %5714 = vrot.lane.b32.xlu0 %v5567_v54, %s11221_s24  ;;  %5568 = vst [vmem:[#allocation1] ss:$9 sm:$0xff] %v10248_v23  ;;  %v10299_v23 = vld [vmem:[%s11269_s19 + $0x101] sm:$0x1]  ;;  %v10301_v54 = vld [vmem:[%s11269_s19 + $0x103] sm:$0x1] }
 0xa9e   : > { %5569 = vst [vmem:[#allocation1 + $0x1] ss:$9 sm:$0xff] %v10249_v39  ;;  %v10300_v39 = vld [vmem:[%s11269_s19 + $0x102] sm:$0x1] }
 0xa9f   : > { %5570 = vst [vmem:[#allocation1 + $0x2] ss:$9 sm:$0xff] %v10250_v46  ;;  %v10302_v46 = vld [vmem:[%s11269_s19 + $0x104] sm:$0x1] }
 0xaa0   : > { %5571 = vst [vmem:[#allocation1 + $0x3] ss:$9 sm:$0xff] %v10251_v48  ;;  %v10303_v48 = vld [vmem:[%s11269_s19 + $0x105] sm:$0x1] }
 0xaa1   : > { %5572 = vst [vmem:[#allocation1 + $0x4] ss:$9 sm:$0xff] %v10252_v49  ;;  %v10304_v49 = vld [vmem:[%s11269_s19 + $0x106] sm:$0x1] }
 0xaa2   : > { %5573 = vst [vmem:[#allocation1 + $0x5] ss:$9 sm:$0xff] %v10253_v52  ;;  %v10305_v52 = vld [vmem:[%s11269_s19 + $0x107] sm:$0x1] }
 0xaa3   : > { %5574 = vst [vmem:[#allocation1 + $0x6] ss:$9 sm:$0xff] %v10254_v55  ;;  %v10306_v55 = vld [vmem:[%s11269_s19 + $0x108] sm:$0x1] }
 0xaa4   : > { %5575 = vst [vmem:[#allocation1 + $0x7] ss:$9 sm:$0xff] %v10255_v58 }
 0xaab   : > { %v5576_v3 = vld [vmem:[#allocation1] sm:$0xff] }
 0xaac   : > { %5577 = vst [vmem:[#allocation1] ss:$9 sm:$0xff] %v10256_v59  ;;  %5716 = vrot.lane.b32.xlu1 %v5576_v3, %s11221_s24  ;;  %v10307_v59 = vld [vmem:[%s11269_s19 + $0x109] sm:$0x1]  ;;  %v10311_v3 = vld [vmem:[%s11269_s19 + $0x10d] sm:$0x1] }
 0xaad   : > { %5578 = vst [vmem:[#allocation1 + $0x1] ss:$9 sm:$0xff] %v10257_v60  ;;  %v10308_v60 = vld [vmem:[%s11269_s19 + $0x10a] sm:$0x1] }
 0xaae   : > { %5579 = vst [vmem:[#allocation1 + $0x2] ss:$9 sm:$0xff] %v10258_v2  ;;  %v10310_v2 = vld [vmem:[%s11269_s19 + $0x10c] sm:$0x1] }
 0xaaf   : > { %5580 = vst [vmem:[#allocation1 + $0x3] ss:$9 sm:$0xff] %v10259_v4  ;;  %v10312_v4 = vld [vmem:[%s11269_s19 + $0x110] sm:$0x1] }
 0xab0   : > { %5581 = vst [vmem:[#allocation1 + $0x4] ss:$9 sm:$0xff] %v10260_v5  ;;  %v4753_v5 = vpop.permute.xlu1 %4752 }
 0xab1   : > { %5582 = vst [vmem:[#allocation1 + $0x5] ss:$9 sm:$0xff] %v10261_v8  ;;  %v10313_v8 = vld [vmem:[%s11269_s19 + $0x111] sm:$0x1] }
 0xab2   : > { %5583 = vst [vmem:[#allocation1 + $0x6] ss:$9 sm:$0xff] %v10262_v9  ;;  %v4775_v9 = vpop.permute.xlu0 %4774 }
 0xab3   : > { %5584 = vst [vmem:[#allocation1 + $0x7] ss:$9 sm:$0xff] %v10263_v12  ;;  %v10314_v12 = vld [vmem:[%s11269_s19 + $0x112] sm:$0x1] }
 0xab4   : > { %4842 = vst.msk [vmem:[#allocation2 + $0x38] sm:$0xff] %vm4834_vm4, %v4753_v5 }
 0xab5   : > { %4853 = vst.msk [vmem:[#allocation2 + $0x90] sm:$0xff] %vm4834_vm4, %v4775_v9  ;;  %v10364_v9 = vld [vmem:[%s11269_s19 + $0x3a] sm:$0x1] }
 0xaba   : > { %v5585_v24 = vld [vmem:[#allocation1] sm:$0xff] }
 0xabb   : > { %5586 = vst [vmem:[#allocation1] ss:$9 sm:$0xff] %v10264_v17  ;;  %5718 = vrot.lane.b32.xlu2 %v5585_v24, %s11221_s24  ;;  %v10316_v17 = vld [vmem:[%s11269_s19 + $0x114] sm:$0x1]  ;;  %v10319_v24 = vld [vmem:[%s11269_s19 + $0x117] sm:$0x1] }
 0xabc   : > { %5587 = vst [vmem:[#allocation1 + $0x1] ss:$9 sm:$0xff] %v10265_v19  ;;  %v10317_v19 = vld [vmem:[%s11269_s19 + $0x115] sm:$0x1] }
 0xabd   : > { %5588 = vst [vmem:[#allocation1 + $0x2] ss:$9 sm:$0xff] %v10266_v22  ;;  %v10318_v22 = vld [vmem:[%s11269_s19 + $0x116] sm:$0x1] }
 0xabe   : > { %5589 = vst [vmem:[#allocation1 + $0x3] ss:$9 sm:$0xff] %v10267_v26  ;;  %v4779_v26 = vpop.permute.xlu2 %4778 }
 0xabf   : > { %5590 = vst [vmem:[#allocation1 + $0x4] ss:$9 sm:$0xff] %v10268_v28  ;;  %v10320_v28 = vld [vmem:[%s11269_s19 + $0x118] sm:$0x1] }
 0xac0   : > { %5591 = vst [vmem:[#allocation1 + $0x5] ss:$9 sm:$0xff] %v10269_v32  ;;  %v10321_v32 = vld [vmem:[%s11269_s19 + $0x119] sm:$0x1] }
 0xac1   : > { %5592 = vst [vmem:[#allocation1 + $0x6] ss:$9 sm:$0xff] %v10270_v33  ;;  %v10322_v33 = vld [vmem:[%s11269_s19 + $0x11a] sm:$0x1] }
 0xac2   : > { %5593 = vst [vmem:[#allocation1 + $0x7] ss:$9 sm:$0xff] %v10271_v34 }
 0xac3   : > { %4855 = vst.msk [vmem:[#allocation2 + $0xa0] sm:$0xff] %vm4834_vm4, %v4779_v26 }
 0xac9   : > { %v5594_v36 = vld [vmem:[#allocation1] sm:$0xff] }
 0xaca   : > { %5720 = vrot.lane.b32.xlu0 %v5594_v36, %s11221_s24  ;;  %5595 = vst [vmem:[#allocation1] ss:$9 sm:$0xff] %v10272_v11  ;;  %v10323_v11 = vld [vmem:[%s11269_s19 + $0x11b] sm:$0x1]  ;;  %v10325_v36 = vld [vmem:[%s11269_s19 + $0x11d] sm:$0x1] }
 0xacb   : > { %5596 = vst [vmem:[#allocation1 + $0x1] ss:$9 sm:$0xff] %v10273_v35  ;;  %v10324_v35 = vld [vmem:[%s11269_s19 + $0x11c] sm:$0x1] }
 0xacc   : > { %5597 = vst [vmem:[#allocation1 + $0x2] ss:$9 sm:$0xff] %v10274_v40  ;;  %v10326_v40 = vld [vmem:[%s11269_s19 + $0x11e] sm:$0x1] }
 0xacd   : > { %5598 = vst [vmem:[#allocation1 + $0x3] ss:$9 sm:$0xff] %v10275_v44  ;;  %v10327_v44 = vld [vmem:[%s11269_s19 + $0x11f] sm:$0x1] }
 0xace   : > { %5599 = vst [vmem:[#allocation1 + $0x4] ss:$9 sm:$0xff] %v10276_v20  ;;  %v10328_v20 = vld [vmem:[%s11269_s19 + $0x122] sm:$0x1] }
 0xacf   : > { %5600 = vst [vmem:[#allocation1 + $0x5] ss:$9 sm:$0xff] %v10277_v29  ;;  %v10329_v29 = vld [vmem:[%s11269_s19 + $0x123] sm:$0x1] }
 0xad0   : > { %5601 = vst [vmem:[#allocation1 + $0x6] ss:$9 sm:$0xff] %v10278_v38 }
 0xad1   : > { %5602 = vst [vmem:[#allocation1 + $0x7] ss:$9 sm:$0xff] %v10279_v45  ;;  %v10330_v45 = vld [vmem:[%s11269_s19 + $0x124] sm:$0x1] }
 0xad8   : > { %v5603_v21 = vld [vmem:[#allocation1] sm:$0xff] }
 0xad9   : > { %5604 = vst [vmem:[#allocation1] ss:$9 sm:$0xff] %v10280_v47  ;;  %5722 = vrot.lane.b32.xlu1 %v5603_v21, %s11221_s24  ;;  %v10331_v47 = vld [vmem:[%s11269_s19 + $0x125] sm:$0x1]  ;;  %v10335_v21 = vld [vmem:[%s11269_s19 + $0x129] sm:$0x1] }
 0xada   : > { %5605 = vst [vmem:[#allocation1 + $0x1] ss:$9 sm:$0xff] %v10281_v56  ;;  %v10332_v56 = vld [vmem:[%s11269_s19 + $0x126] sm:$0x1] }
 0xadb   : > { %5606 = vst [vmem:[#allocation1 + $0x2] ss:$9 sm:$0xff] %v10282_v10  ;;  %v10334_v10 = vld [vmem:[%s11269_s19 + $0x128] sm:$0x1] }
 0xadc   : > { %5607 = vst [vmem:[#allocation1 + $0x3] ss:$9 sm:$0xff] %v10283_v31  ;;  %v10336_v31 = vld [vmem:[%s11269_s19 + $0x12a] sm:$0x1] }
 0xadd   : > { %5608 = vst [vmem:[#allocation1 + $0x4] ss:$9 sm:$0xff] %v10284_v41  ;;  %v4759_v41 = vpop.permute.xlu1 %4758 }
 0xade   : > { %5609 = vst [vmem:[#allocation1 + $0x5] ss:$9 sm:$0xff] %v10285_v51  ;;  %v10337_v51 = vld [vmem:[%s11269_s19 + $0x12b] sm:$0x1] }
 0xadf   : > { %5610 = vst [vmem:[#allocation1 + $0x6] ss:$9 sm:$0xff] %v10286_v61  ;;  %v4781_v61 = vpop.permute.xlu0 %4780 }
 0xae0   : > { %5611 = vst [vmem:[#allocation1 + $0x7] ss:$9 sm:$0xff] %v10287_v7  ;;  %v10338_v7 = vld [vmem:[%s11269_s19 + $0x12c] sm:$0x1] }
 0xae1   : > { %4845 = vst.msk [vmem:[#allocation2 + $0x50] sm:$0xff] %vm4834_vm4, %v4759_v41 }
 0xae2   : > { %4856 = vst.msk [vmem:[#allocation2 + $0xa8] sm:$0xff] %vm4834_vm4, %v4781_v61  ;;  %v10388_v61 = vld [vmem:[%s11269_s19 + $0x54] sm:$0x1] }
 0xae7   : > { %v5612_v13 = vld [vmem:[#allocation1] sm:$0xff] }
 0xae8   : > { %5613 = vst [vmem:[#allocation1] ss:$9 sm:$0xff] %v10288_v42  ;;  %5724 = vrot.lane.b32.xlu2 %v5612_v13, %s11221_s24  ;;  %v10340_v42 = vld [vmem:[%s11269_s19 + $0x12e] sm:$0x1]  ;;  %v10343_v13 = vld [vmem:[%s11269_s19 + $0x131] sm:$0x1] }
 0xae9   : > { %5614 = vst [vmem:[#allocation1 + $0x1] ss:$9 sm:$0xff] %v10289_v53  ;;  %v10341_v53 = vld [vmem:[%s11269_s19 + $0x12f] sm:$0x1] }
 0xaea   : > { %5615 = vst [vmem:[#allocation1 + $0x2] ss:$9 sm:$0xff] %v10290_v0  ;;  %v10342_v0 = vld [vmem:[%s11269_s19 + $0x130] sm:$0x1] }
 0xaeb   : > { %5616 = vst [vmem:[#allocation1 + $0x3] ss:$9 sm:$0xff] %v10291_v25  ;;  %v4785_v25 = vpop.permute.xlu2 %4784 }
 0xaec   : > { %5617 = vst [vmem:[#allocation1 + $0x4] ss:$9 sm:$0xff] %v10292_v37  ;;  %v10344_v37 = vld [vmem:[%s11269_s19 + $0x24] sm:$0x1] }
 0xaed   : > { %5618 = vst [vmem:[#allocation1 + $0x5] ss:$9 sm:$0xff] %v10293_v50  ;;  %v10345_v50 = vld [vmem:[%s11269_s19 + $0x25] sm:$0x1] }
 0xaee   : > { %5619 = vst [vmem:[#allocation1 + $0x6] ss:$9 sm:$0xff] %v10294_v63 }
 0xaef   : > { %5620 = vst [vmem:[#allocation1 + $0x7] ss:$9 sm:$0xff] %v10295_v14  ;;  %v10346_v14 = vld [vmem:[%s11269_s19 + $0x26] sm:$0x1] }
 0xaf0   : > { %4858 = vst.msk [vmem:[#allocation2 + $0xb8] sm:$0xff] %vm4834_vm4, %v4785_v25 }
 0xaf6   : > { %v5621_v57 = vld [vmem:[#allocation1] sm:$0xff] }
 0xaf7   : > { %5726 = vrot.lane.b32.xlu0 %v5621_v57, %s11221_s24  ;;  %5622 = vst [vmem:[#allocation1] ss:$9 sm:$0xff] %v10296_v27  ;;  %v10347_v27 = vld [vmem:[%s11269_s19 + $0x27] sm:$0x1]  ;;  %v10349_v57 = vld [vmem:[%s11269_s19 + $0x29] sm:$0x1] }
 0xaf8   : > { %5623 = vst [vmem:[#allocation1 + $0x1] ss:$9 sm:$0xff] %v10297_v43  ;;  %v10348_v43 = vld [vmem:[%s11269_s19 + $0x28] sm:$0x1] }
 0xaf9   : > { %5624 = vst [vmem:[#allocation1 + $0x2] ss:$9 sm:$0xff] %v10298_v6  ;;  %v10350_v6 = vld [vmem:[%s11269_s19 + $0x2a] sm:$0x1] }
 0xafa   : > { %5625 = vst [vmem:[#allocation1 + $0x3] ss:$9 sm:$0xff] %v10299_v23  ;;  %v10351_v23 = vld [vmem:[%s11269_s19 + $0x2b] sm:$0x1] }
 0xafb   : > { %5626 = vst [vmem:[#allocation1 + $0x4] ss:$9 sm:$0xff] %v10300_v39  ;;  %v10352_v39 = vld [vmem:[%s11269_s19 + $0x2c] sm:$0x1] }
 0xafc   : > { %5627 = vst [vmem:[#allocation1 + $0x5] ss:$9 sm:$0xff] %v10301_v54  ;;  %v10353_v54 = vld [vmem:[%s11269_s19 + $0x2d] sm:$0x1] }
 0xafd   : > { %5628 = vst [vmem:[#allocation1 + $0x6] ss:$9 sm:$0xff] %v10302_v46 }
 0xafe   : > { %5629 = vst [vmem:[#allocation1 + $0x7] ss:$9 sm:$0xff] %v10303_v48  ;;  %v10354_v48 = vld [vmem:[%s11269_s19 + $0x2e] sm:$0x1] }
 0xb05   : > { %v5630_v58 = vld [vmem:[#allocation1] sm:$0xff] }
 0xb06   : > { %5631 = vst [vmem:[#allocation1] ss:$9 sm:$0xff] %v10304_v49  ;;  %5728 = vrot.lane.b32.xlu1 %v5630_v58, %s11221_s24  ;;  %v10355_v49 = vld [vmem:[%s11269_s19 + $0x2f] sm:$0x1]  ;;  %v10358_v58 = vld [vmem:[%s11269_s19 + $0x32] sm:$0x1] }
 0xb07   : > { %5632 = vst [vmem:[#allocation1 + $0x1] ss:$9 sm:$0xff] %v10305_v52  ;;  %v10356_v52 = vld [vmem:[%s11269_s19 + $0x30] sm:$0x1] }
 0xb08   : > { %5633 = vst [vmem:[#allocation1 + $0x2] ss:$9 sm:$0xff] %v10306_v55  ;;  %v10357_v55 = vld [vmem:[%s11269_s19 + $0x31] sm:$0x1] }
 0xb09   : > { %5634 = vst [vmem:[#allocation1 + $0x3] ss:$9 sm:$0xff] %v10307_v59  ;;  %v10359_v59 = vld [vmem:[%s11269_s19 + $0x33] sm:$0x1] }
 0xb0a   : > { %5635 = vst [vmem:[#allocation1 + $0x4] ss:$9 sm:$0xff] %v10308_v60  ;;  %v10360_v60 = vld [vmem:[%s11269_s19 + $0x36] sm:$0x1] }
 0xb0b   : > { %5636 = vst [vmem:[#allocation1 + $0x5] ss:$9 sm:$0xff] %v10309_v62  ;;  %v4765_v62 = vpop.permute.xlu1 %4764 }
 0xb0c   : > { %5637 = vst [vmem:[#allocation1 + $0x6] ss:$9 sm:$0xff] %v10310_v2  ;;  %v10361_v2 = vld [vmem:[%s11269_s19 + $0x37] sm:$0x1] }
 0xb0d   : > { %5638 = vst [vmem:[#allocation1 + $0x7] ss:$9 sm:$0xff] %v10311_v3  ;;  %v4787_v3 = vpop.permute.xlu0 %4786 }
 0xb0e   : > { %4848 = vst.msk [vmem:[#allocation2 + $0x68] sm:$0xff] %vm4834_vm4, %v4765_v62 }
 0xb0f   : > { %4859 = vst.msk [vmem:[#allocation2 + $0xc0] sm:$0xff] %vm4834_vm4, %v4787_v3  ;;  %v10412_v3 = vld [vmem:[%s11269_s19 + $0x70] sm:$0x1] }
 0xb14   : > { %v5639_v15 = vld [vmem:[#allocation1] sm:$0xff] }
 0xb15   : > { %5640 = vst [vmem:[#allocation1] ss:$9 sm:$0xff] %v10312_v4  ;;  %5730 = vrot.lane.b32.xlu2 %v5639_v15, %s11221_s24  ;;  %v10362_v4 = vld [vmem:[%s11269_s19 + $0x38] sm:$0x1]  ;;  %v10366_v15 = vld [vmem:[%s11269_s19 + $0x3c] sm:$0x1] }
 0xb16   : > { %5641 = vst [vmem:[#allocation1 + $0x1] ss:$9 sm:$0xff] %v10313_v8  ;;  %v10363_v8 = vld [vmem:[%s11269_s19 + $0x39] sm:$0x1] }
 0xb17   : > { %5642 = vst [vmem:[#allocation1 + $0x2] ss:$9 sm:$0xff] %v10314_v12  ;;  %v10365_v12 = vld [vmem:[%s11269_s19 + $0x3b] sm:$0x1] }
 0xb18   : > { %5643 = vst [vmem:[#allocation1 + $0x3] ss:$9 sm:$0xff] %v10315_v16  ;;  %v10367_v16 = vld [vmem:[%s11269_s19 + $0x3d] sm:$0x1] }
 0xb19   : > { %5644 = vst [vmem:[#allocation1 + $0x4] ss:$9 sm:$0xff] %v10316_v17  ;;  %v4791_v17 = vpop.permute.xlu2 %4790 }
 0xb1a   : > { %5645 = vst [vmem:[#allocation1 + $0x5] ss:$9 sm:$0xff] %v10317_v19  ;;  %v10368_v19 = vld [vmem:[%s11269_s19 + $0x3e] sm:$0x1] }
 0xb1b   : > { %5646 = vst [vmem:[#allocation1 + $0x6] ss:$9 sm:$0xff] %v10318_v22  ;;  %v10369_v22 = vld [vmem:[%s11269_s19 + $0x3f] sm:$0x1] }
 0xb1c   : > { %5647 = vst [vmem:[#allocation1 + $0x7] ss:$9 sm:$0xff] %v10319_v24  ;;  %v10370_v24 = vld [vmem:[%s11269_s19 + $0x40] sm:$0x1] }
 0xb1d   : > { %4861 = vst.msk [vmem:[#allocation2 + $0xd0] sm:$0xff] %vm4834_vm4, %v4791_v17 }
 0xb23   : > { %v5648_v34 = vld [vmem:[#allocation1] sm:$0xff] }
 0xb24   : > { %5732 = vrot.lane.b32.xlu0 %v5648_v34, %s11221_s24  ;;  %5649 = vst [vmem:[#allocation1] ss:$9 sm:$0xff] %v10320_v28  ;;  %v10371_v28 = vld [vmem:[%s11269_s19 + $0x41] sm:$0x1]  ;;  %v10374_v34 = vld [vmem:[%s11269_s19 + $0x44] sm:$0x1] }
 0xb25   : > { %5650 = vst [vmem:[#allocation1 + $0x1] ss:$9 sm:$0xff] %v10321_v32  ;;  %v10372_v32 = vld [vmem:[%s11269_s19 + $0x42] sm:$0x1] }
 0xb26   : > { %5651 = vst [vmem:[#allocation1 + $0x2] ss:$9 sm:$0xff] %v10322_v33  ;;  %v10373_v33 = vld [vmem:[%s11269_s19 + $0x43] sm:$0x1] }
 0xb27   : > { %5652 = vst [vmem:[#allocation1 + $0x3] ss:$9 sm:$0xff] %v10323_v11  ;;  %v10375_v11 = vld [vmem:[%s11269_s19 + $0x45] sm:$0x1] }
 0xb28   : > { %5653 = vst [vmem:[#allocation1 + $0x4] ss:$9 sm:$0xff] %v10324_v35  ;;  %v10376_v35 = vld [vmem:[%s11269_s19 + $0x48] sm:$0x1] }
 0xb29   : > { %5654 = vst [vmem:[#allocation1 + $0x5] ss:$9 sm:$0xff] %v10325_v36  ;;  %v10377_v36 = vld [vmem:[%s11269_s19 + $0x49] sm:$0x1] }
 0xb2a   : > { %5655 = vst [vmem:[#allocation1 + $0x6] ss:$9 sm:$0xff] %v10326_v40 }
 0xb2b   : > { %5656 = vst [vmem:[#allocation1 + $0x7] ss:$9 sm:$0xff] %v10327_v44  ;;  %v10378_v44 = vld [vmem:[%s11269_s19 + $0x4a] sm:$0x1] }
 0xb32   : > { %v5657_v38 = vld [vmem:[#allocation1] sm:$0xff] }
 0xb33   : > { %5658 = vst [vmem:[#allocation1] ss:$9 sm:$0xff] %v10328_v20  ;;  %5734 = vrot.lane.b32.xlu1 %v5657_v38, %s11221_s24  ;;  %v10379_v20 = vld [vmem:[%s11269_s19 + $0x4b] sm:$0x1]  ;;  %v10381_v38 = vld [vmem:[%s11269_s19 + $0x4d] sm:$0x1] }
 0xb34   : > { %5659 = vst [vmem:[#allocation1 + $0x1] ss:$9 sm:$0xff] %v10329_v29  ;;  %v10380_v29 = vld [vmem:[%s11269_s19 + $0x4c] sm:$0x1] }
 0xb35   : > { %5660 = vst [vmem:[#allocation1 + $0x2] ss:$9 sm:$0xff] %v10330_v45  ;;  %v10382_v45 = vld [vmem:[%s11269_s19 + $0x4e] sm:$0x1] }
 0xb36   : > { %5661 = vst [vmem:[#allocation1 + $0x3] ss:$9 sm:$0xff] %v10331_v47  ;;  %v10383_v47 = vld [vmem:[%s11269_s19 + $0x4f] sm:$0x1] }
 0xb37   : > { %5662 = vst [vmem:[#allocation1 + $0x4] ss:$9 sm:$0xff] %v10332_v56  ;;  %v10384_v56 = vld [vmem:[%s11269_s19 + $0x50] sm:$0x1] }
 0xb38   : > { %5663 = vst [vmem:[#allocation1 + $0x5] ss:$9 sm:$0xff] %v10333_v1  ;;  %v4771_v1 = vpop.permute.xlu1 %4770 }
 0xb39   : > { %5664 = vst [vmem:[#allocation1 + $0x6] ss:$9 sm:$0xff] %v10334_v10  ;;  %v10385_v10 = vld [vmem:[%s11269_s19 + $0x51] sm:$0x1] }
 0xb3a   : > { %5665 = vst [vmem:[#allocation1 + $0x7] ss:$9 sm:$0xff] %v10335_v21  ;;  %v4793_v21 = vpop.permute.xlu0 %4792 }
 0xb3b   : > { %4851 = vst.msk [vmem:[#allocation2 + $0x80] sm:$0xff] %vm4834_vm4, %v4771_v1 }
 0xb3c   : > { %4862 = vst.msk [vmem:[#allocation2 + $0xd8] sm:$0xff] %vm4834_vm4, %v4793_v21  ;;  %v10436_v21 = vld [vmem:[%s11269_s19 + $0x8a] sm:$0x1] }
 0xb41   : > { %v5666_v18 = vld [vmem:[#allocation1] sm:$0xff] }
 0xb42   : > { %5667 = vst [vmem:[#allocation1] ss:$9 sm:$0xff] %v10336_v31  ;;  %5736 = vrot.lane.b32.xlu2 %v5666_v18, %s11221_s24  ;;  %v10386_v31 = vld [vmem:[%s11269_s19 + $0x52] sm:$0x1]  ;;  %v10390_v18 = vld [vmem:[%s11269_s19 + $0x56] sm:$0x1] }
 0xb43   : > { %5668 = vst [vmem:[#allocation1 + $0x1] ss:$9 sm:$0xff] %v10337_v51  ;;  %v10387_v51 = vld [vmem:[%s11269_s19 + $0x53] sm:$0x1] }
 0xb44   : > { %5669 = vst [vmem:[#allocation1 + $0x2] ss:$9 sm:$0xff] %v10338_v7  ;;  %v10389_v7 = vld [vmem:[%s11269_s19 + $0x55] sm:$0x1] }
 0xb45   : > { %5670 = vst [vmem:[#allocation1 + $0x3] ss:$9 sm:$0xff] %v10339_v30  ;;  %v10391_v30 = vld [vmem:[%s11269_s19 + $0x57] sm:$0x1] }
 0xb46   : > { %5671 = vst [vmem:[#allocation1 + $0x4] ss:$9 sm:$0xff] %v10340_v42  ;;  %v4797_v42 = vpop.permute.xlu2 %4796 }
 0xb47   : > { %5672 = vst [vmem:[#allocation1 + $0x5] ss:$9 sm:$0xff] %v10341_v53  ;;  %v10392_v53 = vld [vmem:[%s11269_s19 + $0x5a] sm:$0x1] }
 0xb48   : > { %5673 = vst [vmem:[#allocation1 + $0x6] ss:$9 sm:$0xff] %v10342_v0  ;;  %v10393_v0 = vld [vmem:[%s11269_s19 + $0x5b] sm:$0x1] }
 0xb49   : > { %5674 = vst [vmem:[#allocation1 + $0x7] ss:$9 sm:$0xff] %v10343_v13  ;;  %v10394_v13 = vld [vmem:[%s11269_s19 + $0x5c] sm:$0x1] }
 0xb4a   : > { %4864 = vst.msk [vmem:[#allocation2 + $0xe8] sm:$0xff] %vm4834_vm4, %v4797_v42 }
 0xb50   : > { %v5675_v63 = vld [vmem:[#allocation1] sm:$0xff] }
 0xb51   : > { %5738 = vrot.lane.b32.xlu0 %v5675_v63, %s11221_s24  ;;  %6320 = vst [vmem:[#allocation1] ss:$9 sm:$0xff] %v10344_v37  ;;  %v10395_v37 = vld [vmem:[%s11269_s19 + $0x5d] sm:$0x1]  ;;  %v10397_v63 = vld [vmem:[%s11269_s19 + $0x5f] sm:$0x1] }
 0xb52   : > { %6322 = vst [vmem:[#allocation1 + $0x1] ss:$9 sm:$0xff] %v10345_v50  ;;  %v10396_v50 = vld [vmem:[%s11269_s19 + $0x5e] sm:$0x1] }
 0xb53   : > { %6324 = vst [vmem:[#allocation1 + $0x2] ss:$9 sm:$0xff] %v10346_v14  ;;  %v10398_v14 = vld [vmem:[%s11269_s19 + $0x60] sm:$0x1] }
 0xb54   : > { %6326 = vst [vmem:[#allocation1 + $0x3] ss:$9 sm:$0xff] %v10347_v27  ;;  %v10399_v27 = vld [vmem:[%s11269_s19 + $0x61] sm:$0x1] }
 0xb55   : > { %6328 = vst [vmem:[#allocation1 + $0x4] ss:$9 sm:$0xff] %v10348_v43  ;;  %v10400_v43 = vld [vmem:[%s11269_s19 + $0x62] sm:$0x1] }
 0xb56   : > { %6330 = vst [vmem:[#allocation1 + $0x5] ss:$9 sm:$0xff] %v10349_v57  ;;  %v10401_v57 = vld [vmem:[%s11269_s19 + $0x63] sm:$0x1] }
 0xb57   : > { %6332 = vst [vmem:[#allocation1 + $0x6] ss:$9 sm:$0xff] %v10350_v6 }
 0xb58   : > { %6334 = vst [vmem:[#allocation1 + $0x7] ss:$9 sm:$0xff] %v10351_v23  ;;  %v10402_v23 = vld [vmem:[%s11269_s19 + $0x64] sm:$0x1] }
 0xb5f   : > { %v6335_v46 = vld [vmem:[#allocation1] sm:$0xff] }
 0xb60   : > { %6336 = vst [vmem:[#allocation1] ss:$9 sm:$0xff] %v10352_v39  ;;  %6615 = vrot.lane.b32.xlu1 %v6335_v46, %s11222_s25  ;;  %v10403_v39 = vld [vmem:[%s11269_s19 + $0x65] sm:$0x1]  ;;  %v10405_v46 = vld [vmem:[%s11269_s19 + $0x67] sm:$0x1] }
 0xb61   : > { %6337 = vst [vmem:[#allocation1 + $0x1] ss:$9 sm:$0xff] %v10353_v54  ;;  %v10404_v54 = vld [vmem:[%s11269_s19 + $0x66] sm:$0x1] }
 0xb62   : > { %6338 = vst [vmem:[#allocation1 + $0x2] ss:$9 sm:$0xff] %v10354_v48  ;;  %v10406_v48 = vld [vmem:[%s11269_s19 + $0x68] sm:$0x1] }
 0xb63   : > { %6339 = vst [vmem:[#allocation1 + $0x3] ss:$9 sm:$0xff] %v10355_v49  ;;  %v10407_v49 = vld [vmem:[%s11269_s19 + $0x69] sm:$0x1] }
 0xb64   : > { %6340 = vst [vmem:[#allocation1 + $0x4] ss:$9 sm:$0xff] %v10356_v52  ;;  %v10408_v52 = vld [vmem:[%s11269_s19 + $0x6c] sm:$0x1] }
 0xb65   : > { %6341 = vst [vmem:[#allocation1 + $0x5] ss:$9 sm:$0xff] %v10357_v55  ;;  %v4777_v55 = vpop.permute.xlu1 %4776 }
 0xb66   : > { %6342 = vst [vmem:[#allocation1 + $0x6] ss:$9 sm:$0xff] %v10358_v58  ;;  %v10409_v58 = vld [vmem:[%s11269_s19 + $0x6d] sm:$0x1] }
 0xb67   : > { %6343 = vst [vmem:[#allocation1 + $0x7] ss:$9 sm:$0xff] %v10359_v59  ;;  %v4799_v59 = vpop.permute.xlu0 %4798 }
 0xb68   : > { %4854 = vst.msk [vmem:[#allocation2 + $0x98] sm:$0xff] %vm4834_vm4, %v4777_v55 }
 0xb69   : > { %4865 = vst.msk [vmem:[#allocation2 + $0xf0] sm:$0xff] %vm4834_vm4, %v4799_v59  ;;  %v10460_v59 = vld [vmem:[%s11269_s19 + $0xa6] sm:$0x1] }
 0xb6e   : > { %v6344_v5 = vld [vmem:[#allocation1] sm:$0xff] }
 0xb6f   : > { %6345 = vst [vmem:[#allocation1] ss:$9 sm:$0xff] %v10360_v60  ;;  %6617 = vrot.lane.b32.xlu2 %v6344_v5, %s11222_s25  ;;  %v10410_v60 = vld [vmem:[%s11269_s19 + $0x6e] sm:$0x1]  ;;  %v10414_v5 = vld [vmem:[%s11269_s19 + $0x72] sm:$0x1] }
 0xb70   : > { %6346 = vst [vmem:[#allocation1 + $0x1] ss:$9 sm:$0xff] %v10361_v2  ;;  %v10411_v2 = vld [vmem:[%s11269_s19 + $0x6f] sm:$0x1] }
 0xb71   : > { %6347 = vst [vmem:[#allocation1 + $0x2] ss:$9 sm:$0xff] %v10362_v4  ;;  %v10413_v4 = vld [vmem:[%s11269_s19 + $0x71] sm:$0x1] }
 0xb72   : > { %6348 = vst [vmem:[#allocation1 + $0x3] ss:$9 sm:$0xff] %v10363_v8  ;;  %v10415_v8 = vld [vmem:[%s11269_s19 + $0x73] sm:$0x1] }
 0xb73   : > { %6349 = vst [vmem:[#allocation1 + $0x4] ss:$9 sm:$0xff] %v10364_v9  ;;  %v5677_v9 = vpop.permute.xlu2 %5676 }
 0xb74   : > { %6350 = vst [vmem:[#allocation1 + $0x5] ss:$9 sm:$0xff] %v10365_v12  ;;  %v10416_v12 = vld [vmem:[%s11269_s19 + $0x74] sm:$0x1] }
 0xb75   : > { %6351 = vst [vmem:[#allocation1 + $0x6] ss:$9 sm:$0xff] %v10366_v15  ;;  %v10417_v15 = vld [vmem:[%s11269_s19 + $0x75] sm:$0x1] }
 0xb76   : > { %6352 = vst [vmem:[#allocation1 + $0x7] ss:$9 sm:$0xff] %v10367_v16  ;;  %v10418_v16 = vld [vmem:[%s11269_s19 + $0x76] sm:$0x1] }
 0xb77   : > { %5773 = vst.msk [vmem:[#allocation2] sm:$0xff] %vm5772_vm5, %v5677_v9 }
 0xb7d   : > { %v6353_v26 = vld [vmem:[#allocation1] sm:$0xff] }
 0xb7e   : > { %6619 = vrot.lane.b32.xlu0 %v6353_v26, %s11222_s25  ;;  %6354 = vst [vmem:[#allocation1] ss:$9 sm:$0xff] %v10368_v19  ;;  %v10419_v19 = vld [vmem:[%s11269_s19 + $0x77] sm:$0x1]  ;;  %v10422_v26 = vld [vmem:[%s11269_s19 + $0x7a] sm:$0x1] }
 0xb7f   : > { %6355 = vst [vmem:[#allocation1 + $0x1] ss:$9 sm:$0xff] %v10369_v22  ;;  %v10420_v22 = vld [vmem:[%s11269_s19 + $0x78] sm:$0x1] }
 0xb80   : > { %6356 = vst [vmem:[#allocation1 + $0x2] ss:$9 sm:$0xff] %v10370_v24  ;;  %v10421_v24 = vld [vmem:[%s11269_s19 + $0x79] sm:$0x1] }
 0xb81   : > { %6357 = vst [vmem:[#allocation1 + $0x3] ss:$9 sm:$0xff] %v10371_v28  ;;  %v10423_v28 = vld [vmem:[%s11269_s19 + $0x7b] sm:$0x1] }
 0xb82   : > { %6358 = vst [vmem:[#allocation1 + $0x4] ss:$9 sm:$0xff] %v10372_v32  ;;  %v10424_v32 = vld [vmem:[%s11269_s19 + $0x7e] sm:$0x1] }
 0xb83   : > { %6359 = vst [vmem:[#allocation1 + $0x5] ss:$9 sm:$0xff] %v10373_v33  ;;  %v10425_v33 = vld [vmem:[%s11269_s19 + $0x7f] sm:$0x1] }
 0xb84   : > { %6360 = vst [vmem:[#allocation1 + $0x6] ss:$9 sm:$0xff] %v10374_v34 }
 0xb85   : > { %6361 = vst [vmem:[#allocation1 + $0x7] ss:$9 sm:$0xff] %v10375_v11  ;;  %v10426_v11 = vld [vmem:[%s11269_s19 + $0x80] sm:$0x1] }
 0xb8c   : > { %v6362_v40 = vld [vmem:[#allocation1] sm:$0xff] }
 0xb8d   : > { %6363 = vst [vmem:[#allocation1] ss:$9 sm:$0xff] %v10376_v35  ;;  %6621 = vrot.lane.b32.xlu1 %v6362_v40, %s11222_s25  ;;  %v10427_v35 = vld [vmem:[%s11269_s19 + $0x81] sm:$0x1]  ;;  %v10429_v40 = vld [vmem:[%s11269_s19 + $0x83] sm:$0x1] }
 0xb8e   : > { %6364 = vst [vmem:[#allocation1 + $0x1] ss:$9 sm:$0xff] %v10377_v36  ;;  %v10428_v36 = vld [vmem:[%s11269_s19 + $0x82] sm:$0x1] }
 0xb8f   : > { %6365 = vst [vmem:[#allocation1 + $0x2] ss:$9 sm:$0xff] %v10378_v44  ;;  %v10430_v44 = vld [vmem:[%s11269_s19 + $0x84] sm:$0x1] }
 0xb90   : > { %6366 = vst [vmem:[#allocation1 + $0x3] ss:$9 sm:$0xff] %v10379_v20  ;;  %v10431_v20 = vld [vmem:[%s11269_s19 + $0x85] sm:$0x1] }
 0xb91   : > { %6367 = vst [vmem:[#allocation1 + $0x4] ss:$9 sm:$0xff] %v10380_v29  ;;  %v10432_v29 = vld [vmem:[%s11269_s19 + $0x86] sm:$0x1] }
 0xb92   : > { %6368 = vst [vmem:[#allocation1 + $0x5] ss:$9 sm:$0xff] %v10381_v38  ;;  %v4783_v38 = vpop.permute.xlu1 %4782 }
 0xb93   : > { %6369 = vst [vmem:[#allocation1 + $0x6] ss:$9 sm:$0xff] %v10382_v45  ;;  %v10433_v45 = vld [vmem:[%s11269_s19 + $0x87] sm:$0x1] }
 0xb94   : > { %6370 = vst [vmem:[#allocation1 + $0x7] ss:$9 sm:$0xff] %v10383_v47  ;;  %v5679_v47 = vpop.permute.xlu0 %5678 }
 0xb95   : > { %4857 = vst.msk [vmem:[#allocation2 + $0xb0] sm:$0xff] %vm4834_vm4, %v4783_v38  ;;  %v10484_v38 = vld [vmem:[%s11269_s19 + $0xc0] sm:$0x1] }
 0xb96   : > { %5774 = vst.msk [vmem:[#allocation2 + $0x8] sm:$0xff] %vm5772_vm5, %v5679_v47  ;;  %v10486_v47 = vld [vmem:[%s11269_s19 + $0xc2] sm:$0x1] }
 0xb9b   : > { %v6371_v41 = vld [vmem:[#allocation1] sm:$0xff] }
 0xb9c   : > { %6372 = vst [vmem:[#allocation1] ss:$9 sm:$0xff] %v10384_v56  ;;  %6623 = vrot.lane.b32.xlu2 %v6371_v41, %s11222_s25  ;;  %v10434_v56 = vld [vmem:[%s11269_s19 + $0x88] sm:$0x1]  ;;  %v10438_v41 = vld [vmem:[%s11269_s19 + $0x8c] sm:$0x1] }
 0xb9d   : > { %6373 = vst [vmem:[#allocation1 + $0x1] ss:$9 sm:$0xff] %v10385_v10  ;;  %v10435_v10 = vld [vmem:[%s11269_s19 + $0x89] sm:$0x1] }
 0xb9e   : > { %6374 = vst [vmem:[#allocation1 + $0x2] ss:$9 sm:$0xff] %v10386_v31  ;;  %v10437_v31 = vld [vmem:[%s11269_s19 + $0x8b] sm:$0x1] }
 0xb9f   : > { %6375 = vst [vmem:[#allocation1 + $0x3] ss:$9 sm:$0xff] %v10387_v51  ;;  %v10439_v51 = vld [vmem:[%s11269_s19 + $0x8d] sm:$0x1] }
 0xba0   : > { %6376 = vst [vmem:[#allocation1 + $0x4] ss:$9 sm:$0xff] %v10388_v61  ;;  %v5683_v61 = vpop.permute.xlu2 %5682 }
 0xba1   : > { %6377 = vst [vmem:[#allocation1 + $0x5] ss:$9 sm:$0xff] %v10389_v7  ;;  %v10440_v7 = vld [vmem:[%s11269_s19 + $0x90] sm:$0x1] }
 0xba2   : > { %6378 = vst [vmem:[#allocation1 + $0x6] ss:$9 sm:$0xff] %v10390_v18  ;;  %v10441_v18 = vld [vmem:[%s11269_s19 + $0x91] sm:$0x1] }
 0xba3   : > { %6379 = vst [vmem:[#allocation1 + $0x7] ss:$9 sm:$0xff] %v10391_v30  ;;  %v10442_v30 = vld [vmem:[%s11269_s19 + $0x92] sm:$0x1] }
 0xba4   : > { %5776 = vst.msk [vmem:[#allocation2 + $0x18] sm:$0xff] %vm5772_vm5, %v5683_v61  ;;  %v10491_v61 = vld [vmem:[%s11269_s19 + $0xc9] sm:$0x1] }
 0xbaa   : > { %v6380_v25 = vld [vmem:[#allocation1] sm:$0xff] }
 0xbab   : > { %6625 = vrot.lane.b32.xlu0 %v6380_v25, %s11222_s25  ;;  %6381 = vst [vmem:[#allocation1] ss:$9 sm:$0xff] %v10392_v53  ;;  %v10443_v53 = vld [vmem:[%s11269_s19 + $0x93] sm:$0x1]  ;;  %v10446_v25 = vld [vmem:[%s11269_s19 + $0x96] sm:$0x1] }
 0xbac   : > { %6382 = vst [vmem:[#allocation1 + $0x1] ss:$9 sm:$0xff] %v10393_v0  ;;  %v10444_v0 = vld [vmem:[%s11269_s19 + $0x94] sm:$0x1] }
 0xbad   : > { %6383 = vst [vmem:[#allocation1 + $0x2] ss:$9 sm:$0xff] %v10394_v13  ;;  %v10445_v13 = vld [vmem:[%s11269_s19 + $0x95] sm:$0x1] }
 0xbae   : > { %6384 = vst [vmem:[#allocation1 + $0x3] ss:$9 sm:$0xff] %v10395_v37  ;;  %v10447_v37 = vld [vmem:[%s11269_s19 + $0x97] sm:$0x1] }
 0xbaf   : > { %6385 = vst [vmem:[#allocation1 + $0x4] ss:$9 sm:$0xff] %v10396_v50  ;;  %v10448_v50 = vld [vmem:[%s11269_s19 + $0x98] sm:$0x1] }
 0xbb0   : > { %6386 = vst [vmem:[#allocation1 + $0x5] ss:$9 sm:$0xff] %v10397_v63  ;;  %v10449_v63 = vld [vmem:[%s11269_s19 + $0x99] sm:$0x1] }
 0xbb1   : > { %6387 = vst [vmem:[#allocation1 + $0x6] ss:$9 sm:$0xff] %v10398_v14 }
 0xbb2   : > { %6388 = vst [vmem:[#allocation1 + $0x7] ss:$9 sm:$0xff] %v10399_v27  ;;  %v10450_v27 = vld [vmem:[%s11269_s19 + $0x9a] sm:$0x1] }
 0xbb9   : > { %v6389_v6 = vld [vmem:[#allocation1] sm:$0xff] }
 0xbba   : > { %6390 = vst [vmem:[#allocation1] ss:$9 sm:$0xff] %v10400_v43  ;;  %6627 = vrot.lane.b32.xlu1 %v6389_v6, %s11222_s25  ;;  %v10451_v43 = vld [vmem:[%s11269_s19 + $0x9b] sm:$0x1]  ;;  %v10453_v6 = vld [vmem:[%s11269_s19 + $0x9d] sm:$0x1] }
 0xbbb   : > { %6391 = vst [vmem:[#allocation1 + $0x1] ss:$9 sm:$0xff] %v10401_v57  ;;  %v10452_v57 = vld [vmem:[%s11269_s19 + $0x9c] sm:$0x1] }
 0xbbc   : > { %6392 = vst [vmem:[#allocation1 + $0x2] ss:$9 sm:$0xff] %v10402_v23  ;;  %v10454_v23 = vld [vmem:[%s11269_s19 + $0x9e] sm:$0x1] }
 0xbbd   : > { %6393 = vst [vmem:[#allocation1 + $0x3] ss:$9 sm:$0xff] %v10403_v39  ;;  %v10455_v39 = vld [vmem:[%s11269_s19 + $0x9f] sm:$0x1] }
 0xbbe   : > { %6394 = vst [vmem:[#allocation1 + $0x4] ss:$9 sm:$0xff] %v10404_v54  ;;  %v10456_v54 = vld [vmem:[%s11269_s19 + $0xa2] sm:$0x1] }
 0xbbf   : > { %6395 = vst [vmem:[#allocation1 + $0x5] ss:$9 sm:$0xff] %v10405_v46  ;;  %v4789_v46 = vpop.permute.xlu1 %4788 }
 0xbc0   : > { %6396 = vst [vmem:[#allocation1 + $0x6] ss:$9 sm:$0xff] %v10406_v48  ;;  %v10457_v48 = vld [vmem:[%s11269_s19 + $0xa3] sm:$0x1] }
 0xbc1   : > { %6397 = vst [vmem:[#allocation1 + $0x7] ss:$9 sm:$0xff] %v10407_v49  ;;  %v5685_v49 = vpop.permute.xlu0 %5684 }
 0xbc2   : > { %4860 = vst.msk [vmem:[#allocation2 + $0xc8] sm:$0xff] %vm4834_vm4, %v4789_v46  ;;  %v10508_v46 = vld [vmem:[%s11269_s19 + $0xdc] sm:$0x1] }
 0xbc3   : > { %5777 = vst.msk [vmem:[#allocation2 + $0x20] sm:$0xff] %vm5772_vm5, %v5685_v49  ;;  %v10510_v49 = vld [vmem:[%s11269_s19 + $0xde] sm:$0x1] }
 0xbc8   : > { %v6398_v62 = vld [vmem:[#allocation1] sm:$0xff] }
 0xbc9   : > { %6399 = vst [vmem:[#allocation1] ss:$9 sm:$0xff] %v10408_v52  ;;  %6629 = vrot.lane.b32.xlu2 %v6398_v62, %s11222_s25  ;;  %v10458_v52 = vld [vmem:[%s11269_s19 + $0xa4] sm:$0x1]  ;;  %v10462_v62 = vld [vmem:[%s11269_s19 + $0xa8] sm:$0x1] }
 0xbca   : > { %6400 = vst [vmem:[#allocation1 + $0x1] ss:$9 sm:$0xff] %v10409_v58  ;;  %v10459_v58 = vld [vmem:[%s11269_s19 + $0xa5] sm:$0x1] }
 0xbcb   : > { %6401 = vst [vmem:[#allocation1 + $0x2] ss:$9 sm:$0xff] %v10410_v60  ;;  %v10461_v60 = vld [vmem:[%s11269_s19 + $0xa7] sm:$0x1] }
 0xbcc   : > { %6402 = vst [vmem:[#allocation1 + $0x3] ss:$9 sm:$0xff] %v10411_v2  ;;  %v10463_v2 = vld [vmem:[%s11269_s19 + $0xa9] sm:$0x1] }
 0xbcd   : > { %6403 = vst [vmem:[#allocation1 + $0x4] ss:$9 sm:$0xff] %v10412_v3  ;;  %v5689_v3 = vpop.permute.xlu2 %5688 }
 0xbce   : > { %6404 = vst [vmem:[#allocation1 + $0x5] ss:$9 sm:$0xff] %v10413_v4  ;;  %v10464_v4 = vld [vmem:[%s11269_s19 + $0xaa] sm:$0x1] }
 0xbcf   : > { %6405 = vst [vmem:[#allocation1 + $0x6] ss:$9 sm:$0xff] %v10414_v5  ;;  %v10465_v5 = vld [vmem:[%s11269_s19 + $0xab] sm:$0x1] }
 0xbd0   : > { %6406 = vst [vmem:[#allocation1 + $0x7] ss:$9 sm:$0xff] %v10415_v8  ;;  %v10466_v8 = vld [vmem:[%s11269_s19 + $0xac] sm:$0x1] }
 0xbd1   : > { %5779 = vst.msk [vmem:[#allocation2 + $0x30] sm:$0xff] %vm5772_vm5, %v5689_v3  ;;  %v10515_v3 = vld [vmem:[%s11269_s19 + $0xe3] sm:$0x1] }
 0xbd7   : > { %v6407_v17 = vld [vmem:[#allocation1] sm:$0xff] }
 0xbd8   : > { %6631 = vrot.lane.b32.xlu0 %v6407_v17, %s11222_s25  ;;  %6408 = vst [vmem:[#allocation1] ss:$9 sm:$0xff] %v10416_v12  ;;  %v10467_v12 = vld [vmem:[%s11269_s19 + $0xad] sm:$0x1]  ;;  %v10470_v17 = vld [vmem:[%s11269_s19 + $0xb0] sm:$0x1] }
 0xbd9   : > { %6409 = vst [vmem:[#allocation1 + $0x1] ss:$9 sm:$0xff] %v10417_v15  ;;  %v10468_v15 = vld [vmem:[%s11269_s19 + $0xae] sm:$0x1] }
 0xbda   : > { %6410 = vst [vmem:[#allocation1 + $0x2] ss:$9 sm:$0xff] %v10418_v16  ;;  %v10469_v16 = vld [vmem:[%s11269_s19 + $0xaf] sm:$0x1] }
 0xbdb   : > { %6411 = vst [vmem:[#allocation1 + $0x3] ss:$9 sm:$0xff] %v10419_v19  ;;  %v10471_v19 = vld [vmem:[%s11269_s19 + $0xb1] sm:$0x1] }
 0xbdc   : > { %6412 = vst [vmem:[#allocation1 + $0x4] ss:$9 sm:$0xff] %v10420_v22  ;;  %v10472_v22 = vld [vmem:[%s11269_s19 + $0xb4] sm:$0x1] }
 0xbdd   : > { %6413 = vst [vmem:[#allocation1 + $0x5] ss:$9 sm:$0xff] %v10421_v24  ;;  %v10473_v24 = vld [vmem:[%s11269_s19 + $0xb5] sm:$0x1] }
 0xbde   : > { %6414 = vst [vmem:[#allocation1 + $0x6] ss:$9 sm:$0xff] %v10422_v26 }
 0xbdf   : > { %6415 = vst [vmem:[#allocation1 + $0x7] ss:$9 sm:$0xff] %v10423_v28  ;;  %v10474_v28 = vld [vmem:[%s11269_s19 + $0xb6] sm:$0x1] }
 0xbe6   : > { %v6416_v34 = vld [vmem:[#allocation1] sm:$0xff] }
 0xbe7   : > { %6417 = vst [vmem:[#allocation1] ss:$9 sm:$0xff] %v10424_v32  ;;  %6633 = vrot.lane.b32.xlu1 %v6416_v34, %s11222_s25  ;;  %v10475_v32 = vld [vmem:[%s11269_s19 + $0xb7] sm:$0x1]  ;;  %v10477_v34 = vld [vmem:[%s11269_s19 + $0xb9] sm:$0x1] }
 0xbe8   : > { %6418 = vst [vmem:[#allocation1 + $0x1] ss:$9 sm:$0xff] %v10425_v33  ;;  %v10476_v33 = vld [vmem:[%s11269_s19 + $0xb8] sm:$0x1] }
 0xbe9   : > { %6419 = vst [vmem:[#allocation1 + $0x2] ss:$9 sm:$0xff] %v10426_v11  ;;  %v10478_v11 = vld [vmem:[%s11269_s19 + $0xba] sm:$0x1] }
 0xbea   : > { %6420 = vst [vmem:[#allocation1 + $0x3] ss:$9 sm:$0xff] %v10427_v35  ;;  %v10479_v35 = vld [vmem:[%s11269_s19 + $0xbb] sm:$0x1] }
 0xbeb   : > { %6421 = vst [vmem:[#allocation1 + $0x4] ss:$9 sm:$0xff] %v10428_v36  ;;  %v10480_v36 = vld [vmem:[%s11269_s19 + $0xbc] sm:$0x1] }
 0xbec   : > { %6422 = vst [vmem:[#allocation1 + $0x5] ss:$9 sm:$0xff] %v10429_v40  ;;  %v10481_v40 = vld [vmem:[%s11269_s19 + $0xbd] sm:$0x1] }
 0xbed   : > { %6423 = vst [vmem:[#allocation1 + $0x6] ss:$9 sm:$0xff] %v10430_v44  ;;  %v10482_v44 = vld [vmem:[%s11269_s19 + $0xbe] sm:$0x1] }
 0xbee   : > { %6424 = vst [vmem:[#allocation1 + $0x7] ss:$9 sm:$0xff] %v10431_v20 }
 0xbf5   : > { %v6425_v1 = vld [vmem:[#allocation1] sm:$0xff] }
 0xbf6   : > { %6426 = vst [vmem:[#allocation1] ss:$9 sm:$0xff] %v10432_v29  ;;  %6635 = vrot.lane.b32.xlu2 %v6425_v1, %s11222_s25  ;;  %v10483_v29 = vld [vmem:[%s11269_s19 + $0xbf] sm:$0x1]  ;;  %v10488_v1 = vld [vmem:[%s11269_s19 + $0xc6] sm:$0x1] }
 0xbf7   : > { %6427 = vst [vmem:[#allocation1 + $0x1] ss:$9 sm:$0xff] %v10433_v45  ;;  %v10485_v45 = vld [vmem:[%s11269_s19 + $0xc1] sm:$0x1] }
 0xbf8   : > { %6428 = vst [vmem:[#allocation1 + $0x2] ss:$9 sm:$0xff] %v10434_v56  ;;  %v10487_v56 = vld [vmem:[%s11269_s19 + $0xc3] sm:$0x1] }
 0xbf9   : > { %6429 = vst [vmem:[#allocation1 + $0x3] ss:$9 sm:$0xff] %v10435_v10  ;;  %v4795_v10 = vpop.permute.xlu1 %4794 }
 0xbfa   : > { %6430 = vst [vmem:[#allocation1 + $0x4] ss:$9 sm:$0xff] %v10436_v21  ;;  %v10489_v21 = vld [vmem:[%s11269_s19 + $0xc7] sm:$0x1] }
 0xbfb   : > { %6431 = vst [vmem:[#allocation1 + $0x5] ss:$9 sm:$0xff] %v10437_v31  ;;  %v5691_v31 = vpop.permute.xlu0 %5690 }
 0xbfc   : > { %6432 = vst [vmem:[#allocation1 + $0x6] ss:$9 sm:$0xff] %v10438_v41  ;;  %v10490_v41 = vld [vmem:[%s11269_s19 + $0xc8] sm:$0x1] }
 0xbfd   : > { %6433 = vst [vmem:[#allocation1 + $0x7] ss:$9 sm:$0xff] %v10439_v51 }
 0xbfe   : > { %4863 = vst.msk [vmem:[#allocation2 + $0xe0] sm:$0xff] %vm4834_vm4, %v4795_v10 }
 0xbff   : > { %5780 = vst.msk [vmem:[#allocation2 + $0x38] sm:$0xff] %vm5772_vm5, %v5691_v31  ;;  %v10540_v31 = vld [vmem:[%s11269_s19 + $0x100] sm:$0x1] }
 0xc04   : > { %v6434_v42 = vld [vmem:[#allocation1] sm:$0xff] }
 0xc05   : > { %6637 = vrot.lane.b32.xlu0 %v6434_v42, %s11222_s25  ;;  %6435 = vst [vmem:[#allocation1] ss:$9 sm:$0xff] %v10440_v7  ;;  %v10492_v7 = vld [vmem:[%s11269_s19 + $0xca] sm:$0x1]  ;;  %v10495_v42 = vld [vmem:[%s11269_s19 + $0xcd] sm:$0x1] }
 0xc06   : > { %6436 = vst [vmem:[#allocation1 + $0x1] ss:$9 sm:$0xff] %v10441_v18  ;;  %v10493_v18 = vld [vmem:[%s11269_s19 + $0xcb] sm:$0x1] }
 0xc07   : > { %6437 = vst [vmem:[#allocation1 + $0x2] ss:$9 sm:$0xff] %v10442_v30  ;;  %v10494_v30 = vld [vmem:[%s11269_s19 + $0xcc] sm:$0x1] }
 0xc08   : > { %6438 = vst [vmem:[#allocation1 + $0x3] ss:$9 sm:$0xff] %v10443_v53  ;;  %v5695_v53 = vpop.permute.xlu2 %5694 }
 0xc09   : > { %6439 = vst [vmem:[#allocation1 + $0x4] ss:$9 sm:$0xff] %v10444_v0  ;;  %v10496_v0 = vld [vmem:[%s11269_s19 + $0xce] sm:$0x1] }
 0xc0a   : > { %6440 = vst [vmem:[#allocation1 + $0x5] ss:$9 sm:$0xff] %v10445_v13  ;;  %v10497_v13 = vld [vmem:[%s11269_s19 + $0xcf] sm:$0x1] }
 0xc0b   : > { %6441 = vst [vmem:[#allocation1 + $0x6] ss:$9 sm:$0xff] %v10446_v25  ;;  %v10498_v25 = vld [vmem:[%s11269_s19 + $0xd0] sm:$0x1] }
 0xc0c   : > { %6442 = vst [vmem:[#allocation1 + $0x7] ss:$9 sm:$0xff] %v10447_v37 }
 0xc0d   : > { %5782 = vst.msk [vmem:[#allocation2 + $0x48] sm:$0xff] %vm5772_vm5, %v5695_v53 }
 0xc13   : > { %v6443_v14 = vld [vmem:[#allocation1] sm:$0xff] }
 0xc14   : > { %6444 = vst [vmem:[#allocation1] ss:$9 sm:$0xff] %v10448_v50  ;;  %6639 = vrot.lane.b32.xlu1 %v6443_v14, %s11222_s25  ;;  %v10499_v50 = vld [vmem:[%s11269_s19 + $0xd1] sm:$0x1]  ;;  %v10501_v14 = vld [vmem:[%s11269_s19 + $0xd3] sm:$0x1] }
 0xc15   : > { %6445 = vst [vmem:[#allocation1 + $0x1] ss:$9 sm:$0xff] %v10449_v63  ;;  %v10500_v63 = vld [vmem:[%s11269_s19 + $0xd2] sm:$0x1] }
 0xc16   : > { %6446 = vst [vmem:[#allocation1 + $0x2] ss:$9 sm:$0xff] %v10450_v27  ;;  %v10502_v27 = vld [vmem:[%s11269_s19 + $0xd4] sm:$0x1] }
 0xc17   : > { %6447 = vst [vmem:[#allocation1 + $0x3] ss:$9 sm:$0xff] %v10451_v43  ;;  %v10503_v43 = vld [vmem:[%s11269_s19 + $0xd5] sm:$0x1] }
 0xc18   : > { %6448 = vst [vmem:[#allocation1 + $0x4] ss:$9 sm:$0xff] %v10452_v57  ;;  %v10504_v57 = vld [vmem:[%s11269_s19 + $0xd8] sm:$0x1] }
 0xc19   : > { %6449 = vst [vmem:[#allocation1 + $0x5] ss:$9 sm:$0xff] %v10453_v6  ;;  %v10505_v6 = vld [vmem:[%s11269_s19 + $0xd9] sm:$0x1] }
 0xc1a   : > { %6450 = vst [vmem:[#allocation1 + $0x6] ss:$9 sm:$0xff] %v10454_v23 }
 0xc1b   : > { %6451 = vst [vmem:[#allocation1 + $0x7] ss:$9 sm:$0xff] %v10455_v39  ;;  %v10506_v39 = vld [vmem:[%s11269_s19 + $0xda] sm:$0x1] }
 0xc22   : > { %v6452_v55 = vld [vmem:[#allocation1] sm:$0xff] }
 0xc23   : > { %6453 = vst [vmem:[#allocation1] ss:$9 sm:$0xff] %v10456_v54  ;;  %6641 = vrot.lane.b32.xlu2 %v6452_v55, %s11222_s25  ;;  %v10507_v54 = vld [vmem:[%s11269_s19 + $0xdb] sm:$0x1]  ;;  %v10512_v55 = vld [vmem:[%s11269_s19 + $0xe0] sm:$0x1] }
 0xc24   : > { %6454 = vst [vmem:[#allocation1 + $0x1] ss:$9 sm:$0xff] %v10457_v48  ;;  %v10509_v48 = vld [vmem:[%s11269_s19 + $0xdd] sm:$0x1] }
 0xc25   : > { %6455 = vst [vmem:[#allocation1 + $0x2] ss:$9 sm:$0xff] %v10458_v52  ;;  %v10511_v52 = vld [vmem:[%s11269_s19 + $0xdf] sm:$0x1] }
 0xc26   : > { %6456 = vst [vmem:[#allocation1 + $0x3] ss:$9 sm:$0xff] %v10459_v58  ;;  %v4801_v58 = vpop.permute.xlu1 %4800 }
 0xc27   : > { %6457 = vst [vmem:[#allocation1 + $0x4] ss:$9 sm:$0xff] %v10460_v59  ;;  %v10513_v59 = vld [vmem:[%s11269_s19 + $0xe1] sm:$0x1] }
 0xc28   : > { %6458 = vst [vmem:[#allocation1 + $0x5] ss:$9 sm:$0xff] %v10461_v60  ;;  %v5697_v60 = vpop.permute.xlu0 %5696 }
 0xc29   : > { %6459 = vst [vmem:[#allocation1 + $0x6] ss:$9 sm:$0xff] %v10462_v62  ;;  %v10514_v62 = vld [vmem:[%s11269_s19 + $0xe2] sm:$0x1] }
 0xc2a   : > { %6460 = vst [vmem:[#allocation1 + $0x7] ss:$9 sm:$0xff] %v10463_v2 }
 0xc2b   : > { %4866 = vst.msk [vmem:[#allocation2 + $0xf8] sm:$0xff] %vm4834_vm4, %v4801_v58 }
 0xc2c   : > { %5783 = vst.msk [vmem:[#allocation2 + $0x50] sm:$0xff] %vm5772_vm5, %v5697_v60  ;;  %v10564_v60 = vld [vmem:[%s11269_s19 + $0x11a] sm:$0x1] }
 0xc31   : > { %v6461_v9 = vld [vmem:[#allocation1] sm:$0xff] }
 0xc32   : > { %6643 = vrot.lane.b32.xlu0 %v6461_v9, %s11222_s25  ;;  %6462 = vst [vmem:[#allocation1] ss:$9 sm:$0xff] %v10464_v4  ;;  %v10516_v4 = vld [vmem:[%s11269_s19 + $0xe4] sm:$0x1]  ;;  %v10519_v9 = vld [vmem:[%s11269_s19 + $0xe7] sm:$0x1] }
 0xc33   : > { %6463 = vst [vmem:[#allocation1 + $0x1] ss:$9 sm:$0xff] %v10465_v5  ;;  %v10517_v5 = vld [vmem:[%s11269_s19 + $0xe5] sm:$0x1] }
 0xc34   : > { %6464 = vst [vmem:[#allocation1 + $0x2] ss:$9 sm:$0xff] %v10466_v8  ;;  %v10518_v8 = vld [vmem:[%s11269_s19 + $0xe6] sm:$0x1] }
 0xc35   : > { %6465 = vst [vmem:[#allocation1 + $0x3] ss:$9 sm:$0xff] %v10467_v12  ;;  %v5701_v12 = vpop.permute.xlu2 %5700 }
 0xc36   : > { %6466 = vst [vmem:[#allocation1 + $0x4] ss:$9 sm:$0xff] %v10468_v15  ;;  %v10520_v15 = vld [vmem:[%s11269_s19 + $0xea] sm:$0x1] }
 0xc37   : > { %6467 = vst [vmem:[#allocation1 + $0x5] ss:$9 sm:$0xff] %v10469_v16  ;;  %v10521_v16 = vld [vmem:[%s11269_s19 + $0xeb] sm:$0x1] }
 0xc38   : > { %6468 = vst [vmem:[#allocation1 + $0x6] ss:$9 sm:$0xff] %v10470_v17  ;;  %v10522_v17 = vld [vmem:[%s11269_s19 + $0xec] sm:$0x1] }
 0xc39   : > { %6469 = vst [vmem:[#allocation1 + $0x7] ss:$9 sm:$0xff] %v10471_v19 }
 0xc3a   : > { %5785 = vst.msk [vmem:[#allocation2 + $0x60] sm:$0xff] %vm5772_vm5, %v5701_v12 }
 0xc40   : > { %v6470_v26 = vld [vmem:[#allocation1] sm:$0xff] }
 0xc41   : > { %6471 = vst [vmem:[#allocation1] ss:$9 sm:$0xff] %v10472_v22  ;;  %6645 = vrot.lane.b32.xlu1 %v6470_v26, %s11222_s25  ;;  %v10523_v22 = vld [vmem:[%s11269_s19 + $0xed] sm:$0x1]  ;;  %v10525_v26 = vld [vmem:[%s11269_s19 + $0xef] sm:$0x1] }
 0xc42   : > { %6472 = vst [vmem:[#allocation1 + $0x1] ss:$9 sm:$0xff] %v10473_v24  ;;  %v10524_v24 = vld [vmem:[%s11269_s19 + $0xee] sm:$0x1] }
 0xc43   : > { %6473 = vst [vmem:[#allocation1 + $0x2] ss:$9 sm:$0xff] %v10474_v28  ;;  %v10526_v28 = vld [vmem:[%s11269_s19 + $0xf0] sm:$0x1] }
 0xc44   : > { %6474 = vst [vmem:[#allocation1 + $0x3] ss:$9 sm:$0xff] %v10475_v32  ;;  %v10527_v32 = vld [vmem:[%s11269_s19 + $0xf1] sm:$0x1] }
 0xc45   : > { %6475 = vst [vmem:[#allocation1 + $0x4] ss:$9 sm:$0xff] %v10476_v33  ;;  %v10528_v33 = vld [vmem:[%s11269_s19 + $0xf2] sm:$0x1] }
 0xc46   : > { %6476 = vst [vmem:[#allocation1 + $0x5] ss:$9 sm:$0xff] %v10477_v34  ;;  %v10529_v34 = vld [vmem:[%s11269_s19 + $0xf3] sm:$0x1] }
 0xc47   : > { %6477 = vst [vmem:[#allocation1 + $0x6] ss:$9 sm:$0xff] %v10478_v11 }
 0xc48   : > { %6478 = vst [vmem:[#allocation1 + $0x7] ss:$9 sm:$0xff] %v10479_v35  ;;  %v10530_v35 = vld [vmem:[%s11269_s19 + $0xf4] sm:$0x1] }
 0xc4f   : > { %v6479_v20 = vld [vmem:[#allocation1] sm:$0xff] }
 0xc50   : > { %6480 = vst [vmem:[#allocation1] ss:$9 sm:$0xff] %v10480_v36  ;;  %6647 = vrot.lane.b32.xlu2 %v6479_v20, %s11222_s25  ;;  %v10531_v36 = vld [vmem:[%s11269_s19 + $0xf5] sm:$0x1]  ;;  %v10534_v20 = vld [vmem:[%s11269_s19 + $0xf8] sm:$0x1] }
 0xc51   : > { %6481 = vst [vmem:[#allocation1 + $0x1] ss:$9 sm:$0xff] %v10481_v40  ;;  %v10532_v40 = vld [vmem:[%s11269_s19 + $0xf6] sm:$0x1] }
 0xc52   : > { %6482 = vst [vmem:[#allocation1 + $0x2] ss:$9 sm:$0xff] %v10482_v44  ;;  %v10533_v44 = vld [vmem:[%s11269_s19 + $0xf7] sm:$0x1] }
 0xc53   : > { %6483 = vst [vmem:[#allocation1 + $0x3] ss:$9 sm:$0xff] %v10483_v29  ;;  %v10535_v29 = vld [vmem:[%s11269_s19 + $0xf9] sm:$0x1] }
 0xc54   : > { %6484 = vst [vmem:[#allocation1 + $0x4] ss:$9 sm:$0xff] %v10484_v38  ;;  %v10536_v38 = vld [vmem:[%s11269_s19 + $0xfc] sm:$0x1] }
 0xc55   : > { %6485 = vst [vmem:[#allocation1 + $0x5] ss:$9 sm:$0xff] %v10485_v45  ;;  %v5681_v45 = vpop.permute.xlu1 %5680 }
 0xc56   : > { %6486 = vst [vmem:[#allocation1 + $0x6] ss:$9 sm:$0xff] %v10486_v47  ;;  %v10537_v47 = vld [vmem:[%s11269_s19 + $0xfd] sm:$0x1] }
 0xc57   : > { %6487 = vst [vmem:[#allocation1 + $0x7] ss:$9 sm:$0xff] %v10487_v56  ;;  %v5703_v56 = vpop.permute.xlu0 %5702 }
 0xc58   : > { %5775 = vst.msk [vmem:[#allocation2 + $0x10] sm:$0xff] %vm5772_vm5, %v5681_v45  ;;  %v10586_v45 = vld [vmem:[%s11269_s19 + $0x134] sm:$0x1] }
 0xc59   : > { %5786 = vst.msk [vmem:[#allocation2 + $0x68] sm:$0xff] %vm5772_vm5, %v5703_v56  ;;  %v10587_v56 = vld [vmem:[%s11269_s19 + $0x135] sm:$0x1] }
 0xc5e   : > { %v6488_v51 = vld [vmem:[#allocation1] sm:$0xff] }
 0xc5f   : > { %6489 = vst [vmem:[#allocation1] ss:$9 sm:$0xff] %v10488_v1  ;;  %6649 = vrot.lane.b32.xlu2 %v6488_v51, %s11222_s25  ;;  %v10538_v1 = vld [vmem:[%s11269_s19 + $0xfe] sm:$0x1]  ;;  %v10542_v51 = vld [vmem:[%s11269_s19 + $0x102] sm:$0x1] }
 0xc60   : > { %6490 = vst [vmem:[#allocation1 + $0x1] ss:$9 sm:$0xff] %v10489_v21  ;;  %v10539_v21 = vld [vmem:[%s11269_s19 + $0xff] sm:$0x1] }
 0xc61   : > { %6491 = vst [vmem:[#allocation1 + $0x2] ss:$9 sm:$0xff] %v10490_v41  ;;  %v10541_v41 = vld [vmem:[%s11269_s19 + $0x101] sm:$0x1] }
 0xc62   : > { %6492 = vst [vmem:[#allocation1 + $0x3] ss:$9 sm:$0xff] %v10491_v61  ;;  %v10543_v61 = vld [vmem:[%s11269_s19 + $0x103] sm:$0x1] }
 0xc63   : > { %6493 = vst [vmem:[#allocation1 + $0x4] ss:$9 sm:$0xff] %v10492_v7  ;;  %v5707_v7 = vpop.permute.xlu2 %5706 }
 0xc64   : > { %6494 = vst [vmem:[#allocation1 + $0x5] ss:$9 sm:$0xff] %v10493_v18  ;;  %v10544_v18 = vld [vmem:[%s11269_s19 + $0x104] sm:$0x1] }
 0xc65   : > { %6495 = vst [vmem:[#allocation1 + $0x6] ss:$9 sm:$0xff] %v10494_v30  ;;  %v10545_v30 = vld [vmem:[%s11269_s19 + $0x105] sm:$0x1] }
 0xc66   : > { %6496 = vst [vmem:[#allocation1 + $0x7] ss:$9 sm:$0xff] %v10495_v42  ;;  %v10546_v42 = vld [vmem:[%s11269_s19 + $0x106] sm:$0x1] }
 0xc67   : > { %5788 = vst.msk [vmem:[#allocation2 + $0x78] sm:$0xff] %vm5772_vm5, %v5707_v7  ;;  %v10593_v7 = vld [vmem:[%s11269_s19 + $0x13b] sm:$0x1] }
 0xc6d   : > { %v6497_v37 = vld [vmem:[#allocation1] sm:$0xff] }
 0xc6e   : > { %6651 = vrot.lane.b32.xlu0 %v6497_v37, %s11222_s25  ;;  %6498 = vst [vmem:[#allocation1] ss:$9 sm:$0xff] %v10496_v0  ;;  %v10547_v0 = vld [vmem:[%s11269_s19 + $0x107] sm:$0x1]  ;;  %v10550_v37 = vld [vmem:[%s11269_s19 + $0x10a] sm:$0x1] }
 0xc6f   : > { %6499 = vst [vmem:[#allocation1 + $0x1] ss:$9 sm:$0xff] %v10497_v13  ;;  %v10548_v13 = vld [vmem:[%s11269_s19 + $0x108] sm:$0x1] }
 0xc70   : > { %6500 = vst [vmem:[#allocation1 + $0x2] ss:$9 sm:$0xff] %v10498_v25  ;;  %v10549_v25 = vld [vmem:[%s11269_s19 + $0x109] sm:$0x1] }
 0xc71   : > { %6501 = vst [vmem:[#allocation1 + $0x3] ss:$9 sm:$0xff] %v10499_v50  ;;  %v10551_v50 = vld [vmem:[%s11269_s19 + $0x10b] sm:$0x1] }
 0xc72   : > { %6502 = vst [vmem:[#allocation1 + $0x4] ss:$9 sm:$0xff] %v10500_v63  ;;  %v10552_v63 = vld [vmem:[%s11269_s19 + $0x10e] sm:$0x1] }
 0xc73   : > { %6503 = vst [vmem:[#allocation1 + $0x5] ss:$9 sm:$0xff] %v10501_v14  ;;  %v10553_v14 = vld [vmem:[%s11269_s19 + $0x10f] sm:$0x1] }
 0xc74   : > { %6504 = vst [vmem:[#allocation1 + $0x6] ss:$9 sm:$0xff] %v10502_v27 }
 0xc75   : > { %6505 = vst [vmem:[#allocation1 + $0x7] ss:$9 sm:$0xff] %v10503_v43  ;;  %v10554_v43 = vld [vmem:[%s11269_s19 + $0x110] sm:$0x1] }
 0xc7c   : > { %v6506_v23 = vld [vmem:[#allocation1] sm:$0xff] }
 0xc7d   : > { %6507 = vst [vmem:[#allocation1] ss:$9 sm:$0xff] %v10504_v57  ;;  %6653 = vrot.lane.b32.xlu1 %v6506_v23, %s11222_s25  ;;  %v10555_v57 = vld [vmem:[%s11269_s19 + $0x111] sm:$0x1]  ;;  %v10557_v23 = vld [vmem:[%s11269_s19 + $0x113] sm:$0x1] }
 0xc7e   : > { %6508 = vst [vmem:[#allocation1 + $0x1] ss:$9 sm:$0xff] %v10505_v6  ;;  %v10556_v6 = vld [vmem:[%s11269_s19 + $0x112] sm:$0x1] }
 0xc7f   : > { %6509 = vst [vmem:[#allocation1 + $0x2] ss:$9 sm:$0xff] %v10506_v39  ;;  %v10558_v39 = vld [vmem:[%s11269_s19 + $0x114] sm:$0x1] }
 0xc80   : > { %6510 = vst [vmem:[#allocation1 + $0x3] ss:$9 sm:$0xff] %v10507_v54  ;;  %v10559_v54 = vld [vmem:[%s11269_s19 + $0x115] sm:$0x1] }
 0xc81   : > { %6511 = vst [vmem:[#allocation1 + $0x4] ss:$9 sm:$0xff] %v10508_v46  ;;  %v10560_v46 = vld [vmem:[%s11269_s19 + $0x116] sm:$0x1] }
 0xc82   : > { %6512 = vst [vmem:[#allocation1 + $0x5] ss:$9 sm:$0xff] %v10509_v48  ;;  %v5687_v48 = vpop.permute.xlu1 %5686 }
 0xc83   : > { %6513 = vst [vmem:[#allocation1 + $0x6] ss:$9 sm:$0xff] %v10510_v49  ;;  %v10561_v49 = vld [vmem:[%s11269_s19 + $0x117] sm:$0x1] }
 0xc84   : > { %6514 = vst [vmem:[#allocation1 + $0x7] ss:$9 sm:$0xff] %v10511_v52  ;;  %v5709_v52 = vpop.permute.xlu0 %5708 }
 0xc85   : > { %5778 = vst.msk [vmem:[#allocation2 + $0x28] sm:$0xff] %vm5772_vm5, %v5687_v48 }
 0xc86   : > { %5789 = vst.msk [vmem:[#allocation2 + $0x80] sm:$0xff] %vm5772_vm5, %v5709_v52 }
 0xc8b   : > { %v6515_v2 = vld [vmem:[#allocation1] sm:$0xff] }
 0xc8c   : > { %6516 = vst [vmem:[#allocation1] ss:$9 sm:$0xff] %v10512_v55  ;;  %6655 = vrot.lane.b32.xlu2 %v6515_v2, %s11222_s25  ;;  %v10562_v55 = vld [vmem:[%s11269_s19 + $0x118] sm:$0x1]  ;;  %v10566_v2 = vld [vmem:[%s11269_s19 + $0x11c] sm:$0x1] }
 0xc8d   : > { %6517 = vst [vmem:[#allocation1 + $0x1] ss:$9 sm:$0xff] %v10513_v59  ;;  %v10563_v59 = vld [vmem:[%s11269_s19 + $0x119] sm:$0x1] }
 0xc8e   : > { %6518 = vst [vmem:[#allocation1 + $0x2] ss:$9 sm:$0xff] %v10514_v62  ;;  %v10565_v62 = vld [vmem:[%s11269_s19 + $0x11b] sm:$0x1] }
 0xc8f   : > { %6519 = vst [vmem:[#allocation1 + $0x3] ss:$9 sm:$0xff] %v10515_v3  ;;  %v10567_v3 = vld [vmem:[%s11269_s19 + $0x11d] sm:$0x1] }
 0xc90   : > { %6520 = vst [vmem:[#allocation1 + $0x4] ss:$9 sm:$0xff] %v10516_v4  ;;  %v5713_v4 = vpop.permute.xlu2 %5712 }
 0xc91   : > { %6521 = vst [vmem:[#allocation1 + $0x5] ss:$9 sm:$0xff] %v10517_v5  ;;  %v10568_v5 = vld [vmem:[%s11269_s19 + $0x120] sm:$0x1] }
 0xc92   : > { %6522 = vst [vmem:[#allocation1 + $0x6] ss:$9 sm:$0xff] %v10518_v8  ;;  %v10569_v8 = vld [vmem:[%s11269_s19 + $0x121] sm:$0x1] }
 0xc93   : > { %6523 = vst [vmem:[#allocation1 + $0x7] ss:$9 sm:$0xff] %v10519_v9  ;;  %v10570_v9 = vld [vmem:[%s11269_s19 + $0x122] sm:$0x1] }
 0xc94   : > { %5791 = vst.msk [vmem:[#allocation2 + $0x90] sm:$0xff] %vm5772_vm5, %v5713_v4  ;;  %v10617_v4 = vld [vmem:[%s11269_s19 + $0x38] sm:$0x1] }
 0xc9a   : > { %v6524_v19 = vld [vmem:[#allocation1] sm:$0xff] }
 0xc9b   : > { %6657 = vrot.lane.b32.xlu0 %v6524_v19, %s11222_s25  ;;  %6525 = vst [vmem:[#allocation1] ss:$9 sm:$0xff] %v10520_v15  ;;  %v10571_v15 = vld [vmem:[%s11269_s19 + $0x123] sm:$0x1]  ;;  %v10574_v19 = vld [vmem:[%s11269_s19 + $0x126] sm:$0x1] }
 0xc9c   : > { %6526 = vst [vmem:[#allocation1 + $0x1] ss:$9 sm:$0xff] %v10521_v16  ;;  %v10572_v16 = vld [vmem:[%s11269_s19 + $0x124] sm:$0x1] }
 0xc9d   : > { %6527 = vst [vmem:[#allocation1 + $0x2] ss:$9 sm:$0xff] %v10522_v17  ;;  %v10573_v17 = vld [vmem:[%s11269_s19 + $0x125] sm:$0x1] }
 0xc9e   : > { %6528 = vst [vmem:[#allocation1 + $0x3] ss:$9 sm:$0xff] %v10523_v22  ;;  %v10575_v22 = vld [vmem:[%s11269_s19 + $0x127] sm:$0x1] }
 0xc9f   : > { %6529 = vst [vmem:[#allocation1 + $0x4] ss:$9 sm:$0xff] %v10524_v24  ;;  %v10576_v24 = vld [vmem:[%s11269_s19 + $0x128] sm:$0x1] }
 0xca0   : > { %6530 = vst [vmem:[#allocation1 + $0x5] ss:$9 sm:$0xff] %v10525_v26  ;;  %v10577_v26 = vld [vmem:[%s11269_s19 + $0x129] sm:$0x1] }
 0xca1   : > { %6531 = vst [vmem:[#allocation1 + $0x6] ss:$9 sm:$0xff] %v10526_v28 }
 0xca2   : > { %6532 = vst [vmem:[#allocation1 + $0x7] ss:$9 sm:$0xff] %v10527_v32  ;;  %v10578_v32 = vld [vmem:[%s11269_s19 + $0x12a] sm:$0x1] }
 0xca9   : > { %v13440_v11 = vld [vmem:[#allocation1] sm:$0xff] }
 0xcaa   : > { %6534 = vst [vmem:[#allocation1] ss:$9 sm:$0xff] %v10528_v33  ;;  %v10579_v33 = vld [vmem:[%s11269_s19 + $0x12b] sm:$0x1] }
 0xcab   : > { %6535 = vst [vmem:[#allocation1 + $0x1] ss:$9 sm:$0xff] %v10529_v34  ;;  %v10580_v34 = vld [vmem:[%s11269_s19 + $0x12c] sm:$0x1] }
 0xcac   : > { %6536 = vst [vmem:[#allocation1 + $0x2] ss:$9 sm:$0xff] %v10530_v35  ;;  %v10581_v35 = vld [vmem:[%s11269_s19 + $0x12d] sm:$0x1] }
 0xcad   : > { %6537 = vst [vmem:[#allocation1 + $0x3] ss:$9 sm:$0xff] %v10531_v36  ;;  %v10582_v36 = vld [vmem:[%s11269_s19 + $0x12e] sm:$0x1] }
 0xcae   : > { %6538 = vst [vmem:[#allocation1 + $0x4] ss:$9 sm:$0xff] %v10532_v40  ;;  %v10583_v40 = vld [vmem:[%s11269_s19 + $0x12f] sm:$0x1] }
 0xcaf   : > { %6539 = vst [vmem:[#allocation1 + $0x5] ss:$9 sm:$0xff] %v10533_v44  ;;  %v10584_v44 = vld [vmem:[%s11269_s19 + $0x132] sm:$0x1] }
 0xcb0   : > { %6540 = vst [vmem:[#allocation1 + $0x6] ss:$9 sm:$0xff] %v10534_v20  ;;  %v5693_v20 = vpop.permute.xlu1 %5692 }
 0xcb1   : > { %6541 = vst [vmem:[#allocation1 + $0x7] ss:$9 sm:$0xff] %v10535_v29  ;;  %v10585_v29 = vld [vmem:[%s11269_s19 + $0x133] sm:$0x1] }
 0xcb2   : > { %5781 = vst.msk [vmem:[#allocation2 + $0x40] sm:$0xff] %vm5772_vm5, %v5693_v20 }
 0xcb8   : > { %v13452_v10 = vld [vmem:[#allocation1] sm:$0xff] }
 0xcb9   : > { %6543 = vst [vmem:[#allocation1] ss:$9 sm:$0xff] %v10536_v38  ;;  %v5715_v38 = vpop.permute.xlu0 %5714 }
 0xcba   : > { %6544 = vst [vmem:[#allocation1 + $0x1] ss:$9 sm:$0xff] %v10537_v47 }
 0xcbb   : > { %6545 = vst [vmem:[#allocation1 + $0x2] ss:$9 sm:$0xff] %v10538_v1  ;;  %v10588_v1 = vld [vmem:[%s11269_s19 + $0x136] sm:$0x1] }
 0xcbc   : > { %6546 = vst [vmem:[#allocation1 + $0x3] ss:$9 sm:$0xff] %v10539_v21  ;;  %v10589_v21 = vld [vmem:[%s11269_s19 + $0x137] sm:$0x1] }
 0xcbd   : > { %6547 = vst [vmem:[#allocation1 + $0x4] ss:$9 sm:$0xff] %v10540_v31  ;;  %v10590_v31 = vld [vmem:[%s11269_s19 + $0x138] sm:$0x1] }
 0xcbe   : > { %6548 = vst [vmem:[#allocation1 + $0x5] ss:$9 sm:$0xff] %v10541_v41  ;;  %v10591_v41 = vld [vmem:[%s11269_s19 + $0x139] sm:$0x1] }
 0xcbf   : > { %6549 = vst [vmem:[#allocation1 + $0x6] ss:$9 sm:$0xff] %v10542_v51  ;;  %v5719_v51 = vpop.permute.xlu2 %5718 }
 0xcc0   : > { %6550 = vst [vmem:[#allocation1 + $0x7] ss:$9 sm:$0xff] %v10543_v61  ;;  %v10592_v61 = vld [vmem:[%s11269_s19 + $0x13a] sm:$0x1] }
 0xcc1   : > { %5792 = vst.msk [vmem:[#allocation2 + $0x98] sm:$0xff] %vm5772_vm5, %v5715_v38  ;;  %v5721_v48 = vpop.permute.xlu0 %5720  ;;  %v10636_v38 = vld [vmem:[%s11269_s19 + $0x4d] sm:$0x1] }
 0xcc2   : > { %5794 = vst.msk [vmem:[#allocation2 + $0xa8] sm:$0xff] %vm5772_vm5, %v5719_v51  ;;  %v10642_v51 = vld [vmem:[%s11269_s19 + $0x53] sm:$0x1] }
 0xcc3   : > { %5795 = vst.msk [vmem:[#allocation2 + $0xb0] sm:$0xff] %vm5772_vm5, %v5721_v48  ;;  %v10659_v48 = vld [vmem:[%s11269_s19 + $0x66] sm:$0x1] }
 0xcc7   : > { %v6551_v53 = vld [vmem:[#allocation1] sm:$0xff] }
 0xcc8   : > { %6663 = vrot.lane.b32.xlu0 %v6551_v53, %s11222_s25  ;;  %6552 = vst [vmem:[#allocation1] ss:$9 sm:$0xff] %v10544_v18  ;;  %v10594_v18 = vld [vmem:[%s11269_s19 + $0x13c] sm:$0x1]  ;;  %v10596_v53 = vld [vmem:[%s11269_s19 + $0x13e] sm:$0x1] }
 0xcc9   : > { %6553 = vst [vmem:[#allocation1 + $0x1] ss:$9 sm:$0xff] %v10545_v30 }
 0xcca   : > { %6554 = vst [vmem:[#allocation1 + $0x2] ss:$9 sm:$0xff] %v10546_v42  ;;  %v10595_v42 = vld [vmem:[%s11269_s19 + $0x13d] sm:$0x1] }
 0xccb   : > { %6555 = vst [vmem:[#allocation1 + $0x3] ss:$9 sm:$0xff] %v10547_v0  ;;  %v10597_v0 = vld [vmem:[%s11269_s19 + $0x13f] sm:$0x1] }
 0xccc   : > { %6556 = vst [vmem:[#allocation1 + $0x4] ss:$9 sm:$0xff] %v10548_v13  ;;  %v10598_v13 = vld [vmem:[%s11269_s19 + $0x140] sm:$0x1] }
 0xccd   : > { %6557 = vst [vmem:[#allocation1 + $0x5] ss:$9 sm:$0xff] %v10549_v25  ;;  %v10599_v25 = vld [vmem:[%s11269_s19 + $0x141] sm:$0x1] }
 0xcce   : > { %6558 = vst [vmem:[#allocation1 + $0x6] ss:$9 sm:$0xff] %v10550_v37  ;;  %v10600_v37 = vld [vmem:[%s11269_s19 + $0x25] sm:$0x1] }
 0xccf   : > { %6559 = vst [vmem:[#allocation1 + $0x7] ss:$9 sm:$0xff] %v10551_v50  ;;  %v10601_v50 = vld [vmem:[%s11269_s19 + $0x26] sm:$0x1] }
 0xcd6   : > { %v6560_v27 = vld [vmem:[#allocation1] sm:$0xff] }
 0xcd7   : > { %6561 = vst [vmem:[#allocation1] ss:$9 sm:$0xff] %v10552_v63  ;;  %6665 = vrot.lane.b32.xlu1 %v6560_v27, %s11222_s25  ;;  %v10603_v27 = vld [vmem:[%s11269_s19 + $0x28] sm:$0x1] }
 0xcd8   : > { %6562 = vst [vmem:[#allocation1 + $0x1] ss:$9 sm:$0xff] %v10553_v14  ;;  %v10602_v14 = vld [vmem:[%s11269_s19 + $0x27] sm:$0x1] }
 0xcd9   : > { %6563 = vst [vmem:[#allocation1 + $0x2] ss:$9 sm:$0xff] %v10554_v43  ;;  %v10604_v43 = vld [vmem:[%s11269_s19 + $0x29] sm:$0x1] }
 0xcda   : > { %6564 = vst [vmem:[#allocation1 + $0x3] ss:$9 sm:$0xff] %v10555_v57  ;;  %v10605_v57 = vld [vmem:[%s11269_s19 + $0x2a] sm:$0x1] }
 0xcdb   : > { %6565 = vst [vmem:[#allocation1 + $0x4] ss:$9 sm:$0xff] %v10556_v6  ;;  %v10606_v6 = vld [vmem:[%s11269_s19 + $0x2b] sm:$0x1] }
 0xcdc   : > { %6566 = vst [vmem:[#allocation1 + $0x5] ss:$9 sm:$0xff] %v10557_v23  ;;  %v10607_v23 = vld [vmem:[%s11269_s19 + $0x2c] sm:$0x1] }
 0xcdd   : > { %6567 = vst [vmem:[#allocation1 + $0x6] ss:$9 sm:$0xff] %v10558_v39  ;;  %v10608_v39 = vld [vmem:[%s11269_s19 + $0x2d] sm:$0x1] }
 0xcde   : > { %6568 = vst [vmem:[#allocation1 + $0x7] ss:$9 sm:$0xff] %v10559_v54  ;;  %v5699_v54 = vpop.permute.xlu1 %5698 }
 0xcdf   : > { %5784 = vst.msk [vmem:[#allocation2 + $0x58] sm:$0xff] %vm5772_vm5, %v5699_v54 }
 0xce5   : > { %v6569_v58 = vld [vmem:[#allocation1] sm:$0xff] }
 0xce6   : > { %6570 = vst [vmem:[#allocation1] ss:$9 sm:$0xff] %v10560_v46  ;;  %6667 = vrot.lane.b32.xlu2 %v6569_v58, %s11222_s25  ;;  %v10609_v46 = vld [vmem:[%s11269_s19 + $0x2e] sm:$0x1]  ;;  %v10612_v58 = vld [vmem:[%s11269_s19 + $0x31] sm:$0x1] }
 0xce7   : > { %6571 = vst [vmem:[#allocation1 + $0x1] ss:$9 sm:$0xff] %v10561_v49  ;;  %v10610_v49 = vld [vmem:[%s11269_s19 + $0x2f] sm:$0x1] }
 0xce8   : > { %6572 = vst [vmem:[#allocation1 + $0x2] ss:$9 sm:$0xff] %v10562_v55  ;;  %v10611_v55 = vld [vmem:[%s11269_s19 + $0x30] sm:$0x1] }
 0xce9   : > { %6573 = vst [vmem:[#allocation1 + $0x3] ss:$9 sm:$0xff] %v10563_v59  ;;  %v10613_v59 = vld [vmem:[%s11269_s19 + $0x32] sm:$0x1] }
 0xcea   : > { %6574 = vst [vmem:[#allocation1 + $0x4] ss:$9 sm:$0xff] %v10564_v60  ;;  %v10614_v60 = vld [vmem:[%s11269_s19 + $0x33] sm:$0x1] }
 0xceb   : > { %6575 = vst [vmem:[#allocation1 + $0x5] ss:$9 sm:$0xff] %v10565_v62  ;;  %v10615_v62 = vld [vmem:[%s11269_s19 + $0x34] sm:$0x1] }
 0xcec   : > { %6576 = vst [vmem:[#allocation1 + $0x6] ss:$9 sm:$0xff] %v10566_v2  ;;  %v5725_v2 = vpop.permute.xlu2 %5724 }
 0xced   : > { %6577 = vst [vmem:[#allocation1 + $0x7] ss:$9 sm:$0xff] %v10567_v3  ;;  %v10616_v3 = vld [vmem:[%s11269_s19 + $0x37] sm:$0x1] }
 0xcee   : > { %5797 = vst.msk [vmem:[#allocation2 + $0xc0] sm:$0xff] %vm5772_vm5, %v5725_v2 }
 0xcf4   : > { %v6578_v12 = vld [vmem:[#allocation1] sm:$0xff] }
 0xcf5   : > { %6669 = vrot.lane.b32.xlu0 %v6578_v12, %s11222_s25  ;;  %6579 = vst [vmem:[#allocation1] ss:$9 sm:$0xff] %v10568_v5  ;;  %v10618_v5 = vld [vmem:[%s11269_s19 + $0x39] sm:$0x1]  ;;  %v10620_v12 = vld [vmem:[%s11269_s19 + $0x3b] sm:$0x1] }
 0xcf6   : > { %6580 = vst [vmem:[#allocation1 + $0x1] ss:$9 sm:$0xff] %v10569_v8 }
 0xcf7   : > { %6581 = vst [vmem:[#allocation1 + $0x2] ss:$9 sm:$0xff] %v10570_v9  ;;  %v10619_v9 = vld [vmem:[%s11269_s19 + $0x3a] sm:$0x1] }
 0xcf8   : > { %6582 = vst [vmem:[#allocation1 + $0x3] ss:$9 sm:$0xff] %v10571_v15  ;;  %v10621_v15 = vld [vmem:[%s11269_s19 + $0x3c] sm:$0x1] }
 0xcf9   : > { %6583 = vst [vmem:[#allocation1 + $0x4] ss:$9 sm:$0xff] %v10572_v16  ;;  %v10622_v16 = vld [vmem:[%s11269_s19 + $0x3d] sm:$0x1] }
 0xcfa   : > { %6584 = vst [vmem:[#allocation1 + $0x5] ss:$9 sm:$0xff] %v10573_v17  ;;  %v10623_v17 = vld [vmem:[%s11269_s19 + $0x3e] sm:$0x1] }
 0xcfb   : > { %6585 = vst [vmem:[#allocation1 + $0x6] ss:$9 sm:$0xff] %v10574_v19  ;;  %v10624_v19 = vld [vmem:[%s11269_s19 + $0x3f] sm:$0x1] }
 0xcfc   : > { %6586 = vst [vmem:[#allocation1 + $0x7] ss:$9 sm:$0xff] %v10575_v22  ;;  %v10625_v22 = vld [vmem:[%s11269_s19 + $0x40] sm:$0x1] }
 0xd03   : > { %v6587_v28 = vld [vmem:[#allocation1] sm:$0xff] }
 0xd04   : > { %6588 = vst [vmem:[#allocation1] ss:$9 sm:$0xff] %v10576_v24  ;;  %6671 = vrot.lane.b32.xlu1 %v6587_v28, %s11222_s25  ;;  %v10627_v28 = vld [vmem:[%s11269_s19 + $0x42] sm:$0x1] }
 0xd05   : > { %6589 = vst [vmem:[#allocation1 + $0x1] ss:$9 sm:$0xff] %v10577_v26  ;;  %v10626_v26 = vld [vmem:[%s11269_s19 + $0x41] sm:$0x1] }
 0xd06   : > { %6590 = vst [vmem:[#allocation1 + $0x2] ss:$9 sm:$0xff] %v10578_v32  ;;  %v10628_v32 = vld [vmem:[%s11269_s19 + $0x43] sm:$0x1] }
 0xd07   : > { %6591 = vst [vmem:[#allocation1 + $0x3] ss:$9 sm:$0xff] %v10579_v33  ;;  %v10629_v33 = vld [vmem:[%s11269_s19 + $0x44] sm:$0x1] }
 0xd08   : > { %6592 = vst [vmem:[#allocation1 + $0x4] ss:$9 sm:$0xff] %v10580_v34  ;;  %v10630_v34 = vld [vmem:[%s11269_s19 + $0x45] sm:$0x1] }
 0xd09   : > { %6593 = vst [vmem:[#allocation1 + $0x5] ss:$9 sm:$0xff] %v10581_v35  ;;  %v10631_v35 = vld [vmem:[%s11269_s19 + $0x46] sm:$0x1] }
 0xd0a   : > { %6594 = vst [vmem:[#allocation1 + $0x6] ss:$9 sm:$0xff] %v10582_v36  ;;  %v10632_v36 = vld [vmem:[%s11269_s19 + $0x49] sm:$0x1] }
 0xd0b   : > { %6595 = vst [vmem:[#allocation1 + $0x7] ss:$9 sm:$0xff] %v10583_v40  ;;  %v10633_v40 = vld [vmem:[%s11269_s19 + $0x4a] sm:$0x1] }
 0xd12   : > { %v6596_v47 = vld [vmem:[#allocation1] sm:$0xff] }
 0xd13   : > { %6597 = vst [vmem:[#allocation1] ss:$9 sm:$0xff] %v10584_v44  ;;  %6673 = vrot.lane.b32.xlu2 %v6596_v47, %s11222_s25  ;;  %v10634_v44 = vld [vmem:[%s11269_s19 + $0x4b] sm:$0x1]  ;;  %v10638_v47 = vld [vmem:[%s11269_s19 + $0x4f] sm:$0x1] }
 0xd14   : > { %6598 = vst [vmem:[#allocation1 + $0x1] ss:$9 sm:$0xff] %v10585_v29  ;;  %v10635_v29 = vld [vmem:[%s11269_s19 + $0x4c] sm:$0x1] }
 0xd15   : > { %6599 = vst [vmem:[#allocation1 + $0x2] ss:$9 sm:$0xff] %v10586_v45  ;;  %v10637_v45 = vld [vmem:[%s11269_s19 + $0x4e] sm:$0x1] }
 0xd16   : > { %6600 = vst [vmem:[#allocation1 + $0x3] ss:$9 sm:$0xff] %v10587_v56  ;;  %v10639_v56 = vld [vmem:[%s11269_s19 + $0x50] sm:$0x1] }
 0xd17   : > { %6601 = vst [vmem:[#allocation1 + $0x4] ss:$9 sm:$0xff] %v10588_v1  ;;  %v10640_v1 = vld [vmem:[%s11269_s19 + $0x51] sm:$0x1] }
 0xd18   : > { %6602 = vst [vmem:[#allocation1 + $0x5] ss:$9 sm:$0xff] %v10589_v21  ;;  %v5705_v21 = vpop.permute.xlu1 %5704 }
 0xd19   : > { %6603 = vst [vmem:[#allocation1 + $0x6] ss:$9 sm:$0xff] %v10590_v31  ;;  %v10641_v31 = vld [vmem:[%s11269_s19 + $0x52] sm:$0x1] }
 0xd1a   : > { %6604 = vst [vmem:[#allocation1 + $0x7] ss:$9 sm:$0xff] %v10591_v41  ;;  %v5727_v41 = vpop.permute.xlu0 %5726 }
 0xd1b   : > { %5787 = vst.msk [vmem:[#allocation2 + $0x70] sm:$0xff] %vm5772_vm5, %v5705_v21 }
 0xd1c   : > { %5798 = vst.msk [vmem:[#allocation2 + $0xc8] sm:$0xff] %vm5772_vm5, %v5727_v41  ;;  %v10692_v41 = vld [vmem:[%s11269_s19 + $0x8b] sm:$0x1] }
 0xd21   : > { %v6605_v30 = vld [vmem:[#allocation1] sm:$0xff] }
 0xd22   : > { %6675 = vrot.lane.b32.xlu0 %v6605_v30, %s11222_s25  ;;  %6606 = vst [vmem:[#allocation1] ss:$9 sm:$0xff] %v10592_v61  ;;  %v10645_v30 = vld [vmem:[%s11269_s19 + $0x56] sm:$0x1] }
 0xd23   : > { %6607 = vst [vmem:[#allocation1 + $0x1] ss:$9 sm:$0xff] %v10593_v7  ;;  %v10643_v7 = vld [vmem:[%s11269_s19 + $0x54] sm:$0x1] }
 0xd24   : > { %6608 = vst [vmem:[#allocation1 + $0x2] ss:$9 sm:$0xff] %v10594_v18  ;;  %v10644_v18 = vld [vmem:[%s11269_s19 + $0x55] sm:$0x1] }
 0xd25   : > { %6609 = vst [vmem:[#allocation1 + $0x3] ss:$9 sm:$0xff] %v10595_v42  ;;  %v10646_v42 = vld [vmem:[%s11269_s19 + $0x57] sm:$0x1] }
 0xd26   : > { %6610 = vst [vmem:[#allocation1 + $0x4] ss:$9 sm:$0xff] %v10596_v53  ;;  %v10647_v53 = vld [vmem:[%s11269_s19 + $0x58] sm:$0x1] }
 0xd27   : > { %6611 = vst [vmem:[#allocation1 + $0x5] ss:$9 sm:$0xff] %v10597_v0  ;;  %v5731_v0 = vpop.permute.xlu2 %5730 }
 0xd28   : > { %6612 = vst [vmem:[#allocation1 + $0x6] ss:$9 sm:$0xff] %v10598_v13  ;;  %v10648_v13 = vld [vmem:[%s11269_s19 + $0x5b] sm:$0x1] }
 0xd29   : > { %6613 = vst [vmem:[#allocation1 + $0x7] ss:$9 sm:$0xff] %v10599_v25  ;;  %v10649_v25 = vld [vmem:[%s11269_s19 + $0x5c] sm:$0x1] }
 0xd2a   : > { %5800 = vst.msk [vmem:[#allocation2 + $0xd8] sm:$0xff] %vm5772_vm5, %v5731_v0 }
 0xd30   : > { %v13532_v63 = vld [vmem:[#allocation1] sm:$0xff] }
 0xd31   : > { %7258 = vst [vmem:[#allocation1] ss:$9 sm:$0xff] %v10600_v37  ;;  %v10650_v37 = vld [vmem:[%s11269_s19 + $0x5d] sm:$0x1] }
 0xd32   : > { %7260 = vst [vmem:[#allocation1 + $0x1] ss:$9 sm:$0xff] %v10601_v50 }
 0xd33   : > { %7262 = vst [vmem:[#allocation1 + $0x2] ss:$9 sm:$0xff] %v10602_v14  ;;  %v10651_v14 = vld [vmem:[%s11269_s19 + $0x5e] sm:$0x1] }
 0xd34   : > { %7264 = vst [vmem:[#allocation1 + $0x3] ss:$9 sm:$0xff] %v10603_v27  ;;  %v10652_v27 = vld [vmem:[%s11269_s19 + $0x5f] sm:$0x1] }
 0xd35   : > { %7266 = vst [vmem:[#allocation1 + $0x4] ss:$9 sm:$0xff] %v10604_v43  ;;  %v10653_v43 = vld [vmem:[%s11269_s19 + $0x60] sm:$0x1] }
 0xd36   : > { %7268 = vst [vmem:[#allocation1 + $0x5] ss:$9 sm:$0xff] %v10605_v57  ;;  %v10654_v57 = vld [vmem:[%s11269_s19 + $0x61] sm:$0x1] }
 0xd37   : > { %7270 = vst [vmem:[#allocation1 + $0x6] ss:$9 sm:$0xff] %v10606_v6  ;;  %v10655_v6 = vld [vmem:[%s11269_s19 + $0x62] sm:$0x1] }
 0xd38   : > { %7272 = vst [vmem:[#allocation1 + $0x7] ss:$9 sm:$0xff] %v10607_v23  ;;  %v10656_v23 = vld [vmem:[%s11269_s19 + $0x63] sm:$0x1] }
 0xd3f   : > { %v7273_v52 = vld [vmem:[#allocation1] sm:$0xff] }
 0xd40   : > { %7274 = vst [vmem:[#allocation1] ss:$9 sm:$0xff] %v10608_v39  ;;  %7553 = vrot.lane.b32.xlu2 %v7273_v52, %s11223_s26  ;;  %v10657_v39 = vld [vmem:[%s11269_s19 + $0x64] sm:$0x1]  ;;  %v10661_v52 = vld [vmem:[%s11269_s19 + $0x68] sm:$0x1] }
 0xd41   : > { %7275 = vst [vmem:[#allocation1 + $0x1] ss:$9 sm:$0xff] %v10609_v46  ;;  %v10658_v46 = vld [vmem:[%s11269_s19 + $0x65] sm:$0x1] }
 0xd42   : > { %7276 = vst [vmem:[#allocation1 + $0x2] ss:$9 sm:$0xff] %v10610_v49  ;;  %v10660_v49 = vld [vmem:[%s11269_s19 + $0x67] sm:$0x1] }
 0xd43   : > { %7277 = vst [vmem:[#allocation1 + $0x3] ss:$9 sm:$0xff] %v10611_v55  ;;  %v10662_v55 = vld [vmem:[%s11269_s19 + $0x69] sm:$0x1] }
 0xd44   : > { %7278 = vst [vmem:[#allocation1 + $0x4] ss:$9 sm:$0xff] %v10612_v58  ;;  %v10663_v58 = vld [vmem:[%s11269_s19 + $0x6a] sm:$0x1] }
 0xd45   : > { %7279 = vst [vmem:[#allocation1 + $0x5] ss:$9 sm:$0xff] %v10613_v59  ;;  %v10664_v59 = vld [vmem:[%s11269_s19 + $0x6d] sm:$0x1] }
 0xd46   : > { %7280 = vst [vmem:[#allocation1 + $0x6] ss:$9 sm:$0xff] %v10614_v60  ;;  %v10665_v60 = vld [vmem:[%s11269_s19 + $0x6e] sm:$0x1] }
 0xd47   : > { %7281 = vst [vmem:[#allocation1 + $0x7] ss:$9 sm:$0xff] %v10615_v62  ;;  %v10666_v62 = vld [vmem:[%s11269_s19 + $0x6f] sm:$0x1] }
 0xd4e   : > { %v7282_v8 = vld [vmem:[#allocation1] sm:$0xff] }
 0xd4f   : > { %7555 = vrot.lane.b32.xlu0 %v7282_v8, %s11223_s26  ;;  %7283 = vst [vmem:[#allocation1] ss:$9 sm:$0xff] %v10616_v3  ;;  %v10667_v3 = vld [vmem:[%s11269_s19 + $0x70] sm:$0x1]  ;;  %v10670_v8 = vld [vmem:[%s11269_s19 + $0x73] sm:$0x1] }
 0xd50   : > { %7284 = vst [vmem:[#allocation1 + $0x1] ss:$9 sm:$0xff] %v10617_v4  ;;  %v10668_v4 = vld [vmem:[%s11269_s19 + $0x71] sm:$0x1] }
 0xd51   : > { %7285 = vst [vmem:[#allocation1 + $0x2] ss:$9 sm:$0xff] %v10618_v5  ;;  %v10669_v5 = vld [vmem:[%s11269_s19 + $0x72] sm:$0x1] }
 0xd52   : > { %7286 = vst [vmem:[#allocation1 + $0x3] ss:$9 sm:$0xff] %v10619_v9  ;;  %v10671_v9 = vld [vmem:[%s11269_s19 + $0x74] sm:$0x1] }
 0xd53   : > { %7287 = vst [vmem:[#allocation1 + $0x4] ss:$9 sm:$0xff] %v10620_v12  ;;  %v10672_v12 = vld [vmem:[%s11269_s19 + $0x75] sm:$0x1] }
 0xd54   : > { %7288 = vst [vmem:[#allocation1 + $0x5] ss:$9 sm:$0xff] %v10621_v15  ;;  %v10673_v15 = vld [vmem:[%s11269_s19 + $0x76] sm:$0x1] }
 0xd55   : > { %7289 = vst [vmem:[#allocation1 + $0x6] ss:$9 sm:$0xff] %v10622_v16  ;;  %v10674_v16 = vld [vmem:[%s11269_s19 + $0x77] sm:$0x1] }
 0xd56   : > { %7290 = vst [vmem:[#allocation1 + $0x7] ss:$9 sm:$0xff] %v10623_v17 }
 0xd5d   : > { %v7291_v24 = vld [vmem:[#allocation1] sm:$0xff] }
 0xd5e   : > { %7292 = vst [vmem:[#allocation1] ss:$9 sm:$0xff] %v10624_v19  ;;  %7557 = vrot.lane.b32.xlu1 %v7291_v24, %s11223_s26  ;;  %v10675_v19 = vld [vmem:[%s11269_s19 + $0x78] sm:$0x1]  ;;  %v10677_v24 = vld [vmem:[%s11269_s19 + $0x7a] sm:$0x1] }
 0xd5f   : > { %7293 = vst [vmem:[#allocation1 + $0x1] ss:$9 sm:$0xff] %v10625_v22  ;;  %v10676_v22 = vld [vmem:[%s11269_s19 + $0x79] sm:$0x1] }
 0xd60   : > { %7294 = vst [vmem:[#allocation1 + $0x2] ss:$9 sm:$0xff] %v10626_v26  ;;  %v10678_v26 = vld [vmem:[%s11269_s19 + $0x7b] sm:$0x1] }
 0xd61   : > { %7295 = vst [vmem:[#allocation1 + $0x3] ss:$9 sm:$0xff] %v10627_v28  ;;  %v10679_v28 = vld [vmem:[%s11269_s19 + $0x7c] sm:$0x1] }
 0xd62   : > { %7296 = vst [vmem:[#allocation1 + $0x4] ss:$9 sm:$0xff] %v10628_v32  ;;  %v10680_v32 = vld [vmem:[%s11269_s19 + $0x7f] sm:$0x1] }
 0xd63   : > { %7297 = vst [vmem:[#allocation1 + $0x5] ss:$9 sm:$0xff] %v10629_v33  ;;  %v10681_v33 = vld [vmem:[%s11269_s19 + $0x80] sm:$0x1] }
 0xd64   : > { %7298 = vst [vmem:[#allocation1 + $0x6] ss:$9 sm:$0xff] %v10630_v34  ;;  %v10682_v34 = vld [vmem:[%s11269_s19 + $0x81] sm:$0x1] }
 0xd65   : > { %7299 = vst [vmem:[#allocation1 + $0x7] ss:$9 sm:$0xff] %v10631_v35 }
 0xd6c   : > { %v7300_v20 = vld [vmem:[#allocation1] sm:$0xff] }
 0xd6d   : > { %7301 = vst [vmem:[#allocation1] ss:$9 sm:$0xff] %v10632_v36  ;;  %7559 = vrot.lane.b32.xlu2 %v7300_v20, %s11223_s26  ;;  %v10683_v36 = vld [vmem:[%s11269_s19 + $0x82] sm:$0x1]  ;;  %v10686_v20 = vld [vmem:[%s11269_s19 + $0x85] sm:$0x1] }
 0xd6e   : > { %7302 = vst [vmem:[#allocation1 + $0x1] ss:$9 sm:$0xff] %v10633_v40  ;;  %v10684_v40 = vld [vmem:[%s11269_s19 + $0x83] sm:$0x1] }
 0xd6f   : > { %7303 = vst [vmem:[#allocation1 + $0x2] ss:$9 sm:$0xff] %v10634_v44  ;;  %v10685_v44 = vld [vmem:[%s11269_s19 + $0x84] sm:$0x1] }
 0xd70   : > { %7304 = vst [vmem:[#allocation1 + $0x3] ss:$9 sm:$0xff] %v10635_v29  ;;  %v10687_v29 = vld [vmem:[%s11269_s19 + $0x86] sm:$0x1] }
 0xd71   : > { %7305 = vst [vmem:[#allocation1 + $0x4] ss:$9 sm:$0xff] %v10636_v38  ;;  %v10688_v38 = vld [vmem:[%s11269_s19 + $0x87] sm:$0x1] }
 0xd72   : > { %7306 = vst [vmem:[#allocation1 + $0x5] ss:$9 sm:$0xff] %v10637_v45  ;;  %v5711_v45 = vpop.permute.xlu1 %5710 }
 0xd73   : > { %7307 = vst [vmem:[#allocation1 + $0x6] ss:$9 sm:$0xff] %v10638_v47  ;;  %v10689_v47 = vld [vmem:[%s11269_s19 + $0x88] sm:$0x1] }
 0xd74   : > { %7308 = vst [vmem:[#allocation1 + $0x7] ss:$9 sm:$0xff] %v10639_v56  ;;  %v5733_v56 = vpop.permute.xlu0 %5732 }
 0xd75   : > { %5790 = vst.msk [vmem:[#allocation2 + $0x88] sm:$0xff] %vm5772_vm5, %v5711_v45  ;;  %v10734_v45 = vld [vmem:[%s11269_s19 + $0xbb] sm:$0x1] }
 0xd76   : > { %5801 = vst.msk [vmem:[#allocation2 + $0xe0] sm:$0xff] %vm5772_vm5, %v5733_v56 }
 0xd7b   : > { %v7309_v61 = vld [vmem:[#allocation1] sm:$0xff] }
 0xd7c   : > { %7561 = vrot.lane.b32.xlu0 %v7309_v61, %s11223_s26  ;;  %7310 = vst [vmem:[#allocation1] ss:$9 sm:$0xff] %v10640_v1  ;;  %v10690_v1 = vld [vmem:[%s11269_s19 + $0x89] sm:$0x1]  ;;  %v10694_v61 = vld [vmem:[%s11269_s19 + $0x8d] sm:$0x1] }
 0xd7d   : > { %7311 = vst [vmem:[#allocation1 + $0x1] ss:$9 sm:$0xff] %v10641_v31  ;;  %v10691_v31 = vld [vmem:[%s11269_s19 + $0x8a] sm:$0x1] }
 0xd7e   : > { %7312 = vst [vmem:[#allocation1 + $0x2] ss:$9 sm:$0xff] %v10642_v51  ;;  %v10693_v51 = vld [vmem:[%s11269_s19 + $0x8c] sm:$0x1] }
 0xd7f   : > { %7313 = vst [vmem:[#allocation1 + $0x3] ss:$9 sm:$0xff] %v10643_v7  ;;  %v10695_v7 = vld [vmem:[%s11269_s19 + $0x8e] sm:$0x1] }
 0xd80   : > { %7314 = vst [vmem:[#allocation1 + $0x4] ss:$9 sm:$0xff] %v10644_v18  ;;  %v5737_v18 = vpop.permute.xlu2 %5736 }
 0xd81   : > { %7315 = vst [vmem:[#allocation1 + $0x5] ss:$9 sm:$0xff] %v10645_v30  ;;  %v10696_v30 = vld [vmem:[%s11269_s19 + $0x91] sm:$0x1] }
 0xd82   : > { %7316 = vst [vmem:[#allocation1 + $0x6] ss:$9 sm:$0xff] %v10646_v42  ;;  %v10697_v42 = vld [vmem:[%s11269_s19 + $0x92] sm:$0x1] }
 0xd83   : > { %7317 = vst [vmem:[#allocation1 + $0x7] ss:$9 sm:$0xff] %v10647_v53  ;;  %v10698_v53 = vld [vmem:[%s11269_s19 + $0x93] sm:$0x1] }
 0xd84   : > { %5803 = vst.msk [vmem:[#allocation2 + $0xf0] sm:$0xff] %vm5772_vm5, %v5737_v18  ;;  %v10742_v18 = vld [vmem:[%s11269_s19 + $0xc3] sm:$0x1] }
 0xd8a   : > { %v7318_v50 = vld [vmem:[#allocation1] sm:$0xff] }
 0xd8b   : > { %7319 = vst [vmem:[#allocation1] ss:$9 sm:$0xff] %v10648_v13  ;;  %7563 = vrot.lane.b32.xlu1 %v7318_v50, %s11223_s26  ;;  %v10699_v13 = vld [vmem:[%s11269_s19 + $0x94] sm:$0x1]  ;;  %v10702_v50 = vld [vmem:[%s11269_s19 + $0x97] sm:$0x1] }
 0xd8c   : > { %7320 = vst [vmem:[#allocation1 + $0x1] ss:$9 sm:$0xff] %v10649_v25  ;;  %v10700_v25 = vld [vmem:[%s11269_s19 + $0x95] sm:$0x1] }
 0xd8d   : > { %7321 = vst [vmem:[#allocation1 + $0x2] ss:$9 sm:$0xff] %v10650_v37  ;;  %v10701_v37 = vld [vmem:[%s11269_s19 + $0x96] sm:$0x1] }
 0xd8e   : > { %7322 = vst [vmem:[#allocation1 + $0x3] ss:$9 sm:$0xff] %v10651_v14  ;;  %v10703_v14 = vld [vmem:[%s11269_s19 + $0x98] sm:$0x1] }
 0xd8f   : > { %7323 = vst [vmem:[#allocation1 + $0x4] ss:$9 sm:$0xff] %v10652_v27  ;;  %v10704_v27 = vld [vmem:[%s11269_s19 + $0x99] sm:$0x1] }
 0xd90   : > { %7324 = vst [vmem:[#allocation1 + $0x5] ss:$9 sm:$0xff] %v10653_v43  ;;  %v10705_v43 = vld [vmem:[%s11269_s19 + $0x9a] sm:$0x1] }
 0xd91   : > { %7325 = vst [vmem:[#allocation1 + $0x6] ss:$9 sm:$0xff] %v10654_v57  ;;  %v5717_v57 = vpop.permute.xlu1 %5716 }
 0xd92   : > { %7326 = vst [vmem:[#allocation1 + $0x7] ss:$9 sm:$0xff] %v10655_v6 }
 0xd93   : > { %5793 = vst.msk [vmem:[#allocation2 + $0xa0] sm:$0xff] %vm5772_vm5, %v5717_v57 }
 0xd99   : > { %v13602_v54 = vld [vmem:[#allocation1] sm:$0xff] }
 0xd9a   : > { %7328 = vst [vmem:[#allocation1] ss:$9 sm:$0xff] %v10656_v23  ;;  %v10706_v23 = vld [vmem:[%s11269_s19 + $0x9b] sm:$0x1] }
 0xd9b   : > { %7329 = vst [vmem:[#allocation1 + $0x1] ss:$9 sm:$0xff] %v10657_v39  ;;  %v10707_v39 = vld [vmem:[%s11269_s19 + $0x9c] sm:$0x1] }
 0xd9c   : > { %7330 = vst [vmem:[#allocation1 + $0x2] ss:$9 sm:$0xff] %v10658_v46  ;;  %v10708_v46 = vld [vmem:[%s11269_s19 + $0x9d] sm:$0x1] }
 0xd9d   : > { %7331 = vst [vmem:[#allocation1 + $0x3] ss:$9 sm:$0xff] %v10659_v48  ;;  %v10709_v48 = vld [vmem:[%s11269_s19 + $0x9e] sm:$0x1] }
 0xd9e   : > { %7332 = vst [vmem:[#allocation1 + $0x4] ss:$9 sm:$0xff] %v10660_v49  ;;  %v10710_v49 = vld [vmem:[%s11269_s19 + $0x9f] sm:$0x1] }
 0xd9f   : > { %7333 = vst [vmem:[#allocation1 + $0x5] ss:$9 sm:$0xff] %v10661_v52  ;;  %v10711_v52 = vld [vmem:[%s11269_s19 + $0xa0] sm:$0x1] }
 0xda0   : > { %7334 = vst [vmem:[#allocation1 + $0x6] ss:$9 sm:$0xff] %v10662_v55  ;;  %v5739_v55 = vpop.permute.xlu0 %5738 }
 0xda1   : > { %7335 = vst [vmem:[#allocation1 + $0x7] ss:$9 sm:$0xff] %v10663_v58  ;;  %v6618_v58 = vpop.permute.xlu2 %6617 }
 0xda2   : > { %5804 = vst.msk [vmem:[#allocation2 + $0xf8] sm:$0xff] %vm5772_vm5, %v5739_v55  ;;  %v10758_v55 = vld [vmem:[%s11269_s19 + $0xd5] sm:$0x1] }
 0xda3   : > { %6713 = vst.msk [vmem:[#allocation2 + $0x8] sm:$0xff] %vm6711_vm6, %v6618_v58  ;;  %v10759_v58 = vld [vmem:[%s11269_s19 + $0xd6] sm:$0x1] }
 0xda8   : > { %v13613_v2 = vld [vmem:[#allocation1] sm:$0xff] }
 0xda9   : > { %7337 = vst [vmem:[#allocation1] ss:$9 sm:$0xff] %v10664_v59  ;;  %v10712_v59 = vld [vmem:[%s11269_s19 + $0xa3] sm:$0x1]  ;;  %v6624_v56 = vpop.permute.xlu2 %6623 }
 0xdaa   : > { %7338 = vst [vmem:[#allocation1 + $0x1] ss:$9 sm:$0xff] %v10665_v60  ;;  %v10713_v60 = vld [vmem:[%s11269_s19 + $0xa4] sm:$0x1] }
 0xdab   : > { %7339 = vst [vmem:[#allocation1 + $0x2] ss:$9 sm:$0xff] %v10666_v62  ;;  %v10714_v62 = vld [vmem:[%s11269_s19 + $0xa5] sm:$0x1] }
 0xdac   : > { %7340 = vst [vmem:[#allocation1 + $0x3] ss:$9 sm:$0xff] %v10667_v3 }
 0xdad   : > { %7341 = vst [vmem:[#allocation1 + $0x4] ss:$9 sm:$0xff] %v10668_v4  ;;  %v10715_v4 = vld [vmem:[%s11269_s19 + $0xa6] sm:$0x1] }
 0xdae   : > { %7342 = vst [vmem:[#allocation1 + $0x5] ss:$9 sm:$0xff] %v10669_v5  ;;  %v10716_v5 = vld [vmem:[%s11269_s19 + $0xa7] sm:$0x1] }
 0xdaf   : > { %7343 = vst [vmem:[#allocation1 + $0x6] ss:$9 sm:$0xff] %v10670_v8  ;;  %v10717_v8 = vld [vmem:[%s11269_s19 + $0xa8] sm:$0x1] }
 0xdb0   : > { %7344 = vst [vmem:[#allocation1 + $0x7] ss:$9 sm:$0xff] %v10671_v9  ;;  %v10718_v9 = vld [vmem:[%s11269_s19 + $0xa9] sm:$0x1] }
 0xdb1   : > { %6716 = vst.msk [vmem:[#allocation2 + $0x20] sm:$0xff] %vm6711_vm6, %v6624_v56  ;;  %v10784_v56 = vld [vmem:[%s11269_s19 + $0xf3] sm:$0x1] }
 0xdb7   : > { %v7345_v17 = vld [vmem:[#allocation1] sm:$0xff] }
 0xdb8   : > { %7346 = vst [vmem:[#allocation1] ss:$9 sm:$0xff] %v10672_v12  ;;  %7569 = vrot.lane.b32.xlu1 %v7345_v17, %s11223_s26  ;;  %v10719_v12 = vld [vmem:[%s11269_s19 + $0xaa] sm:$0x1] }
 0xdb9   : > { %7347 = vst [vmem:[#allocation1 + $0x1] ss:$9 sm:$0xff] %v10673_v15  ;;  %v10720_v15 = vld [vmem:[%s11269_s19 + $0xab] sm:$0x1] }
 0xdba   : > { %7348 = vst [vmem:[#allocation1 + $0x2] ss:$9 sm:$0xff] %v10674_v16  ;;  %v10721_v16 = vld [vmem:[%s11269_s19 + $0xac] sm:$0x1] }
 0xdbb   : > { %7349 = vst [vmem:[#allocation1 + $0x3] ss:$9 sm:$0xff] %v10675_v19  ;;  %v10722_v19 = vld [vmem:[%s11269_s19 + $0xad] sm:$0x1] }
 0xdbc   : > { %7350 = vst [vmem:[#allocation1 + $0x4] ss:$9 sm:$0xff] %v10676_v22  ;;  %v10723_v22 = vld [vmem:[%s11269_s19 + $0xae] sm:$0x1] }
 0xdbd   : > { %7351 = vst [vmem:[#allocation1 + $0x5] ss:$9 sm:$0xff] %v10677_v24  ;;  %v10724_v24 = vld [vmem:[%s11269_s19 + $0xaf] sm:$0x1] }
 0xdbe   : > { %7352 = vst [vmem:[#allocation1 + $0x6] ss:$9 sm:$0xff] %v10678_v26  ;;  %v10725_v26 = vld [vmem:[%s11269_s19 + $0xb0] sm:$0x1] }
 0xdbf   : > { %7353 = vst [vmem:[#allocation1 + $0x7] ss:$9 sm:$0xff] %v10679_v28  ;;  %v10726_v28 = vld [vmem:[%s11269_s19 + $0xb1] sm:$0x1] }
 0xdc6   : > { %v7354_v35 = vld [vmem:[#allocation1] sm:$0xff] }
 0xdc7   : > { %7355 = vst [vmem:[#allocation1] ss:$9 sm:$0xff] %v10680_v32  ;;  %7571 = vrot.lane.b32.xlu1 %v7354_v35, %s11223_s26  ;;  %v10727_v32 = vld [vmem:[%s11269_s19 + $0xb2] sm:$0x1]  ;;  %v10729_v35 = vld [vmem:[%s11269_s19 + $0xb6] sm:$0x1] }
 0xdc8   : > { %7356 = vst [vmem:[#allocation1 + $0x1] ss:$9 sm:$0xff] %v10681_v33  ;;  %v10728_v33 = vld [vmem:[%s11269_s19 + $0xb5] sm:$0x1] }
 0xdc9   : > { %7357 = vst [vmem:[#allocation1 + $0x2] ss:$9 sm:$0xff] %v10682_v34  ;;  %v5723_v34 = vpop.permute.xlu1 %5722 }
 0xdca   : > { %7358 = vst [vmem:[#allocation1 + $0x3] ss:$9 sm:$0xff] %v10683_v36  ;;  %v6620_v36 = vpop.permute.xlu0 %6619 }
 0xdcb   : > { %7359 = vst [vmem:[#allocation1 + $0x4] ss:$9 sm:$0xff] %v10684_v40  ;;  %v10730_v40 = vld [vmem:[%s11269_s19 + $0xb7] sm:$0x1] }
 0xdcc   : > { %7360 = vst [vmem:[#allocation1 + $0x5] ss:$9 sm:$0xff] %v10685_v44 }
 0xdcd   : > { %7361 = vst [vmem:[#allocation1 + $0x6] ss:$9 sm:$0xff] %v10686_v20  ;;  %v10731_v20 = vld [vmem:[%s11269_s19 + $0xb8] sm:$0x1] }
 0xdce   : > { %7362 = vst [vmem:[#allocation1 + $0x7] ss:$9 sm:$0xff] %v10687_v29  ;;  %v10732_v29 = vld [vmem:[%s11269_s19 + $0xb9] sm:$0x1] }
 0xdcf   : > { %5796 = vst.msk [vmem:[#allocation2 + $0xb8] sm:$0xff] %vm5772_vm5, %v5723_v34  ;;  %v10776_v34 = vld [vmem:[%s11269_s19 + $0xeb] sm:$0x1] }
 0xdd0   : > { %6714 = vst.msk [vmem:[#allocation2 + $0x10] sm:$0xff] %vm6711_vm6, %v6620_v36  ;;  %v10778_v36 = vld [vmem:[%s11269_s19 + $0xed] sm:$0x1] }
 0xdd1   : > { %v5729_v57 = vpop.permute.xlu1 %5728 }
 0xdd2   : > { %5799 = vst.msk [vmem:[#allocation2 + $0xd0] sm:$0xff] %vm5772_vm5, %v5729_v57  ;;  %v10802_v57 = vld [vmem:[%s11269_s19 + $0x107] sm:$0x1] }
 0xdd5   : > { %v7363_v21 = vld [vmem:[#allocation1] sm:$0xff] }
 0xdd6   : > { %7364 = vst [vmem:[#allocation1] ss:$9 sm:$0xff] %v10688_v38  ;;  %7573 = vrot.lane.b32.xlu2 %v7363_v21, %s11223_s26  ;;  %v10733_v38 = vld [vmem:[%s11269_s19 + $0xba] sm:$0x1]  ;;  %v10737_v21 = vld [vmem:[%s11269_s19 + $0xbe] sm:$0x1] }
 0xdd7   : > { %7365 = vst [vmem:[#allocation1 + $0x1] ss:$9 sm:$0xff] %v10689_v47  ;;  %v10735_v47 = vld [vmem:[%s11269_s19 + $0xbc] sm:$0x1] }
 0xdd8   : > { %7366 = vst [vmem:[#allocation1 + $0x2] ss:$9 sm:$0xff] %v10690_v1  ;;  %v10736_v1 = vld [vmem:[%s11269_s19 + $0xbd] sm:$0x1] }
 0xdd9   : > { %7367 = vst [vmem:[#allocation1 + $0x3] ss:$9 sm:$0xff] %v10691_v31  ;;  %v10738_v31 = vld [vmem:[%s11269_s19 + $0xbf] sm:$0x1] }
 0xdda   : > { %7368 = vst [vmem:[#allocation1 + $0x4] ss:$9 sm:$0xff] %v10692_v41 }
 0xddb   : > { %7369 = vst [vmem:[#allocation1 + $0x5] ss:$9 sm:$0xff] %v10693_v51  ;;  %v10739_v51 = vld [vmem:[%s11269_s19 + $0xc0] sm:$0x1] }
 0xddc   : > { %7370 = vst [vmem:[#allocation1 + $0x6] ss:$9 sm:$0xff] %v10694_v61  ;;  %v10740_v61 = vld [vmem:[%s11269_s19 + $0xc1] sm:$0x1] }
 0xddd   : > { %7371 = vst [vmem:[#allocation1 + $0x7] ss:$9 sm:$0xff] %v10695_v7  ;;  %v10741_v7 = vld [vmem:[%s11269_s19 + $0xc2] sm:$0x1] }
 0xde4   : > { %v7372_v0 = vld [vmem:[#allocation1] sm:$0xff] }
 0xde5   : > { %7575 = vrot.lane.b32.xlu0 %v7372_v0, %s11223_s26  ;;  %7373 = vst [vmem:[#allocation1] ss:$9 sm:$0xff] %v10696_v30  ;;  %v10743_v30 = vld [vmem:[%s11269_s19 + $0xc4] sm:$0x1] }
 0xde6   : > { %7374 = vst [vmem:[#allocation1 + $0x1] ss:$9 sm:$0xff] %v10697_v42  ;;  %v10744_v42 = vld [vmem:[%s11269_s19 + $0xc7] sm:$0x1] }
 0xde7   : > { %7375 = vst [vmem:[#allocation1 + $0x2] ss:$9 sm:$0xff] %v10698_v53  ;;  %v10745_v53 = vld [vmem:[%s11269_s19 + $0xc8] sm:$0x1] }
 0xde8   : > { %7376 = vst [vmem:[#allocation1 + $0x3] ss:$9 sm:$0xff] %v10699_v13  ;;  %v10746_v13 = vld [vmem:[%s11269_s19 + $0xc9] sm:$0x1] }
 0xde9   : > { %7377 = vst [vmem:[#allocation1 + $0x4] ss:$9 sm:$0xff] %v10700_v25  ;;  %v10747_v25 = vld [vmem:[%s11269_s19 + $0xca] sm:$0x1] }
 0xdea   : > { %7378 = vst [vmem:[#allocation1 + $0x5] ss:$9 sm:$0xff] %v10701_v37  ;;  %v10748_v37 = vld [vmem:[%s11269_s19 + $0xcb] sm:$0x1] }
 0xdeb   : > { %7379 = vst [vmem:[#allocation1 + $0x6] ss:$9 sm:$0xff] %v10702_v50  ;;  %v10749_v50 = vld [vmem:[%s11269_s19 + $0xcc] sm:$0x1] }
 0xdec   : > { %7380 = vst [vmem:[#allocation1 + $0x7] ss:$9 sm:$0xff] %v10703_v14  ;;  %v10750_v14 = vld [vmem:[%s11269_s19 + $0xcd] sm:$0x1] }
 0xdf3   : > { %v7381_v6 = vld [vmem:[#allocation1] sm:$0xff] }
 0xdf4   : > { %7382 = vst [vmem:[#allocation1] ss:$9 sm:$0xff] %v10704_v27  ;;  %7577 = vrot.lane.b32.xlu1 %v7381_v6, %s11223_s26  ;;  %v10751_v27 = vld [vmem:[%s11269_s19 + $0xce] sm:$0x1]  ;;  %v10753_v6 = vld [vmem:[%s11269_s19 + $0xd0] sm:$0x1] }
 0xdf5   : > { %7383 = vst [vmem:[#allocation1 + $0x1] ss:$9 sm:$0xff] %v10705_v43  ;;  %v10752_v43 = vld [vmem:[%s11269_s19 + $0xcf] sm:$0x1] }
 0xdf6   : > { %7384 = vst [vmem:[#allocation1 + $0x2] ss:$9 sm:$0xff] %v10706_v23  ;;  %v6626_v23 = vpop.permute.xlu0 %6625 }
 0xdf7   : > { %7385 = vst [vmem:[#allocation1 + $0x3] ss:$9 sm:$0xff] %v10707_v39  ;;  %v10754_v39 = vld [vmem:[%s11269_s19 + $0xd1] sm:$0x1] }
 0xdf8   : > { %7386 = vst [vmem:[#allocation1 + $0x4] ss:$9 sm:$0xff] %v10708_v46 }
 0xdf9   : > { %7387 = vst [vmem:[#allocation1 + $0x5] ss:$9 sm:$0xff] %v10709_v48  ;;  %v10755_v48 = vld [vmem:[%s11269_s19 + $0xd2] sm:$0x1] }
 0xdfa   : > { %7388 = vst [vmem:[#allocation1 + $0x6] ss:$9 sm:$0xff] %v10710_v49  ;;  %v10756_v49 = vld [vmem:[%s11269_s19 + $0xd3] sm:$0x1] }
 0xdfb   : > { %7389 = vst [vmem:[#allocation1 + $0x7] ss:$9 sm:$0xff] %v10711_v52  ;;  %v10757_v52 = vld [vmem:[%s11269_s19 + $0xd4] sm:$0x1] }
 0xdfc   : > { %6717 = vst.msk [vmem:[#allocation2 + $0x28] sm:$0xff] %vm6711_vm6, %v6626_v23  ;;  %v10803_v23 = vld [vmem:[%s11269_s19 + $0x108] sm:$0x1] }
 0xe02   : > { %v7390_v3 = vld [vmem:[#allocation1] sm:$0xff] }
 0xe03   : > { %7391 = vst [vmem:[#allocation1] ss:$9 sm:$0xff] %v10712_v59  ;;  %7579 = vrot.lane.b32.xlu2 %v7390_v3, %s11223_s26  ;;  %v6630_v59 = vpop.permute.xlu2 %6629  ;;  %v10762_v3 = vld [vmem:[%s11269_s19 + $0xdb] sm:$0x1] }
 0xe04   : > { %7392 = vst [vmem:[#allocation1 + $0x1] ss:$9 sm:$0xff] %v10713_v60  ;;  %v10760_v60 = vld [vmem:[%s11269_s19 + $0xd9] sm:$0x1] }
 0xe05   : > { %7393 = vst [vmem:[#allocation1 + $0x2] ss:$9 sm:$0xff] %v10714_v62  ;;  %v10761_v62 = vld [vmem:[%s11269_s19 + $0xda] sm:$0x1] }
 0xe06   : > { %7394 = vst [vmem:[#allocation1 + $0x3] ss:$9 sm:$0xff] %v10715_v4 }
 0xe07   : > { %7395 = vst [vmem:[#allocation1 + $0x4] ss:$9 sm:$0xff] %v10716_v5  ;;  %v10763_v5 = vld [vmem:[%s11269_s19 + $0xdc] sm:$0x1] }
 0xe08   : > { %7396 = vst [vmem:[#allocation1 + $0x5] ss:$9 sm:$0xff] %v10717_v8  ;;  %v10764_v8 = vld [vmem:[%s11269_s19 + $0xdd] sm:$0x1] }
 0xe09   : > { %7397 = vst [vmem:[#allocation1 + $0x6] ss:$9 sm:$0xff] %v10718_v9  ;;  %v10765_v9 = vld [vmem:[%s11269_s19 + $0xde] sm:$0x1] }
 0xe0a   : > { %7398 = vst [vmem:[#allocation1 + $0x7] ss:$9 sm:$0xff] %v10719_v12  ;;  %v10766_v12 = vld [vmem:[%s11269_s19 + $0xdf] sm:$0x1] }
 0xe0b   : > { %6719 = vst.msk [vmem:[#allocation2 + $0x38] sm:$0xff] %vm6711_vm6, %v6630_v59  ;;  %v6632_v59 = vpop.permute.xlu0 %6631 }
 0xe0c   : > { %6720 = vst.msk [vmem:[#allocation2 + $0x40] sm:$0xff] %vm6711_vm6, %v6632_v59  ;;  %v10855_v59 = vld [vmem:[%s11269_s19 + $0x142] sm:$0x1] }
 0xe11   : > { %v7399_v17 = vld [vmem:[#allocation1] sm:$0xff] }
 0xe12   : > { %7581 = vrot.lane.b32.xlu0 %v7399_v17, %s11223_s26  ;;  %7400 = vst [vmem:[#allocation1] ss:$9 sm:$0xff] %v10720_v15  ;;  %v10767_v15 = vld [vmem:[%s11269_s19 + $0xe0] sm:$0x1]  ;;  %v10769_v17 = vld [vmem:[%s11269_s19 + $0xe2] sm:$0x1] }
 0xe13   : > { %7401 = vst [vmem:[#allocation1 + $0x1] ss:$9 sm:$0xff] %v10721_v16  ;;  %v10768_v16 = vld [vmem:[%s11269_s19 + $0xe1] sm:$0x1] }
 0xe14   : > { %7402 = vst [vmem:[#allocation1 + $0x2] ss:$9 sm:$0xff] %v10722_v19 }
 0xe15   : > { %7403 = vst [vmem:[#allocation1 + $0x3] ss:$9 sm:$0xff] %v10723_v22  ;;  %v10770_v22 = vld [vmem:[%s11269_s19 + $0xe3] sm:$0x1] }
 0xe16   : > { %7404 = vst [vmem:[#allocation1 + $0x4] ss:$9 sm:$0xff] %v10724_v24  ;;  %v10771_v24 = vld [vmem:[%s11269_s19 + $0xe4] sm:$0x1] }
 0xe17   : > { %7405 = vst [vmem:[#allocation1 + $0x5] ss:$9 sm:$0xff] %v10725_v26  ;;  %v10772_v26 = vld [vmem:[%s11269_s19 + $0xe5] sm:$0x1] }
 0xe18   : > { %7406 = vst [vmem:[#allocation1 + $0x6] ss:$9 sm:$0xff] %v10726_v28  ;;  %v10773_v28 = vld [vmem:[%s11269_s19 + $0xe6] sm:$0x1] }
 0xe19   : > { %7407 = vst [vmem:[#allocation1 + $0x7] ss:$9 sm:$0xff] %v10727_v32  ;;  %v10774_v32 = vld [vmem:[%s11269_s19 + $0xe7] sm:$0x1] }
 0xe20   : > { %v13693_v44 = vld [vmem:[#allocation1] sm:$0xff] }
 0xe21   : > { %7409 = vst [vmem:[#allocation1] ss:$9 sm:$0xff] %v10728_v33  ;;  %v10775_v33 = vld [vmem:[%s11269_s19 + $0xe8] sm:$0x1] }
 0xe22   : > { %7410 = vst [vmem:[#allocation1 + $0x1] ss:$9 sm:$0xff] %v10729_v35  ;;  %v10777_v35 = vld [vmem:[%s11269_s19 + $0xec] sm:$0x1] }
 0xe23   : > { %7411 = vst [vmem:[#allocation1 + $0x2] ss:$9 sm:$0xff] %v10730_v40 }
 0xe24   : > { %7412 = vst [vmem:[#allocation1 + $0x3] ss:$9 sm:$0xff] %v10731_v20  ;;  %v10779_v20 = vld [vmem:[%s11269_s19 + $0xee] sm:$0x1] }
 0xe25   : > { %7413 = vst [vmem:[#allocation1 + $0x4] ss:$9 sm:$0xff] %v10732_v29  ;;  %v10780_v29 = vld [vmem:[%s11269_s19 + $0xef] sm:$0x1] }
 0xe26   : > { %7414 = vst [vmem:[#allocation1 + $0x5] ss:$9 sm:$0xff] %v10733_v38  ;;  %v10781_v38 = vld [vmem:[%s11269_s19 + $0xf0] sm:$0x1] }
 0xe27   : > { %7415 = vst [vmem:[#allocation1 + $0x6] ss:$9 sm:$0xff] %v10734_v45  ;;  %v10782_v45 = vld [vmem:[%s11269_s19 + $0xf1] sm:$0x1] }
 0xe28   : > { %7416 = vst [vmem:[#allocation1 + $0x7] ss:$9 sm:$0xff] %v10735_v47  ;;  %v10783_v47 = vld [vmem:[%s11269_s19 + $0xf2] sm:$0x1] }
 0xe2f   : > { %v7417_v41 = vld [vmem:[#allocation1] sm:$0xff] }
 0xe30   : > { %7585 = vrot.lane.b32.xlu0 %v7417_v41, %s11223_s26  ;;  %7418 = vst [vmem:[#allocation1] ss:$9 sm:$0xff] %v10736_v1  ;;  %v10785_v1 = vld [vmem:[%s11269_s19 + $0xf4] sm:$0x1]  ;;  %v10787_v41 = vld [vmem:[%s11269_s19 + $0xf6] sm:$0x1] }
 0xe31   : > { %7419 = vst [vmem:[#allocation1 + $0x1] ss:$9 sm:$0xff] %v10737_v21  ;;  %v10786_v21 = vld [vmem:[%s11269_s19 + $0xf5] sm:$0x1] }
 0xe32   : > { %7420 = vst [vmem:[#allocation1 + $0x2] ss:$9 sm:$0xff] %v10738_v31 }
 0xe33   : > { %7421 = vst [vmem:[#allocation1 + $0x3] ss:$9 sm:$0xff] %v10739_v51  ;;  %v10788_v51 = vld [vmem:[%s11269_s19 + $0xf7] sm:$0x1] }
 0xe34   : > { %7422 = vst [vmem:[#allocation1 + $0x4] ss:$9 sm:$0xff] %v10740_v61  ;;  %v10789_v61 = vld [vmem:[%s11269_s19 + $0xf8] sm:$0x1] }
 0xe35   : > { %7423 = vst [vmem:[#allocation1 + $0x5] ss:$9 sm:$0xff] %v10741_v7  ;;  %v10790_v7 = vld [vmem:[%s11269_s19 + $0xf9] sm:$0x1] }
 0xe36   : > { %7424 = vst [vmem:[#allocation1 + $0x6] ss:$9 sm:$0xff] %v10742_v18  ;;  %v10791_v18 = vld [vmem:[%s11269_s19 + $0xfa] sm:$0x1] }
 0xe37   : > { %7425 = vst [vmem:[#allocation1 + $0x7] ss:$9 sm:$0xff] %v10743_v30  ;;  %v10792_v30 = vld [vmem:[%s11269_s19 + $0xfd] sm:$0x1] }
 0xe3e   : > { %v7426_v0 = vld [vmem:[#allocation1] sm:$0xff] }
 0xe3f   : > { %7427 = vst [vmem:[#allocation1] ss:$9 sm:$0xff] %v10744_v42  ;;  %7587 = vrot.lane.b32.xlu1 %v7426_v0, %s11223_s26  ;;  %v10793_v42 = vld [vmem:[%s11269_s19 + $0xfe] sm:$0x1] }
 0xe40   : > { %7428 = vst [vmem:[#allocation1 + $0x1] ss:$9 sm:$0xff] %v10745_v53  ;;  %v10794_v53 = vld [vmem:[%s11269_s19 + $0xff] sm:$0x1] }
 0xe41   : > { %7429 = vst [vmem:[#allocation1 + $0x2] ss:$9 sm:$0xff] %v10746_v13  ;;  %v10795_v13 = vld [vmem:[%s11269_s19 + $0x100] sm:$0x1] }
 0xe42   : > { %7430 = vst [vmem:[#allocation1 + $0x3] ss:$9 sm:$0xff] %v10747_v25  ;;  %v10796_v25 = vld [vmem:[%s11269_s19 + $0x101] sm:$0x1] }
 0xe43   : > { %7431 = vst [vmem:[#allocation1 + $0x4] ss:$9 sm:$0xff] %v10748_v37  ;;  %v10797_v37 = vld [vmem:[%s11269_s19 + $0x102] sm:$0x1] }
 0xe44   : > { %7432 = vst [vmem:[#allocation1 + $0x5] ss:$9 sm:$0xff] %v10749_v50  ;;  %v10798_v50 = vld [vmem:[%s11269_s19 + $0x103] sm:$0x1] }
 0xe45   : > { %7433 = vst [vmem:[#allocation1 + $0x6] ss:$9 sm:$0xff] %v10750_v14  ;;  %v10799_v14 = vld [vmem:[%s11269_s19 + $0x104] sm:$0x1] }
 0xe46   : > { %7434 = vst [vmem:[#allocation1 + $0x7] ss:$9 sm:$0xff] %v10751_v27  ;;  %v10800_v27 = vld [vmem:[%s11269_s19 + $0x105] sm:$0x1] }
 0xe4d   : > { %v7435_v46 = vld [vmem:[#allocation1] sm:$0xff] }
 0xe4e   : > { %7436 = vst [vmem:[#allocation1] ss:$9 sm:$0xff] %v10752_v43  ;;  %7589 = vrot.lane.b32.xlu2 %v7435_v46, %s11223_s26  ;;  %v10801_v43 = vld [vmem:[%s11269_s19 + $0x106] sm:$0x1]  ;;  %v10805_v46 = vld [vmem:[%s11269_s19 + $0x10a] sm:$0x1] }
 0xe4f   : > { %7437 = vst [vmem:[#allocation1 + $0x1] ss:$9 sm:$0xff] %v10753_v6 }
 0xe50   : > { %7438 = vst [vmem:[#allocation1 + $0x2] ss:$9 sm:$0xff] %v10754_v39  ;;  %v10804_v39 = vld [vmem:[%s11269_s19 + $0x109] sm:$0x1] }
 0xe51   : > { %7439 = vst [vmem:[#allocation1 + $0x3] ss:$9 sm:$0xff] %v10755_v48  ;;  %v10806_v48 = vld [vmem:[%s11269_s19 + $0x10b] sm:$0x1] }
 0xe52   : > { %7440 = vst [vmem:[#allocation1 + $0x4] ss:$9 sm:$0xff] %v10756_v49  ;;  %v10807_v49 = vld [vmem:[%s11269_s19 + $0x10c] sm:$0x1] }
 0xe53   : > { %7441 = vst [vmem:[#allocation1 + $0x5] ss:$9 sm:$0xff] %v10757_v52  ;;  %v10808_v52 = vld [vmem:[%s11269_s19 + $0x10f] sm:$0x1] }
 0xe54   : > { %7442 = vst [vmem:[#allocation1 + $0x6] ss:$9 sm:$0xff] %v10758_v55  ;;  %v5735_v55 = vpop.permute.xlu1 %5734 }
 0xe55   : > { %7443 = vst [vmem:[#allocation1 + $0x7] ss:$9 sm:$0xff] %v10759_v58  ;;  %v10809_v58 = vld [vmem:[%s11269_s19 + $0x110] sm:$0x1] }
 0xe56   : > { %5802 = vst.msk [vmem:[#allocation2 + $0xe8] sm:$0xff] %vm5772_vm5, %v5735_v55  ;;  %v10853_v55 = vld [vmem:[%s11269_s19 + $0x140] sm:$0x1] }
 0xe5c   : > { %v7444_v4 = vld [vmem:[#allocation1] sm:$0xff] }
 0xe5d   : > { %7591 = vrot.lane.b32.xlu0 %v7444_v4, %s11223_s26  ;;  %7445 = vst [vmem:[#allocation1] ss:$9 sm:$0xff] %v10760_v60  ;;  %v10810_v60 = vld [vmem:[%s11269_s19 + $0x111] sm:$0x1]  ;;  %v10812_v4 = vld [vmem:[%s11269_s19 + $0x113] sm:$0x1] }
 0xe5e   : > { %7446 = vst [vmem:[#allocation1 + $0x1] ss:$9 sm:$0xff] %v10761_v62 }
 0xe5f   : > { %7447 = vst [vmem:[#allocation1 + $0x2] ss:$9 sm:$0xff] %v10762_v3  ;;  %v10811_v3 = vld [vmem:[%s11269_s19 + $0x112] sm:$0x1] }
 0xe60   : > { %7448 = vst [vmem:[#allocation1 + $0x3] ss:$9 sm:$0xff] %v10763_v5  ;;  %v10813_v5 = vld [vmem:[%s11269_s19 + $0x114] sm:$0x1] }
 0xe61   : > { %7449 = vst [vmem:[#allocation1 + $0x4] ss:$9 sm:$0xff] %v10764_v8  ;;  %v10814_v8 = vld [vmem:[%s11269_s19 + $0x115] sm:$0x1] }
 0xe62   : > { %7450 = vst [vmem:[#allocation1 + $0x5] ss:$9 sm:$0xff] %v10765_v9  ;;  %v10815_v9 = vld [vmem:[%s11269_s19 + $0x116] sm:$0x1] }
 0xe63   : > { %7451 = vst [vmem:[#allocation1 + $0x6] ss:$9 sm:$0xff] %v10766_v12  ;;  %v6636_v12 = vpop.permute.xlu2 %6635 }
 0xe64   : > { %7452 = vst [vmem:[#allocation1 + $0x7] ss:$9 sm:$0xff] %v10767_v15  ;;  %v10816_v15 = vld [vmem:[%s11269_s19 + $0x117] sm:$0x1] }
 0xe65   : > { %6722 = vst.msk [vmem:[#allocation2 + $0x50] sm:$0xff] %vm6711_vm6, %v6636_v12  ;;  %v10861_v12 = vld [vmem:[%s11269_s19 + $0x2b] sm:$0x1] }
 0xe6b   : > { %v7453_v19 = vld [vmem:[#allocation1] sm:$0xff] }
 0xe6c   : > { %7454 = vst [vmem:[#allocation1] ss:$9 sm:$0xff] %v10768_v16  ;;  %7593 = vrot.lane.b32.xlu1 %v7453_v19, %s11223_s26  ;;  %v10817_v16 = vld [vmem:[%s11269_s19 + $0x118] sm:$0x1] }
 0xe6d   : > { %7455 = vst [vmem:[#allocation1 + $0x1] ss:$9 sm:$0xff] %v10769_v17  ;;  %v10818_v17 = vld [vmem:[%s11269_s19 + $0x119] sm:$0x1] }
 0xe6e   : > { %7456 = vst [vmem:[#allocation1 + $0x2] ss:$9 sm:$0xff] %v10770_v22  ;;  %v10819_v22 = vld [vmem:[%s11269_s19 + $0x11a] sm:$0x1] }
 0xe6f   : > { %7457 = vst [vmem:[#allocation1 + $0x3] ss:$9 sm:$0xff] %v10771_v24  ;;  %v10820_v24 = vld [vmem:[%s11269_s19 + $0x11b] sm:$0x1] }
 0xe70   : > { %7458 = vst [vmem:[#allocation1 + $0x4] ss:$9 sm:$0xff] %v10772_v26  ;;  %v10821_v26 = vld [vmem:[%s11269_s19 + $0x11c] sm:$0x1] }
 0xe71   : > { %7459 = vst [vmem:[#allocation1 + $0x5] ss:$9 sm:$0xff] %v10773_v28  ;;  %v10822_v28 = vld [vmem:[%s11269_s19 + $0x11d] sm:$0x1] }
 0xe72   : > { %7460 = vst [vmem:[#allocation1 + $0x6] ss:$9 sm:$0xff] %v10774_v32  ;;  %v10823_v32 = vld [vmem:[%s11269_s19 + $0x11e] sm:$0x1] }
 0xe73   : > { %7461 = vst [vmem:[#allocation1 + $0x7] ss:$9 sm:$0xff] %v10775_v33  ;;  %v10824_v33 = vld [vmem:[%s11269_s19 + $0x121] sm:$0x1] }
 0xe7a   : > { %v7462_v40 = vld [vmem:[#allocation1] sm:$0xff] }
 0xe7b   : > { %7463 = vst [vmem:[#allocation1] ss:$9 sm:$0xff] %v10776_v34  ;;  %7595 = vrot.lane.b32.xlu2 %v7462_v40, %s11223_s26  ;;  %v10825_v34 = vld [vmem:[%s11269_s19 + $0x122] sm:$0x1]  ;;  %v10826_v40 = vld [vmem:[%s11269_s19 + $0x123] sm:$0x1] }
 0xe7c   : > { %7464 = vst [vmem:[#allocation1 + $0x1] ss:$9 sm:$0xff] %v10777_v35  ;;  %v6616_v35 = vpop.permute.xlu1 %6615 }
 0xe7d   : > { %7465 = vst [vmem:[#allocation1 + $0x2] ss:$9 sm:$0xff] %v10778_v36 }
 0xe7e   : > { %7466 = vst [vmem:[#allocation1 + $0x3] ss:$9 sm:$0xff] %v10779_v20  ;;  %v10827_v20 = vld [vmem:[%s11269_s19 + $0x124] sm:$0x1] }
 0xe7f   : > { %7467 = vst [vmem:[#allocation1 + $0x4] ss:$9 sm:$0xff] %v10780_v29  ;;  %v10828_v29 = vld [vmem:[%s11269_s19 + $0x125] sm:$0x1] }
 0xe80   : > { %7468 = vst [vmem:[#allocation1 + $0x5] ss:$9 sm:$0xff] %v10781_v38  ;;  %v10829_v38 = vld [vmem:[%s11269_s19 + $0x126] sm:$0x1] }
 0xe81   : > { %7469 = vst [vmem:[#allocation1 + $0x6] ss:$9 sm:$0xff] %v10782_v45  ;;  %v10830_v45 = vld [vmem:[%s11269_s19 + $0x127] sm:$0x1] }
 0xe82   : > { %7470 = vst [vmem:[#allocation1 + $0x7] ss:$9 sm:$0xff] %v10783_v47  ;;  %v10831_v47 = vld [vmem:[%s11269_s19 + $0x128] sm:$0x1] }
 0xe83   : > { %6712 = vst.msk [vmem:[#allocation2] sm:$0xff] %vm6711_vm6, %v6616_v35  ;;  %v10870_v35 = vld [vmem:[%s11269_s19 + $0x34] sm:$0x1] }
 0xe89   : > { %v13762_v31 = vld [vmem:[#allocation1] sm:$0xff] }
 0xe8a   : > { %7472 = vst [vmem:[#allocation1] ss:$9 sm:$0xff] %v10784_v56  ;;  %v6638_v56 = vpop.permute.xlu0 %6637 }
 0xe8b   : > { %7473 = vst [vmem:[#allocation1 + $0x1] ss:$9 sm:$0xff] %v10785_v1  ;;  %v6642_v1 = vpop.permute.xlu2 %6641 }
 0xe8c   : > { %7474 = vst [vmem:[#allocation1 + $0x2] ss:$9 sm:$0xff] %v10786_v21  ;;  %v10832_v21 = vld [vmem:[%s11269_s19 + $0x129] sm:$0x1] }
 0xe8d   : > { %7475 = vst [vmem:[#allocation1 + $0x3] ss:$9 sm:$0xff] %v10787_v41  ;;  %v10833_v41 = vld [vmem:[%s11269_s19 + $0x12a] sm:$0x1] }
 0xe8e   : > { %7476 = vst [vmem:[#allocation1 + $0x4] ss:$9 sm:$0xff] %v10788_v51  ;;  %v10834_v51 = vld [vmem:[%s11269_s19 + $0x12b] sm:$0x1] }
 0xe8f   : > { %7477 = vst [vmem:[#allocation1 + $0x5] ss:$9 sm:$0xff] %v10789_v61 }
 0xe90   : > { %7478 = vst [vmem:[#allocation1 + $0x6] ss:$9 sm:$0xff] %v10790_v7  ;;  %v10835_v7 = vld [vmem:[%s11269_s19 + $0x12c] sm:$0x1] }
 0xe91   : > { %7479 = vst [vmem:[#allocation1 + $0x7] ss:$9 sm:$0xff] %v10791_v18  ;;  %v10836_v18 = vld [vmem:[%s11269_s19 + $0x12d] sm:$0x1] }
 0xe92   : > { %6723 = vst.msk [vmem:[#allocation2 + $0x58] sm:$0xff] %vm6711_vm6, %v6638_v56  ;;  %v10877_v56 = vld [vmem:[%s11269_s19 + $0x3d] sm:$0x1] }
 0xe93   : > { %6725 = vst.msk [vmem:[#allocation2 + $0x68] sm:$0xff] %vm6711_vm6, %v6642_v1  ;;  %v10878_v1 = vld [vmem:[%s11269_s19 + $0x3e] sm:$0x1] }
 0xe98   : > { %v13772_v0 = vld [vmem:[#allocation1] sm:$0xff] }
 0xe99   : > { %7481 = vst [vmem:[#allocation1] ss:$9 sm:$0xff] %v10792_v30  ;;  %v10837_v30 = vld [vmem:[%s11269_s19 + $0x12e] sm:$0x1] }
 0xe9a   : > { %7482 = vst [vmem:[#allocation1 + $0x1] ss:$9 sm:$0xff] %v10793_v42  ;;  %v10838_v42 = vld [vmem:[%s11269_s19 + $0x12f] sm:$0x1] }
 0xe9b   : > { %7483 = vst [vmem:[#allocation1 + $0x2] ss:$9 sm:$0xff] %v10794_v53  ;;  %v10839_v53 = vld [vmem:[%s11269_s19 + $0x130] sm:$0x1] }
 0xe9c   : > { %7484 = vst [vmem:[#allocation1 + $0x3] ss:$9 sm:$0xff] %v10795_v13  ;;  %v10840_v13 = vld [vmem:[%s11269_s19 + $0x133] sm:$0x1] }
 0xe9d   : > { %7485 = vst [vmem:[#allocation1 + $0x4] ss:$9 sm:$0xff] %v10796_v25  ;;  %v10841_v25 = vld [vmem:[%s11269_s19 + $0x134] sm:$0x1] }
 0xe9e   : > { %7486 = vst [vmem:[#allocation1 + $0x5] ss:$9 sm:$0xff] %v10797_v37 }
 0xe9f   : > { %7487 = vst [vmem:[#allocation1 + $0x6] ss:$9 sm:$0xff] %v10798_v50  ;;  %v10842_v50 = vld [vmem:[%s11269_s19 + $0x135] sm:$0x1] }
 0xea0   : > { %7488 = vst [vmem:[#allocation1 + $0x7] ss:$9 sm:$0xff] %v10799_v14  ;;  %v10843_v14 = vld [vmem:[%s11269_s19 + $0x136] sm:$0x1] }
 0xea7   : > { %v7489_v6 = vld [vmem:[#allocation1] sm:$0xff] }
 0xea8   : > { %7490 = vst [vmem:[#allocation1] ss:$9 sm:$0xff] %v10800_v27  ;;  %7601 = vrot.lane.b32.xlu2 %v7489_v6, %s11223_s26  ;;  %v10844_v27 = vld [vmem:[%s11269_s19 + $0x137] sm:$0x1]  ;;  %v10847_v6 = vld [vmem:[%s11269_s19 + $0x13a] sm:$0x1] }
 0xea9   : > { %7491 = vst [vmem:[#allocation1 + $0x1] ss:$9 sm:$0xff] %v10801_v43  ;;  %v10845_v43 = vld [vmem:[%s11269_s19 + $0x138] sm:$0x1] }
 0xeaa   : > { %7492 = vst [vmem:[#allocation1 + $0x2] ss:$9 sm:$0xff] %v10802_v57  ;;  %v10846_v57 = vld [vmem:[%s11269_s19 + $0x139] sm:$0x1] }
 0xeab   : > { %7493 = vst [vmem:[#allocation1 + $0x3] ss:$9 sm:$0xff] %v10803_v23  ;;  %v10848_v23 = vld [vmem:[%s11269_s19 + $0x13b] sm:$0x1] }
 0xeac   : > { %7494 = vst [vmem:[#allocation1 + $0x4] ss:$9 sm:$0xff] %v10804_v39  ;;  %v10849_v39 = vld [vmem:[%s11269_s19 + $0x13c] sm:$0x1] }
 0xead   : > { %7495 = vst [vmem:[#allocation1 + $0x5] ss:$9 sm:$0xff] %v10805_v46  ;;  %v10850_v46 = vld [vmem:[%s11269_s19 + $0x13d] sm:$0x1] }
 0xeae   : > { %7496 = vst [vmem:[#allocation1 + $0x6] ss:$9 sm:$0xff] %v10806_v48 }
 0xeaf   : > { %7497 = vst [vmem:[#allocation1 + $0x7] ss:$9 sm:$0xff] %v10807_v49  ;;  %v10851_v49 = vld [vmem:[%s11269_s19 + $0x13e] sm:$0x1] }
 0xeb6   : > { %v7498_v62 = vld [vmem:[#allocation1] sm:$0xff] }
 0xeb7   : > { %7499 = vst [vmem:[#allocation1] ss:$9 sm:$0xff] %v10808_v52  ;;  %7603 = vrot.lane.b32.xlu2 %v7498_v62, %s11223_s26  ;;  %v10852_v52 = vld [vmem:[%s11269_s19 + $0x13f] sm:$0x1]  ;;  %v10857_v62 = vld [vmem:[%s11269_s19 + $0x27] sm:$0x1] }
 0xeb8   : > { %7500 = vst [vmem:[#allocation1 + $0x1] ss:$9 sm:$0xff] %v10809_v58  ;;  %v10854_v58 = vld [vmem:[%s11269_s19 + $0x141] sm:$0x1] }
 0xeb9   : > { %7501 = vst [vmem:[#allocation1 + $0x2] ss:$9 sm:$0xff] %v10810_v60  ;;  %v10856_v60 = vld [vmem:[%s11269_s19 + $0x26] sm:$0x1] }
 0xeba   : > { %7502 = vst [vmem:[#allocation1 + $0x3] ss:$9 sm:$0xff] %v10811_v3  ;;  %v6622_v3 = vpop.permute.xlu1 %6621 }
 0xebb   : > { %7503 = vst [vmem:[#allocation1 + $0x4] ss:$9 sm:$0xff] %v10812_v4 }
 0xebc   : > { %7504 = vst [vmem:[#allocation1 + $0x5] ss:$9 sm:$0xff] %v10813_v5  ;;  %v10858_v5 = vld [vmem:[%s11269_s19 + $0x28] sm:$0x1] }
 0xebd   : > { %7505 = vst [vmem:[#allocation1 + $0x6] ss:$9 sm:$0xff] %v10814_v8  ;;  %v10859_v8 = vld [vmem:[%s11269_s19 + $0x29] sm:$0x1] }
 0xebe   : > { %7506 = vst [vmem:[#allocation1 + $0x7] ss:$9 sm:$0xff] %v10815_v9  ;;  %v10860_v9 = vld [vmem:[%s11269_s19 + $0x2a] sm:$0x1] }
 0xebf   : > { %6715 = vst.msk [vmem:[#allocation2 + $0x18] sm:$0xff] %vm6711_vm6, %v6622_v3  ;;  %v10901_v3 = vld [vmem:[%s11269_s19 + $0x57] sm:$0x1] }
 0xec5   : > { %v7507_v19 = vld [vmem:[#allocation1] sm:$0xff] }
 0xec6   : > { %7605 = vrot.lane.b32.xlu0 %v7507_v19, %s11223_s26  ;;  %7508 = vst [vmem:[#allocation1] ss:$9 sm:$0xff] %v10816_v15  ;;  %v10862_v15 = vld [vmem:[%s11269_s19 + $0x2c] sm:$0x1]  ;;  %v6648_v19 = vpop.permute.xlu2 %6647 }
 0xec7   : > { %7509 = vst [vmem:[#allocation1 + $0x1] ss:$9 sm:$0xff] %v10817_v16  ;;  %v10863_v16 = vld [vmem:[%s11269_s19 + $0x2d] sm:$0x1] }
 0xec8   : > { %7510 = vst [vmem:[#allocation1 + $0x2] ss:$9 sm:$0xff] %v10818_v17  ;;  %v6644_v17 = vpop.permute.xlu0 %6643 }
 0xec9   : > { %7511 = vst [vmem:[#allocation1 + $0x3] ss:$9 sm:$0xff] %v10819_v22  ;;  %v10864_v22 = vld [vmem:[%s11269_s19 + $0x2e] sm:$0x1] }
 0xeca   : > { %7512 = vst [vmem:[#allocation1 + $0x4] ss:$9 sm:$0xff] %v10820_v24  ;;  %v10865_v24 = vld [vmem:[%s11269_s19 + $0x2f] sm:$0x1] }
 0xecb   : > { %7513 = vst [vmem:[#allocation1 + $0x5] ss:$9 sm:$0xff] %v10821_v26  ;;  %v10866_v26 = vld [vmem:[%s11269_s19 + $0x30] sm:$0x1] }
 0xecc   : > { %7514 = vst [vmem:[#allocation1 + $0x6] ss:$9 sm:$0xff] %v10822_v28 }
 0xecd   : > { %7515 = vst [vmem:[#allocation1 + $0x7] ss:$9 sm:$0xff] %v10823_v32  ;;  %v10867_v32 = vld [vmem:[%s11269_s19 + $0x31] sm:$0x1] }
 0xece   : > { %6726 = vst.msk [vmem:[#allocation2 + $0x70] sm:$0xff] %vm6711_vm6, %v6644_v17  ;;  %v10907_v17 = vld [vmem:[%s11269_s19 + $0x5f] sm:$0x1] }
 0xecf   : > { %6728 = vst.msk [vmem:[#allocation2 + $0x80] sm:$0xff] %vm6711_vm6, %v6648_v19  ;;  %v10908_v19 = vld [vmem:[%s11269_s19 + $0x60] sm:$0x1] }
 0xed4   : > { %v7516_v36 = vld [vmem:[#allocation1] sm:$0xff] }
 0xed5   : > { %7517 = vst [vmem:[#allocation1] ss:$9 sm:$0xff] %v10824_v33  ;;  %7607 = vrot.lane.b32.xlu1 %v7516_v36, %s11223_s26  ;;  %v10868_v33 = vld [vmem:[%s11269_s19 + $0x32] sm:$0x1]  ;;  %v10871_v36 = vld [vmem:[%s11269_s19 + $0x35] sm:$0x1] }
 0xed6   : > { %7518 = vst [vmem:[#allocation1 + $0x1] ss:$9 sm:$0xff] %v10825_v34  ;;  %v10869_v34 = vld [vmem:[%s11269_s19 + $0x33] sm:$0x1] }
 0xed7   : > { %7519 = vst [vmem:[#allocation1 + $0x2] ss:$9 sm:$0xff] %v10826_v40  ;;  %v10872_v40 = vld [vmem:[%s11269_s19 + $0x38] sm:$0x1] }
 0xed8   : > { %7520 = vst [vmem:[#allocation1 + $0x3] ss:$9 sm:$0xff] %v10827_v20  ;;  %v10873_v20 = vld [vmem:[%s11269_s19 + $0x39] sm:$0x1] }
 0xed9   : > { %7521 = vst [vmem:[#allocation1 + $0x4] ss:$9 sm:$0xff] %v10828_v29 }
 0xeda   : > { %7522 = vst [vmem:[#allocation1 + $0x5] ss:$9 sm:$0xff] %v10829_v38  ;;  %v10874_v38 = vld [vmem:[%s11269_s19 + $0x3a] sm:$0x1] }
 0xedb   : > { %7523 = vst [vmem:[#allocation1 + $0x6] ss:$9 sm:$0xff] %v10830_v45  ;;  %v10875_v45 = vld [vmem:[%s11269_s19 + $0x3b] sm:$0x1] }
 0xedc   : > { %7524 = vst [vmem:[#allocation1 + $0x7] ss:$9 sm:$0xff] %v10831_v47  ;;  %v10876_v47 = vld [vmem:[%s11269_s19 + $0x3c] sm:$0x1] }
 0xee3   : > { %v7525_v61 = vld [vmem:[#allocation1] sm:$0xff] }
 0xee4   : > { %7526 = vst [vmem:[#allocation1] ss:$9 sm:$0xff] %v10832_v21  ;;  %7609 = vrot.lane.b32.xlu2 %v7525_v61, %s11223_s26  ;;  %v10879_v21 = vld [vmem:[%s11269_s19 + $0x3f] sm:$0x1]  ;;  %v6628_v61 = vpop.permute.xlu1 %6627 }
 0xee5   : > { %7527 = vst [vmem:[#allocation1 + $0x1] ss:$9 sm:$0xff] %v10833_v41  ;;  %v10880_v41 = vld [vmem:[%s11269_s19 + $0x40] sm:$0x1] }
 0xee6   : > { %7528 = vst [vmem:[#allocation1 + $0x2] ss:$9 sm:$0xff] %v10834_v51  ;;  %v10881_v51 = vld [vmem:[%s11269_s19 + $0x41] sm:$0x1] }
 0xee7   : > { %7529 = vst [vmem:[#allocation1 + $0x3] ss:$9 sm:$0xff] %v10835_v7  ;;  %v10882_v7 = vld [vmem:[%s11269_s19 + $0x42] sm:$0x1] }
 0xee8   : > { %7530 = vst [vmem:[#allocation1 + $0x4] ss:$9 sm:$0xff] %v10836_v18 }
 0xee9   : > { %7531 = vst [vmem:[#allocation1 + $0x5] ss:$9 sm:$0xff] %v10837_v30  ;;  %v10883_v30 = vld [vmem:[%s11269_s19 + $0x43] sm:$0x1] }
 0xeea   : > { %7532 = vst [vmem:[#allocation1 + $0x6] ss:$9 sm:$0xff] %v10838_v42  ;;  %v10884_v42 = vld [vmem:[%s11269_s19 + $0x44] sm:$0x1] }
 0xeeb   : > { %7533 = vst [vmem:[#allocation1 + $0x7] ss:$9 sm:$0xff] %v10839_v53  ;;  %v10885_v53 = vld [vmem:[%s11269_s19 + $0x45] sm:$0x1] }
 0xeec   : > { %6718 = vst.msk [vmem:[#allocation2 + $0x30] sm:$0xff] %vm6711_vm6, %v6628_v61  ;;  %v10923_v61 = vld [vmem:[%s11269_s19 + $0x71] sm:$0x1] }
 0xef2   : > { %v7534_v37 = vld [vmem:[#allocation1] sm:$0xff] }
 0xef3   : > { %7611 = vrot.lane.b32.xlu0 %v7534_v37, %s11223_s26  ;;  %7535 = vst [vmem:[#allocation1] ss:$9 sm:$0xff] %v10840_v13  ;;  %v10886_v13 = vld [vmem:[%s11269_s19 + $0x46] sm:$0x1]  ;;  %v6650_v37 = vpop.permute.xlu2 %6649 }
 0xef4   : > { %7536 = vst [vmem:[#allocation1 + $0x1] ss:$9 sm:$0xff] %v10841_v25  ;;  %v10887_v25 = vld [vmem:[%s11269_s19 + $0x47] sm:$0x1] }
 0xef5   : > { %7537 = vst [vmem:[#allocation1 + $0x2] ss:$9 sm:$0xff] %v10842_v50  ;;  %v6652_v50 = vpop.permute.xlu0 %6651 }
 0xef6   : > { %7538 = vst [vmem:[#allocation1 + $0x3] ss:$9 sm:$0xff] %v10843_v14  ;;  %v10888_v14 = vld [vmem:[%s11269_s19 + $0x4a] sm:$0x1] }
 0xef7   : > { %7539 = vst [vmem:[#allocation1 + $0x4] ss:$9 sm:$0xff] %v10844_v27  ;;  %v10889_v27 = vld [vmem:[%s11269_s19 + $0x4b] sm:$0x1] }
 0xef8   : > { %7540 = vst [vmem:[#allocation1 + $0x5] ss:$9 sm:$0xff] %v10845_v43  ;;  %v10890_v43 = vld [vmem:[%s11269_s19 + $0x4c] sm:$0x1] }
 0xef9   : > { %7541 = vst [vmem:[#allocation1 + $0x6] ss:$9 sm:$0xff] %v10846_v57 }
 0xefa   : > { %7542 = vst [vmem:[#allocation1 + $0x7] ss:$9 sm:$0xff] %v10847_v6  ;;  %v10891_v6 = vld [vmem:[%s11269_s19 + $0x4d] sm:$0x1] }
 0xefb   : > { %6729 = vst.msk [vmem:[#allocation2 + $0x88] sm:$0xff] %vm6711_vm6, %v6650_v37  ;;  %v10929_v37 = vld [vmem:[%s11269_s19 + $0x77] sm:$0x1] }
 0xefc   : > { %6730 = vst.msk [vmem:[#allocation2 + $0x90] sm:$0xff] %vm6711_vm6, %v6652_v50 }
 0xf01   : > { %v13842_v48 = vld [vmem:[#allocation1] sm:$0xff] }
 0xf02   : > { %7544 = vst [vmem:[#allocation1] ss:$9 sm:$0xff] %v10848_v23  ;;  %v10892_v23 = vld [vmem:[%s11269_s19 + $0x4e] sm:$0x1] }
 0xf03   : > { %7545 = vst [vmem:[#allocation1 + $0x1] ss:$9 sm:$0xff] %v10849_v39  ;;  %v10893_v39 = vld [vmem:[%s11269_s19 + $0x4f] sm:$0x1] }
 0xf04   : > { %7546 = vst [vmem:[#allocation1 + $0x2] ss:$9 sm:$0xff] %v10850_v46  ;;  %v10894_v46 = vld [vmem:[%s11269_s19 + $0x50] sm:$0x1] }
 0xf05   : > { %7547 = vst [vmem:[#allocation1 + $0x3] ss:$9 sm:$0xff] %v10851_v49  ;;  %v10895_v49 = vld [vmem:[%s11269_s19 + $0x51] sm:$0x1] }
 0xf06   : > { %7548 = vst [vmem:[#allocation1 + $0x4] ss:$9 sm:$0xff] %v10852_v52  ;;  %v10896_v52 = vld [vmem:[%s11269_s19 + $0x52] sm:$0x1] }
 0xf07   : > { %7549 = vst [vmem:[#allocation1 + $0x5] ss:$9 sm:$0xff] %v10853_v55  ;;  %v10897_v55 = vld [vmem:[%s11269_s19 + $0x53] sm:$0x1] }
 0xf08   : > { %7550 = vst [vmem:[#allocation1 + $0x6] ss:$9 sm:$0xff] %v10854_v58 }
 0xf09   : > { %7551 = vst [vmem:[#allocation1 + $0x7] ss:$9 sm:$0xff] %v10855_v59  ;;  %v10898_v59 = vld [vmem:[%s11269_s19 + $0x54] sm:$0x1] }
 0xf10   : > { %v13851_v4 = vld [vmem:[#allocation1] sm:$0xff] }
 0xf11   : > { %8196 = vst [vmem:[#allocation1] ss:$9 sm:$0xff] %v10856_v60  ;;  %v10899_v60 = vld [vmem:[%s11269_s19 + $0x55] sm:$0x1] }
 0xf12   : > { %8198 = vst [vmem:[#allocation1 + $0x1] ss:$9 sm:$0xff] %v10857_v62  ;;  %v10900_v62 = vld [vmem:[%s11269_s19 + $0x56] sm:$0x1] }
 0xf13   : > { %8200 = vst [vmem:[#allocation1 + $0x2] ss:$9 sm:$0xff] %v10858_v5  ;;  %v10902_v5 = vld [vmem:[%s11269_s19 + $0x58] sm:$0x1] }
 0xf14   : > { %8202 = vst [vmem:[#allocation1 + $0x3] ss:$9 sm:$0xff] %v10859_v8  ;;  %v10903_v8 = vld [vmem:[%s11269_s19 + $0x59] sm:$0x1] }
 0xf15   : > { %8204 = vst [vmem:[#allocation1 + $0x4] ss:$9 sm:$0xff] %v10860_v9  ;;  %v10904_v9 = vld [vmem:[%s11269_s19 + $0x5c] sm:$0x1] }
 0xf16   : > { %8206 = vst [vmem:[#allocation1 + $0x5] ss:$9 sm:$0xff] %v10861_v12  ;;  %v10905_v12 = vld [vmem:[%s11269_s19 + $0x5d] sm:$0x1] }
 0xf17   : > { %8208 = vst [vmem:[#allocation1 + $0x6] ss:$9 sm:$0xff] %v10862_v15  ;;  %v10906_v15 = vld [vmem:[%s11269_s19 + $0x5e] sm:$0x1] }
 0xf18   : > { %8210 = vst [vmem:[#allocation1 + $0x7] ss:$9 sm:$0xff] %v10863_v16 }
 0xf1f   : > { %v8211_v28 = vld [vmem:[#allocation1] sm:$0xff] }
 0xf20   : > { %8212 = vst [vmem:[#allocation1] ss:$9 sm:$0xff] %v10864_v22  ;;  %8491 = vrot.lane.b32.xlu2 %v8211_v28, %s11224_s27  ;;  %v10909_v22 = vld [vmem:[%s11269_s19 + $0x61] sm:$0x1]  ;;  %v10912_v28 = vld [vmem:[%s11269_s19 + $0x64] sm:$0x1] }
 0xf21   : > { %8213 = vst [vmem:[#allocation1 + $0x1] ss:$9 sm:$0xff] %v10865_v24  ;;  %v10910_v24 = vld [vmem:[%s11269_s19 + $0x62] sm:$0x1] }
 0xf22   : > { %8214 = vst [vmem:[#allocation1 + $0x2] ss:$9 sm:$0xff] %v10866_v26  ;;  %v10911_v26 = vld [vmem:[%s11269_s19 + $0x63] sm:$0x1] }
 0xf23   : > { %8215 = vst [vmem:[#allocation1 + $0x3] ss:$9 sm:$0xff] %v10867_v32  ;;  %v10913_v32 = vld [vmem:[%s11269_s19 + $0x65] sm:$0x1] }
 0xf24   : > { %8216 = vst [vmem:[#allocation1 + $0x4] ss:$9 sm:$0xff] %v10868_v33  ;;  %v6634_v33 = vpop.permute.xlu1 %6633 }
 0xf25   : > { %8217 = vst [vmem:[#allocation1 + $0x5] ss:$9 sm:$0xff] %v10869_v34  ;;  %v10914_v34 = vld [vmem:[%s11269_s19 + $0x66] sm:$0x1] }
 0xf26   : > { %8218 = vst [vmem:[#allocation1 + $0x6] ss:$9 sm:$0xff] %v10870_v35 }
 0xf27   : > { %8219 = vst [vmem:[#allocation1 + $0x7] ss:$9 sm:$0xff] %v10871_v36  ;;  %v10915_v36 = vld [vmem:[%s11269_s19 + $0x67] sm:$0x1] }
 0xf28   : > { %6721 = vst.msk [vmem:[#allocation2 + $0x48] sm:$0xff] %vm6711_vm6, %v6634_v33  ;;  %v10954_v33 = vld [vmem:[%s11269_s19 + $0x94] sm:$0x1] }
 0xf2e   : > { %v8220_v29 = vld [vmem:[#allocation1] sm:$0xff] }
 0xf2f   : > { %8493 = vrot.lane.b32.xlu0 %v8220_v29, %s11224_s27  ;;  %8221 = vst [vmem:[#allocation1] ss:$9 sm:$0xff] %v10872_v40  ;;  %v10916_v40 = vld [vmem:[%s11269_s19 + $0x68] sm:$0x1]  ;;  %v10918_v29 = vld [vmem:[%s11269_s19 + $0x6a] sm:$0x1] }
 0xf30   : > { %8222 = vst [vmem:[#allocation1 + $0x1] ss:$9 sm:$0xff] %v10873_v20  ;;  %v10917_v20 = vld [vmem:[%s11269_s19 + $0x69] sm:$0x1] }
 0xf31   : > { %8223 = vst [vmem:[#allocation1 + $0x2] ss:$9 sm:$0xff] %v10874_v38  ;;  %v10919_v38 = vld [vmem:[%s11269_s19 + $0x6b] sm:$0x1] }
 0xf32   : > { %8224 = vst [vmem:[#allocation1 + $0x3] ss:$9 sm:$0xff] %v10875_v45  ;;  %v6656_v45 = vpop.permute.xlu2 %6655 }
 0xf33   : > { %8225 = vst [vmem:[#allocation1 + $0x4] ss:$9 sm:$0xff] %v10876_v47  ;;  %v6658_v47 = vpop.permute.xlu0 %6657 }
 0xf34   : > { %8226 = vst [vmem:[#allocation1 + $0x5] ss:$9 sm:$0xff] %v10877_v56  ;;  %v10920_v56 = vld [vmem:[%s11269_s19 + $0x6e] sm:$0x1] }
 0xf35   : > { %8227 = vst [vmem:[#allocation1 + $0x6] ss:$9 sm:$0xff] %v10878_v1  ;;  %v10921_v1 = vld [vmem:[%s11269_s19 + $0x6f] sm:$0x1] }
 0xf36   : > { %8228 = vst [vmem:[#allocation1 + $0x7] ss:$9 sm:$0xff] %v10879_v21  ;;  %v6640_v21 = vpop.permute.xlu1 %6639 }
 0xf37   : > { %6732 = vst.msk [vmem:[#allocation2 + $0xa0] sm:$0xff] %vm6711_vm6, %v6656_v45  ;;  %v10960_v45 = vld [vmem:[%s11269_s19 + $0x9a] sm:$0x1] }
 0xf38   : > { %6733 = vst.msk [vmem:[#allocation2 + $0xa8] sm:$0xff] %vm6711_vm6, %v6658_v47  ;;  %v10961_v47 = vld [vmem:[%s11269_s19 + $0x9b] sm:$0x1] }
 0xf39   : > { %6724 = vst.msk [vmem:[#allocation2 + $0x60] sm:$0xff] %vm6711_vm6, %v6640_v21  ;;  %v10963_v21 = vld [vmem:[%s11269_s19 + $0x9d] sm:$0x1] }
 0xf3d   : > { %v8229_v18 = vld [vmem:[#allocation1] sm:$0xff] }
 0xf3e   : > { %8230 = vst [vmem:[#allocation1] ss:$9 sm:$0xff] %v10880_v41  ;;  %8495 = vrot.lane.b32.xlu1 %v8229_v18, %s11224_s27  ;;  %v10922_v41 = vld [vmem:[%s11269_s19 + $0x70] sm:$0x1]  ;;  %v10925_v18 = vld [vmem:[%s11269_s19 + $0x73] sm:$0x1] }
 0xf3f   : > { %8231 = vst [vmem:[#allocation1 + $0x1] ss:$9 sm:$0xff] %v10881_v51 }
 0xf40   : > { %8232 = vst [vmem:[#allocation1 + $0x2] ss:$9 sm:$0xff] %v10882_v7  ;;  %v10924_v7 = vld [vmem:[%s11269_s19 + $0x72] sm:$0x1] }
 0xf41   : > { %8233 = vst [vmem:[#allocation1 + $0x3] ss:$9 sm:$0xff] %v10883_v30  ;;  %v10926_v30 = vld [vmem:[%s11269_s19 + $0x74] sm:$0x1] }
 0xf42   : > { %8234 = vst [vmem:[#allocation1 + $0x4] ss:$9 sm:$0xff] %v10884_v42  ;;  %v10927_v42 = vld [vmem:[%s11269_s19 + $0x75] sm:$0x1] }
 0xf43   : > { %8235 = vst [vmem:[#allocation1 + $0x5] ss:$9 sm:$0xff] %v10885_v53  ;;  %v6664_v53 = vpop.permute.xlu0 %6663 }
 0xf44   : > { %8236 = vst [vmem:[#allocation1 + $0x6] ss:$9 sm:$0xff] %v10886_v13  ;;  %v6668_v13 = vpop.permute.xlu2 %6667 }
 0xf45   : > { %8237 = vst [vmem:[#allocation1 + $0x7] ss:$9 sm:$0xff] %v10887_v25  ;;  %v10928_v25 = vld [vmem:[%s11269_s19 + $0x76] sm:$0x1] }
 0xf46   : > { %6736 = vst.msk [vmem:[#allocation2 + $0xc0] sm:$0xff] %vm6711_vm6, %v6664_v53 }
 0xf47   : > { %6738 = vst.msk [vmem:[#allocation2 + $0xd0] sm:$0xff] %vm6711_vm6, %v6668_v13  ;;  %v10970_v13 = vld [vmem:[%s11269_s19 + $0xa6] sm:$0x1] }
 0xf4c   : > { %v8238_v57 = vld [vmem:[#allocation1] sm:$0xff] }
 0xf4d   : > { %8239 = vst [vmem:[#allocation1] ss:$9 sm:$0xff] %v10888_v14  ;;  %8497 = vrot.lane.b32.xlu2 %v8238_v57, %s11224_s27  ;;  %v10930_v14 = vld [vmem:[%s11269_s19 + $0x78] sm:$0x1]  ;;  %v10933_v57 = vld [vmem:[%s11269_s19 + $0x7b] sm:$0x1] }
 0xf4e   : > { %8240 = vst [vmem:[#allocation1 + $0x1] ss:$9 sm:$0xff] %v10889_v27  ;;  %v10931_v27 = vld [vmem:[%s11269_s19 + $0x79] sm:$0x1] }
 0xf4f   : > { %8241 = vst [vmem:[#allocation1 + $0x2] ss:$9 sm:$0xff] %v10890_v43  ;;  %v10932_v43 = vld [vmem:[%s11269_s19 + $0x7a] sm:$0x1] }
 0xf50   : > { %8242 = vst [vmem:[#allocation1 + $0x3] ss:$9 sm:$0xff] %v10891_v6  ;;  %v10934_v6 = vld [vmem:[%s11269_s19 + $0x7c] sm:$0x1] }
 0xf51   : > { %8243 = vst [vmem:[#allocation1 + $0x4] ss:$9 sm:$0xff] %v10892_v23  ;;  %v10935_v23 = vld [vmem:[%s11269_s19 + $0x7d] sm:$0x1] }
 0xf52   : > { %8244 = vst [vmem:[#allocation1 + $0x5] ss:$9 sm:$0xff] %v10893_v39  ;;  %v10936_v39 = vld [vmem:[%s11269_s19 + $0x80] sm:$0x1] }
 0xf53   : > { %8245 = vst [vmem:[#allocation1 + $0x6] ss:$9 sm:$0xff] %v10894_v46  ;;  %v10937_v46 = vld [vmem:[%s11269_s19 + $0x81] sm:$0x1] }
 0xf54   : > { %8246 = vst [vmem:[#allocation1 + $0x7] ss:$9 sm:$0xff] %v10895_v49 }
 0xf5b   : > { %v8247_v58 = vld [vmem:[#allocation1] sm:$0xff] }
 0xf5c   : > { %8499 = vrot.lane.b32.xlu0 %v8247_v58, %s11224_s27  ;;  %8248 = vst [vmem:[#allocation1] ss:$9 sm:$0xff] %v10896_v52  ;;  %v10938_v52 = vld [vmem:[%s11269_s19 + $0x82] sm:$0x1]  ;;  %v10940_v58 = vld [vmem:[%s11269_s19 + $0x84] sm:$0x1] }
 0xf5d   : > { %8249 = vst [vmem:[#allocation1 + $0x1] ss:$9 sm:$0xff] %v10897_v55  ;;  %v10939_v55 = vld [vmem:[%s11269_s19 + $0x83] sm:$0x1] }
 0xf5e   : > { %8250 = vst [vmem:[#allocation1 + $0x2] ss:$9 sm:$0xff] %v10898_v59  ;;  %v10941_v59 = vld [vmem:[%s11269_s19 + $0x85] sm:$0x1] }
 0xf5f   : > { %8251 = vst [vmem:[#allocation1 + $0x3] ss:$9 sm:$0xff] %v10899_v60  ;;  %v10942_v60 = vld [vmem:[%s11269_s19 + $0x86] sm:$0x1] }
 0xf60   : > { %8252 = vst [vmem:[#allocation1 + $0x4] ss:$9 sm:$0xff] %v10900_v62  ;;  %v10943_v62 = vld [vmem:[%s11269_s19 + $0x87] sm:$0x1] }
 0xf61   : > { %8253 = vst [vmem:[#allocation1 + $0x5] ss:$9 sm:$0xff] %v10901_v3  ;;  %v10944_v3 = vld [vmem:[%s11269_s19 + $0x88] sm:$0x1] }
 0xf62   : > { %8254 = vst [vmem:[#allocation1 + $0x6] ss:$9 sm:$0xff] %v10902_v5  ;;  %v10945_v5 = vld [vmem:[%s11269_s19 + $0x89] sm:$0x1] }
 0xf63   : > { %8255 = vst [vmem:[#allocation1 + $0x7] ss:$9 sm:$0xff] %v10903_v8  ;;  %v6646_v8 = vpop.permute.xlu1 %6645 }
 0xf64   : > { %6727 = vst.msk [vmem:[#allocation2 + $0x78] sm:$0xff] %vm6711_vm6, %v6646_v8  ;;  %v10986_v8 = vld [vmem:[%s11269_s19 + $0xb8] sm:$0x1] }
 0xf6a   : > { %v8256_v16 = vld [vmem:[#allocation1] sm:$0xff] }
 0xf6b   : > { %8257 = vst [vmem:[#allocation1] ss:$9 sm:$0xff] %v10904_v9  ;;  %8501 = vrot.lane.b32.xlu1 %v8256_v16, %s11224_s27  ;;  %v10948_v16 = vld [vmem:[%s11269_s19 + $0x8c] sm:$0x1] }
 0xf6c   : > { %8258 = vst [vmem:[#allocation1 + $0x1] ss:$9 sm:$0xff] %v10905_v12  ;;  %v10946_v12 = vld [vmem:[%s11269_s19 + $0x8a] sm:$0x1] }
 0xf6d   : > { %8259 = vst [vmem:[#allocation1 + $0x2] ss:$9 sm:$0xff] %v10906_v15  ;;  %v10947_v15 = vld [vmem:[%s11269_s19 + $0x8b] sm:$0x1] }
 0xf6e   : > { %8260 = vst [vmem:[#allocation1 + $0x3] ss:$9 sm:$0xff] %v10907_v17  ;;  %v10949_v17 = vld [vmem:[%s11269_s19 + $0x8d] sm:$0x1] }
 0xf6f   : > { %8261 = vst [vmem:[#allocation1 + $0x4] ss:$9 sm:$0xff] %v10908_v19  ;;  %v10950_v19 = vld [vmem:[%s11269_s19 + $0x8e] sm:$0x1] }
 0xf70   : > { %8262 = vst [vmem:[#allocation1 + $0x5] ss:$9 sm:$0xff] %v10909_v22  ;;  %v10951_v22 = vld [vmem:[%s11269_s19 + $0x8f] sm:$0x1] }
 0xf71   : > { %8263 = vst [vmem:[#allocation1 + $0x6] ss:$9 sm:$0xff] %v10910_v24  ;;  %v6670_v24 = vpop.permute.xlu0 %6669 }
 0xf72   : > { %8264 = vst [vmem:[#allocation1 + $0x7] ss:$9 sm:$0xff] %v10911_v26  ;;  %v6674_v26 = vpop.permute.xlu2 %6673 }
 0xf73   : > { %6739 = vst.msk [vmem:[#allocation2 + $0xd8] sm:$0xff] %vm6711_vm6, %v6670_v24  ;;  %v10991_v24 = vld [vmem:[%s11269_s19 + $0xbd] sm:$0x1] }
 0xf74   : > { %6741 = vst.msk [vmem:[#allocation2 + $0xe8] sm:$0xff] %vm6711_vm6, %v6674_v26 }
 0xf79   : > { %v13922_v35 = vld [vmem:[#allocation1] sm:$0xff] }
 0xf7a   : > { %8266 = vst [vmem:[#allocation1] ss:$9 sm:$0xff] %v10912_v28  ;;  %v10952_v28 = vld [vmem:[%s11269_s19 + $0x92] sm:$0x1] }
 0xf7b   : > { %8267 = vst [vmem:[#allocation1 + $0x1] ss:$9 sm:$0xff] %v10913_v32  ;;  %v10953_v32 = vld [vmem:[%s11269_s19 + $0x93] sm:$0x1] }
 0xf7c   : > { %8268 = vst [vmem:[#allocation1 + $0x2] ss:$9 sm:$0xff] %v10914_v34 }
 0xf7d   : > { %8269 = vst [vmem:[#allocation1 + $0x3] ss:$9 sm:$0xff] %v10915_v36  ;;  %v10955_v36 = vld [vmem:[%s11269_s19 + $0x95] sm:$0x1] }
 0xf7e   : > { %8270 = vst [vmem:[#allocation1 + $0x4] ss:$9 sm:$0xff] %v10916_v40  ;;  %v10956_v40 = vld [vmem:[%s11269_s19 + $0x96] sm:$0x1] }
 0xf7f   : > { %8271 = vst [vmem:[#allocation1 + $0x5] ss:$9 sm:$0xff] %v10917_v20  ;;  %v10957_v20 = vld [vmem:[%s11269_s19 + $0x97] sm:$0x1] }
 0xf80   : > { %8272 = vst [vmem:[#allocation1 + $0x6] ss:$9 sm:$0xff] %v10918_v29  ;;  %v10958_v29 = vld [vmem:[%s11269_s19 + $0x98] sm:$0x1] }
 0xf81   : > { %8273 = vst [vmem:[#allocation1 + $0x7] ss:$9 sm:$0xff] %v10919_v38  ;;  %v10959_v38 = vld [vmem:[%s11269_s19 + $0x99] sm:$0x1] }
 0xf88   : > { %v13935_v51 = vld [vmem:[#allocation1] sm:$0xff] }
 0xf89   : > { %8275 = vst [vmem:[#allocation1] ss:$9 sm:$0xff] %v10920_v56 }
 0xf8a   : > { %8276 = vst [vmem:[#allocation1 + $0x1] ss:$9 sm:$0xff] %v10921_v1  ;;  %v10962_v1 = vld [vmem:[%s11269_s19 + $0x9c] sm:$0x1] }
 0xf8b   : > { %8277 = vst [vmem:[#allocation1 + $0x2] ss:$9 sm:$0xff] %v10922_v41  ;;  %v10964_v41 = vld [vmem:[%s11269_s19 + $0x9e] sm:$0x1] }
 0xf8c   : > { %8278 = vst [vmem:[#allocation1 + $0x3] ss:$9 sm:$0xff] %v10923_v61  ;;  %v10965_v61 = vld [vmem:[%s11269_s19 + $0x9f] sm:$0x1] }
 0xf8d   : > { %8279 = vst [vmem:[#allocation1 + $0x4] ss:$9 sm:$0xff] %v10924_v7  ;;  %v10966_v7 = vld [vmem:[%s11269_s19 + $0xa0] sm:$0x1] }
 0xf8e   : > { %8280 = vst [vmem:[#allocation1 + $0x5] ss:$9 sm:$0xff] %v10925_v18  ;;  %v10967_v18 = vld [vmem:[%s11269_s19 + $0xa1] sm:$0x1] }
 0xf8f   : > { %8281 = vst [vmem:[#allocation1 + $0x6] ss:$9 sm:$0xff] %v10926_v30  ;;  %v10968_v30 = vld [vmem:[%s11269_s19 + $0xa4] sm:$0x1] }
 0xf90   : > { %8282 = vst [vmem:[#allocation1 + $0x7] ss:$9 sm:$0xff] %v10927_v42  ;;  %v10969_v42 = vld [vmem:[%s11269_s19 + $0xa5] sm:$0x1] }
 0xf97   : > { %v8283_v50 = vld [vmem:[#allocation1] sm:$0xff] }
 0xf98   : > { %8507 = vrot.lane.b32.xlu0 %v8283_v50, %s11224_s27  ;;  %8284 = vst [vmem:[#allocation1] ss:$9 sm:$0xff] %v10928_v25  ;;  %v10971_v25 = vld [vmem:[%s11269_s19 + $0xa7] sm:$0x1]  ;;  %v10973_v50 = vld [vmem:[%s11269_s19 + $0xa9] sm:$0x1] }
 0xf99   : > { %8285 = vst [vmem:[#allocation1 + $0x1] ss:$9 sm:$0xff] %v10929_v37  ;;  %v10972_v37 = vld [vmem:[%s11269_s19 + $0xa8] sm:$0x1] }
 0xf9a   : > { %8286 = vst [vmem:[#allocation1 + $0x2] ss:$9 sm:$0xff] %v10930_v14  ;;  %v10974_v14 = vld [vmem:[%s11269_s19 + $0xaa] sm:$0x1] }
 0xf9b   : > { %8287 = vst [vmem:[#allocation1 + $0x3] ss:$9 sm:$0xff] %v10931_v27  ;;  %v10975_v27 = vld [vmem:[%s11269_s19 + $0xab] sm:$0x1] }
 0xf9c   : > { %8288 = vst [vmem:[#allocation1 + $0x4] ss:$9 sm:$0xff] %v10932_v43  ;;  %v10976_v43 = vld [vmem:[%s11269_s19 + $0xac] sm:$0x1] }
 0xf9d   : > { %8289 = vst [vmem:[#allocation1 + $0x5] ss:$9 sm:$0xff] %v10933_v57  ;;  %v10977_v57 = vld [vmem:[%s11269_s19 + $0xad] sm:$0x1] }
 0xf9e   : > { %8290 = vst [vmem:[#allocation1 + $0x6] ss:$9 sm:$0xff] %v10934_v6  ;;  %v6654_v6 = vpop.permute.xlu1 %6653 }
 0xf9f   : > { %8291 = vst [vmem:[#allocation1 + $0x7] ss:$9 sm:$0xff] %v10935_v23  ;;  %v10978_v23 = vld [vmem:[%s11269_s19 + $0xae] sm:$0x1] }
 0xfa0   : > { %6731 = vst.msk [vmem:[#allocation2 + $0x98] sm:$0xff] %vm6711_vm6, %v6654_v6  ;;  %v11012_v6 = vld [vmem:[%s11269_s19 + $0xd4] sm:$0x1] }
 0xfa6   : > { %v8292_v49 = vld [vmem:[#allocation1] sm:$0xff] }
 0xfa7   : > { %8509 = vrot.lane.b32.xlu0 %v8292_v49, %s11224_s27  ;;  %8293 = vst [vmem:[#allocation1] ss:$9 sm:$0xff] %v10936_v39  ;;  %v10980_v49 = vld [vmem:[%s11269_s19 + $0xb0] sm:$0x1] }
 0xfa8   : > { %8294 = vst [vmem:[#allocation1 + $0x1] ss:$9 sm:$0xff] %v10937_v46  ;;  %v10979_v46 = vld [vmem:[%s11269_s19 + $0xaf] sm:$0x1] }
 0xfa9   : > { %8295 = vst [vmem:[#allocation1 + $0x2] ss:$9 sm:$0xff] %v10938_v52  ;;  %v10981_v52 = vld [vmem:[%s11269_s19 + $0xb1] sm:$0x1] }
 0xfaa   : > { %8296 = vst [vmem:[#allocation1 + $0x3] ss:$9 sm:$0xff] %v10939_v55  ;;  %v10982_v55 = vld [vmem:[%s11269_s19 + $0xb2] sm:$0x1] }
 0xfab   : > { %8297 = vst [vmem:[#allocation1 + $0x4] ss:$9 sm:$0xff] %v10940_v58  ;;  %v10983_v58 = vld [vmem:[%s11269_s19 + $0xb3] sm:$0x1] }
 0xfac   : > { %8298 = vst [vmem:[#allocation1 + $0x5] ss:$9 sm:$0xff] %v10941_v59  ;;  %v6676_v59 = vpop.permute.xlu0 %6675 }
 0xfad   : > { %8299 = vst [vmem:[#allocation1 + $0x6] ss:$9 sm:$0xff] %v10942_v60  ;;  %v7554_v60 = vpop.permute.xlu2 %7553 }
 0xfae   : > { %8300 = vst [vmem:[#allocation1 + $0x7] ss:$9 sm:$0xff] %v10943_v62  ;;  %v10984_v62 = vld [vmem:[%s11269_s19 + $0xb6] sm:$0x1] }
 0xfaf   : > { %6742 = vst.msk [vmem:[#allocation2 + $0xf0] sm:$0xff] %vm6711_vm6, %v6676_v59  ;;  %v11017_v59 = vld [vmem:[%s11269_s19 + $0xdb] sm:$0x1] }
 0xfb0   : > { %7650 = vst.msk [vmem:[#allocation2] sm:$0xff] %vm7649_vm7, %v7554_v60 }
 0xfb5   : > { %v8301_v9 = vld [vmem:[#allocation1] sm:$0xff] }
 0xfb6   : > { %8511 = vrot.lane.b32.xlu1 %v8301_v9, %s11224_s27  ;;  %8302 = vst [vmem:[#allocation1] ss:$9 sm:$0xff] %v10944_v3  ;;  %v10985_v3 = vld [vmem:[%s11269_s19 + $0xb7] sm:$0x1] }
 0xfb7   : > { %8303 = vst [vmem:[#allocation1 + $0x1] ss:$9 sm:$0xff] %v10945_v5  ;;  %v6666_v5 = vpop.permute.xlu1 %6665 }
 0xfb8   : > { %8304 = vst [vmem:[#allocation1 + $0x2] ss:$9 sm:$0xff] %v10946_v12  ;;  %v10987_v12 = vld [vmem:[%s11269_s19 + $0xb9] sm:$0x1] }
 0xfb9   : > { %8305 = vst [vmem:[#allocation1 + $0x3] ss:$9 sm:$0xff] %v10947_v15  ;;  %v7556_v15 = vpop.permute.xlu0 %7555 }
 0xfba   : > { %8306 = vst [vmem:[#allocation1 + $0x4] ss:$9 sm:$0xff] %v10948_v16  ;;  %v10988_v16 = vld [vmem:[%s11269_s19 + $0xba] sm:$0x1] }
 0xfbb   : > { %8307 = vst [vmem:[#allocation1 + $0x5] ss:$9 sm:$0xff] %v10949_v17  ;;  %v7560_v17 = vpop.permute.xlu2 %7559 }
 0xfbc   : > { %8308 = vst [vmem:[#allocation1 + $0x6] ss:$9 sm:$0xff] %v10950_v19  ;;  %v10989_v19 = vld [vmem:[%s11269_s19 + $0xbb] sm:$0x1] }
 0xfbd   : > { %8309 = vst [vmem:[#allocation1 + $0x7] ss:$9 sm:$0xff] %v10951_v22  ;;  %v10990_v22 = vld [vmem:[%s11269_s19 + $0xbc] sm:$0x1] }
 0xfbe   : > { %6737 = vst.msk [vmem:[#allocation2 + $0xc8] sm:$0xff] %vm6711_vm6, %v6666_v5  ;;  %v11020_v5 = vld [vmem:[%s11269_s19 + $0xde] sm:$0x1] }
 0xfbf   : > { %7651 = vst.msk [vmem:[#allocation2 + $0x8] sm:$0xff] %vm7649_vm7, %v7556_v15  ;;  %v6672_v26 = vpop.permute.xlu1 %6671  ;;  %v11023_v15 = vld [vmem:[%s11269_s19 + $0xe1] sm:$0x1] }
 0xfc0   : > { %7653 = vst.msk [vmem:[#allocation2 + $0x18] sm:$0xff] %vm7649_vm7, %v7560_v17  ;;  %v11025_v17 = vld [vmem:[%s11269_s19 + $0xe3] sm:$0x1] }
 0xfc1   : > { %6740 = vst.msk [vmem:[#allocation2 + $0xe0] sm:$0xff] %vm6711_vm6, %v6672_v26  ;;  %v11028_v26 = vld [vmem:[%s11269_s19 + $0xe6] sm:$0x1] }
 0xfc4   : > { %v8310_v34 = vld [vmem:[#allocation1] sm:$0xff] }
 0xfc5   : > { %8311 = vst [vmem:[#allocation1] ss:$9 sm:$0xff] %v10952_v28  ;;  %8513 = vrot.lane.b32.xlu2 %v8310_v34, %s11224_s27  ;;  %v7562_v28 = vpop.permute.xlu0 %7561  ;;  %v10993_v34 = vld [vmem:[%s11269_s19 + $0xbf] sm:$0x1] }
 0xfc6   : > { %8312 = vst [vmem:[#allocation1 + $0x1] ss:$9 sm:$0xff] %v10953_v32  ;;  %v7574_v32 = vpop.permute.xlu2 %7573 }
 0xfc7   : > { %8313 = vst [vmem:[#allocation1 + $0x2] ss:$9 sm:$0xff] %v10954_v33  ;;  %v10992_v33 = vld [vmem:[%s11269_s19 + $0xbe] sm:$0x1] }
 0xfc8   : > { %8314 = vst [vmem:[#allocation1 + $0x3] ss:$9 sm:$0xff] %v10955_v36 }
 0xfc9   : > { %8315 = vst [vmem:[#allocation1 + $0x4] ss:$9 sm:$0xff] %v10956_v40  ;;  %v10994_v40 = vld [vmem:[%s11269_s19 + $0xc0] sm:$0x1] }
 0xfca   : > { %8316 = vst [vmem:[#allocation1 + $0x5] ss:$9 sm:$0xff] %v10957_v20  ;;  %v10995_v20 = vld [vmem:[%s11269_s19 + $0xc1] sm:$0x1] }
 0xfcb   : > { %8317 = vst [vmem:[#allocation1 + $0x6] ss:$9 sm:$0xff] %v10958_v29  ;;  %v10996_v29 = vld [vmem:[%s11269_s19 + $0xc2] sm:$0x1] }
 0xfcc   : > { %8318 = vst [vmem:[#allocation1 + $0x7] ss:$9 sm:$0xff] %v10959_v38  ;;  %v10997_v38 = vld [vmem:[%s11269_s19 + $0xc3] sm:$0x1] }
 0xfcd   : > { %7654 = vst.msk [vmem:[#allocation2 + $0x20] sm:$0xff] %vm7649_vm7, %v7562_v28  ;;  %v11029_v28 = vld [vmem:[%s11269_s19 + $0xe7] sm:$0x1] }
 0xfce   : > { %7660 = vst.msk [vmem:[#allocation2 + $0x50] sm:$0xff] %vm7649_vm7, %v7574_v32  ;;  %v11030_v32 = vld [vmem:[%s11269_s19 + $0xe8] sm:$0x1] }
 0xfd3   : > { %v8319_v56 = vld [vmem:[#allocation1] sm:$0xff] }
 0xfd4   : > { %8515 = vrot.lane.b32.xlu0 %v8319_v56, %s11224_s27  ;;  %8320 = vst [vmem:[#allocation1] ss:$9 sm:$0xff] %v10960_v45  ;;  %v10998_v45 = vld [vmem:[%s11269_s19 + $0xc4] sm:$0x1]  ;;  %v11000_v56 = vld [vmem:[%s11269_s19 + $0xc8] sm:$0x1] }
 0xfd5   : > { %8321 = vst [vmem:[#allocation1 + $0x1] ss:$9 sm:$0xff] %v10961_v47  ;;  %v10999_v47 = vld [vmem:[%s11269_s19 + $0xc5] sm:$0x1] }
 0xfd6   : > { %8322 = vst [vmem:[#allocation1 + $0x2] ss:$9 sm:$0xff] %v10962_v1  ;;  %v11001_v1 = vld [vmem:[%s11269_s19 + $0xc9] sm:$0x1] }
 0xfd7   : > { %8323 = vst [vmem:[#allocation1 + $0x3] ss:$9 sm:$0xff] %v10963_v21  ;;  %v7558_v21 = vpop.permute.xlu1 %7557 }
 0xfd8   : > { %8324 = vst [vmem:[#allocation1 + $0x4] ss:$9 sm:$0xff] %v10964_v41 }
 0xfd9   : > { %8325 = vst [vmem:[#allocation1 + $0x5] ss:$9 sm:$0xff] %v10965_v61  ;;  %v11002_v61 = vld [vmem:[%s11269_s19 + $0xca] sm:$0x1] }
 0xfda   : > { %8326 = vst [vmem:[#allocation1 + $0x6] ss:$9 sm:$0xff] %v10966_v7  ;;  %v11003_v7 = vld [vmem:[%s11269_s19 + $0xcb] sm:$0x1] }
 0xfdb   : > { %8327 = vst [vmem:[#allocation1 + $0x7] ss:$9 sm:$0xff] %v10967_v18  ;;  %v11004_v18 = vld [vmem:[%s11269_s19 + $0xcc] sm:$0x1] }
 0xfdc   : > { %7652 = vst.msk [vmem:[#allocation2 + $0x10] sm:$0xff] %vm7649_vm7, %v7558_v21 }
 0xfe2   : > { %v8328_v53 = vld [vmem:[#allocation1] sm:$0xff] }
 0xfe3   : > { %8517 = vrot.lane.b32.xlu1 %v8328_v53, %s11224_s27  ;;  %8329 = vst [vmem:[#allocation1] ss:$9 sm:$0xff] %v10968_v30  ;;  %v11005_v30 = vld [vmem:[%s11269_s19 + $0xcd] sm:$0x1]  ;;  %v11007_v53 = vld [vmem:[%s11269_s19 + $0xcf] sm:$0x1] }
 0xfe4   : > { %8330 = vst [vmem:[#allocation1 + $0x1] ss:$9 sm:$0xff] %v10969_v42  ;;  %v11006_v42 = vld [vmem:[%s11269_s19 + $0xce] sm:$0x1] }
 0xfe5   : > { %8331 = vst [vmem:[#allocation1 + $0x2] ss:$9 sm:$0xff] %v10970_v13  ;;  %v7576_v13 = vpop.permute.xlu0 %7575 }
 0xfe6   : > { %8332 = vst [vmem:[#allocation1 + $0x3] ss:$9 sm:$0xff] %v10971_v25  ;;  %v7580_v25 = vpop.permute.xlu2 %7579 }
 0xfe7   : > { %8333 = vst [vmem:[#allocation1 + $0x4] ss:$9 sm:$0xff] %v10972_v37  ;;  %v11008_v37 = vld [vmem:[%s11269_s19 + $0xd0] sm:$0x1] }
 0xfe8   : > { %8334 = vst [vmem:[#allocation1 + $0x5] ss:$9 sm:$0xff] %v10973_v50  ;;  %v11009_v50 = vld [vmem:[%s11269_s19 + $0xd1] sm:$0x1] }
 0xfe9   : > { %8335 = vst [vmem:[#allocation1 + $0x6] ss:$9 sm:$0xff] %v10974_v14  ;;  %v7564_v14 = vpop.permute.xlu1 %7563 }
 0xfea   : > { %8336 = vst [vmem:[#allocation1 + $0x7] ss:$9 sm:$0xff] %v10975_v27  ;;  %v11010_v27 = vld [vmem:[%s11269_s19 + $0xd2] sm:$0x1] }
 0xfeb   : > { %7661 = vst.msk [vmem:[#allocation2 + $0x58] sm:$0xff] %vm7649_vm7, %v7576_v13 }
 0xfec   : > { %7663 = vst.msk [vmem:[#allocation2 + $0x68] sm:$0xff] %vm7649_vm7, %v7580_v25  ;;  %v11048_v25 = vld [vmem:[%s11269_s19 + $0xfe] sm:$0x1] }
 0xfed   : > { %7655 = vst.msk [vmem:[#allocation2 + $0x28] sm:$0xff] %vm7649_vm7, %v7564_v14  ;;  %v11050_v14 = vld [vmem:[%s11269_s19 + $0x100] sm:$0x1] }
 0xff1   : > { %v14005_v39 = vld [vmem:[#allocation1] sm:$0xff]  ;;  %v7570_v21 = vpop.permute.xlu1 %7569 }
 0xff2   : > { %8338 = vst [vmem:[#allocation1] ss:$9 sm:$0xff] %v10976_v43 }
 0xff3   : > { %8339 = vst [vmem:[#allocation1 + $0x1] ss:$9 sm:$0xff] %v10977_v57  ;;  %v11011_v57 = vld [vmem:[%s11269_s19 + $0xd3] sm:$0x1] }
 0xff4   : > { %8340 = vst [vmem:[#allocation1 + $0x2] ss:$9 sm:$0xff] %v10978_v23  ;;  %v11013_v23 = vld [vmem:[%s11269_s19 + $0xd5] sm:$0x1] }
 0xff5   : > { %8341 = vst [vmem:[#allocation1 + $0x3] ss:$9 sm:$0xff] %v10979_v46  ;;  %v11014_v46 = vld [vmem:[%s11269_s19 + $0xd6] sm:$0x1] }
 0xff6   : > { %8342 = vst [vmem:[#allocation1 + $0x4] ss:$9 sm:$0xff] %v10980_v49  ;;  %v11015_v49 = vld [vmem:[%s11269_s19 + $0xd7] sm:$0x1] }
 0xff7   : > { %8343 = vst [vmem:[#allocation1 + $0x5] ss:$9 sm:$0xff] %v10981_v52  ;;  %v7582_v52 = vpop.permute.xlu0 %7581 }
 0xff8   : > { %8344 = vst [vmem:[#allocation1 + $0x6] ss:$9 sm:$0xff] %v10982_v55  ;;  %v7590_v55 = vpop.permute.xlu2 %7589 }
 0xff9   : > { %8345 = vst [vmem:[#allocation1 + $0x7] ss:$9 sm:$0xff] %v10983_v58  ;;  %v11016_v58 = vld [vmem:[%s11269_s19 + $0xda] sm:$0x1] }
 0xffa   : > { %7664 = vst.msk [vmem:[#allocation2 + $0x70] sm:$0xff] %vm7649_vm7, %v7582_v52  ;;  %v11055_v52 = vld [vmem:[%s11269_s19 + $0x105] sm:$0x1] }
 0xffb   : > { %7668 = vst.msk [vmem:[#allocation2 + $0x90] sm:$0xff] %vm7649_vm7, %v7590_v55 }
 0xffc   : > { %7658 = vst.msk [vmem:[#allocation2 + $0x40] sm:$0xff] %vm7649_vm7, %v7570_v21  ;;  %v11078_v21 = vld [vmem:[%s11269_s19 + $0x11e] sm:$0x1] }
 0xfff   : > { %v7586_v13 = vpop.permute.xlu0 %7585 }
0x1000   : > { %v14018_v9 = vld [vmem:[#allocation1] sm:$0xff]  ;;  %7666 = vst.msk [vmem:[#allocation2 + $0x80] sm:$0xff] %vm7649_vm7, %v7586_v13 }
0x1001   : > { %8347 = vst [vmem:[#allocation1] ss:$9 sm:$0xff] %v10984_v62  ;;  %v11018_v62 = vld [vmem:[%s11269_s19 + $0xdc] sm:$0x1]  ;;  %v8620_v13 = vld [vmem:[%s14399_s1] sm:$0xff] }
0x1002   : > { %8348 = vst [vmem:[#allocation1 + $0x1] ss:$9 sm:$0xff] %v10985_v3  ;;  %v11019_v3 = vld [vmem:[%s11269_s19 + $0xdd] sm:$0x1] }
0x1003   : > { %8349 = vst [vmem:[#allocation1 + $0x2] ss:$9 sm:$0xff] %v10986_v8  ;;  %v11021_v8 = vld [vmem:[%s11269_s19 + $0xdf] sm:$0x1] }
0x1004   : > { %8350 = vst [vmem:[#allocation1 + $0x3] ss:$9 sm:$0xff] %v10987_v12  ;;  %v11022_v12 = vld [vmem:[%s11269_s19 + $0xe0] sm:$0x1] }
0x1005   : > { %8351 = vst [vmem:[#allocation1 + $0x4] ss:$9 sm:$0xff] %v10988_v16  ;;  %v11024_v16 = vld [vmem:[%s11269_s19 + $0xe2] sm:$0x1] }
0x1006   : > { %8352 = vst [vmem:[#allocation1 + $0x5] ss:$9 sm:$0xff] %v10989_v19 }
0x1007   : > { %8353 = vst [vmem:[#allocation1 + $0x6] ss:$9 sm:$0xff] %v10990_v22  ;;  %v11026_v22 = vld [vmem:[%s11269_s19 + $0xe4] sm:$0x1] }
0x1008   : > { %8354 = vst [vmem:[#allocation1 + $0x7] ss:$9 sm:$0xff] %v10991_v24  ;;  %v11027_v24 = vld [vmem:[%s11269_s19 + $0xe5] sm:$0x1] }
0x100f   : > { %v8355_v36 = vld [vmem:[#allocation1] sm:$0xff] }
0x1010   : > { %8523 = vrot.lane.b32.xlu0 %v8355_v36, %s11224_s27  ;;  %8356 = vst [vmem:[#allocation1] ss:$9 sm:$0xff] %v10992_v33  ;;  %v11032_v33 = vld [vmem:[%s11269_s19 + $0xec] sm:$0x1]  ;;  %v11034_v36 = vld [vmem:[%s11269_s19 + $0xee] sm:$0x1] }
0x1011   : > { %8357 = vst [vmem:[#allocation1 + $0x1] ss:$9 sm:$0xff] %v10993_v34  ;;  %v11033_v34 = vld [vmem:[%s11269_s19 + $0xed] sm:$0x1] }
0x1012   : > { %8358 = vst [vmem:[#allocation1 + $0x2] ss:$9 sm:$0xff] %v10994_v40 }
0x1013   : > { %8359 = vst [vmem:[#allocation1 + $0x3] ss:$9 sm:$0xff] %v10995_v20  ;;  %v11035_v20 = vld [vmem:[%s11269_s19 + $0xef] sm:$0x1] }
0x1014   : > { %8360 = vst [vmem:[#allocation1 + $0x4] ss:$9 sm:$0xff] %v10996_v29  ;;  %v11036_v29 = vld [vmem:[%s11269_s19 + $0xf0] sm:$0x1] }
0x1015   : > { %8361 = vst [vmem:[#allocation1 + $0x5] ss:$9 sm:$0xff] %v10997_v38  ;;  %v11037_v38 = vld [vmem:[%s11269_s19 + $0xf1] sm:$0x1] }
0x1016   : > { %8362 = vst [vmem:[#allocation1 + $0x6] ss:$9 sm:$0xff] %v10998_v45  ;;  %v11038_v45 = vld [vmem:[%s11269_s19 + $0xf2] sm:$0x1] }
0x1017   : > { %8363 = vst [vmem:[#allocation1 + $0x7] ss:$9 sm:$0xff] %v10999_v47  ;;  %v11039_v47 = vld [vmem:[%s11269_s19 + $0xf3] sm:$0x1] }
0x101e   : > { %v8364_v41 = vld [vmem:[#allocation1] sm:$0xff] }
0x101f   : > { %8525 = vrot.lane.b32.xlu1 %v8364_v41, %s11224_s27  ;;  %8365 = vst [vmem:[#allocation1] ss:$9 sm:$0xff] %v11000_v56  ;;  %v11040_v56 = vld [vmem:[%s11269_s19 + $0xf4] sm:$0x1]  ;;  %v11042_v41 = vld [vmem:[%s11269_s19 + $0xf6] sm:$0x1] }
0x1020   : > { %8366 = vst [vmem:[#allocation1 + $0x1] ss:$9 sm:$0xff] %v11001_v1  ;;  %v11041_v1 = vld [vmem:[%s11269_s19 + $0xf5] sm:$0x1] }
0x1021   : > { %8367 = vst [vmem:[#allocation1 + $0x2] ss:$9 sm:$0xff] %v11002_v61 }
0x1022   : > { %8368 = vst [vmem:[#allocation1 + $0x3] ss:$9 sm:$0xff] %v11003_v7  ;;  %v11043_v7 = vld [vmem:[%s11269_s19 + $0xf7] sm:$0x1] }
0x1023   : > { %8369 = vst [vmem:[#allocation1 + $0x4] ss:$9 sm:$0xff] %v11004_v18  ;;  %v11044_v18 = vld [vmem:[%s11269_s19 + $0xf8] sm:$0x1] }
0x1024   : > { %8370 = vst [vmem:[#allocation1 + $0x5] ss:$9 sm:$0xff] %v11005_v30  ;;  %v11045_v30 = vld [vmem:[%s11269_s19 + $0xf9] sm:$0x1] }
0x1025   : > { %8371 = vst [vmem:[#allocation1 + $0x6] ss:$9 sm:$0xff] %v11006_v42  ;;  %v11046_v42 = vld [vmem:[%s11269_s19 + $0xfa] sm:$0x1] }
0x1026   : > { %8372 = vst [vmem:[#allocation1 + $0x7] ss:$9 sm:$0xff] %v11007_v53  ;;  %v7596_v53 = vpop.permute.xlu2 %7595 }
0x1027   : > { %7671 = vst.msk [vmem:[#allocation2 + $0xa8] sm:$0xff] %vm7649_vm7, %v7596_v53  ;;  %v8621_v53 = vld [vmem:[%s14399_s1 + $0x8] sm:$0xff] }
0x102d   : > { %v8373_v43 = vld [vmem:[#allocation1] sm:$0xff] }
0x102e   : > { %8374 = vst [vmem:[#allocation1] ss:$9 sm:$0xff] %v11008_v37  ;;  %8527 = vrot.lane.b32.xlu2 %v8373_v43, %s11224_s27  ;;  %v11049_v37 = vld [vmem:[%s11269_s19 + $0xff] sm:$0x1]  ;;  %v11051_v43 = vld [vmem:[%s11269_s19 + $0x101] sm:$0x1] }
0x102f   : > { %8375 = vst [vmem:[#allocation1 + $0x1] ss:$9 sm:$0xff] %v11009_v50  ;;  %v7572_v50 = vpop.permute.xlu1 %7571 }
0x1030   : > { %8376 = vst [vmem:[#allocation1 + $0x2] ss:$9 sm:$0xff] %v11010_v27 }
0x1031   : > { %8377 = vst [vmem:[#allocation1 + $0x3] ss:$9 sm:$0xff] %v11011_v57  ;;  %v7602_v57 = vpop.permute.xlu2 %7601 }
0x1032   : > { %8378 = vst [vmem:[#allocation1 + $0x4] ss:$9 sm:$0xff] %v11012_v6  ;;  %v11052_v6 = vld [vmem:[%s11269_s19 + $0x102] sm:$0x1] }
0x1033   : > { %8379 = vst [vmem:[#allocation1 + $0x5] ss:$9 sm:$0xff] %v11013_v23  ;;  %v7592_v23 = vpop.permute.xlu0 %7591 }
0x1034   : > { %8380 = vst [vmem:[#allocation1 + $0x6] ss:$9 sm:$0xff] %v11014_v46  ;;  %v11053_v46 = vld [vmem:[%s11269_s19 + $0x103] sm:$0x1] }
0x1035   : > { %8381 = vst [vmem:[#allocation1 + $0x7] ss:$9 sm:$0xff] %v11015_v49  ;;  %v11054_v49 = vld [vmem:[%s11269_s19 + $0x104] sm:$0x1] }
0x1036   : > { %7659 = vst.msk [vmem:[#allocation2 + $0x48] sm:$0xff] %vm7649_vm7, %v7572_v50  ;;  %v11082_v50 = vld [vmem:[%s11269_s19 + $0x124] sm:$0x1] }
0x1037   : > { %7669 = vst.msk [vmem:[#allocation2 + $0x98] sm:$0xff] %vm7649_vm7, %v7592_v23  ;;  %v7578_v55 = vpop.permute.xlu1 %7577  ;;  %v11086_v23 = vld [vmem:[%s11269_s19 + $0x128] sm:$0x1] }
0x1038   : > { %7674 = vst.msk [vmem:[#allocation2 + $0xc0] sm:$0xff] %vm7649_vm7, %v7602_v57 }
0x1039   : > { %7662 = vst.msk [vmem:[#allocation2 + $0x60] sm:$0xff] %vm7649_vm7, %v7578_v55  ;;  %v11089_v55 = vld [vmem:[%s11269_s19 + $0x12b] sm:$0x1] }
0x103c   : > { %v8382_v60 = vld [vmem:[#allocation1] sm:$0xff] }
0x103d   : > { %8529 = vrot.lane.b32.xlu0 %v8382_v60, %s11224_s27  ;;  %8383 = vst [vmem:[#allocation1] ss:$9 sm:$0xff] %v11016_v58  ;;  %v7604_v58 = vpop.permute.xlu2 %7603  ;;  %v11056_v60 = vld [vmem:[%s11269_s19 + $0x106] sm:$0x1] }
0x103e   : > { %8384 = vst [vmem:[#allocation1 + $0x1] ss:$9 sm:$0xff] %v11017_v59  ;;  %v7606_v59 = vpop.permute.xlu0 %7605 }
0x103f   : > { %8385 = vst [vmem:[#allocation1 + $0x2] ss:$9 sm:$0xff] %v11018_v62  ;;  %v11057_v62 = vld [vmem:[%s11269_s19 + $0x107] sm:$0x1] }
0x1040   : > { %8386 = vst [vmem:[#allocation1 + $0x3] ss:$9 sm:$0xff] %v11019_v3 }
0x1041   : > { %8387 = vst [vmem:[#allocation1 + $0x4] ss:$9 sm:$0xff] %v11020_v5  ;;  %v11058_v5 = vld [vmem:[%s11269_s19 + $0x108] sm:$0x1] }
0x1042   : > { %8388 = vst [vmem:[#allocation1 + $0x5] ss:$9 sm:$0xff] %v11021_v8  ;;  %v11059_v8 = vld [vmem:[%s11269_s19 + $0x109] sm:$0x1] }
0x1043   : > { %8389 = vst [vmem:[#allocation1 + $0x6] ss:$9 sm:$0xff] %v11022_v12  ;;  %v11060_v12 = vld [vmem:[%s11269_s19 + $0x10a] sm:$0x1] }
0x1044   : > { %8390 = vst [vmem:[#allocation1 + $0x7] ss:$9 sm:$0xff] %v11023_v15  ;;  %v11061_v15 = vld [vmem:[%s11269_s19 + $0x10b] sm:$0x1] }
0x1045   : > { %7597 = vrot.lane.b32.xlu0 %v13762_v31, %s11223_s26  ;;  %v11031_v31 = vld [vmem:[%s11269_s19 + $0xe9] sm:$0x1]  ;;  %7675 = vst.msk [vmem:[#allocation2 + $0xc8] sm:$0xff] %vm7649_vm7, %v7604_v58 }
0x1046   : > { %7676 = vst.msk [vmem:[#allocation2 + $0xd0] sm:$0xff] %vm7649_vm7, %v7606_v59 }
0x104b   : > { %v8391_v19 = vld [vmem:[#allocation1] sm:$0xff] }
0x104c   : > { %8531 = vrot.lane.b32.xlu1 %v8391_v19, %s11224_s27  ;;  %8392 = vst [vmem:[#allocation1] ss:$9 sm:$0xff] %v11024_v16  ;;  %v11062_v16 = vld [vmem:[%s11269_s19 + $0x10c] sm:$0x1]  ;;  %v11064_v19 = vld [vmem:[%s11269_s19 + $0x110] sm:$0x1] }
0x104d   : > { %8393 = vst [vmem:[#allocation1 + $0x1] ss:$9 sm:$0xff] %v11025_v17  ;;  %v11063_v17 = vld [vmem:[%s11269_s19 + $0x10d] sm:$0x1] }
0x104e   : > { %8394 = vst [vmem:[#allocation1 + $0x2] ss:$9 sm:$0xff] %v11026_v22  ;;  %v11065_v22 = vld [vmem:[%s11269_s19 + $0x111] sm:$0x1] }
0x104f   : > { %8395 = vst [vmem:[#allocation1 + $0x3] ss:$9 sm:$0xff] %v11027_v24  ;;  %v7588_v24 = vpop.permute.xlu1 %7587 }
0x1050   : > { %8396 = vst [vmem:[#allocation1 + $0x4] ss:$9 sm:$0xff] %v11028_v26 }
0x1051   : > { %8397 = vst [vmem:[#allocation1 + $0x5] ss:$9 sm:$0xff] %v11029_v28  ;;  %v11066_v28 = vld [vmem:[%s11269_s19 + $0x112] sm:$0x1] }
0x1052   : > { %8398 = vst [vmem:[#allocation1 + $0x6] ss:$9 sm:$0xff] %v11030_v32  ;;  %v11067_v32 = vld [vmem:[%s11269_s19 + $0x113] sm:$0x1] }
0x1053   : > { %8399 = vst [vmem:[#allocation1 + $0x7] ss:$9 sm:$0xff] %v11031_v31  ;;  %v11068_v31 = vld [vmem:[%s11269_s19 + $0x114] sm:$0x1] }
0x1054   : > { %7667 = vst.msk [vmem:[#allocation2 + $0x88] sm:$0xff] %vm7649_vm7, %v7588_v24 }
0x105a   : > { %v8400_v40 = vld [vmem:[#allocation1] sm:$0xff] }
0x105b   : > { %8401 = vst [vmem:[#allocation1] ss:$9 sm:$0xff] %v11032_v33  ;;  %8533 = vrot.lane.b32.xlu2 %v8400_v40, %s11224_s27  ;;  %v11069_v33 = vld [vmem:[%s11269_s19 + $0x115] sm:$0x1]  ;;  %v7610_v40 = vpop.permute.xlu2 %7609 }
0x105c   : > { %8402 = vst [vmem:[#allocation1 + $0x1] ss:$9 sm:$0xff] %v11033_v34  ;;  %v11070_v34 = vld [vmem:[%s11269_s19 + $0x116] sm:$0x1] }
0x105d   : > { %8403 = vst [vmem:[#allocation1 + $0x2] ss:$9 sm:$0xff] %v11034_v36  ;;  %v11071_v36 = vld [vmem:[%s11269_s19 + $0x117] sm:$0x1] }
0x105e   : > { %8404 = vst [vmem:[#allocation1 + $0x3] ss:$9 sm:$0xff] %v11035_v20  ;;  %v7612_v20 = vpop.permute.xlu0 %7611 }
0x105f   : > { %8405 = vst [vmem:[#allocation1 + $0x4] ss:$9 sm:$0xff] %v11036_v29  ;;  %v11072_v29 = vld [vmem:[%s11269_s19 + $0x118] sm:$0x1] }
0x1060   : > { %8406 = vst [vmem:[#allocation1 + $0x5] ss:$9 sm:$0xff] %v11037_v38  ;;  %v11073_v38 = vld [vmem:[%s11269_s19 + $0x119] sm:$0x1] }
0x1061   : > { %8407 = vst [vmem:[#allocation1 + $0x6] ss:$9 sm:$0xff] %v11038_v45  ;;  %v11074_v45 = vld [vmem:[%s11269_s19 + $0x11a] sm:$0x1] }
0x1062   : > { %8408 = vst [vmem:[#allocation1 + $0x7] ss:$9 sm:$0xff] %v11039_v47 }
0x1063   : > { %8519 = vrot.lane.b32.xlu2 %v14005_v39, %s11224_s27  ;;  %v11047_v39 = vld [vmem:[%s11269_s19 + $0xfb] sm:$0x1]  ;;  %7678 = vst.msk [vmem:[#allocation2 + $0xe0] sm:$0xff] %vm7649_vm7, %v7610_v40 }
0x1064   : > { %7679 = vst.msk [vmem:[#allocation2 + $0xe8] sm:$0xff] %vm7649_vm7, %v7612_v20 }
0x1069   : > { %v14098_v61 = vld [vmem:[#allocation1] sm:$0xff] }
0x106a   : > { %8410 = vst [vmem:[#allocation1] ss:$9 sm:$0xff] %v11040_v56  ;;  %v11075_v56 = vld [vmem:[%s11269_s19 + $0x11b] sm:$0x1] }
0x106b   : > { %8411 = vst [vmem:[#allocation1 + $0x1] ss:$9 sm:$0xff] %v11041_v1  ;;  %v11076_v1 = vld [vmem:[%s11269_s19 + $0x11c] sm:$0x1] }
0x106c   : > { %8412 = vst [vmem:[#allocation1 + $0x2] ss:$9 sm:$0xff] %v11042_v41  ;;  %v11079_v41 = vld [vmem:[%s11269_s19 + $0x11f] sm:$0x1] }
0x106d   : > { %8413 = vst [vmem:[#allocation1 + $0x3] ss:$9 sm:$0xff] %v11043_v7  ;;  %v8624_v7 = vld [vmem:[%s14399_s1 + $0x20] sm:$0xf] }
0x106e   : > { %8414 = vst [vmem:[#allocation1 + $0x4] ss:$9 sm:$0xff] %v11044_v18  ;;  %11112 = vmatpush.msk.msra.mxu0 %vm8693_vm8, %v8624_v7  ;;  %v7594_v18 = vpop.permute.xlu1 %7593  ;;  %11149 = vmatpush.msk.msra.mxu2 %vm8693_vm8, %v8624_v7 }
0x106f   : > { %8415 = vst [vmem:[#allocation1 + $0x5] ss:$9 sm:$0xff] %v11045_v30  ;;  %v8623_v30 = vld [vmem:[%s14399_s1 + $0x18] sm:$0xff]  ;;  %11129 = vmatpush.msk.msra.mxu1 %vm8693_vm8, %v8624_v7  ;;  %11154 = vmatpush.msk.msra.mxu3 %vm8693_vm8, %v8624_v7 }
0x1070   : > { %8416 = vst [vmem:[#allocation1 + $0x6] ss:$9 sm:$0xff] %v11046_v42  ;;  %v8494_v42 = vpop.permute.xlu0 %8493  ;;  %8709 = vmatpush.msra.mxu0 %v8623_v30  ;;  %11150 = vmatpush.msra.mxu2 %v8623_v30 }
0x1071   : > { %8417 = vst [vmem:[#allocation1 + $0x7] ss:$9 sm:$0xff] %v11047_v39  ;;  %v8622_v39 = vld [vmem:[%s14399_s1 + $0x10] sm:$0xff]  ;;  %8854 = vmatpush.msra.mxu1 %v8623_v30  ;;  %11155 = vmatpush.msra.mxu3 %v8623_v30  ;;  %v11110_v30 = vld [vmem:[%s11269_s19 + $0x142] sm:$0x1] }
0x1072   : > { %7670 = vst.msk [vmem:[#allocation2 + $0xa0] sm:$0xff] %vm7649_vm7, %v7594_v18  ;;  %8710 = vmatpush.msra.mxu0 %v8622_v39  ;;  %11151 = vmatpush.msra.mxu2 %v8622_v39 }
0x1073   : > { %8589 = vst.msk [vmem:[#allocation2 + $0x8] sm:$0xff] %vm8587_vm9, %v8494_v42  ;;  %8855 = vmatpush.msra.mxu1 %v8622_v39  ;;  %11156 = vmatpush.msra.mxu3 %v8622_v39  ;;  %v11111_v42 = vld [vmem:[%s11269_s19 + $0x143] sm:$0x1] }
0x1074   : > { %8711 = vmatpush.msra.mxu0 %v8621_v53  ;;  %11152 = vmatpush.msra.mxu2 %v8621_v53 }
0x1075   : > { %8856 = vmatpush.msra.mxu1 %v8621_v53  ;;  %11157 = vmatpush.msra.mxu3 %v8621_v53 }
0x1076   : > { %8712 = vmatpush.msra.mxu0 %v8620_v13  ;;  %11153 = vmatpush.msra.mxu2 %v8620_v13 }
0x1077   : > { %8857 = vmatpush.msra.mxu1 %v8620_v13  ;;  %11158 = vmatpush.msra.mxu3 %v8620_v13 }
0x1078   : > { %v14111_v27 = vld [vmem:[#allocation1] sm:$0xff] }
0x1079   : > { %8419 = vst [vmem:[#allocation1] ss:$9 sm:$0xff] %v11048_v25  ;;  %v11081_v25 = vld [vmem:[%s11269_s19 + $0x123] sm:$0x1] }
0x107a   : > { %8420 = vst [vmem:[#allocation1 + $0x1] ss:$9 sm:$0xff] %v11049_v37  ;;  %v8626_v59 = vld [vmem:[#allocation2 + $0x8] sm:$0xff] }
0x107b   : > { %8421 = vst [vmem:[#allocation1 + $0x2] ss:$9 sm:$0xff] %v11050_v14  ;;  %v11083_v14 = vld [vmem:[%s11269_s19 + $0x125] sm:$0x1] }
0x107c   : > { %8422 = vst [vmem:[#allocation1 + $0x3] ss:$9 sm:$0xff] %v11051_v43  ;;  %v11084_v43 = vld [vmem:[%s11269_s19 + $0x126] sm:$0x1] }
0x107d   : > { %8423 = vst [vmem:[#allocation1 + $0x4] ss:$9 sm:$0xff] %v11052_v6  ;;  %v11085_v6 = vld [vmem:[%s11269_s19 + $0x127] sm:$0x1] }
0x107e   : > { %8424 = vst [vmem:[#allocation1 + $0x5] ss:$9 sm:$0xff] %v11053_v46  ;;  %v7608_v46 = vpop.permute.xlu1 %7607 }
0x107f   : > { %8425 = vst [vmem:[#allocation1 + $0x6] ss:$9 sm:$0xff] %v11054_v49  ;;  %v11087_v49 = vld [vmem:[%s11269_s19 + $0x129] sm:$0x1] }
0x1080   : > { %8426 = vst [vmem:[#allocation1 + $0x7] ss:$9 sm:$0xff] %v11055_v52  ;;  %v11088_v52 = vld [vmem:[%s11269_s19 + $0x12a] sm:$0x1] }
0x1081   : > { %7677 = vst.msk [vmem:[#allocation2 + $0xd8] sm:$0xff] %vm7649_vm7, %v7608_v46 }
0x1086   : > { %v8496_v58 = vpop.permute.xlu1 %8495 }
0x1087   : > { %v8427_v3 = vld [vmem:[#allocation1] sm:$0xff]  ;;  %8590 = vst.msk [vmem:[#allocation2 + $0x10] sm:$0xff] %vm8587_vm9, %v8496_v58 }
0x1088   : > { %8539 = vrot.lane.b32.xlu1 %v8427_v3, %s11224_s27  ;;  %8428 = vst [vmem:[#allocation1] ss:$9 sm:$0xff] %v11056_v60  ;;  %v11090_v60 = vld [vmem:[%s11269_s19 + $0x12c] sm:$0x1]  ;;  %v11091_v3 = vld [vmem:[%s11269_s19 + $0x12d] sm:$0x1] }
0x1089   : > { %8429 = vst [vmem:[#allocation1 + $0x1] ss:$9 sm:$0xff] %v11057_v62 }
0x108a   : > { %8430 = vst [vmem:[#allocation1 + $0x2] ss:$9 sm:$0xff] %v11058_v5  ;;  %v11093_v5 = vld [vmem:[%s11269_s19 + $0x12f] sm:$0x1] }
0x108b   : > { %8431 = vst [vmem:[#allocation1 + $0x3] ss:$9 sm:$0xff] %v11059_v8  ;;  %v11094_v8 = vld [vmem:[%s11269_s19 + $0x130] sm:$0x1] }
0x108c   : > { %8432 = vst [vmem:[#allocation1 + $0x4] ss:$9 sm:$0xff] %v11060_v12  ;;  %v11095_v12 = vld [vmem:[%s11269_s19 + $0x131] sm:$0x1] }
0x108d   : > { %8433 = vst [vmem:[#allocation1 + $0x5] ss:$9 sm:$0xff] %v11061_v15 }
0x108e   : > { %8434 = vst [vmem:[#allocation1 + $0x6] ss:$9 sm:$0xff] %v11062_v16  ;;  %v11096_v16 = vld [vmem:[%s11269_s19 + $0x134] sm:$0x1] }
0x108f   : > { %8435 = vst [vmem:[#allocation1 + $0x7] ss:$9 sm:$0xff] %v11063_v17 }
0x1096   : > { %v8436_v26 = vld [vmem:[#allocation1] sm:$0xff] }
0x1097   : > { %8541 = vrot.lane.b32.xlu1 %v8436_v26, %s11224_s27  ;;  %8437 = vst [vmem:[#allocation1] ss:$9 sm:$0xff] %v11064_v19  ;;  %v8502_v19 = vpop.permute.xlu1 %8501  ;;  %v11098_v26 = vld [vmem:[%s11269_s19 + $0x136] sm:$0x1] }
0x1098   : > { %8438 = vst [vmem:[#allocation1 + $0x1] ss:$9 sm:$0xff] %v11065_v22  ;;  %v8627_v22 = vld [vmem:[#allocation2 + $0x10] sm:$0xff] }
0x1099   : > { %8439 = vst [vmem:[#allocation1 + $0x2] ss:$9 sm:$0xff] %v11066_v28 }
0x109a   : > { %8440 = vst [vmem:[#allocation1 + $0x3] ss:$9 sm:$0xff] %v11067_v32  ;;  %v11099_v32 = vld [vmem:[%s11269_s19 + $0x137] sm:$0x1] }
0x109b   : > { %8441 = vst [vmem:[#allocation1 + $0x4] ss:$9 sm:$0xff] %v11068_v31  ;;  %v11100_v31 = vld [vmem:[%s11269_s19 + $0x138] sm:$0x1] }
0x109c   : > { %8442 = vst [vmem:[#allocation1 + $0x5] ss:$9 sm:$0xff] %v11069_v33  ;;  %v11101_v33 = vld [vmem:[%s11269_s19 + $0x139] sm:$0x1] }
0x109d   : > { %8443 = vst [vmem:[#allocation1 + $0x6] ss:$9 sm:$0xff] %v11070_v34  ;;  %v11102_v34 = vld [vmem:[%s11269_s19 + $0x13a] sm:$0x1] }
0x109e   : > { %8444 = vst [vmem:[#allocation1 + $0x7] ss:$9 sm:$0xff] %v11071_v36  ;;  %v11103_v36 = vld [vmem:[%s11269_s19 + $0x13b] sm:$0x1] }
0x109f   : > { %7613 = vrot.lane.b32.xlu1 %v13842_v48, %s11223_s26  ;;  %v11077_v48 = vld [vmem:[%s11269_s19 + $0x11d] sm:$0x1]  ;;  %v8512_v40 = vpop.permute.xlu1 %8511  ;;  %8593 = vst.msk [vmem:[#allocation2 + $0x28] sm:$0xff] %vm8587_vm9, %v8502_v19 }
0x10a0   : > { %8598 = vst.msk [vmem:[#allocation2 + $0x50] sm:$0xff] %vm8587_vm9, %v8512_v40 }
0x10a5   : > { %v8445_v47 = vld [vmem:[#allocation1] sm:$0xff] }
0x10a6   : > { %8446 = vst [vmem:[#allocation1] ss:$9 sm:$0xff] %v11072_v29  ;;  %8543 = vrot.lane.b32.xlu2 %v8445_v47, %s11224_s27  ;;  %v11105_v47 = vld [vmem:[%s11269_s19 + $0x13d] sm:$0x1]  ;;  %v8630_v39 = vld [vmem:[#allocation2 + $0x28] sm:$0xff] }
0x10a7   : > { %6659 = vrot.lane.b32.xlu1 %v13440_v11, %s11222_s25  ;;  %8447 = vst [vmem:[#allocation1 + $0x1] ss:$9 sm:$0xff] %v11073_v38  ;;  %v8492_v11 = vpop.permute.xlu2 %8491  ;;  %v11104_v38 = vld [vmem:[%s11269_s19 + $0x13c] sm:$0x1] }
0x10a8   : > { %8448 = vst [vmem:[#allocation1 + $0x2] ss:$9 sm:$0xff] %v11074_v45 }
0x10a9   : > { %8449 = vst [vmem:[#allocation1 + $0x3] ss:$9 sm:$0xff] %v11075_v56 }
0x10aa   : > { %8450 = vst [vmem:[#allocation1 + $0x4] ss:$9 sm:$0xff] %v11076_v1  ;;  %v11106_v1 = vld [vmem:[%s11269_s19 + $0x13e] sm:$0x1] }
0x10ab   : > { %8451 = vst [vmem:[#allocation1 + $0x5] ss:$9 sm:$0xff] %v11077_v48  ;;  %v8518_v48 = vpop.permute.xlu1 %8517 }
0x10ac   : > { %8452 = vst [vmem:[#allocation1 + $0x6] ss:$9 sm:$0xff] %v11078_v21  ;;  %v11108_v21 = vld [vmem:[%s11269_s19 + $0x140] sm:$0x1] }
0x10ad   : > { %8453 = vst [vmem:[#allocation1 + $0x7] ss:$9 sm:$0xff] %v11079_v41 }
0x10ae   : > { %7565 = vrot.lane.b32.xlu2 %v13602_v54, %s11223_s26  ;;  %8588 = vst.msk [vmem:[#allocation2] sm:$0xff] %vm8587_vm9, %v8492_v11  ;;  %v11080_v54 = vld [vmem:[%s11269_s19 + $0x122] sm:$0x1]  ;;  %v11109_v11 = vld [vmem:[%s11269_s19 + $0x141] sm:$0x1] }
0x10af   : > { %v8498_v17 = vpop.permute.xlu2 %8497  ;;  %8601 = vst.msk [vmem:[#allocation2 + $0x68] sm:$0xff] %vm8587_vm9, %v8518_v48 }
0x10b0   : > { %8591 = vst.msk [vmem:[#allocation2 + $0x18] sm:$0xff] %vm8587_vm9, %v8498_v17  ;;  %v14298_v17 = vld [vmem:[%s14400_s2] ss:$0 sm:$0xff] }
0x10b3   : > { %v8526_v53 = vpop.permute.xlu1 %8525 }
0x10b4   : > { %v8454_v37 = vld [vmem:[#allocation1] sm:$0xff]  ;;  %8605 = vst.msk [vmem:[#allocation2 + $0x88] sm:$0xff] %vm8587_vm9, %v8526_v53 }
0x10b5   : > { %8545 = vrot.lane.b32.xlu0 %v8454_v37, %s11224_s27  ;;  %8455 = vst [vmem:[#allocation1] ss:$9 sm:$0xff] %v11080_v54  ;;  %v8625_v57 = vld [vmem:[#allocation2] sm:$0xff]  ;;  %v8635_v54 = vld [vmem:[#allocation2 + $0x50] sm:$0xff] }
0x10b6   : > { %8456 = vst [vmem:[#allocation1 + $0x1] ss:$9 sm:$0xff] %v11081_v25  ;;  %8503 = vrot.lane.b32.xlu2 %v13922_v35, %s11224_s27  ;;  %11113 = vmatmul.msk.f32.vlgmr.msra.gmra.mxu0 %vm8644_vm10, %v8625_v57  ;;  %v8500_v35 = vpop.permute.xlu0 %8499 }
0x10b7   : > { %8457 = vst [vmem:[#allocation1 + $0x2] ss:$9 sm:$0xff] %v11082_v50  ;;  %v8628_v20 = vld [vmem:[#allocation2 + $0x18] sm:$0xff] }
0x10b8   : > { %8458 = vst [vmem:[#allocation1 + $0x3] ss:$9 sm:$0xff] %v11083_v14 }
0x10b9   : > { %8459 = vst [vmem:[#allocation1 + $0x4] ss:$9 sm:$0xff] %v11084_v43 }
0x10ba   : > { %8460 = vst [vmem:[#allocation1 + $0x5] ss:$9 sm:$0xff] %v11085_v6 }
0x10bb   : > { %8461 = vst [vmem:[#allocation1 + $0x6] ss:$9 sm:$0xff] %v11086_v23  ;;  %v8779_v14 = vld [vmem:[#allocation2 + $0x88] sm:$0xff] }
0x10bc   : > { %8462 = vst [vmem:[#allocation1 + $0x7] ss:$9 sm:$0xff] %v11087_v49  ;;  %v8638_v23 = vld [vmem:[#allocation2 + $0x68] sm:$0xff] }
0x10bd   : > { %8535 = vrot.lane.b32.xlu0 %v14098_v61, %s11224_s27  ;;  %8592 = vst.msk [vmem:[#allocation2 + $0x20] sm:$0xff] %vm8587_vm9, %v8500_v35  ;;  %v11092_v61 = vld [vmem:[%s11269_s19 + $0x12e] sm:$0x1] }
0x10be   : > { %11114 = vmatmul.msk.f32.gmra.mxu0 %vm8644_vm10, %v8626_v59  ;;  %v8508_v15 = vpop.permute.xlu0 %8507  ;;  %v8532_v37 = vpop.permute.xlu1 %8531 }
0x10bf   : > { %8596 = vst.msk [vmem:[#allocation2 + $0x40] sm:$0xff] %vm8587_vm9, %v8508_v15 }
0x10c0   : > { %8608 = vst.msk [vmem:[#allocation2 + $0xa0] sm:$0xff] %vm8587_vm9, %v8532_v37 }
0x10c3   : > { %v8463_v62 = vld [vmem:[#allocation1] sm:$0xff] }
0x10c4   : > { %8547 = vrot.lane.b32.xlu1 %v8463_v62, %s11224_s27  ;;  %8464 = vst [vmem:[#allocation1] ss:$9 sm:$0xff] %v11088_v52  ;;  %v8629_v45 = vld [vmem:[#allocation2 + $0x20] sm:$0xff] }
0x10c5   : > { %8465 = vst [vmem:[#allocation1 + $0x1] ss:$9 sm:$0xff] %v11089_v55  ;;  %8521 = vrot.lane.b32.xlu0 %v14018_v9, %s11224_s27  ;;  %v11097_v9 = vld [vmem:[%s11269_s19 + $0x135] sm:$0x1] }
0x10c6   : > { %8466 = vst [vmem:[#allocation1 + $0x2] ss:$9 sm:$0xff] %v11090_v60  ;;  %v8510_v28 = vpop.permute.xlu0 %8509  ;;  %11115 = vmatmul.msk.f32.gmra.mxu0 %vm8644_vm10, %v8627_v22 }
0x10c7   : > { %8467 = vst [vmem:[#allocation1 + $0x3] ss:$9 sm:$0xff] %v11091_v3  ;;  %v8782_v55 = vld [vmem:[#allocation2 + $0xa0] sm:$0xff] }
0x10c8   : > { %8468 = vst [vmem:[#allocation1 + $0x4] ss:$9 sm:$0xff] %v11092_v61 }
0x10c9   : > { %8469 = vst [vmem:[#allocation1 + $0x5] ss:$9 sm:$0xff] %v11093_v5 }
0x10ca   : > { %8470 = vst [vmem:[#allocation1 + $0x6] ss:$9 sm:$0xff] %v11094_v8 }
0x10cb   : > { %8471 = vst [vmem:[#allocation1 + $0x7] ss:$9 sm:$0xff] %v11095_v12 }
0x10cc   : > { %6677 = vrot.lane.b32.xlu1 %v13532_v63, %s11222_s25  ;;  %v8633_v63 = vld [vmem:[#allocation2 + $0x40] sm:$0xff]  ;;  %8597 = vst.msk [vmem:[#allocation2 + $0x48] sm:$0xff] %vm8587_vm9, %v8510_v28 }
0x10cd   : > { %11121 = vmatmul.msk.f32.vlgmr.msra.gmra.mxu2 %vm8644_vm10, %v8633_v63 }
0x10ce   : > { %v8516_v29 = vpop.permute.xlu0 %8515  ;;  %11116 = vmatmul.msk.f32.gmra.mxu0 %vm8644_vm10, %v8628_v20 }
0x10cf   : > { %8600 = vst.msk [vmem:[#allocation2 + $0x60] sm:$0xff] %vm8587_vm9, %v8516_v29 }
0x10d2   : > { %v8472_v24 = vld [vmem:[#allocation1] sm:$0xff] }
0x10d3   : > { %8473 = vst [vmem:[#allocation1] ss:$9 sm:$0xff] %v11096_v16  ;;  %8549 = vrot.lane.b32.xlu2 %v8472_v24, %s11224_s27  ;;  %v8634_v41 = vld [vmem:[#allocation2 + $0x48] sm:$0xff] }
0x10d4   : > { %7583 = vrot.lane.b32.xlu1 %v13693_v44, %s11223_s26  ;;  %8474 = vst [vmem:[#allocation1 + $0x1] ss:$9 sm:$0xff] %v11097_v9  ;;  %v8514_v44 = vpop.permute.xlu2 %8513 }
0x10d5   : > { %8475 = vst [vmem:[#allocation1 + $0x2] ss:$9 sm:$0xff] %v11098_v26  ;;  %11122 = vmatmul.msk.f32.gmra.mxu2 %vm8644_vm10, %v8634_v41 }
0x10d6   : > { %8476 = vst [vmem:[#allocation1 + $0x3] ss:$9 sm:$0xff] %v11099_v32  ;;  %11117 = vmatmul.msk.f32.gmra.mxu0 %vm8644_vm10, %v8629_v45  ;;  %v8524_v7 = vpop.permute.xlu0 %8523  ;;  %v8637_v43 = vld [vmem:[#allocation2 + $0x60] sm:$0xff] }
0x10d7   : > { %8477 = vst [vmem:[#allocation1 + $0x4] ss:$9 sm:$0xff] %v11100_v31 }
0x10d8   : > { %8478 = vst [vmem:[#allocation1 + $0x5] ss:$9 sm:$0xff] %v11101_v33 }
0x10d9   : > { %8479 = vst [vmem:[#allocation1 + $0x6] ss:$9 sm:$0xff] %v11102_v34 }
0x10da   : > { %8480 = vst [vmem:[#allocation1 + $0x7] ss:$9 sm:$0xff] %v11103_v36 }
0x10db   : > { %7615 = vrot.lane.b32.xlu2 %v13851_v4, %s11223_s26  ;;  %8599 = vst.msk [vmem:[#allocation2 + $0x58] sm:$0xff] %vm8587_vm9, %v8514_v44  ;;  %v11107_v4 = vld [vmem:[%s11269_s19 + $0x13f] sm:$0x1] }
0x10dc   : > { %v8528_v18 = vpop.permute.xlu2 %8527  ;;  %8604 = vst.msk [vmem:[#allocation2 + $0x80] sm:$0xff] %vm8587_vm9, %v8524_v7 }
0x10dd   : > { %11123 = vmatmul.msk.f32.gmra.mxu2 %vm8644_vm10, %v8635_v54  ;;  %8606 = vst.msk [vmem:[#allocation2 + $0x90] sm:$0xff] %vm8587_vm9, %v8528_v18 }
0x10de   : > { %11118 = vmatmul.msk.f32.gmra.mxu0 %vm8644_vm10, %v8630_v39 }
0x10e1   : > { %v8481_v56 = vld [vmem:[#allocation1] sm:$0xff] }
0x10e2   : > { %8551 = vrot.lane.b32.xlu0 %v8481_v56, %s11224_s27  ;;  %8482 = vst [vmem:[#allocation1] ss:$9 sm:$0xff] %v11104_v38  ;;  %v8636_v25 = vld [vmem:[#allocation2 + $0x58] sm:$0xff] }
0x10e3   : > { %8483 = vst [vmem:[#allocation1 + $0x1] ss:$9 sm:$0xff] %v11105_v47  ;;  %6661 = vrot.lane.b32.xlu2 %v13452_v10, %s11222_s25  ;;  %v8530_v10 = vpop.permute.xlu0 %8529 }
0x10e4   : > { %8484 = vst [vmem:[#allocation1 + $0x2] ss:$9 sm:$0xff] %v11106_v1  ;;  %v8534_v13 = vpop.permute.xlu2 %8533 }
0x10e5   : > { %8485 = vst [vmem:[#allocation1 + $0x3] ss:$9 sm:$0xff] %v11107_v4  ;;  %11124 = vmatmul.msk.f32.gmra.mxu2 %vm8644_vm10, %v8636_v25 }
0x10e6   : > { %8486 = vst [vmem:[#allocation1 + $0x4] ss:$9 sm:$0xff] %v11108_v21 }
0x10e7   : > { %8487 = vst [vmem:[#allocation1 + $0x5] ss:$9 sm:$0xff] %v11109_v11 }
0x10e8   : > { %8488 = vst [vmem:[#allocation1 + $0x6] ss:$9 sm:$0xff] %v11110_v30 }
0x10e9   : > { %8489 = vst [vmem:[#allocation1 + $0x7] ss:$9 sm:$0xff] %v11111_v42 }
0x10ea   : > { %7567 = vrot.lane.b32.xlu0 %v13613_v2, %s11223_s26  ;;  %8607 = vst.msk [vmem:[#allocation2 + $0x98] sm:$0xff] %vm8587_vm9, %v8530_v10 }
0x10eb   : > { %8505 = vrot.lane.b32.xlu2 %v13935_v51, %s11224_s27  ;;  %8609 = vst.msk [vmem:[#allocation2 + $0xa8] sm:$0xff] %vm8587_vm9, %v8534_v13  ;;  %v8778_v51 = vld [vmem:[#allocation2 + $0x80] sm:$0xff]  ;;  %v7598_v5 = vpop.permute.xlu0 %7597 }
0x10ec   : > { %11130 = vmatmul.msk.f32.vlgmr.msra.gmra.mxu1 %vm8644_vm10, %v8778_v51  ;;  %v8520_v50 = vpop.permute.xlu2 %8519 }
0x10ed   : > { %8602 = vst.msk [vmem:[#allocation2 + $0x70] sm:$0xff] %vm8587_vm9, %v8520_v50  ;;  %11125 = vmatmul.msk.f32.gmra.mxu2 %vm8644_vm10, %v8637_v43 }
0x10f0   : > { %v8490_v2 = vld [vmem:[#allocation1] sm:$0xff] }
0x10f1   : > { %8553 = vrot.lane.b32.xlu1 %v8490_v2, %s11224_s27 }
0x10f2   : > { %8537 = vrot.lane.b32.xlu0 %v14111_v27, %s11224_s27  ;;  %v8780_v27 = vld [vmem:[#allocation2 + $0x90] sm:$0xff]  ;;  %v8783_v3 = vld [vmem:[#allocation2 + $0xa8] sm:$0xff] }
0x10f4   : > { %11131 = vmatmul.msk.f32.gmra.mxu1 %vm8644_vm10, %v8779_v14  ;;  %v8639_v52 = vld [vmem:[#allocation2 + $0x70] sm:$0xff] }
0x10f5   : > { %11126 = vmatmul.msk.f32.gmra.mxu2 %vm8644_vm10, %v8638_v23 }
0x10f9   : > { %7599 = vrot.lane.b32.xlu1 %v13772_v0, %s11223_s26  ;;  %v8781_v0 = vld [vmem:[#allocation2 + $0x98] sm:$0xff] }
0x10fa   : > { %v8540_v57 = vpop.permute.xlu1 %8539 }
0x10fb   : > { %8612 = vst.msk [vmem:[#allocation2 + $0xc0] sm:$0xff] %vm8587_vm9, %v8540_v57 }
0x10fc   : > { %11132 = vmatmul.msk.f32.gmra.mxu1 %vm8644_vm10, %v8780_v27 }
0x10fd   : > { %11127 = vmatmul.msk.f32.gmra.mxu2 %vm8644_vm10, %v8639_v52 }
0x1100   : > { %v8544_v6 = vpop.permute.xlu2 %8543 }
0x1101   : > { %8614 = vst.msk [vmem:[#allocation2 + $0xd0] sm:$0xff] %vm8587_vm9, %v8544_v6 }
0x1102   : > { %v8786_v46 = vld [vmem:[#allocation2 + $0xc0] sm:$0xff] }
0x1103   : > { %11138 = vmatmul.msk.f32.vlgmr.msra.gmra.mxu3 %vm8644_vm10, %v8786_v46 }
0x1104   : > { %11133 = vmatmul.msk.f32.gmra.mxu1 %vm8644_vm10, %v8781_v0 }
0x1108   : > { %v7566_v49 = vpop.permute.xlu2 %7565  ;;  %v8788_v62 = vld [vmem:[#allocation2 + $0xd0] sm:$0xff] }
0x1109   : > { %v8542_v35 = vpop.permute.xlu1 %8541  ;;  %7656 = vst.msk [vmem:[#allocation2 + $0x30] sm:$0xff] %vm7649_vm7, %v7566_v49 }
0x110a   : > { %8613 = vst.msk [vmem:[#allocation2 + $0xc8] sm:$0xff] %vm8587_vm9, %v8542_v35 }
0x110c   : > { %11134 = vmatmul.msk.f32.gmra.mxu1 %vm8644_vm10, %v8782_v55 }
0x1110   : > { %v8504_v58 = vpop.permute.xlu2 %8503 }
0x1111   : > { %v7614_v59 = vpop.permute.xlu1 %7613  ;;  %v8787_v60 = vld [vmem:[#allocation2 + $0xc8] sm:$0xff]  ;;  %8594 = vst.msk [vmem:[#allocation2 + $0x30] sm:$0xff] %vm8587_vm9, %v8504_v58 }
0x1112   : > { %7680 = vst.msk [vmem:[#allocation2 + $0xf0] sm:$0xff] %vm7649_vm7, %v7614_v59  ;;  %11139 = vmatmul.msk.f32.gmra.mxu3 %vm8644_vm10, %v8787_v60 }
0x1114   : > { %11135 = vmatmul.msk.f32.gmra.mxu1 %vm8644_vm10, %v8783_v3 }
0x1118   : > { %v8631_v8 = vld [vmem:[#allocation2 + $0x30] sm:$0xff] }
0x1119   : > { %v6660_v61 = vpop.permute.xlu1 %6659  ;;  %11119 = vmatmul.msk.f32.gmra.mxu0 %vm8644_vm10, %v8631_v8 }
0x111a   : > { %6734 = vst.msk [vmem:[#allocation2 + $0xb0] sm:$0xff] %vm6711_vm6, %v6660_v61  ;;  %11140 = vmatmul.msk.f32.gmra.mxu3 %vm8644_vm10, %v8788_v62 }
0x111b   : > { %7672 = vst.msk [vmem:[#allocation2 + $0xb0] sm:$0xff] %vm7649_vm7, %v7598_v5 }
0x1127   : > { %v8546_v12 = vpop.permute.xlu0 %8545 }
0x1128   : > { %8615 = vst.msk [vmem:[#allocation2 + $0xd8] sm:$0xff] %vm8587_vm9, %v8546_v12 }
0x112d   : > { %v8550_v15 = vpop.permute.xlu2 %8549 }
0x112e   : > { %8617 = vst.msk [vmem:[#allocation2 + $0xe8] sm:$0xff] %vm8587_vm9, %v8550_v15 }
0x112f   : > { %v8536_v16 = vpop.permute.xlu0 %8535  ;;  %v8789_v9 = vld [vmem:[#allocation2 + $0xd8] sm:$0xff] }
0x1130   : > { %8610 = vst.msk [vmem:[#allocation2 + $0xb0] sm:$0xff] %vm8587_vm9, %v8536_v16  ;;  %11141 = vmatmul.msk.f32.gmra.mxu3 %vm8644_vm10, %v8789_v9 }
0x1133   : > { %v8714_v22 = vpop.f32.mrf.mxu0 }
0x1134   : > { %v8715_v26 = vadd.f32 %v14298_v17, %v8714_v22 }
0x1135   : > { %v7616_v28 = vpop.permute.xlu2 %7615  ;;  %v8791_v31 = vld [vmem:[#allocation2 + $0xe8] sm:$0xff] }
0x1136   : > { %v8548_v19 = vpop.permute.xlu1 %8547  ;;  %8762 = vst [vmem:[%s14306_s20] sm:$0xff] %v8715_v26 }
0x1137   : > { %8616 = vst.msk [vmem:[#allocation2 + $0xe0] sm:$0xff] %vm8587_vm9, %v8548_v19  ;;  %v8784_v24 = vld [vmem:[#allocation2 + $0xb0] sm:$0xff]  ;;  %v8522_v20 = vpop.permute.xlu0 %8521 }
0x1138   : > { %11136 = vmatmul.msk.f32.gmra.mxu1 %vm8644_vm10, %v8784_v24 }
0x113b   : > { %v8717_v34 = vpop.f32.mrf.mxu0 }
0x113c   : > { %v8718_v36 = vadd.f32 %v14298_v17, %v8717_v34 }
0x113d   : > { %v6662_v33 = vpop.permute.xlu2 %6661 }
0x113e   : > { %v6678_v32 = vpop.permute.xlu1 %6677  ;;  %v8790_v63 = vld [vmem:[#allocation2 + $0xe0] sm:$0xff]  ;;  %6735 = vst.msk [vmem:[#allocation2 + $0xb8] sm:$0xff] %vm6711_vm6, %v6662_v33 }
0x113f   : > { %6743 = vst.msk [vmem:[#allocation2 + $0xf8] sm:$0xff] %vm6711_vm6, %v6678_v32  ;;  %11142 = vmatmul.msk.f32.gmra.mxu3 %vm8644_vm10, %v8790_v63 }
0x1140   : > { %7681 = vst.msk [vmem:[#allocation2 + $0xf8] sm:$0xff] %vm7649_vm7, %v7616_v28 }
0x1141   : > { %8763 = vst [vmem:[%s14306_s20 + $0x8] sm:$0xff] %v8718_v36 }
0x1143   : > { %v8720_v44 = vpop.f32.mrf.mxu0 }
0x1144   : > { %v8721_v38 = vadd.f32 %v14298_v17, %v8720_v44 }
0x1145   : > { %v8506_v4 = vpop.permute.xlu2 %8505 }
0x1146   : > { %v7584_v40 = vpop.permute.xlu1 %7583  ;;  %8764 = vst [vmem:[%s14306_s20 + $0x10] sm:$0xff] %v8721_v38 }
0x1147   : > { %7665 = vst.msk [vmem:[#allocation2 + $0x78] sm:$0xff] %vm7649_vm7, %v7584_v40  ;;  %11143 = vmatmul.msk.f32.gmra.mxu3 %vm8644_vm10, %v8791_v31 }
0x1148   : > { %8603 = vst.msk [vmem:[#allocation2 + $0x78] sm:$0xff] %vm8587_vm9, %v8522_v20 }
0x114b   : > { %v8723_v56 = vpop.f32.mrf.mxu0 }
0x114c   : > { %v8724_v48 = vadd.f32 %v14298_v17, %v8723_v56 }
0x114e   : > { %8765 = vst [vmem:[%s14306_s20 + $0x18] sm:$0xff] %v8724_v48 }
0x114f   : > { %v8640_v29 = vld [vmem:[#allocation2 + $0x78] sm:$0xff] }
0x1150   : > { %11128 = vmatmul.msk.f32.gmra.mxu2 %vm8644_vm10, %v8640_v29  ;;  %v8738_v47 = vpop.f32.mrf.mxu2 }
0x1151   : > { %v8739_v1 = vadd.f32 %v14298_v17, %v8738_v47 }
0x1153   : > { %8770 = vst [vmem:[%s14306_s20 + $0x40] sm:$0xff] %v8739_v1  ;;  %v8726_v7 = vpop.f32.mrf.mxu0 }
0x1154   : > { %v8552_v45 = vpop.permute.xlu0 %8551  ;;  %v8727_v18 = vadd.f32 %v14298_v17, %v8726_v7 }
0x1155   : > { %8618 = vst.msk [vmem:[#allocation2 + $0xf0] sm:$0xff] %vm8587_vm9, %v8552_v45 }
0x1156   : > { %8766 = vst [vmem:[%s14306_s20 + $0x20] sm:$0xff] %v8727_v18 }
0x1158   : > { %v8741_v42 = vpop.f32.mrf.mxu2 }
0x1159   : > { %v8742_v54 = vadd.f32 %v14298_v17, %v8741_v42 }
0x115b   : > { %v8729_v39 = vpop.f32.mrf.mxu0  ;;  %8771 = vst [vmem:[%s14306_s20 + $0x48] sm:$0xff] %v8742_v54 }
0x115c   : > { %v8792_v21 = vld [vmem:[#allocation2 + $0xf0] sm:$0xff]  ;;  %v7568_v41 = vpop.permute.xlu0 %7567  ;;  %v8730_v53 = vadd.f32 %v14298_v17, %v8729_v39 }
0x115d   : > { %11144 = vmatmul.msk.f32.gmra.mxu3 %vm8644_vm10, %v8792_v21  ;;  %7657 = vst.msk [vmem:[#allocation2 + $0x38] sm:$0xff] %vm7649_vm7, %v7568_v41 }
0x115e   : > { %8595 = vst.msk [vmem:[#allocation2 + $0x38] sm:$0xff] %vm8587_vm9, %v8506_v4 }
0x115f   : > { %8767 = vst [vmem:[%s14306_s20 + $0x28] sm:$0xff] %v8730_v53 }
0x1160   : > { %v8744_v25 = vpop.f32.mrf.mxu2 }
0x1161   : > { %v8745_v37 = vadd.f32 %v14298_v17, %v8744_v25 }
0x1163   : > { %v8554_v11 = vpop.permute.xlu1 %8553  ;;  %8772 = vst [vmem:[%s14306_s20 + $0x50] sm:$0xff] %v8745_v37 }
0x1164   : > { %8619 = vst.msk [vmem:[#allocation2 + $0xf8] sm:$0xff] %vm8587_vm9, %v8554_v11  ;;  %v8538_v10 = vpop.permute.xlu0 %8537 }
0x1165   : > { %v8632_v30 = vld [vmem:[#allocation2 + $0x38] sm:$0xff] }
0x1166   : > { %11120 = vmatmul.msk.f32.gmra.mxu0 %vm8644_vm10, %v8632_v30 }
0x1168   : > { %v8747_v43 = vpop.f32.mrf.mxu2 }
0x1169   : > { %v8859_v51 = vpop.f32.mrf.mxu1  ;;  %v8748_v57 = vadd.f32 %v14298_v17, %v8747_v43 }
0x116a   : > { %v8860_v50 = vadd.f32 %v14298_v17, %v8859_v51 }
0x116b   : > { %v7600_v13 = vpop.permute.xlu1 %7599  ;;  %v8793_v2 = vld [vmem:[#allocation2 + $0xf8] sm:$0xff]  ;;  %8773 = vst [vmem:[%s14306_s20 + $0x58] sm:$0xff] %v8748_v57 }
0x116c   : > { %7673 = vst.msk [vmem:[#allocation2 + $0xb8] sm:$0xff] %vm7649_vm7, %v7600_v13  ;;  %11145 = vmatmul.msk.f32.gmra.mxu3 %vm8644_vm10, %v8793_v2 }
0x116d   : > { %8611 = vst.msk [vmem:[#allocation2 + $0xb8] sm:$0xff] %vm8587_vm9, %v8538_v10 }
0x116e   : > { %8907 = vst [vmem:[%s14306_s20 + $0x80] sm:$0xff] %v8860_v50 }
0x1170   : > { %v8750_v23 = vpop.f32.mrf.mxu2 }
0x1171   : > { %v8862_v27 = vpop.f32.mrf.mxu1  ;;  %v8751_v46 = vadd.f32 %v14298_v17, %v8750_v23 }
0x1172   : > { %v8863_v6 = vadd.f32 %v14298_v17, %v8862_v27 }
0x1173   : > { %8774 = vst [vmem:[%s14306_s20 + $0x60] sm:$0xff] %v8751_v46 }
0x1174   : > { %v8785_v14 = vld [vmem:[#allocation2 + $0xb8] sm:$0xff]  ;;  %8908 = vst [vmem:[%s14306_s20 + $0x88] sm:$0xff] %v8863_v6 }
0x1175   : > { %11137 = vmatmul.msk.f32.gmra.mxu1 %vm8644_vm10, %v8785_v14 }
0x1178   : > { %v8753_v52 = vpop.f32.mrf.mxu2 }
0x1179   : > { %v8865_v0 = vpop.f32.mrf.mxu1  ;;  %v8754_v58 = vadd.f32 %v14298_v17, %v8753_v52 }
0x117a   : > { %v8866_v49 = vadd.f32 %v14298_v17, %v8865_v0 }
0x117b   : > { %8775 = vst [vmem:[%s14306_s20 + $0x68] sm:$0xff] %v8754_v58 }
0x117c   : > { %8909 = vst [vmem:[%s14306_s20 + $0x90] sm:$0xff] %v8866_v49 }
0x1180   : > { %v8756_v62 = vpop.f32.mrf.mxu2 }
0x1181   : > { %v8868_v59 = vpop.f32.mrf.mxu1  ;;  %v8757_v61 = vadd.f32 %v14298_v17, %v8756_v62 }
0x1182   : > { %v8869_v60 = vadd.f32 %v14298_v17, %v8868_v59 }
0x1183   : > { %8776 = vst [vmem:[%s14306_s20 + $0x70] sm:$0xff] %v8757_v61 }
0x1184   : > { %8910 = vst [vmem:[%s14306_s20 + $0x98] sm:$0xff] %v8869_v60 }
0x1186   : > { %v8883_v35 = vpop.f32.mrf.mxu3 }
0x1187   : > { %v8884_v55 = vadd.f32 %v14298_v17, %v8883_v35 }
0x1189   : > { %8915 = vst [vmem:[%s14306_s20 + $0xc0] sm:$0xff] %v8884_v55  ;;  %v8871_v3 = vpop.f32.mrf.mxu1 }
0x118a   : > { %v8872_v5 = vadd.f32 %v14298_v17, %v8871_v3 }
0x118c   : > { %8911 = vst [vmem:[%s14306_s20 + $0xa0] sm:$0xff] %v8872_v5 }
0x1191   : > { %v8874_v15 = vpop.f32.mrf.mxu1 }
0x1192   : > { %v8875_v16 = vadd.f32 %v14298_v17, %v8874_v15 }
0x1194   : > { %8912 = vst [vmem:[%s14306_s20 + $0xa8] sm:$0xff] %v8875_v16 }
0x1195   : > { %v8886_v8 = vpop.f32.mrf.mxu3 }
0x1196   : > { %v8887_v12 = vadd.f32 %v14298_v17, %v8886_v8  ;;  %v8732_v19 = vpop.f32.mrf.mxu0 }
0x1197   : > { %v8733_v24 = vadd.f32 %v14298_v17, %v8732_v19 }
0x1198   : > { %8916 = vst [vmem:[%s14306_s20 + $0xc8] sm:$0xff] %v8887_v12 }
0x1199   : > { %8768 = vst [vmem:[%s14306_s20 + $0x30] sm:$0xff] %v8733_v24 }
0x119d   : > { %v8889_v9 = vpop.f32.mrf.mxu3 }
0x119e   : > { %v8890_v22 = vadd.f32 %v14298_v17, %v8889_v9 }
0x11a0   : > { %8917 = vst [vmem:[%s14306_s20 + $0xd0] sm:$0xff] %v8890_v22 }
0x11b3   : > { %v8892_v26 = vpop.f32.mrf.mxu3 }
0x11b4   : > { %v8893_v28 = vadd.f32 %v14298_v17, %v8892_v26 }
0x11b5   : > { %v8877_v32 = vpop.f32.mrf.mxu1 }
0x11b6   : > { %8918 = vst [vmem:[%s14306_s20 + $0xd8] sm:$0xff] %v8893_v28  ;;  %v8878_v63 = vadd.f32 %v14298_v17, %v8877_v32 }
0x11b8   : > { %8913 = vst [vmem:[%s14306_s20 + $0xb0] sm:$0xff] %v8878_v63 }
0x11c2   : > { %v8895_v31 = vpop.f32.mrf.mxu3 }
0x11c3   : > { %v8896_v33 = vadd.f32 %v14298_v17, %v8895_v31 }
0x11c5   : > { %8919 = vst [vmem:[%s14306_s20 + $0xe0] sm:$0xff] %v8896_v33 }
0x11ca   : > { %v8898_v34 = vpop.f32.mrf.mxu3 }
0x11cb   : > { %v8899_v36 = vadd.f32 %v14298_v17, %v8898_v34 }
0x11cd   : > { %8920 = vst [vmem:[%s14306_s20 + $0xe8] sm:$0xff] %v8899_v36 }
0x11d3   : > { %v8759_v40 = vpop.f32.mrf.mxu2 }
0x11d4   : > { %v8760_v20 = vadd.f32 %v14298_v17, %v8759_v40 }
0x11d6   : > { %8777 = vst [vmem:[%s14306_s20 + $0x78] sm:$0xff] %v8760_v20 }
0x11e0   : > { %v8901_v29 = vpop.f32.mrf.mxu3 }
0x11e1   : > { %v8902_v44 = vadd.f32 %v14298_v17, %v8901_v29 }
0x11e3   : > { %8921 = vst [vmem:[%s14306_s20 + $0xf0] sm:$0xff] %v8902_v44  ;;  %v8735_v38 = vpop.f32.mrf.mxu0 }
0x11e4   : > { %v8736_v45 = vadd.f32 %v14298_v17, %v8735_v38 }
0x11e6   : > { %8769 = vst [vmem:[%s14306_s20 + $0x38] sm:$0xff] %v8736_v45 }
0x11ef   : > { %v8904_v47 = vpop.f32.mrf.mxu3 }
0x11f0   : > { %v8905_v56 = vadd.f32 %v14298_v17, %v8904_v47 }
0x11f2   : > { %8922 = vst [vmem:[%s14306_s20 + $0xf8] sm:$0xff] %v8905_v56  ;;  %v8880_v1 = vpop.f32.mrf.mxu1 }
0x11f3   : > { %v8881_v48 = vadd.f32 %v14298_v17, %v8880_v1 }
0x11f5   : > { %8914 = vst [vmem:[%s14306_s20 + $0xb8] sm:$0xff] %v8881_v48 }
0x11f6 PF: > { %s13_s14 = sadd.s32 1, %s11215_s14   ;;  %s14402_s12 = smov %s11211_s13 }
0x11f7   : > { %p10_p5 = scmp.ge.s32.totalorder %s13_s14, 4   ;;  %s14403_s13 = smov %s14405_s15 }
0x11f9   :  { %12 = sbr.rel (!%p10_p5) target bundleno = 2 (0x2), region = 140 }

</bundles_post_ra>
